<compile_context>
chip_gen: v7x
topology: tpu7x:2x2x1
jax: 0.10.0
libtpu: 0.0.40
codegen_flags: <defaults>
</compile_context>

<pallas_src>
import math
import functools

import jax
import jax.numpy as jnp
from jax.experimental import pallas as pl
from jax.experimental.pallas import tpu as pltpu

VMEM_SPEC = pl.BlockSpec(memory_space=pltpu.MemorySpace.VMEM)

# Feed bf16 operands to the MXU (f32 accumulation).  Worth enabling on v6e/v7x;
# elementwise math stays f32 either way (v5e VPU/EUP have no bf16).
USE_BF16_MXU = False


def _mx(a):
    return a.astype(jnp.bfloat16) if USE_BF16_MXU else a


def _dot(a, b):
    return jnp.dot(_mx(a), _mx(b), preferred_element_type=jnp.float32)


# ----------------------------------------------------------------------------
# Fused Pallas kernel: conv stack + maxpool + 2-layer GRU + FC head
# ----------------------------------------------------------------------------
def _fused_forward_kernel(
        # inputs
        x_ref,                                      # (N*L0, C_in)
        w1_ref, b1_ref,                             # (K1, C_in, 128), (1, 128)
        w2_ref, b2_ref,                             # (K2, 128, 128), (1, 128)
        w3_ref, b3_ref,                             # (K3, 128, 128), (1, 128)
        w4_ref, b4_ref,                             # (K4, 128, 128), (1, 128)
        wih0_ref, whh0_ref, bih0_ref, bhh0_ref,     # (128,384)x2, (1,384)x2
        wih1_ref, whh1_ref, bih1_ref, bhh1_ref,
        fc1w_ref, fc1b_ref, fc2w_ref, fc2b_ref,     # (128,64),(1,64),(64,5),(1,5)
        # output
        o_ref,                                      # (1, num_behs)
        # scratch (VMEM): conv activations, flat (N*L, 128) rows
        act1_ref, act2_ref, act3_ref,
        *, N, lens, ksizes, stride, hidden):

    H = hidden
    L0, L1, L2, L3, L4 = lens
    K1, K2, K3, K4 = ksizes

    def conv_relu(src_ref, L_in, L_out, K, w_ref, b_ref):
        """Stride-`stride` Conv1d + ReLU, accumulated tap-by-tap.

        src_ref rows are sample-major: row n*L_in + l == (sample n, position l).
        Tap k contributes rows {n*L_in + k + stride*j}, gathered per sample with
        a strided pl.ds load and concatenated so the matmul M dim is N*L_out.
        """
        c_out = w_ref.shape[-1]
        acc = jnp.zeros((N * L_out, c_out), jnp.float32)
        for k in range(K):
            slab = jnp.concatenate(
                [src_ref[pl.ds(n * L_in + k, L_out, stride), :]
                 for n in range(N)],
                axis=0)                                      # (N*L_out, C_in)
            acc = acc + _dot(slab, w_ref[k])
        return jnp.maximum(acc + b_ref[...], 0.0)

    # ---- conv stack (cnn_1d + cnn_1d_part2 convs), NLC layout end-to-end ----
    act1_ref[...] = conv_relu(x_ref,    L0, L1, K1, w1_ref, b1_ref)
    act2_ref[...] = conv_relu(act1_ref, L1, L2, K2, w2_ref, b2_ref)
    act3_ref[...] = conv_relu(act2_ref, L2, L3, K3, w3_ref, b3_ref)
    y4 = conv_relu(act3_ref, L3, L4, K4, w4_ref, b4_ref)    # (N*L4, 128)

    # ---- AdaptiveMaxPool1d(1): per-sample max over the L4 output positions ----
    pooled = jnp.concatenate(
        [jnp.max(y4[n * L4:(n + 1) * L4, :], axis=0, keepdims=True)
         for n in range(N)],
        axis=0)                                              # (N, 128)

    # ---- 2-layer GRU, seq_len = N, batch = 1, PyTorch gate order (r, z, n) ----
    # Layer-0 input transform is h-independent -> one batched matmul for all T.
    gi0_all = _dot(pooled, wih0_ref[...]) + bih0_ref[...]    # (N, 3H)

    def gru_gates(gi, gh, h_prev):
        r = jax.nn.sigmoid(gi[:, 0:H] + gh[:, 0:H])
        z = jax.nn.sigmoid(gi[:, H:2 * H] + gh[:, H:2 * H])
        n = jnp.tanh(gi[:, 2 * H:3 * H] + r * gh[:, 2 * H:3 * H])
        return (1.0 - z) * n + z * h_prev

    h0 = jnp.zeros((1, H), jnp.float32)                      # initHidden -> zeros
    h1 = jnp.zeros((1, H), jnp.float32)
    for t in range(N):                                       # small static seq len
        gh0 = _dot(h0, whh0_ref[...]) + bhh0_ref[...]
        h0 = gru_gates(gi0_all[t:t + 1, :], gh0, h0)
        gi1 = _dot(h0, wih1_ref[...]) + bih1_ref[...]
        gh1 = _dot(h1, whh1_ref[...]) + bhh1_ref[...]
        h1 = gru_gates(gi1, gh1, h1)

    # ---- fc_out head fused into the epilogue (gru_out[-1] == h1) ----
    f = jnp.maximum(_dot(h1, fc1w_ref[...]) + fc1b_ref[...], 0.0)
    o_ref[...] = _dot(f, fc2w_ref[...]) + fc2b_ref[...]


# ----------------------------------------------------------------------------
# Wrapper
# ----------------------------------------------------------------------------
def _conv_out_len(L, K, stride):
    return (L - K) // stride + 1


def forward(kp, x):
    """kp: kernel-layout params (see prepare_kernel_params); x: (N, C_in, L)."""
    N, C_in, L0 = x.shape
    L1 = _conv_out_len(L0, 10, 2)
    L2 = _conv_out_len(L1, 5, 2)
    L3 = _conv_out_len(L2, 5, 2)
    L4 = _conv_out_len(L3, 3, 2)
    H = 128
    num_behs = kp['fc2w'].shape[1]

    # Single one-time layout change: (N, C, L) -> flat (N*L, C) rows so channels
    # sit on lanes and conv taps are strided sublane reads inside the kernel.
    x2d = jnp.transpose(x, (0, 2, 1)).reshape(N * L0, C_in)

    kernel = functools.partial(
        _fused_forward_kernel,
        N=N, lens=(L0, L1, L2, L3, L4), ksizes=(10, 5, 5, 3),
        stride=2, hidden=H)

    operands = (x2d,
                kp['w1'], kp['b1'], kp['w2'], kp['b2'],
                kp['w3'], kp['b3'], kp['w4'], kp['b4'],
                kp['wih0'], kp['whh0'], kp['bih0'], kp['bhh0'],
                kp['wih1'], kp['whh1'], kp['bih1'], kp['bhh1'],
                kp['fc1w'], kp['fc1b'], kp['fc2w'], kp['fc2b'])

    return pl.pallas_call(
        kernel,
        out_shape=jax.ShapeDtypeStruct((1, num_behs), jnp.float32),
        in_specs=[VMEM_SPEC] * len(operands),
        out_specs=VMEM_SPEC,
        scratch_shapes=[
            pltpu.VMEM((N * L1, 128), jnp.float32),
            pltpu.VMEM((N * L2, 128), jnp.float32),
            pltpu.VMEM((N * L3, 128), jnp.float32),
        ],
    )(*operands)


# ----------------------------------------------------------------------------
# Parameters (PyTorch-like init) and conversion to kernel layout
# ----------------------------------------------------------------------------
def init_params(key, in_channels):
    keys = jax.random.split(key, 20)
    H = 128

    def uni(k, shape, fan_in):
        bound = 1.0 / math.sqrt(fan_in)
        return jax.random.uniform(k, shape, jnp.float32, -bound, bound)

    p = {}
    # cnn_1d
    p['conv1_w'] = uni(keys[0], (96, in_channels, 10), in_channels * 10)
    p['conv1_b'] = uni(keys[1], (96,), in_channels * 10)
    p['conv2_w'] = uni(keys[2], (96, 96, 5), 96 * 5)
    p['conv2_b'] = uni(keys[3], (96,), 96 * 5)
    # cnn_1d_part2
    p['conv3_w'] = uni(keys[4], (96, 96, 5), 96 * 5)
    p['conv3_b'] = uni(keys[5], (96,), 96 * 5)
    p['conv4_w'] = uni(keys[6], (128, 96, 3), 96 * 3)
    p['conv4_b'] = uni(keys[7], (128,), 96 * 3)
    # GRU (stored pre-transposed for x @ W; gate order r,z,n along the 3H axis)
    p['wih0'] = uni(keys[8], (H, 3 * H), H)
    p['whh0'] = uni(keys[9], (H, 3 * H), H)
    p['bih0'] = uni(keys[10], (1, 3 * H), H)
    p['bhh0'] = uni(keys[11], (1, 3 * H), H)
    p['wih1'] = uni(keys[12], (H, 3 * H), H)
    p['whh1'] = uni(keys[13], (H, 3 * H), H)
    p['bih1'] = uni(keys[14], (1, 3 * H), H)
    p['bhh1'] = uni(keys[15], (1, 3 * H), H)
    # fc_out
    p['fc1_w'] = uni(keys[16], (H, H // 2), H)
    p['fc1_b'] = uni(keys[17], (1, H // 2), H)
    p['fc2_w'] = uni(keys[18], (H // 2, 5), H // 2)
    p['fc2_b'] = uni(keys[19], (1, 5), H // 2)
    return p


def prepare_kernel_params(p, in_channels):
    """Convert PyTorch-layout params to the fused kernel's layout.

    Conv weights (C_out, C_in, K) -> (K, C_in_pad, C_out_pad) with zero padding
    so 96-channel tensors become 128-lane-dense.  Padded weight columns and bias
    lanes are 0, so padded activations stay exactly 0 through ReLU and do not
    contaminate later layers or the maxpool.
    """
    def conv_w(w, cin_pad, cout_pad):
        C_out, C_in, K = w.shape
        wt = jnp.transpose(w, (2, 1, 0))                   # (K, C_in, C_out)
        return jnp.pad(wt, ((0, 0), (0, cin_pad - C_in), (0, cout_pad - C_out)))

    def pad_b(b, n_pad):
        b2 = b.reshape(1, -1)
        return jnp.pad(b2, ((0, 0), (0, n_pad - b2.shape[1])))

    return {
        'w1': conv_w(p['conv1_w'], in_channels, 128), 'b1': pad_b(p['conv1_b'], 128),
        'w2': conv_w(p['conv2_w'], 128, 128),         'b2': pad_b(p['conv2_b'], 128),
        'w3': conv_w(p['conv3_w'], 128, 128),         'b3': pad_b(p['conv3_b'], 128),
        'w4': conv_w(p['conv4_w'], 128, 128),         'b4': pad_b(p['conv4_b'], 128),
        'wih0': p['wih0'], 'whh0': p['whh0'], 'bih0': p['bih0'], 'bhh0': p['bhh0'],
        'wih1': p['wih1'], 'whh1': p['whh1'], 'bih1': p['bih1'], 'bhh1': p['bhh1'],
        'fc1w': p['fc1_w'], 'fc1b': p['fc1_b'], 'fc2w': p['fc2_w'], 'fc2b': p['fc2_b'],
    }


# ----------------------------------------------------------------------------
# Pure-JAX reference (same math, no Pallas) for the correctness check
# ----------------------------------------------------------------------------
def im2col_1d(x, ksize, stride):
    N, C, L = x.shape
    L_out = (L - ksize) // stride + 1
    idx = jnp.arange(L_out)[:, None] * stride + jnp.arange(ksize)[None, :]
    patches = x[:, :, idx]                          # (N, C, L_out, K)
    patches = jnp.transpose(patches, (0, 2, 1, 3))  # (N, L_out, C, K)
    return patches.reshape(N * L_out, C * ksize), L_out


def reference_forward(params, x):
    p = params
    H = 128

    def conv(x, w, b, stride):
        N = x.shape[0]
        C_out, C_in, K = w.shape
        patches, L_out = im2col_1d(x, K, stride)
        y = jnp.maximum(patches @ w.reshape(C_out, C_in * K).T + b, 0.0)
        return y.reshape(N, L_out, C_out).transpose(0, 2, 1)

    h = conv(x, p['conv1_w'], p['conv1_b'], 2)
    h = conv(h, p['conv2_w'], p['conv2_b'], 2)
    h = conv(h, p['conv3_w'], p['conv3_b'], 2)
    h = conv(h, p['conv4_w'], p['conv4_b'], 2)
    pooled = jnp.max(h, axis=2)

    def cell(x_t, h_prev, wih, whh, bih, bhh):
        gi = x_t @ wih + bih
        gh = h_prev @ whh + bhh
        r = jax.nn.sigmoid(gi[:, :H] + gh[:, :H])
        z = jax.nn.sigmoid(gi[:, H:2 * H] + gh[:, H:2 * H])
        n = jnp.tanh(gi[:, 2 * H:] + r * gh[:, 2 * H:])
        return (1.0 - z) * n + z * h_prev

    h0 = jnp.zeros((1, H), jnp.float32)
    h1 = jnp.zeros((1, H), jnp.float32)
    for t in range(pooled.shape[0]):
        x_t = pooled[t:t + 1]
        h0 = cell(x_t, h0, p['wih0'], p['whh0'], p['bih0'], p['bhh0'])
        h1 = cell(h0, h1, p['wih1'], p['whh1'], p['bih1'], p['bhh1'])
    f = jnp.maximum(h1 @ p['fc1_w'] + p['fc1_b'], 0.0)
    return f @ p['fc2_w'] + p['fc2_b']


if __name__ == "__main__":
    key = jax.random.PRNGKey(0)
    pkey, xkey = jax.random.split(key)

    in_channels = 4
    N, L = 4, 100        # conv batch N becomes the GRU sequence length (batch=1)
    params = init_params(pkey, in_channels)
    kparams = prepare_kernel_params(params, in_channels)
    x = jax.random.normal(xkey, (N, in_channels, L), jnp.float32)

    fwd = jax.jit(forward)
    out = jax.block_until_ready(fwd(kparams, x))

    ref = reference_forward(params, x)
    assert out.shape == (1, 5), out.shape
    assert jnp.allclose(out, ref, atol=2e-3, rtol=2e-3), (out, ref)
    print("KERNEL_OK")
</pallas_src>

<mosaic_0001>
module attributes {stable_mosaic.version = 11 : i64} {
  func.func @_fused_forward_kernel(%arg0: memref<400x4xf32, #tpu.memory_space<vmem>>, %arg1: memref<10x4x128xf32, #tpu.memory_space<vmem>>, %arg2: memref<1x128xf32, #tpu.memory_space<vmem>>, %arg3: memref<5x128x128xf32, #tpu.memory_space<vmem>>, %arg4: memref<1x128xf32, #tpu.memory_space<vmem>>, %arg5: memref<5x128x128xf32, #tpu.memory_space<vmem>>, %arg6: memref<1x128xf32, #tpu.memory_space<vmem>>, %arg7: memref<3x128x128xf32, #tpu.memory_space<vmem>>, %arg8: memref<1x128xf32, #tpu.memory_space<vmem>>, %arg9: memref<128x384xf32, #tpu.memory_space<vmem>>, %arg10: memref<128x384xf32, #tpu.memory_space<vmem>>, %arg11: memref<1x384xf32, #tpu.memory_space<vmem>>, %arg12: memref<1x384xf32, #tpu.memory_space<vmem>>, %arg13: memref<128x384xf32, #tpu.memory_space<vmem>>, %arg14: memref<128x384xf32, #tpu.memory_space<vmem>>, %arg15: memref<1x384xf32, #tpu.memory_space<vmem>>, %arg16: memref<1x384xf32, #tpu.memory_space<vmem>>, %arg17: memref<128x64xf32, #tpu.memory_space<vmem>>, %arg18: memref<1x64xf32, #tpu.memory_space<vmem>>, %arg19: memref<64x5xf32, #tpu.memory_space<vmem>>, %arg20: memref<1x5xf32, #tpu.memory_space<vmem>>, %arg21: memref<1x5xf32, #tpu.memory_space<vmem>>, %arg22: memref<184x128xf32, #tpu.memory_space<vmem>>, %arg23: memref<84x128xf32, #tpu.memory_space<vmem>>, %arg24: memref<36x128xf32, #tpu.memory_space<vmem>>) attributes {dimension_semantics = [], scalar_prefetch = 0 : i64, scratch_operands = 3 : i64, tpu.core_type = #tpu.core_type<tc>} {
    %cst = arith.constant 0.000000e+00 : f32
    %0 = vector.broadcast %cst : f32 to vector<184x128xf32>
    %c0 = arith.constant 0 : index
    %c0_0 = arith.constant 0 : index
    %1 = tpu.strided_load %arg0[%c0, %c0_0] {strides = array<i32: 2, 1>} : memref<400x4xf32, #tpu.memory_space<vmem>>, vector<46x4xf32>
    %c100 = arith.constant 100 : index
    %c0_1 = arith.constant 0 : index
    %2 = tpu.strided_load %arg0[%c100, %c0_1] {strides = array<i32: 2, 1>} : memref<400x4xf32, #tpu.memory_space<vmem>>, vector<46x4xf32>
    %c200 = arith.constant 200 : index
    %c0_2 = arith.constant 0 : index
    %3 = tpu.strided_load %arg0[%c200, %c0_2] {strides = array<i32: 2, 1>} : memref<400x4xf32, #tpu.memory_space<vmem>>, vector<46x4xf32>
    %c300 = arith.constant 300 : index
    %c0_3 = arith.constant 0 : index
    %4 = tpu.strided_load %arg0[%c300, %c0_3] {strides = array<i32: 2, 1>} : memref<400x4xf32, #tpu.memory_space<vmem>>, vector<46x4xf32>
    %5 = tpu.concatenate %1, %2, %3, %4 in 0 : vector<46x4xf32>, vector<46x4xf32>, vector<46x4xf32>, vector<46x4xf32> -> vector<184x4xf32>
    %c0_4 = arith.constant 0 : index
    %c0_5 = arith.constant 0 : index
    %c0_6 = arith.constant 0 : index
    %6 = vector.load %arg1[%c0_4, %c0_5, %c0_6] : memref<10x4x128xf32, #tpu.memory_space<vmem>>, vector<1x4x128xf32>
    %7 = vector.shape_cast %6 : vector<1x4x128xf32> to vector<4x128xf32>
    %cst_7 = arith.constant dense<0.000000e+00> : vector<184x128xf32>
    %8 = tpu.matmul %5, %7, %cst_7 {dimension_numbers = #tpu.dot_dimension_numbers<[1], [0], [0], [1], [0, 0, 1, 1], [], []>} : vector<184x4xf32>, vector<4x128xf32>, vector<184x128xf32> -> vector<184x128xf32>
    %9 = arith.addf %0, %8 : vector<184x128xf32>
    %c1 = arith.constant 1 : index
    %c0_8 = arith.constant 0 : index
    %10 = tpu.strided_load %arg0[%c1, %c0_8] {strides = array<i32: 2, 1>} : memref<400x4xf32, #tpu.memory_space<vmem>>, vector<46x4xf32>
    %c101 = arith.constant 101 : index
    %c0_9 = arith.constant 0 : index
    %11 = tpu.strided_load %arg0[%c101, %c0_9] {strides = array<i32: 2, 1>} : memref<400x4xf32, #tpu.memory_space<vmem>>, vector<46x4xf32>
    %c201 = arith.constant 201 : index
    %c0_10 = arith.constant 0 : index
    %12 = tpu.strided_load %arg0[%c201, %c0_10] {strides = array<i32: 2, 1>} : memref<400x4xf32, #tpu.memory_space<vmem>>, vector<46x4xf32>
    %c301 = arith.constant 301 : index
    %c0_11 = arith.constant 0 : index
    %13 = tpu.strided_load %arg0[%c301, %c0_11] {strides = array<i32: 2, 1>} : memref<400x4xf32, #tpu.memory_space<vmem>>, vector<46x4xf32>
    %14 = tpu.concatenate %10, %11, %12, %13 in 0 : vector<46x4xf32>, vector<46x4xf32>, vector<46x4xf32>, vector<46x4xf32> -> vector<184x4xf32>
    %c1_12 = arith.constant 1 : index
    %c0_13 = arith.constant 0 : index
    %c0_14 = arith.constant 0 : index
    %15 = vector.load %arg1[%c1_12, %c0_13, %c0_14] : memref<10x4x128xf32, #tpu.memory_space<vmem>>, vector<1x4x128xf32>
    %16 = vector.shape_cast %15 : vector<1x4x128xf32> to vector<4x128xf32>
    %cst_15 = arith.constant dense<0.000000e+00> : vector<184x128xf32>
    %17 = tpu.matmul %14, %16, %cst_15 {dimension_numbers = #tpu.dot_dimension_numbers<[1], [0], [0], [1], [0, 0, 1, 1], [], []>} : vector<184x4xf32>, vector<4x128xf32>, vector<184x128xf32> -> vector<184x128xf32>
    %18 = arith.addf %9, %17 : vector<184x128xf32>
    %c2 = arith.constant 2 : index
    %c0_16 = arith.constant 0 : index
    %19 = tpu.strided_load %arg0[%c2, %c0_16] {strides = array<i32: 2, 1>} : memref<400x4xf32, #tpu.memory_space<vmem>>, vector<46x4xf32>
    %c102 = arith.constant 102 : index
    %c0_17 = arith.constant 0 : index
    %20 = tpu.strided_load %arg0[%c102, %c0_17] {strides = array<i32: 2, 1>} : memref<400x4xf32, #tpu.memory_space<vmem>>, vector<46x4xf32>
    %c202 = arith.constant 202 : index
    %c0_18 = arith.constant 0 : index
    %21 = tpu.strided_load %arg0[%c202, %c0_18] {strides = array<i32: 2, 1>} : memref<400x4xf32, #tpu.memory_space<vmem>>, vector<46x4xf32>
    %c302 = arith.constant 302 : index
    %c0_19 = arith.constant 0 : index
    %22 = tpu.strided_load %arg0[%c302, %c0_19] {strides = array<i32: 2, 1>} : memref<400x4xf32, #tpu.memory_space<vmem>>, vector<46x4xf32>
    %23 = tpu.concatenate %19, %20, %21, %22 in 0 : vector<46x4xf32>, vector<46x4xf32>, vector<46x4xf32>, vector<46x4xf32> -> vector<184x4xf32>
    %c2_20 = arith.constant 2 : index
    %c0_21 = arith.constant 0 : index
    %c0_22 = arith.constant 0 : index
    %24 = vector.load %arg1[%c2_20, %c0_21, %c0_22] : memref<10x4x128xf32, #tpu.memory_space<vmem>>, vector<1x4x128xf32>
    %25 = vector.shape_cast %24 : vector<1x4x128xf32> to vector<4x128xf32>
    %cst_23 = arith.constant dense<0.000000e+00> : vector<184x128xf32>
    %26 = tpu.matmul %23, %25, %cst_23 {dimension_numbers = #tpu.dot_dimension_numbers<[1], [0], [0], [1], [0, 0, 1, 1], [], []>} : vector<184x4xf32>, vector<4x128xf32>, vector<184x128xf32> -> vector<184x128xf32>
    %27 = arith.addf %18, %26 : vector<184x128xf32>
    %c3 = arith.constant 3 : index
    %c0_24 = arith.constant 0 : index
    %28 = tpu.strided_load %arg0[%c3, %c0_24] {strides = array<i32: 2, 1>} : memref<400x4xf32, #tpu.memory_space<vmem>>, vector<46x4xf32>
    %c103 = arith.constant 103 : index
    %c0_25 = arith.constant 0 : index
    %29 = tpu.strided_load %arg0[%c103, %c0_25] {strides = array<i32: 2, 1>} : memref<400x4xf32, #tpu.memory_space<vmem>>, vector<46x4xf32>
    %c203 = arith.constant 203 : index
    %c0_26 = arith.constant 0 : index
    %30 = tpu.strided_load %arg0[%c203, %c0_26] {strides = array<i32: 2, 1>} : memref<400x4xf32, #tpu.memory_space<vmem>>, vector<46x4xf32>
    %c303 = arith.constant 303 : index
    %c0_27 = arith.constant 0 : index
    %31 = tpu.strided_load %arg0[%c303, %c0_27] {strides = array<i32: 2, 1>} : memref<400x4xf32, #tpu.memory_space<vmem>>, vector<46x4xf32>
    %32 = tpu.concatenate %28, %29, %30, %31 in 0 : vector<46x4xf32>, vector<46x4xf32>, vector<46x4xf32>, vector<46x4xf32> -> vector<184x4xf32>
    %c3_28 = arith.constant 3 : index
    %c0_29 = arith.constant 0 : index
    %c0_30 = arith.constant 0 : index
    %33 = vector.load %arg1[%c3_28, %c0_29, %c0_30] : memref<10x4x128xf32, #tpu.memory_space<vmem>>, vector<1x4x128xf32>
    %34 = vector.shape_cast %33 : vector<1x4x128xf32> to vector<4x128xf32>
    %cst_31 = arith.constant dense<0.000000e+00> : vector<184x128xf32>
    %35 = tpu.matmul %32, %34, %cst_31 {dimension_numbers = #tpu.dot_dimension_numbers<[1], [0], [0], [1], [0, 0, 1, 1], [], []>} : vector<184x4xf32>, vector<4x128xf32>, vector<184x128xf32> -> vector<184x128xf32>
    %36 = arith.addf %27, %35 : vector<184x128xf32>
    %c4 = arith.constant 4 : index
    %c0_32 = arith.constant 0 : index
    %37 = tpu.strided_load %arg0[%c4, %c0_32] {strides = array<i32: 2, 1>} : memref<400x4xf32, #tpu.memory_space<vmem>>, vector<46x4xf32>
    %c104 = arith.constant 104 : index
    %c0_33 = arith.constant 0 : index
    %38 = tpu.strided_load %arg0[%c104, %c0_33] {strides = array<i32: 2, 1>} : memref<400x4xf32, #tpu.memory_space<vmem>>, vector<46x4xf32>
    %c204 = arith.constant 204 : index
    %c0_34 = arith.constant 0 : index
    %39 = tpu.strided_load %arg0[%c204, %c0_34] {strides = array<i32: 2, 1>} : memref<400x4xf32, #tpu.memory_space<vmem>>, vector<46x4xf32>
    %c304 = arith.constant 304 : index
    %c0_35 = arith.constant 0 : index
    %40 = tpu.strided_load %arg0[%c304, %c0_35] {strides = array<i32: 2, 1>} : memref<400x4xf32, #tpu.memory_space<vmem>>, vector<46x4xf32>
    %41 = tpu.concatenate %37, %38, %39, %40 in 0 : vector<46x4xf32>, vector<46x4xf32>, vector<46x4xf32>, vector<46x4xf32> -> vector<184x4xf32>
    %c4_36 = arith.constant 4 : index
    %c0_37 = arith.constant 0 : index
    %c0_38 = arith.constant 0 : index
    %42 = vector.load %arg1[%c4_36, %c0_37, %c0_38] : memref<10x4x128xf32, #tpu.memory_space<vmem>>, vector<1x4x128xf32>
    %43 = vector.shape_cast %42 : vector<1x4x128xf32> to vector<4x128xf32>
    %cst_39 = arith.constant dense<0.000000e+00> : vector<184x128xf32>
    %44 = tpu.matmul %41, %43, %cst_39 {dimension_numbers = #tpu.dot_dimension_numbers<[1], [0], [0], [1], [0, 0, 1, 1], [], []>} : vector<184x4xf32>, vector<4x128xf32>, vector<184x128xf32> -> vector<184x128xf32>
    %45 = arith.addf %36, %44 : vector<184x128xf32>
    %c5 = arith.constant 5 : index
    %c0_40 = arith.constant 0 : index
    %46 = tpu.strided_load %arg0[%c5, %c0_40] {strides = array<i32: 2, 1>} : memref<400x4xf32, #tpu.memory_space<vmem>>, vector<46x4xf32>
    %c105 = arith.constant 105 : index
    %c0_41 = arith.constant 0 : index
    %47 = tpu.strided_load %arg0[%c105, %c0_41] {strides = array<i32: 2, 1>} : memref<400x4xf32, #tpu.memory_space<vmem>>, vector<46x4xf32>
    %c205 = arith.constant 205 : index
    %c0_42 = arith.constant 0 : index
    %48 = tpu.strided_load %arg0[%c205, %c0_42] {strides = array<i32: 2, 1>} : memref<400x4xf32, #tpu.memory_space<vmem>>, vector<46x4xf32>
    %c305 = arith.constant 305 : index
    %c0_43 = arith.constant 0 : index
    %49 = tpu.strided_load %arg0[%c305, %c0_43] {strides = array<i32: 2, 1>} : memref<400x4xf32, #tpu.memory_space<vmem>>, vector<46x4xf32>
    %50 = tpu.concatenate %46, %47, %48, %49 in 0 : vector<46x4xf32>, vector<46x4xf32>, vector<46x4xf32>, vector<46x4xf32> -> vector<184x4xf32>
    %c5_44 = arith.constant 5 : index
    %c0_45 = arith.constant 0 : index
    %c0_46 = arith.constant 0 : index
    %51 = vector.load %arg1[%c5_44, %c0_45, %c0_46] : memref<10x4x128xf32, #tpu.memory_space<vmem>>, vector<1x4x128xf32>
    %52 = vector.shape_cast %51 : vector<1x4x128xf32> to vector<4x128xf32>
    %cst_47 = arith.constant dense<0.000000e+00> : vector<184x128xf32>
    %53 = tpu.matmul %50, %52, %cst_47 {dimension_numbers = #tpu.dot_dimension_numbers<[1], [0], [0], [1], [0, 0, 1, 1], [], []>} : vector<184x4xf32>, vector<4x128xf32>, vector<184x128xf32> -> vector<184x128xf32>
    %54 = arith.addf %45, %53 : vector<184x128xf32>
    %c6 = arith.constant 6 : index
    %c0_48 = arith.constant 0 : index
    %55 = tpu.strided_load %arg0[%c6, %c0_48] {strides = array<i32: 2, 1>} : memref<400x4xf32, #tpu.memory_space<vmem>>, vector<46x4xf32>
    %c106 = arith.constant 106 : index
    %c0_49 = arith.constant 0 : index
    %56 = tpu.strided_load %arg0[%c106, %c0_49] {strides = array<i32: 2, 1>} : memref<400x4xf32, #tpu.memory_space<vmem>>, vector<46x4xf32>
    %c206 = arith.constant 206 : index
    %c0_50 = arith.constant 0 : index
    %57 = tpu.strided_load %arg0[%c206, %c0_50] {strides = array<i32: 2, 1>} : memref<400x4xf32, #tpu.memory_space<vmem>>, vector<46x4xf32>
    %c306 = arith.constant 306 : index
    %c0_51 = arith.constant 0 : index
    %58 = tpu.strided_load %arg0[%c306, %c0_51] {strides = array<i32: 2, 1>} : memref<400x4xf32, #tpu.memory_space<vmem>>, vector<46x4xf32>
    %59 = tpu.concatenate %55, %56, %57, %58 in 0 : vector<46x4xf32>, vector<46x4xf32>, vector<46x4xf32>, vector<46x4xf32> -> vector<184x4xf32>
    %c6_52 = arith.constant 6 : index
    %c0_53 = arith.constant 0 : index
    %c0_54 = arith.constant 0 : index
    %60 = vector.load %arg1[%c6_52, %c0_53, %c0_54] : memref<10x4x128xf32, #tpu.memory_space<vmem>>, vector<1x4x128xf32>
    %61 = vector.shape_cast %60 : vector<1x4x128xf32> to vector<4x128xf32>
    %cst_55 = arith.constant dense<0.000000e+00> : vector<184x128xf32>
    %62 = tpu.matmul %59, %61, %cst_55 {dimension_numbers = #tpu.dot_dimension_numbers<[1], [0], [0], [1], [0, 0, 1, 1], [], []>} : vector<184x4xf32>, vector<4x128xf32>, vector<184x128xf32> -> vector<184x128xf32>
    %63 = arith.addf %54, %62 : vector<184x128xf32>
    %c7 = arith.constant 7 : index
    %c0_56 = arith.constant 0 : index
    %64 = tpu.strided_load %arg0[%c7, %c0_56] {strides = array<i32: 2, 1>} : memref<400x4xf32, #tpu.memory_space<vmem>>, vector<46x4xf32>
    %c107 = arith.constant 107 : index
    %c0_57 = arith.constant 0 : index
    %65 = tpu.strided_load %arg0[%c107, %c0_57] {strides = array<i32: 2, 1>} : memref<400x4xf32, #tpu.memory_space<vmem>>, vector<46x4xf32>
    %c207 = arith.constant 207 : index
    %c0_58 = arith.constant 0 : index
    %66 = tpu.strided_load %arg0[%c207, %c0_58] {strides = array<i32: 2, 1>} : memref<400x4xf32, #tpu.memory_space<vmem>>, vector<46x4xf32>
    %c307 = arith.constant 307 : index
    %c0_59 = arith.constant 0 : index
    %67 = tpu.strided_load %arg0[%c307, %c0_59] {strides = array<i32: 2, 1>} : memref<400x4xf32, #tpu.memory_space<vmem>>, vector<46x4xf32>
    %68 = tpu.concatenate %64, %65, %66, %67 in 0 : vector<46x4xf32>, vector<46x4xf32>, vector<46x4xf32>, vector<46x4xf32> -> vector<184x4xf32>
    %c7_60 = arith.constant 7 : index
    %c0_61 = arith.constant 0 : index
    %c0_62 = arith.constant 0 : index
    %69 = vector.load %arg1[%c7_60, %c0_61, %c0_62] : memref<10x4x128xf32, #tpu.memory_space<vmem>>, vector<1x4x128xf32>
    %70 = vector.shape_cast %69 : vector<1x4x128xf32> to vector<4x128xf32>
    %cst_63 = arith.constant dense<0.000000e+00> : vector<184x128xf32>
    %71 = tpu.matmul %68, %70, %cst_63 {dimension_numbers = #tpu.dot_dimension_numbers<[1], [0], [0], [1], [0, 0, 1, 1], [], []>} : vector<184x4xf32>, vector<4x128xf32>, vector<184x128xf32> -> vector<184x128xf32>
    %72 = arith.addf %63, %71 : vector<184x128xf32>
    %c8 = arith.constant 8 : index
    %c0_64 = arith.constant 0 : index
    %73 = tpu.strided_load %arg0[%c8, %c0_64] {strides = array<i32: 2, 1>} : memref<400x4xf32, #tpu.memory_space<vmem>>, vector<46x4xf32>
    %c108 = arith.constant 108 : index
    %c0_65 = arith.constant 0 : index
    %74 = tpu.strided_load %arg0[%c108, %c0_65] {strides = array<i32: 2, 1>} : memref<400x4xf32, #tpu.memory_space<vmem>>, vector<46x4xf32>
    %c208 = arith.constant 208 : index
    %c0_66 = arith.constant 0 : index
    %75 = tpu.strided_load %arg0[%c208, %c0_66] {strides = array<i32: 2, 1>} : memref<400x4xf32, #tpu.memory_space<vmem>>, vector<46x4xf32>
    %c308 = arith.constant 308 : index
    %c0_67 = arith.constant 0 : index
    %76 = tpu.strided_load %arg0[%c308, %c0_67] {strides = array<i32: 2, 1>} : memref<400x4xf32, #tpu.memory_space<vmem>>, vector<46x4xf32>
    %77 = tpu.concatenate %73, %74, %75, %76 in 0 : vector<46x4xf32>, vector<46x4xf32>, vector<46x4xf32>, vector<46x4xf32> -> vector<184x4xf32>
    %c8_68 = arith.constant 8 : index
    %c0_69 = arith.constant 0 : index
    %c0_70 = arith.constant 0 : index
    %78 = vector.load %arg1[%c8_68, %c0_69, %c0_70] : memref<10x4x128xf32, #tpu.memory_space<vmem>>, vector<1x4x128xf32>
    %79 = vector.shape_cast %78 : vector<1x4x128xf32> to vector<4x128xf32>
    %cst_71 = arith.constant dense<0.000000e+00> : vector<184x128xf32>
    %80 = tpu.matmul %77, %79, %cst_71 {dimension_numbers = #tpu.dot_dimension_numbers<[1], [0], [0], [1], [0, 0, 1, 1], [], []>} : vector<184x4xf32>, vector<4x128xf32>, vector<184x128xf32> -> vector<184x128xf32>
    %81 = arith.addf %72, %80 : vector<184x128xf32>
    %c9 = arith.constant 9 : index
    %c0_72 = arith.constant 0 : index
    %82 = tpu.strided_load %arg0[%c9, %c0_72] {strides = array<i32: 2, 1>} : memref<400x4xf32, #tpu.memory_space<vmem>>, vector<46x4xf32>
    %c109 = arith.constant 109 : index
    %c0_73 = arith.constant 0 : index
    %83 = tpu.strided_load %arg0[%c109, %c0_73] {strides = array<i32: 2, 1>} : memref<400x4xf32, #tpu.memory_space<vmem>>, vector<46x4xf32>
    %c209 = arith.constant 209 : index
    %c0_74 = arith.constant 0 : index
    %84 = tpu.strided_load %arg0[%c209, %c0_74] {strides = array<i32: 2, 1>} : memref<400x4xf32, #tpu.memory_space<vmem>>, vector<46x4xf32>
    %c309 = arith.constant 309 : index
    %c0_75 = arith.constant 0 : index
    %85 = tpu.strided_load %arg0[%c309, %c0_75] {strides = array<i32: 2, 1>} : memref<400x4xf32, #tpu.memory_space<vmem>>, vector<46x4xf32>
    %86 = tpu.concatenate %82, %83, %84, %85 in 0 : vector<46x4xf32>, vector<46x4xf32>, vector<46x4xf32>, vector<46x4xf32> -> vector<184x4xf32>
    %c9_76 = arith.constant 9 : index
    %c0_77 = arith.constant 0 : index
    %c0_78 = arith.constant 0 : index
    %87 = vector.load %arg1[%c9_76, %c0_77, %c0_78] : memref<10x4x128xf32, #tpu.memory_space<vmem>>, vector<1x4x128xf32>
    %88 = vector.shape_cast %87 : vector<1x4x128xf32> to vector<4x128xf32>
    %cst_79 = arith.constant dense<0.000000e+00> : vector<184x128xf32>
    %89 = tpu.matmul %86, %88, %cst_79 {dimension_numbers = #tpu.dot_dimension_numbers<[1], [0], [0], [1], [0, 0, 1, 1], [], []>} : vector<184x4xf32>, vector<4x128xf32>, vector<184x128xf32> -> vector<184x128xf32>
    %90 = arith.addf %81, %89 : vector<184x128xf32>
    %c0_80 = arith.constant 0 : index
    %c0_81 = arith.constant 0 : index
    %91 = vector.load %arg2[%c0_80, %c0_81] : memref<1x128xf32, #tpu.memory_space<vmem>>, vector<1x128xf32>
    %92 = vector.broadcast %91 : vector<1x128xf32> to vector<184x128xf32>
    %93 = arith.addf %90, %92 : vector<184x128xf32>
    %cst_82 = arith.constant 0.000000e+00 : f32
    %94 = vector.broadcast %cst_82 : f32 to vector<184x128xf32>
    %95 = arith.maximumf %93, %94 : vector<184x128xf32>
    %c0_83 = arith.constant 0 : index
    %c0_84 = arith.constant 0 : index
    %96 = vector.load %arg22[%c0_83, %c0_84] : memref<184x128xf32, #tpu.memory_space<vmem>>, vector<184x128xf32>
    tpu.vector_store %arg22[%c0_83, %c0_84], %95 {strides = array<i32>} : memref<184x128xf32, #tpu.memory_space<vmem>>, vector<184x128xf32>,
    %cst_85 = arith.constant 0.000000e+00 : f32
    %97 = vector.broadcast %cst_85 : f32 to vector<84x128xf32>
    %c0_86 = arith.constant 0 : index
    %c0_87 = arith.constant 0 : index
    %98 = tpu.strided_load %arg22[%c0_86, %c0_87] {strides = array<i32: 2, 1>} : memref<184x128xf32, #tpu.memory_space<vmem>>, vector<21x128xf32>
    %c46 = arith.constant 46 : index
    %c0_88 = arith.constant 0 : index
    %99 = tpu.strided_load %arg22[%c46, %c0_88] {strides = array<i32: 2, 1>} : memref<184x128xf32, #tpu.memory_space<vmem>>, vector<21x128xf32>
    %c92 = arith.constant 92 : index
    %c0_89 = arith.constant 0 : index
    %100 = tpu.strided_load %arg22[%c92, %c0_89] {strides = array<i32: 2, 1>} : memref<184x128xf32, #tpu.memory_space<vmem>>, vector<21x128xf32>
    %c138 = arith.constant 138 : index
    %c0_90 = arith.constant 0 : index
    %101 = tpu.strided_load %arg22[%c138, %c0_90] {strides = array<i32: 2, 1>} : memref<184x128xf32, #tpu.memory_space<vmem>>, vector<21x128xf32>
    %102 = tpu.concatenate %98, %99, %100, %101 in 0 : vector<21x128xf32>, vector<21x128xf32>, vector<21x128xf32>, vector<21x128xf32> -> vector<84x128xf32>
    %c0_91 = arith.constant 0 : index
    %c0_92 = arith.constant 0 : index
    %c0_93 = arith.constant 0 : index
    %103 = vector.load %arg3[%c0_91, %c0_92, %c0_93] : memref<5x128x128xf32, #tpu.memory_space<vmem>>, vector<1x128x128xf32>
    %104 = vector.shape_cast %103 : vector<1x128x128xf32> to vector<128x128xf32>
    %cst_94 = arith.constant dense<0.000000e+00> : vector<84x128xf32>
    %105 = tpu.matmul %102, %104, %cst_94 {dimension_numbers = #tpu.dot_dimension_numbers<[1], [0], [0], [1], [0, 0, 1, 1], [], []>} : vector<84x128xf32>, vector<128x128xf32>, vector<84x128xf32> -> vector<84x128xf32>
    %106 = arith.addf %97, %105 : vector<84x128xf32>
    %c1_95 = arith.constant 1 : index
    %c0_96 = arith.constant 0 : index
    %107 = tpu.strided_load %arg22[%c1_95, %c0_96] {strides = array<i32: 2, 1>} : memref<184x128xf32, #tpu.memory_space<vmem>>, vector<21x128xf32>
    %c47 = arith.constant 47 : index
    %c0_97 = arith.constant 0 : index
    %108 = tpu.strided_load %arg22[%c47, %c0_97] {strides = array<i32: 2, 1>} : memref<184x128xf32, #tpu.memory_space<vmem>>, vector<21x128xf32>
    %c93 = arith.constant 93 : index
    %c0_98 = arith.constant 0 : index
    %109 = tpu.strided_load %arg22[%c93, %c0_98] {strides = array<i32: 2, 1>} : memref<184x128xf32, #tpu.memory_space<vmem>>, vector<21x128xf32>
    %c139 = arith.constant 139 : index
    %c0_99 = arith.constant 0 : index
    %110 = tpu.strided_load %arg22[%c139, %c0_99] {strides = array<i32: 2, 1>} : memref<184x128xf32, #tpu.memory_space<vmem>>, vector<21x128xf32>
    %111 = tpu.concatenate %107, %108, %109, %110 in 0 : vector<21x128xf32>, vector<21x128xf32>, vector<21x128xf32>, vector<21x128xf32> -> vector<84x128xf32>
    %c1_100 = arith.constant 1 : index
    %c0_101 = arith.constant 0 : index
    %c0_102 = arith.constant 0 : index
    %112 = vector.load %arg3[%c1_100, %c0_101, %c0_102] : memref<5x128x128xf32, #tpu.memory_space<vmem>>, vector<1x128x128xf32>
    %113 = vector.shape_cast %112 : vector<1x128x128xf32> to vector<128x128xf32>
    %cst_103 = arith.constant dense<0.000000e+00> : vector<84x128xf32>
    %114 = tpu.matmul %111, %113, %cst_103 {dimension_numbers = #tpu.dot_dimension_numbers<[1], [0], [0], [1], [0, 0, 1, 1], [], []>} : vector<84x128xf32>, vector<128x128xf32>, vector<84x128xf32> -> vector<84x128xf32>
    %115 = arith.addf %106, %114 : vector<84x128xf32>
    %c2_104 = arith.constant 2 : index
    %c0_105 = arith.constant 0 : index
    %116 = tpu.strided_load %arg22[%c2_104, %c0_105] {strides = array<i32: 2, 1>} : memref<184x128xf32, #tpu.memory_space<vmem>>, vector<21x128xf32>
    %c48 = arith.constant 48 : index
    %c0_106 = arith.constant 0 : index
    %117 = tpu.strided_load %arg22[%c48, %c0_106] {strides = array<i32: 2, 1>} : memref<184x128xf32, #tpu.memory_space<vmem>>, vector<21x128xf32>
    %c94 = arith.constant 94 : index
    %c0_107 = arith.constant 0 : index
    %118 = tpu.strided_load %arg22[%c94, %c0_107] {strides = array<i32: 2, 1>} : memref<184x128xf32, #tpu.memory_space<vmem>>, vector<21x128xf32>
    %c140 = arith.constant 140 : index
    %c0_108 = arith.constant 0 : index
    %119 = tpu.strided_load %arg22[%c140, %c0_108] {strides = array<i32: 2, 1>} : memref<184x128xf32, #tpu.memory_space<vmem>>, vector<21x128xf32>
    %120 = tpu.concatenate %116, %117, %118, %119 in 0 : vector<21x128xf32>, vector<21x128xf32>, vector<21x128xf32>, vector<21x128xf32> -> vector<84x128xf32>
    %c2_109 = arith.constant 2 : index
    %c0_110 = arith.constant 0 : index
    %c0_111 = arith.constant 0 : index
    %121 = vector.load %arg3[%c2_109, %c0_110, %c0_111] : memref<5x128x128xf32, #tpu.memory_space<vmem>>, vector<1x128x128xf32>
    %122 = vector.shape_cast %121 : vector<1x128x128xf32> to vector<128x128xf32>
    %cst_112 = arith.constant dense<0.000000e+00> : vector<84x128xf32>
    %123 = tpu.matmul %120, %122, %cst_112 {dimension_numbers = #tpu.dot_dimension_numbers<[1], [0], [0], [1], [0, 0, 1, 1], [], []>} : vector<84x128xf32>, vector<128x128xf32>, vector<84x128xf32> -> vector<84x128xf32>
    %124 = arith.addf %115, %123 : vector<84x128xf32>
    %c3_113 = arith.constant 3 : index
    %c0_114 = arith.constant 0 : index
    %125 = tpu.strided_load %arg22[%c3_113, %c0_114] {strides = array<i32: 2, 1>} : memref<184x128xf32, #tpu.memory_space<vmem>>, vector<21x128xf32>
    %c49 = arith.constant 49 : index
    %c0_115 = arith.constant 0 : index
    %126 = tpu.strided_load %arg22[%c49, %c0_115] {strides = array<i32: 2, 1>} : memref<184x128xf32, #tpu.memory_space<vmem>>, vector<21x128xf32>
    %c95 = arith.constant 95 : index
    %c0_116 = arith.constant 0 : index
    %127 = tpu.strided_load %arg22[%c95, %c0_116] {strides = array<i32: 2, 1>} : memref<184x128xf32, #tpu.memory_space<vmem>>, vector<21x128xf32>
    %c141 = arith.constant 141 : index
    %c0_117 = arith.constant 0 : index
    %128 = tpu.strided_load %arg22[%c141, %c0_117] {strides = array<i32: 2, 1>} : memref<184x128xf32, #tpu.memory_space<vmem>>, vector<21x128xf32>
    %129 = tpu.concatenate %125, %126, %127, %128 in 0 : vector<21x128xf32>, vector<21x128xf32>, vector<21x128xf32>, vector<21x128xf32> -> vector<84x128xf32>
    %c3_118 = arith.constant 3 : index
    %c0_119 = arith.constant 0 : index
    %c0_120 = arith.constant 0 : index
    %130 = vector.load %arg3[%c3_118, %c0_119, %c0_120] : memref<5x128x128xf32, #tpu.memory_space<vmem>>, vector<1x128x128xf32>
    %131 = vector.shape_cast %130 : vector<1x128x128xf32> to vector<128x128xf32>
    %cst_121 = arith.constant dense<0.000000e+00> : vector<84x128xf32>
    %132 = tpu.matmul %129, %131, %cst_121 {dimension_numbers = #tpu.dot_dimension_numbers<[1], [0], [0], [1], [0, 0, 1, 1], [], []>} : vector<84x128xf32>, vector<128x128xf32>, vector<84x128xf32> -> vector<84x128xf32>
    %133 = arith.addf %124, %132 : vector<84x128xf32>
    %c4_122 = arith.constant 4 : index
    %c0_123 = arith.constant 0 : index
    %134 = tpu.strided_load %arg22[%c4_122, %c0_123] {strides = array<i32: 2, 1>} : memref<184x128xf32, #tpu.memory_space<vmem>>, vector<21x128xf32>
    %c50 = arith.constant 50 : index
    %c0_124 = arith.constant 0 : index
    %135 = tpu.strided_load %arg22[%c50, %c0_124] {strides = array<i32: 2, 1>} : memref<184x128xf32, #tpu.memory_space<vmem>>, vector<21x128xf32>
    %c96 = arith.constant 96 : index
    %c0_125 = arith.constant 0 : index
    %136 = tpu.strided_load %arg22[%c96, %c0_125] {strides = array<i32: 2, 1>} : memref<184x128xf32, #tpu.memory_space<vmem>>, vector<21x128xf32>
    %c142 = arith.constant 142 : index
    %c0_126 = arith.constant 0 : index
    %137 = tpu.strided_load %arg22[%c142, %c0_126] {strides = array<i32: 2, 1>} : memref<184x128xf32, #tpu.memory_space<vmem>>, vector<21x128xf32>
    %138 = tpu.concatenate %134, %135, %136, %137 in 0 : vector<21x128xf32>, vector<21x128xf32>, vector<21x128xf32>, vector<21x128xf32> -> vector<84x128xf32>
    %c4_127 = arith.constant 4 : index
    %c0_128 = arith.constant 0 : index
    %c0_129 = arith.constant 0 : index
    %139 = vector.load %arg3[%c4_127, %c0_128, %c0_129] : memref<5x128x128xf32, #tpu.memory_space<vmem>>, vector<1x128x128xf32>
    %140 = vector.shape_cast %139 : vector<1x128x128xf32> to vector<128x128xf32>
    %cst_130 = arith.constant dense<0.000000e+00> : vector<84x128xf32>
    %141 = tpu.matmul %138, %140, %cst_130 {dimension_numbers = #tpu.dot_dimension_numbers<[1], [0], [0], [1], [0, 0, 1, 1], [], []>} : vector<84x128xf32>, vector<128x128xf32>, vector<84x128xf32> -> vector<84x128xf32>
    %142 = arith.addf %133, %141 : vector<84x128xf32>
    %c0_131 = arith.constant 0 : index
    %c0_132 = arith.constant 0 : index
    %143 = vector.load %arg4[%c0_131, %c0_132] : memref<1x128xf32, #tpu.memory_space<vmem>>, vector<1x128xf32>
    %144 = vector.broadcast %143 : vector<1x128xf32> to vector<84x128xf32>
    %145 = arith.addf %142, %144 : vector<84x128xf32>
    %cst_133 = arith.constant 0.000000e+00 : f32
    %146 = vector.broadcast %cst_133 : f32 to vector<84x128xf32>
    %147 = arith.maximumf %145, %146 : vector<84x128xf32>
    %c0_134 = arith.constant 0 : index
    %c0_135 = arith.constant 0 : index
    %148 = vector.load %arg23[%c0_134, %c0_135] : memref<84x128xf32, #tpu.memory_space<vmem>>, vector<84x128xf32>
    tpu.vector_store %arg23[%c0_134, %c0_135], %147 {strides = array<i32>} : memref<84x128xf32, #tpu.memory_space<vmem>>, vector<84x128xf32>,
    %cst_136 = arith.constant 0.000000e+00 : f32
    %149 = vector.broadcast %cst_136 : f32 to vector<36x128xf32>
    %c0_137 = arith.constant 0 : index
    %c0_138 = arith.constant 0 : index
    %150 = tpu.strided_load %arg23[%c0_137, %c0_138] {strides = array<i32: 2, 1>} : memref<84x128xf32, #tpu.memory_space<vmem>>, vector<9x128xf32>
    %c21 = arith.constant 21 : index
    %c0_139 = arith.constant 0 : index
    %151 = tpu.strided_load %arg23[%c21, %c0_139] {strides = array<i32: 2, 1>} : memref<84x128xf32, #tpu.memory_space<vmem>>, vector<9x128xf32>
    %c42 = arith.constant 42 : index
    %c0_140 = arith.constant 0 : index
    %152 = tpu.strided_load %arg23[%c42, %c0_140] {strides = array<i32: 2, 1>} : memref<84x128xf32, #tpu.memory_space<vmem>>, vector<9x128xf32>
    %c63 = arith.constant 63 : index
    %c0_141 = arith.constant 0 : index
    %153 = tpu.strided_load %arg23[%c63, %c0_141] {strides = array<i32: 2, 1>} : memref<84x128xf32, #tpu.memory_space<vmem>>, vector<9x128xf32>
    %154 = tpu.concatenate %150, %151, %152, %153 in 0 : vector<9x128xf32>, vector<9x128xf32>, vector<9x128xf32>, vector<9x128xf32> -> vector<36x128xf32>
    %c0_142 = arith.constant 0 : index
    %c0_143 = arith.constant 0 : index
    %c0_144 = arith.constant 0 : index
    %155 = vector.load %arg5[%c0_142, %c0_143, %c0_144] : memref<5x128x128xf32, #tpu.memory_space<vmem>>, vector<1x128x128xf32>
    %156 = vector.shape_cast %155 : vector<1x128x128xf32> to vector<128x128xf32>
    %cst_145 = arith.constant dense<0.000000e+00> : vector<36x128xf32>
    %157 = tpu.matmul %154, %156, %cst_145 {dimension_numbers = #tpu.dot_dimension_numbers<[1], [0], [0], [1], [0, 0, 1, 1], [], []>} : vector<36x128xf32>, vector<128x128xf32>, vector<36x128xf32> -> vector<36x128xf32>
    %158 = arith.addf %149, %157 : vector<36x128xf32>
    %c1_146 = arith.constant 1 : index
    %c0_147 = arith.constant 0 : index
    %159 = tpu.strided_load %arg23[%c1_146, %c0_147] {strides = array<i32: 2, 1>} : memref<84x128xf32, #tpu.memory_space<vmem>>, vector<9x128xf32>
    %c22 = arith.constant 22 : index
    %c0_148 = arith.constant 0 : index
    %160 = tpu.strided_load %arg23[%c22, %c0_148] {strides = array<i32: 2, 1>} : memref<84x128xf32, #tpu.memory_space<vmem>>, vector<9x128xf32>
    %c43 = arith.constant 43 : index
    %c0_149 = arith.constant 0 : index
    %161 = tpu.strided_load %arg23[%c43, %c0_149] {strides = array<i32: 2, 1>} : memref<84x128xf32, #tpu.memory_space<vmem>>, vector<9x128xf32>
    %c64 = arith.constant 64 : index
    %c0_150 = arith.constant 0 : index
    %162 = tpu.strided_load %arg23[%c64, %c0_150] {strides = array<i32: 2, 1>} : memref<84x128xf32, #tpu.memory_space<vmem>>, vector<9x128xf32>
    %163 = tpu.concatenate %159, %160, %161, %162 in 0 : vector<9x128xf32>, vector<9x128xf32>, vector<9x128xf32>, vector<9x128xf32> -> vector<36x128xf32>
    %c1_151 = arith.constant 1 : index
    %c0_152 = arith.constant 0 : index
    %c0_153 = arith.constant 0 : index
    %164 = vector.load %arg5[%c1_151, %c0_152, %c0_153] : memref<5x128x128xf32, #tpu.memory_space<vmem>>, vector<1x128x128xf32>
    %165 = vector.shape_cast %164 : vector<1x128x128xf32> to vector<128x128xf32>
    %cst_154 = arith.constant dense<0.000000e+00> : vector<36x128xf32>
    %166 = tpu.matmul %163, %165, %cst_154 {dimension_numbers = #tpu.dot_dimension_numbers<[1], [0], [0], [1], [0, 0, 1, 1], [], []>} : vector<36x128xf32>, vector<128x128xf32>, vector<36x128xf32> -> vector<36x128xf32>
    %167 = arith.addf %158, %166 : vector<36x128xf32>
    %c2_155 = arith.constant 2 : index
    %c0_156 = arith.constant 0 : index
    %168 = tpu.strided_load %arg23[%c2_155, %c0_156] {strides = array<i32: 2, 1>} : memref<84x128xf32, #tpu.memory_space<vmem>>, vector<9x128xf32>
    %c23 = arith.constant 23 : index
    %c0_157 = arith.constant 0 : index
    %169 = tpu.strided_load %arg23[%c23, %c0_157] {strides = array<i32: 2, 1>} : memref<84x128xf32, #tpu.memory_space<vmem>>, vector<9x128xf32>
    %c44 = arith.constant 44 : index
    %c0_158 = arith.constant 0 : index
    %170 = tpu.strided_load %arg23[%c44, %c0_158] {strides = array<i32: 2, 1>} : memref<84x128xf32, #tpu.memory_space<vmem>>, vector<9x128xf32>
    %c65 = arith.constant 65 : index
    %c0_159 = arith.constant 0 : index
    %171 = tpu.strided_load %arg23[%c65, %c0_159] {strides = array<i32: 2, 1>} : memref<84x128xf32, #tpu.memory_space<vmem>>, vector<9x128xf32>
    %172 = tpu.concatenate %168, %169, %170, %171 in 0 : vector<9x128xf32>, vector<9x128xf32>, vector<9x128xf32>, vector<9x128xf32> -> vector<36x128xf32>
    %c2_160 = arith.constant 2 : index
    %c0_161 = arith.constant 0 : index
    %c0_162 = arith.constant 0 : index
    %173 = vector.load %arg5[%c2_160, %c0_161, %c0_162] : memref<5x128x128xf32, #tpu.memory_space<vmem>>, vector<1x128x128xf32>
    %174 = vector.shape_cast %173 : vector<1x128x128xf32> to vector<128x128xf32>
    %cst_163 = arith.constant dense<0.000000e+00> : vector<36x128xf32>
    %175 = tpu.matmul %172, %174, %cst_163 {dimension_numbers = #tpu.dot_dimension_numbers<[1], [0], [0], [1], [0, 0, 1, 1], [], []>} : vector<36x128xf32>, vector<128x128xf32>, vector<36x128xf32> -> vector<36x128xf32>
    %176 = arith.addf %167, %175 : vector<36x128xf32>
    %c3_164 = arith.constant 3 : index
    %c0_165 = arith.constant 0 : index
    %177 = tpu.strided_load %arg23[%c3_164, %c0_165] {strides = array<i32: 2, 1>} : memref<84x128xf32, #tpu.memory_space<vmem>>, vector<9x128xf32>
    %c24 = arith.constant 24 : index
    %c0_166 = arith.constant 0 : index
    %178 = tpu.strided_load %arg23[%c24, %c0_166] {strides = array<i32: 2, 1>} : memref<84x128xf32, #tpu.memory_space<vmem>>, vector<9x128xf32>
    %c45 = arith.constant 45 : index
    %c0_167 = arith.constant 0 : index
    %179 = tpu.strided_load %arg23[%c45, %c0_167] {strides = array<i32: 2, 1>} : memref<84x128xf32, #tpu.memory_space<vmem>>, vector<9x128xf32>
    %c66 = arith.constant 66 : index
    %c0_168 = arith.constant 0 : index
    %180 = tpu.strided_load %arg23[%c66, %c0_168] {strides = array<i32: 2, 1>} : memref<84x128xf32, #tpu.memory_space<vmem>>, vector<9x128xf32>
    %181 = tpu.concatenate %177, %178, %179, %180 in 0 : vector<9x128xf32>, vector<9x128xf32>, vector<9x128xf32>, vector<9x128xf32> -> vector<36x128xf32>
    %c3_169 = arith.constant 3 : index
    %c0_170 = arith.constant 0 : index
    %c0_171 = arith.constant 0 : index
    %182 = vector.load %arg5[%c3_169, %c0_170, %c0_171] : memref<5x128x128xf32, #tpu.memory_space<vmem>>, vector<1x128x128xf32>
    %183 = vector.shape_cast %182 : vector<1x128x128xf32> to vector<128x128xf32>
    %cst_172 = arith.constant dense<0.000000e+00> : vector<36x128xf32>
    %184 = tpu.matmul %181, %183, %cst_172 {dimension_numbers = #tpu.dot_dimension_numbers<[1], [0], [0], [1], [0, 0, 1, 1], [], []>} : vector<36x128xf32>, vector<128x128xf32>, vector<36x128xf32> -> vector<36x128xf32>
    %185 = arith.addf %176, %184 : vector<36x128xf32>
    %c4_173 = arith.constant 4 : index
    %c0_174 = arith.constant 0 : index
    %186 = tpu.strided_load %arg23[%c4_173, %c0_174] {strides = array<i32: 2, 1>} : memref<84x128xf32, #tpu.memory_space<vmem>>, vector<9x128xf32>
    %c25 = arith.constant 25 : index
    %c0_175 = arith.constant 0 : index
    %187 = tpu.strided_load %arg23[%c25, %c0_175] {strides = array<i32: 2, 1>} : memref<84x128xf32, #tpu.memory_space<vmem>>, vector<9x128xf32>
    %c46_176 = arith.constant 46 : index
    %c0_177 = arith.constant 0 : index
    %188 = tpu.strided_load %arg23[%c46_176, %c0_177] {strides = array<i32: 2, 1>} : memref<84x128xf32, #tpu.memory_space<vmem>>, vector<9x128xf32>
    %c67 = arith.constant 67 : index
    %c0_178 = arith.constant 0 : index
    %189 = tpu.strided_load %arg23[%c67, %c0_178] {strides = array<i32: 2, 1>} : memref<84x128xf32, #tpu.memory_space<vmem>>, vector<9x128xf32>
    %190 = tpu.concatenate %186, %187, %188, %189 in 0 : vector<9x128xf32>, vector<9x128xf32>, vector<9x128xf32>, vector<9x128xf32> -> vector<36x128xf32>
    %c4_179 = arith.constant 4 : index
    %c0_180 = arith.constant 0 : index
    %c0_181 = arith.constant 0 : index
    %191 = vector.load %arg5[%c4_179, %c0_180, %c0_181] : memref<5x128x128xf32, #tpu.memory_space<vmem>>, vector<1x128x128xf32>
    %192 = vector.shape_cast %191 : vector<1x128x128xf32> to vector<128x128xf32>
    %cst_182 = arith.constant dense<0.000000e+00> : vector<36x128xf32>
    %193 = tpu.matmul %190, %192, %cst_182 {dimension_numbers = #tpu.dot_dimension_numbers<[1], [0], [0], [1], [0, 0, 1, 1], [], []>} : vector<36x128xf32>, vector<128x128xf32>, vector<36x128xf32> -> vector<36x128xf32>
    %194 = arith.addf %185, %193 : vector<36x128xf32>
    %c0_183 = arith.constant 0 : index
    %c0_184 = arith.constant 0 : index
    %195 = vector.load %arg6[%c0_183, %c0_184] : memref<1x128xf32, #tpu.memory_space<vmem>>, vector<1x128xf32>
    %196 = vector.broadcast %195 : vector<1x128xf32> to vector<36x128xf32>
    %197 = arith.addf %194, %196 : vector<36x128xf32>
    %cst_185 = arith.constant 0.000000e+00 : f32
    %198 = vector.broadcast %cst_185 : f32 to vector<36x128xf32>
    %199 = arith.maximumf %197, %198 : vector<36x128xf32>
    %c0_186 = arith.constant 0 : index
    %c0_187 = arith.constant 0 : index
    %200 = vector.load %arg24[%c0_186, %c0_187] : memref<36x128xf32, #tpu.memory_space<vmem>>, vector<36x128xf32>
    tpu.vector_store %arg24[%c0_186, %c0_187], %199 {strides = array<i32>} : memref<36x128xf32, #tpu.memory_space<vmem>>, vector<36x128xf32>,
    %cst_188 = arith.constant 0.000000e+00 : f32
    %201 = vector.broadcast %cst_188 : f32 to vector<16x128xf32>
    %c0_189 = arith.constant 0 : index
    %c0_190 = arith.constant 0 : index
    %202 = tpu.strided_load %arg24[%c0_189, %c0_190] {strides = array<i32: 2, 1>} : memref<36x128xf32, #tpu.memory_space<vmem>>, vector<4x128xf32>
    %c9_191 = arith.constant 9 : index
    %c0_192 = arith.constant 0 : index
    %203 = tpu.strided_load %arg24[%c9_191, %c0_192] {strides = array<i32: 2, 1>} : memref<36x128xf32, #tpu.memory_space<vmem>>, vector<4x128xf32>
    %c18 = arith.constant 18 : index
    %c0_193 = arith.constant 0 : index
    %204 = tpu.strided_load %arg24[%c18, %c0_193] {strides = array<i32: 2, 1>} : memref<36x128xf32, #tpu.memory_space<vmem>>, vector<4x128xf32>
    %c27 = arith.constant 27 : index
    %c0_194 = arith.constant 0 : index
    %205 = tpu.strided_load %arg24[%c27, %c0_194] {strides = array<i32: 2, 1>} : memref<36x128xf32, #tpu.memory_space<vmem>>, vector<4x128xf32>
    %206 = tpu.concatenate %202, %203, %204, %205 in 0 : vector<4x128xf32>, vector<4x128xf32>, vector<4x128xf32>, vector<4x128xf32> -> vector<16x128xf32>
    %c0_195 = arith.constant 0 : index
    %c0_196 = arith.constant 0 : index
    %c0_197 = arith.constant 0 : index
    %207 = vector.load %arg7[%c0_195, %c0_196, %c0_197] : memref<3x128x128xf32, #tpu.memory_space<vmem>>, vector<1x128x128xf32>
    %208 = vector.shape_cast %207 : vector<1x128x128xf32> to vector<128x128xf32>
    %cst_198 = arith.constant dense<0.000000e+00> : vector<16x128xf32>
    %209 = tpu.matmul %206, %208, %cst_198 {dimension_numbers = #tpu.dot_dimension_numbers<[1], [0], [0], [1], [0, 0, 1, 1], [], []>} : vector<16x128xf32>, vector<128x128xf32>, vector<16x128xf32> -> vector<16x128xf32>
    %210 = arith.addf %201, %209 : vector<16x128xf32>
    %c1_199 = arith.constant 1 : index
    %c0_200 = arith.constant 0 : index
    %211 = tpu.strided_load %arg24[%c1_199, %c0_200] {strides = array<i32: 2, 1>} : memref<36x128xf32, #tpu.memory_space<vmem>>, vector<4x128xf32>
    %c10 = arith.constant 10 : index
    %c0_201 = arith.constant 0 : index
    %212 = tpu.strided_load %arg24[%c10, %c0_201] {strides = array<i32: 2, 1>} : memref<36x128xf32, #tpu.memory_space<vmem>>, vector<4x128xf32>
    %c19 = arith.constant 19 : index
    %c0_202 = arith.constant 0 : index
    %213 = tpu.strided_load %arg24[%c19, %c0_202] {strides = array<i32: 2, 1>} : memref<36x128xf32, #tpu.memory_space<vmem>>, vector<4x128xf32>
    %c28 = arith.constant 28 : index
    %c0_203 = arith.constant 0 : index
    %214 = tpu.strided_load %arg24[%c28, %c0_203] {strides = array<i32: 2, 1>} : memref<36x128xf32, #tpu.memory_space<vmem>>, vector<4x128xf32>
    %215 = tpu.concatenate %211, %212, %213, %214 in 0 : vector<4x128xf32>, vector<4x128xf32>, vector<4x128xf32>, vector<4x128xf32> -> vector<16x128xf32>
    %c1_204 = arith.constant 1 : index
    %c0_205 = arith.constant 0 : index
    %c0_206 = arith.constant 0 : index
    %216 = vector.load %arg7[%c1_204, %c0_205, %c0_206] : memref<3x128x128xf32, #tpu.memory_space<vmem>>, vector<1x128x128xf32>
    %217 = vector.shape_cast %216 : vector<1x128x128xf32> to vector<128x128xf32>
    %cst_207 = arith.constant dense<0.000000e+00> : vector<16x128xf32>
    %218 = tpu.matmul %215, %217, %cst_207 {dimension_numbers = #tpu.dot_dimension_numbers<[1], [0], [0], [1], [0, 0, 1, 1], [], []>} : vector<16x128xf32>, vector<128x128xf32>, vector<16x128xf32> -> vector<16x128xf32>
    %219 = arith.addf %210, %218 : vector<16x128xf32>
    %c2_208 = arith.constant 2 : index
    %c0_209 = arith.constant 0 : index
    %220 = tpu.strided_load %arg24[%c2_208, %c0_209] {strides = array<i32: 2, 1>} : memref<36x128xf32, #tpu.memory_space<vmem>>, vector<4x128xf32>
    %c11 = arith.constant 11 : index
    %c0_210 = arith.constant 0 : index
    %221 = tpu.strided_load %arg24[%c11, %c0_210] {strides = array<i32: 2, 1>} : memref<36x128xf32, #tpu.memory_space<vmem>>, vector<4x128xf32>
    %c20 = arith.constant 20 : index
    %c0_211 = arith.constant 0 : index
    %222 = tpu.strided_load %arg24[%c20, %c0_211] {strides = array<i32: 2, 1>} : memref<36x128xf32, #tpu.memory_space<vmem>>, vector<4x128xf32>
    %c29 = arith.constant 29 : index
    %c0_212 = arith.constant 0 : index
    %223 = tpu.strided_load %arg24[%c29, %c0_212] {strides = array<i32: 2, 1>} : memref<36x128xf32, #tpu.memory_space<vmem>>, vector<4x128xf32>
    %224 = tpu.concatenate %220, %221, %222, %223 in 0 : vector<4x128xf32>, vector<4x128xf32>, vector<4x128xf32>, vector<4x128xf32> -> vector<16x128xf32>
    %c2_213 = arith.constant 2 : index
    %c0_214 = arith.constant 0 : index
    %c0_215 = arith.constant 0 : index
    %225 = vector.load %arg7[%c2_213, %c0_214, %c0_215] : memref<3x128x128xf32, #tpu.memory_space<vmem>>, vector<1x128x128xf32>
    %226 = vector.shape_cast %225 : vector<1x128x128xf32> to vector<128x128xf32>
    %cst_216 = arith.constant dense<0.000000e+00> : vector<16x128xf32>
    %227 = tpu.matmul %224, %226, %cst_216 {dimension_numbers = #tpu.dot_dimension_numbers<[1], [0], [0], [1], [0, 0, 1, 1], [], []>} : vector<16x128xf32>, vector<128x128xf32>, vector<16x128xf32> -> vector<16x128xf32>
    %228 = arith.addf %219, %227 : vector<16x128xf32>
    %c0_217 = arith.constant 0 : index
    %c0_218 = arith.constant 0 : index
    %229 = vector.load %arg8[%c0_217, %c0_218] : memref<1x128xf32, #tpu.memory_space<vmem>>, vector<1x128xf32>
    %230 = vector.broadcast %229 : vector<1x128xf32> to vector<16x128xf32>
    %231 = arith.addf %228, %230 : vector<16x128xf32>
    %cst_219 = arith.constant 0.000000e+00 : f32
    %232 = vector.broadcast %cst_219 : f32 to vector<16x128xf32>
    %233 = arith.maximumf %231, %232 : vector<16x128xf32>
    %234 = vector.extract_strided_slice %233 {offsets = [0, 0], sizes = [4, 128], strides = [1, 1]} : vector<16x128xf32> to vector<4x128xf32>
    %cst_220 = arith.constant dense<0xFF800000> : vector<128xf32>
    %235 = vector.multi_reduction <maximumf>, %234, %cst_220 [0] : vector<4x128xf32> to vector<128xf32>
    %236 = vector.shape_cast %235 : vector<128xf32> to vector<1x128xf32>
    %237 = vector.extract_strided_slice %233 {offsets = [4, 0], sizes = [4, 128], strides = [1, 1]} : vector<16x128xf32> to vector<4x128xf32>
    %cst_221 = arith.constant dense<0xFF800000> : vector<128xf32>
    %238 = vector.multi_reduction <maximumf>, %237, %cst_221 [0] : vector<4x128xf32> to vector<128xf32>
    %239 = vector.shape_cast %238 : vector<128xf32> to vector<1x128xf32>
    %240 = vector.extract_strided_slice %233 {offsets = [8, 0], sizes = [4, 128], strides = [1, 1]} : vector<16x128xf32> to vector<4x128xf32>
    %cst_222 = arith.constant dense<0xFF800000> : vector<128xf32>
    %241 = vector.multi_reduction <maximumf>, %240, %cst_222 [0] : vector<4x128xf32> to vector<128xf32>
    %242 = vector.shape_cast %241 : vector<128xf32> to vector<1x128xf32>
    %243 = vector.extract_strided_slice %233 {offsets = [12, 0], sizes = [4, 128], strides = [1, 1]} : vector<16x128xf32> to vector<4x128xf32>
    %cst_223 = arith.constant dense<0xFF800000> : vector<128xf32>
    %244 = vector.multi_reduction <maximumf>, %243, %cst_223 [0] : vector<4x128xf32> to vector<128xf32>
    %245 = vector.shape_cast %244 : vector<128xf32> to vector<1x128xf32>
    %246 = tpu.concatenate %236, %239, %242, %245 in 0 : vector<1x128xf32>, vector<1x128xf32>, vector<1x128xf32>, vector<1x128xf32> -> vector<4x128xf32>
    %c0_224 = arith.constant 0 : index
    %c0_225 = arith.constant 0 : index
    %247 = vector.load %arg9[%c0_224, %c0_225] : memref<128x384xf32, #tpu.memory_space<vmem>>, vector<128x384xf32>
    %cst_226 = arith.constant dense<0.000000e+00> : vector<4x384xf32>
    %248 = tpu.matmul %246, %247, %cst_226 {dimension_numbers = #tpu.dot_dimension_numbers<[1], [0], [0], [1], [0, 0, 1, 1], [], []>} : vector<4x128xf32>, vector<128x384xf32>, vector<4x384xf32> -> vector<4x384xf32>
    %c0_227 = arith.constant 0 : index
    %c0_228 = arith.constant 0 : index
    %249 = vector.load %arg11[%c0_227, %c0_228] : memref<1x384xf32, #tpu.memory_space<vmem>>, vector<1x384xf32>
    %250 = vector.broadcast %249 : vector<1x384xf32> to vector<4x384xf32>
    %251 = arith.addf %248, %250 : vector<4x384xf32>
    %cst_229 = arith.constant 0.000000e+00 : f32
    %252 = vector.broadcast %cst_229 : f32 to vector<1x128xf32>
    %cst_230 = arith.constant 0.000000e+00 : f32
    %253 = vector.broadcast %cst_230 : f32 to vector<1x128xf32>
    %c0_231 = arith.constant 0 : index
    %c0_232 = arith.constant 0 : index
    %254 = vector.load %arg10[%c0_231, %c0_232] : memref<128x384xf32, #tpu.memory_space<vmem>>, vector<128x384xf32>
    %cst_233 = arith.constant dense<0.000000e+00> : vector<1x384xf32>
    %255 = tpu.matmul %252, %254, %cst_233 {dimension_numbers = #tpu.dot_dimension_numbers<[1], [0], [0], [1], [0, 0, 1, 1], [], []>} : vector<1x128xf32>, vector<128x384xf32>, vector<1x384xf32> -> vector<1x384xf32>
    %c0_234 = arith.constant 0 : index
    %c0_235 = arith.constant 0 : index
    %256 = vector.load %arg12[%c0_234, %c0_235] : memref<1x384xf32, #tpu.memory_space<vmem>>, vector<1x384xf32>
    %257 = arith.addf %255, %256 : vector<1x384xf32>
    %258 = vector.extract_strided_slice %251 {offsets = [0, 0], sizes = [1, 384], strides = [1, 1]} : vector<4x384xf32> to vector<1x384xf32>
    %259 = vector.extract_strided_slice %258 {offsets = [0, 0], sizes = [1, 128], strides = [1, 1]} : vector<1x384xf32> to vector<1x128xf32>
    %260 = vector.extract_strided_slice %257 {offsets = [0, 0], sizes = [1, 128], strides = [1, 1]} : vector<1x384xf32> to vector<1x128xf32>
    %261 = arith.addf %259, %260 : vector<1x128xf32>
    %262 = arith.negf %261 : vector<1x128xf32>
    %263 = math.exp %262 : vector<1x128xf32>
    %cst_236 = arith.constant 1.000000e+00 : f32
    %264 = vector.broadcast %cst_236 : f32 to vector<1x128xf32>
    %265 = arith.addf %264, %263 : vector<1x128xf32>
    %266 = arith.divf %264, %265 : vector<1x128xf32>
    %267 = vector.extract_strided_slice %258 {offsets = [0, 128], sizes = [1, 128], strides = [1, 1]} : vector<1x384xf32> to vector<1x128xf32>
    %268 = vector.extract_strided_slice %257 {offsets = [0, 128], sizes = [1, 128], strides = [1, 1]} : vector<1x384xf32> to vector<1x128xf32>
    %269 = arith.addf %267, %268 : vector<1x128xf32>
    %270 = arith.negf %269 : vector<1x128xf32>
    %271 = math.exp %270 : vector<1x128xf32>
    %cst_237 = arith.constant 1.000000e+00 : f32
    %272 = vector.broadcast %cst_237 : f32 to vector<1x128xf32>
    %273 = arith.addf %272, %271 : vector<1x128xf32>
    %274 = arith.divf %272, %273 : vector<1x128xf32>
    %275 = vector.extract_strided_slice %258 {offsets = [0, 256], sizes = [1, 128], strides = [1, 1]} : vector<1x384xf32> to vector<1x128xf32>
    %276 = vector.extract_strided_slice %257 {offsets = [0, 256], sizes = [1, 128], strides = [1, 1]} : vector<1x384xf32> to vector<1x128xf32>
    %277 = arith.mulf %266, %276 : vector<1x128xf32>
    %278 = arith.addf %275, %277 : vector<1x128xf32>
    %279 = math.tanh %278 : vector<1x128xf32>
    %cst_238 = arith.constant 1.000000e+00 : f32
    %280 = vector.broadcast %cst_238 : f32 to vector<1x128xf32>
    %281 = arith.subf %280, %274 : vector<1x128xf32>
    %282 = arith.mulf %281, %279 : vector<1x128xf32>
    %283 = arith.mulf %274, %252 : vector<1x128xf32>
    %284 = arith.addf %282, %283 : vector<1x128xf32>
    %c0_239 = arith.constant 0 : index
    %c0_240 = arith.constant 0 : index
    %285 = vector.load %arg13[%c0_239, %c0_240] : memref<128x384xf32, #tpu.memory_space<vmem>>, vector<128x384xf32>
    %cst_241 = arith.constant dense<0.000000e+00> : vector<1x384xf32>
    %286 = tpu.matmul %284, %285, %cst_241 {dimension_numbers = #tpu.dot_dimension_numbers<[1], [0], [0], [1], [0, 0, 1, 1], [], []>} : vector<1x128xf32>, vector<128x384xf32>, vector<1x384xf32> -> vector<1x384xf32>
    %c0_242 = arith.constant 0 : index
    %c0_243 = arith.constant 0 : index
    %287 = vector.load %arg15[%c0_242, %c0_243] : memref<1x384xf32, #tpu.memory_space<vmem>>, vector<1x384xf32>
    %288 = arith.addf %286, %287 : vector<1x384xf32>
    %c0_244 = arith.constant 0 : index
    %c0_245 = arith.constant 0 : index
    %289 = vector.load %arg14[%c0_244, %c0_245] : memref<128x384xf32, #tpu.memory_space<vmem>>, vector<128x384xf32>
    %cst_246 = arith.constant dense<0.000000e+00> : vector<1x384xf32>
    %290 = tpu.matmul %253, %289, %cst_246 {dimension_numbers = #tpu.dot_dimension_numbers<[1], [0], [0], [1], [0, 0, 1, 1], [], []>} : vector<1x128xf32>, vector<128x384xf32>, vector<1x384xf32> -> vector<1x384xf32>
    %c0_247 = arith.constant 0 : index
    %c0_248 = arith.constant 0 : index
    %291 = vector.load %arg16[%c0_247, %c0_248] : memref<1x384xf32, #tpu.memory_space<vmem>>, vector<1x384xf32>
    %292 = arith.addf %290, %291 : vector<1x384xf32>
    %293 = vector.extract_strided_slice %288 {offsets = [0, 0], sizes = [1, 128], strides = [1, 1]} : vector<1x384xf32> to vector<1x128xf32>
    %294 = vector.extract_strided_slice %292 {offsets = [0, 0], sizes = [1, 128], strides = [1, 1]} : vector<1x384xf32> to vector<1x128xf32>
    %295 = arith.addf %293, %294 : vector<1x128xf32>
    %296 = arith.negf %295 : vector<1x128xf32>
    %297 = math.exp %296 : vector<1x128xf32>
    %cst_249 = arith.constant 1.000000e+00 : f32
    %298 = vector.broadcast %cst_249 : f32 to vector<1x128xf32>
    %299 = arith.addf %298, %297 : vector<1x128xf32>
    %300 = arith.divf %298, %299 : vector<1x128xf32>
    %301 = vector.extract_strided_slice %288 {offsets = [0, 128], sizes = [1, 128], strides = [1, 1]} : vector<1x384xf32> to vector<1x128xf32>
    %302 = vector.extract_strided_slice %292 {offsets = [0, 128], sizes = [1, 128], strides = [1, 1]} : vector<1x384xf32> to vector<1x128xf32>
    %303 = arith.addf %301, %302 : vector<1x128xf32>
    %304 = arith.negf %303 : vector<1x128xf32>
    %305 = math.exp %304 : vector<1x128xf32>
    %cst_250 = arith.constant 1.000000e+00 : f32
    %306 = vector.broadcast %cst_250 : f32 to vector<1x128xf32>
    %307 = arith.addf %306, %305 : vector<1x128xf32>
    %308 = arith.divf %306, %307 : vector<1x128xf32>
    %309 = vector.extract_strided_slice %288 {offsets = [0, 256], sizes = [1, 128], strides = [1, 1]} : vector<1x384xf32> to vector<1x128xf32>
    %310 = vector.extract_strided_slice %292 {offsets = [0, 256], sizes = [1, 128], strides = [1, 1]} : vector<1x384xf32> to vector<1x128xf32>
    %311 = arith.mulf %300, %310 : vector<1x128xf32>
    %312 = arith.addf %309, %311 : vector<1x128xf32>
    %313 = math.tanh %312 : vector<1x128xf32>
    %cst_251 = arith.constant 1.000000e+00 : f32
    %314 = vector.broadcast %cst_251 : f32 to vector<1x128xf32>
    %315 = arith.subf %314, %308 : vector<1x128xf32>
    %316 = arith.mulf %315, %313 : vector<1x128xf32>
    %317 = arith.mulf %308, %253 : vector<1x128xf32>
    %318 = arith.addf %316, %317 : vector<1x128xf32>
    %c0_252 = arith.constant 0 : index
    %c0_253 = arith.constant 0 : index
    %319 = vector.load %arg10[%c0_252, %c0_253] : memref<128x384xf32, #tpu.memory_space<vmem>>, vector<128x384xf32>
    %cst_254 = arith.constant dense<0.000000e+00> : vector<1x384xf32>
    %320 = tpu.matmul %284, %319, %cst_254 {dimension_numbers = #tpu.dot_dimension_numbers<[1], [0], [0], [1], [0, 0, 1, 1], [], []>} : vector<1x128xf32>, vector<128x384xf32>, vector<1x384xf32> -> vector<1x384xf32>
    %c0_255 = arith.constant 0 : index
    %c0_256 = arith.constant 0 : index
    %321 = vector.load %arg12[%c0_255, %c0_256] : memref<1x384xf32, #tpu.memory_space<vmem>>, vector<1x384xf32>
    %322 = arith.addf %320, %321 : vector<1x384xf32>
    %323 = vector.extract_strided_slice %251 {offsets = [1, 0], sizes = [1, 384], strides = [1, 1]} : vector<4x384xf32> to vector<1x384xf32>
    %324 = vector.extract_strided_slice %323 {offsets = [0, 0], sizes = [1, 128], strides = [1, 1]} : vector<1x384xf32> to vector<1x128xf32>
    %325 = vector.extract_strided_slice %322 {offsets = [0, 0], sizes = [1, 128], strides = [1, 1]} : vector<1x384xf32> to vector<1x128xf32>
    %326 = arith.addf %324, %325 : vector<1x128xf32>
    %327 = arith.negf %326 : vector<1x128xf32>
    %328 = math.exp %327 : vector<1x128xf32>
    %cst_257 = arith.constant 1.000000e+00 : f32
    %329 = vector.broadcast %cst_257 : f32 to vector<1x128xf32>
    %330 = arith.addf %329, %328 : vector<1x128xf32>
    %331 = arith.divf %329, %330 : vector<1x128xf32>
    %332 = vector.extract_strided_slice %323 {offsets = [0, 128], sizes = [1, 128], strides = [1, 1]} : vector<1x384xf32> to vector<1x128xf32>
    %333 = vector.extract_strided_slice %322 {offsets = [0, 128], sizes = [1, 128], strides = [1, 1]} : vector<1x384xf32> to vector<1x128xf32>
    %334 = arith.addf %332, %333 : vector<1x128xf32>
    %335 = arith.negf %334 : vector<1x128xf32>
    %336 = math.exp %335 : vector<1x128xf32>
    %cst_258 = arith.constant 1.000000e+00 : f32
    %337 = vector.broadcast %cst_258 : f32 to vector<1x128xf32>
    %338 = arith.addf %337, %336 : vector<1x128xf32>
    %339 = arith.divf %337, %338 : vector<1x128xf32>
    %340 = vector.extract_strided_slice %323 {offsets = [0, 256], sizes = [1, 128], strides = [1, 1]} : vector<1x384xf32> to vector<1x128xf32>
    %341 = vector.extract_strided_slice %322 {offsets = [0, 256], sizes = [1, 128], strides = [1, 1]} : vector<1x384xf32> to vector<1x128xf32>
    %342 = arith.mulf %331, %341 : vector<1x128xf32>
    %343 = arith.addf %340, %342 : vector<1x128xf32>
    %344 = math.tanh %343 : vector<1x128xf32>
    %cst_259 = arith.constant 1.000000e+00 : f32
    %345 = vector.broadcast %cst_259 : f32 to vector<1x128xf32>
    %346 = arith.subf %345, %339 : vector<1x128xf32>
    %347 = arith.mulf %346, %344 : vector<1x128xf32>
    %348 = arith.mulf %339, %284 : vector<1x128xf32>
    %349 = arith.addf %347, %348 : vector<1x128xf32>
    %c0_260 = arith.constant 0 : index
    %c0_261 = arith.constant 0 : index
    %350 = vector.load %arg13[%c0_260, %c0_261] : memref<128x384xf32, #tpu.memory_space<vmem>>, vector<128x384xf32>
    %cst_262 = arith.constant dense<0.000000e+00> : vector<1x384xf32>
    %351 = tpu.matmul %349, %350, %cst_262 {dimension_numbers = #tpu.dot_dimension_numbers<[1], [0], [0], [1], [0, 0, 1, 1], [], []>} : vector<1x128xf32>, vector<128x384xf32>, vector<1x384xf32> -> vector<1x384xf32>
    %c0_263 = arith.constant 0 : index
    %c0_264 = arith.constant 0 : index
    %352 = vector.load %arg15[%c0_263, %c0_264] : memref<1x384xf32, #tpu.memory_space<vmem>>, vector<1x384xf32>
    %353 = arith.addf %351, %352 : vector<1x384xf32>
    %c0_265 = arith.constant 0 : index
    %c0_266 = arith.constant 0 : index
    %354 = vector.load %arg14[%c0_265, %c0_266] : memref<128x384xf32, #tpu.memory_space<vmem>>, vector<128x384xf32>
    %cst_267 = arith.constant dense<0.000000e+00> : vector<1x384xf32>
    %355 = tpu.matmul %318, %354, %cst_267 {dimension_numbers = #tpu.dot_dimension_numbers<[1], [0], [0], [1], [0, 0, 1, 1], [], []>} : vector<1x128xf32>, vector<128x384xf32>, vector<1x384xf32> -> vector<1x384xf32>
    %c0_268 = arith.constant 0 : index
    %c0_269 = arith.constant 0 : index
    %356 = vector.load %arg16[%c0_268, %c0_269] : memref<1x384xf32, #tpu.memory_space<vmem>>, vector<1x384xf32>
    %357 = arith.addf %355, %356 : vector<1x384xf32>
    %358 = vector.extract_strided_slice %353 {offsets = [0, 0], sizes = [1, 128], strides = [1, 1]} : vector<1x384xf32> to vector<1x128xf32>
    %359 = vector.extract_strided_slice %357 {offsets = [0, 0], sizes = [1, 128], strides = [1, 1]} : vector<1x384xf32> to vector<1x128xf32>
    %360 = arith.addf %358, %359 : vector<1x128xf32>
    %361 = arith.negf %360 : vector<1x128xf32>
    %362 = math.exp %361 : vector<1x128xf32>
    %cst_270 = arith.constant 1.000000e+00 : f32
    %363 = vector.broadcast %cst_270 : f32 to vector<1x128xf32>
    %364 = arith.addf %363, %362 : vector<1x128xf32>
    %365 = arith.divf %363, %364 : vector<1x128xf32>
    %366 = vector.extract_strided_slice %353 {offsets = [0, 128], sizes = [1, 128], strides = [1, 1]} : vector<1x384xf32> to vector<1x128xf32>
    %367 = vector.extract_strided_slice %357 {offsets = [0, 128], sizes = [1, 128], strides = [1, 1]} : vector<1x384xf32> to vector<1x128xf32>
    %368 = arith.addf %366, %367 : vector<1x128xf32>
    %369 = arith.negf %368 : vector<1x128xf32>
    %370 = math.exp %369 : vector<1x128xf32>
    %cst_271 = arith.constant 1.000000e+00 : f32
    %371 = vector.broadcast %cst_271 : f32 to vector<1x128xf32>
    %372 = arith.addf %371, %370 : vector<1x128xf32>
    %373 = arith.divf %371, %372 : vector<1x128xf32>
    %374 = vector.extract_strided_slice %353 {offsets = [0, 256], sizes = [1, 128], strides = [1, 1]} : vector<1x384xf32> to vector<1x128xf32>
    %375 = vector.extract_strided_slice %357 {offsets = [0, 256], sizes = [1, 128], strides = [1, 1]} : vector<1x384xf32> to vector<1x128xf32>
    %376 = arith.mulf %365, %375 : vector<1x128xf32>
    %377 = arith.addf %374, %376 : vector<1x128xf32>
    %378 = math.tanh %377 : vector<1x128xf32>
    %cst_272 = arith.constant 1.000000e+00 : f32
    %379 = vector.broadcast %cst_272 : f32 to vector<1x128xf32>
    %380 = arith.subf %379, %373 : vector<1x128xf32>
    %381 = arith.mulf %380, %378 : vector<1x128xf32>
    %382 = arith.mulf %373, %318 : vector<1x128xf32>
    %383 = arith.addf %381, %382 : vector<1x128xf32>
    %c0_273 = arith.constant 0 : index
    %c0_274 = arith.constant 0 : index
    %384 = vector.load %arg10[%c0_273, %c0_274] : memref<128x384xf32, #tpu.memory_space<vmem>>, vector<128x384xf32>
    %cst_275 = arith.constant dense<0.000000e+00> : vector<1x384xf32>
    %385 = tpu.matmul %349, %384, %cst_275 {dimension_numbers = #tpu.dot_dimension_numbers<[1], [0], [0], [1], [0, 0, 1, 1], [], []>} : vector<1x128xf32>, vector<128x384xf32>, vector<1x384xf32> -> vector<1x384xf32>
    %c0_276 = arith.constant 0 : index
    %c0_277 = arith.constant 0 : index
    %386 = vector.load %arg12[%c0_276, %c0_277] : memref<1x384xf32, #tpu.memory_space<vmem>>, vector<1x384xf32>
    %387 = arith.addf %385, %386 : vector<1x384xf32>
    %388 = vector.extract_strided_slice %251 {offsets = [2, 0], sizes = [1, 384], strides = [1, 1]} : vector<4x384xf32> to vector<1x384xf32>
    %389 = vector.extract_strided_slice %388 {offsets = [0, 0], sizes = [1, 128], strides = [1, 1]} : vector<1x384xf32> to vector<1x128xf32>
    %390 = vector.extract_strided_slice %387 {offsets = [0, 0], sizes = [1, 128], strides = [1, 1]} : vector<1x384xf32> to vector<1x128xf32>
    %391 = arith.addf %389, %390 : vector<1x128xf32>
    %392 = arith.negf %391 : vector<1x128xf32>
    %393 = math.exp %392 : vector<1x128xf32>
    %cst_278 = arith.constant 1.000000e+00 : f32
    %394 = vector.broadcast %cst_278 : f32 to vector<1x128xf32>
    %395 = arith.addf %394, %393 : vector<1x128xf32>
    %396 = arith.divf %394, %395 : vector<1x128xf32>
    %397 = vector.extract_strided_slice %388 {offsets = [0, 128], sizes = [1, 128], strides = [1, 1]} : vector<1x384xf32> to vector<1x128xf32>
    %398 = vector.extract_strided_slice %387 {offsets = [0, 128], sizes = [1, 128], strides = [1, 1]} : vector<1x384xf32> to vector<1x128xf32>
    %399 = arith.addf %397, %398 : vector<1x128xf32>
    %400 = arith.negf %399 : vector<1x128xf32>
    %401 = math.exp %400 : vector<1x128xf32>
    %cst_279 = arith.constant 1.000000e+00 : f32
    %402 = vector.broadcast %cst_279 : f32 to vector<1x128xf32>
    %403 = arith.addf %402, %401 : vector<1x128xf32>
    %404 = arith.divf %402, %403 : vector<1x128xf32>
    %405 = vector.extract_strided_slice %388 {offsets = [0, 256], sizes = [1, 128], strides = [1, 1]} : vector<1x384xf32> to vector<1x128xf32>
    %406 = vector.extract_strided_slice %387 {offsets = [0, 256], sizes = [1, 128], strides = [1, 1]} : vector<1x384xf32> to vector<1x128xf32>
    %407 = arith.mulf %396, %406 : vector<1x128xf32>
    %408 = arith.addf %405, %407 : vector<1x128xf32>
    %409 = math.tanh %408 : vector<1x128xf32>
    %cst_280 = arith.constant 1.000000e+00 : f32
    %410 = vector.broadcast %cst_280 : f32 to vector<1x128xf32>
    %411 = arith.subf %410, %404 : vector<1x128xf32>
    %412 = arith.mulf %411, %409 : vector<1x128xf32>
    %413 = arith.mulf %404, %349 : vector<1x128xf32>
    %414 = arith.addf %412, %413 : vector<1x128xf32>
    %c0_281 = arith.constant 0 : index
    %c0_282 = arith.constant 0 : index
    %415 = vector.load %arg13[%c0_281, %c0_282] : memref<128x384xf32, #tpu.memory_space<vmem>>, vector<128x384xf32>
    %cst_283 = arith.constant dense<0.000000e+00> : vector<1x384xf32>
    %416 = tpu.matmul %414, %415, %cst_283 {dimension_numbers = #tpu.dot_dimension_numbers<[1], [0], [0], [1], [0, 0, 1, 1], [], []>} : vector<1x128xf32>, vector<128x384xf32>, vector<1x384xf32> -> vector<1x384xf32>
    %c0_284 = arith.constant 0 : index
    %c0_285 = arith.constant 0 : index
    %417 = vector.load %arg15[%c0_284, %c0_285] : memref<1x384xf32, #tpu.memory_space<vmem>>, vector<1x384xf32>
    %418 = arith.addf %416, %417 : vector<1x384xf32>
    %c0_286 = arith.constant 0 : index
    %c0_287 = arith.constant 0 : index
    %419 = vector.load %arg14[%c0_286, %c0_287] : memref<128x384xf32, #tpu.memory_space<vmem>>, vector<128x384xf32>
    %cst_288 = arith.constant dense<0.000000e+00> : vector<1x384xf32>
    %420 = tpu.matmul %383, %419, %cst_288 {dimension_numbers = #tpu.dot_dimension_numbers<[1], [0], [0], [1], [0, 0, 1, 1], [], []>} : vector<1x128xf32>, vector<128x384xf32>, vector<1x384xf32> -> vector<1x384xf32>
    %c0_289 = arith.constant 0 : index
    %c0_290 = arith.constant 0 : index
    %421 = vector.load %arg16[%c0_289, %c0_290] : memref<1x384xf32, #tpu.memory_space<vmem>>, vector<1x384xf32>
    %422 = arith.addf %420, %421 : vector<1x384xf32>
    %423 = vector.extract_strided_slice %418 {offsets = [0, 0], sizes = [1, 128], strides = [1, 1]} : vector<1x384xf32> to vector<1x128xf32>
    %424 = vector.extract_strided_slice %422 {offsets = [0, 0], sizes = [1, 128], strides = [1, 1]} : vector<1x384xf32> to vector<1x128xf32>
    %425 = arith.addf %423, %424 : vector<1x128xf32>
    %426 = arith.negf %425 : vector<1x128xf32>
    %427 = math.exp %426 : vector<1x128xf32>
    %cst_291 = arith.constant 1.000000e+00 : f32
    %428 = vector.broadcast %cst_291 : f32 to vector<1x128xf32>
    %429 = arith.addf %428, %427 : vector<1x128xf32>
    %430 = arith.divf %428, %429 : vector<1x128xf32>
    %431 = vector.extract_strided_slice %418 {offsets = [0, 128], sizes = [1, 128], strides = [1, 1]} : vector<1x384xf32> to vector<1x128xf32>
    %432 = vector.extract_strided_slice %422 {offsets = [0, 128], sizes = [1, 128], strides = [1, 1]} : vector<1x384xf32> to vector<1x128xf32>
    %433 = arith.addf %431, %432 : vector<1x128xf32>
    %434 = arith.negf %433 : vector<1x128xf32>
    %435 = math.exp %434 : vector<1x128xf32>
    %cst_292 = arith.constant 1.000000e+00 : f32
    %436 = vector.broadcast %cst_292 : f32 to vector<1x128xf32>
    %437 = arith.addf %436, %435 : vector<1x128xf32>
    %438 = arith.divf %436, %437 : vector<1x128xf32>
    %439 = vector.extract_strided_slice %418 {offsets = [0, 256], sizes = [1, 128], strides = [1, 1]} : vector<1x384xf32> to vector<1x128xf32>
    %440 = vector.extract_strided_slice %422 {offsets = [0, 256], sizes = [1, 128], strides = [1, 1]} : vector<1x384xf32> to vector<1x128xf32>
    %441 = arith.mulf %430, %440 : vector<1x128xf32>
    %442 = arith.addf %439, %441 : vector<1x128xf32>
    %443 = math.tanh %442 : vector<1x128xf32>
    %cst_293 = arith.constant 1.000000e+00 : f32
    %444 = vector.broadcast %cst_293 : f32 to vector<1x128xf32>
    %445 = arith.subf %444, %438 : vector<1x128xf32>
    %446 = arith.mulf %445, %443 : vector<1x128xf32>
    %447 = arith.mulf %438, %383 : vector<1x128xf32>
    %448 = arith.addf %446, %447 : vector<1x128xf32>
    %c0_294 = arith.constant 0 : index
    %c0_295 = arith.constant 0 : index
    %449 = vector.load %arg10[%c0_294, %c0_295] : memref<128x384xf32, #tpu.memory_space<vmem>>, vector<128x384xf32>
    %cst_296 = arith.constant dense<0.000000e+00> : vector<1x384xf32>
    %450 = tpu.matmul %414, %449, %cst_296 {dimension_numbers = #tpu.dot_dimension_numbers<[1], [0], [0], [1], [0, 0, 1, 1], [], []>} : vector<1x128xf32>, vector<128x384xf32>, vector<1x384xf32> -> vector<1x384xf32>
    %c0_297 = arith.constant 0 : index
    %c0_298 = arith.constant 0 : index
    %451 = vector.load %arg12[%c0_297, %c0_298] : memref<1x384xf32, #tpu.memory_space<vmem>>, vector<1x384xf32>
    %452 = arith.addf %450, %451 : vector<1x384xf32>
    %453 = vector.extract_strided_slice %251 {offsets = [3, 0], sizes = [1, 384], strides = [1, 1]} : vector<4x384xf32> to vector<1x384xf32>
    %454 = vector.extract_strided_slice %453 {offsets = [0, 0], sizes = [1, 128], strides = [1, 1]} : vector<1x384xf32> to vector<1x128xf32>
    %455 = vector.extract_strided_slice %452 {offsets = [0, 0], sizes = [1, 128], strides = [1, 1]} : vector<1x384xf32> to vector<1x128xf32>
    %456 = arith.addf %454, %455 : vector<1x128xf32>
    %457 = arith.negf %456 : vector<1x128xf32>
    %458 = math.exp %457 : vector<1x128xf32>
    %cst_299 = arith.constant 1.000000e+00 : f32
    %459 = vector.broadcast %cst_299 : f32 to vector<1x128xf32>
    %460 = arith.addf %459, %458 : vector<1x128xf32>
    %461 = arith.divf %459, %460 : vector<1x128xf32>
    %462 = vector.extract_strided_slice %453 {offsets = [0, 128], sizes = [1, 128], strides = [1, 1]} : vector<1x384xf32> to vector<1x128xf32>
    %463 = vector.extract_strided_slice %452 {offsets = [0, 128], sizes = [1, 128], strides = [1, 1]} : vector<1x384xf32> to vector<1x128xf32>
    %464 = arith.addf %462, %463 : vector<1x128xf32>
    %465 = arith.negf %464 : vector<1x128xf32>
    %466 = math.exp %465 : vector<1x128xf32>
    %cst_300 = arith.constant 1.000000e+00 : f32
    %467 = vector.broadcast %cst_300 : f32 to vector<1x128xf32>
    %468 = arith.addf %467, %466 : vector<1x128xf32>
    %469 = arith.divf %467, %468 : vector<1x128xf32>
    %470 = vector.extract_strided_slice %453 {offsets = [0, 256], sizes = [1, 128], strides = [1, 1]} : vector<1x384xf32> to vector<1x128xf32>
    %471 = vector.extract_strided_slice %452 {offsets = [0, 256], sizes = [1, 128], strides = [1, 1]} : vector<1x384xf32> to vector<1x128xf32>
    %472 = arith.mulf %461, %471 : vector<1x128xf32>
    %473 = arith.addf %470, %472 : vector<1x128xf32>
    %474 = math.tanh %473 : vector<1x128xf32>
    %cst_301 = arith.constant 1.000000e+00 : f32
    %475 = vector.broadcast %cst_301 : f32 to vector<1x128xf32>
    %476 = arith.subf %475, %469 : vector<1x128xf32>
    %477 = arith.mulf %476, %474 : vector<1x128xf32>
    %478 = arith.mulf %469, %414 : vector<1x128xf32>
    %479 = arith.addf %477, %478 : vector<1x128xf32>
    %c0_302 = arith.constant 0 : index
    %c0_303 = arith.constant 0 : index
    %480 = vector.load %arg13[%c0_302, %c0_303] : memref<128x384xf32, #tpu.memory_space<vmem>>, vector<128x384xf32>
    %cst_304 = arith.constant dense<0.000000e+00> : vector<1x384xf32>
    %481 = tpu.matmul %479, %480, %cst_304 {dimension_numbers = #tpu.dot_dimension_numbers<[1], [0], [0], [1], [0, 0, 1, 1], [], []>} : vector<1x128xf32>, vector<128x384xf32>, vector<1x384xf32> -> vector<1x384xf32>
    %c0_305 = arith.constant 0 : index
    %c0_306 = arith.constant 0 : index
    %482 = vector.load %arg15[%c0_305, %c0_306] : memref<1x384xf32, #tpu.memory_space<vmem>>, vector<1x384xf32>
    %483 = arith.addf %481, %482 : vector<1x384xf32>
    %c0_307 = arith.constant 0 : index
    %c0_308 = arith.constant 0 : index
    %484 = vector.load %arg14[%c0_307, %c0_308] : memref<128x384xf32, #tpu.memory_space<vmem>>, vector<128x384xf32>
    %cst_309 = arith.constant dense<0.000000e+00> : vector<1x384xf32>
    %485 = tpu.matmul %448, %484, %cst_309 {dimension_numbers = #tpu.dot_dimension_numbers<[1], [0], [0], [1], [0, 0, 1, 1], [], []>} : vector<1x128xf32>, vector<128x384xf32>, vector<1x384xf32> -> vector<1x384xf32>
    %c0_310 = arith.constant 0 : index
    %c0_311 = arith.constant 0 : index
    %486 = vector.load %arg16[%c0_310, %c0_311] : memref<1x384xf32, #tpu.memory_space<vmem>>, vector<1x384xf32>
    %487 = arith.addf %485, %486 : vector<1x384xf32>
    %488 = vector.extract_strided_slice %483 {offsets = [0, 0], sizes = [1, 128], strides = [1, 1]} : vector<1x384xf32> to vector<1x128xf32>
    %489 = vector.extract_strided_slice %487 {offsets = [0, 0], sizes = [1, 128], strides = [1, 1]} : vector<1x384xf32> to vector<1x128xf32>
    %490 = arith.addf %488, %489 : vector<1x128xf32>
    %491 = arith.negf %490 : vector<1x128xf32>
    %492 = math.exp %491 : vector<1x128xf32>
    %cst_312 = arith.constant 1.000000e+00 : f32
    %493 = vector.broadcast %cst_312 : f32 to vector<1x128xf32>
    %494 = arith.addf %493, %492 : vector<1x128xf32>
    %495 = arith.divf %493, %494 : vector<1x128xf32>
    %496 = vector.extract_strided_slice %483 {offsets = [0, 128], sizes = [1, 128], strides = [1, 1]} : vector<1x384xf32> to vector<1x128xf32>
    %497 = vector.extract_strided_slice %487 {offsets = [0, 128], sizes = [1, 128], strides = [1, 1]} : vector<1x384xf32> to vector<1x128xf32>
    %498 = arith.addf %496, %497 : vector<1x128xf32>
    %499 = arith.negf %498 : vector<1x128xf32>
    %500 = math.exp %499 : vector<1x128xf32>
    %cst_313 = arith.constant 1.000000e+00 : f32
    %501 = vector.broadcast %cst_313 : f32 to vector<1x128xf32>
    %502 = arith.addf %501, %500 : vector<1x128xf32>
    %503 = arith.divf %501, %502 : vector<1x128xf32>
    %504 = vector.extract_strided_slice %483 {offsets = [0, 256], sizes = [1, 128], strides = [1, 1]} : vector<1x384xf32> to vector<1x128xf32>
    %505 = vector.extract_strided_slice %487 {offsets = [0, 256], sizes = [1, 128], strides = [1, 1]} : vector<1x384xf32> to vector<1x128xf32>
    %506 = arith.mulf %495, %505 : vector<1x128xf32>
    %507 = arith.addf %504, %506 : vector<1x128xf32>
    %508 = math.tanh %507 : vector<1x128xf32>
    %cst_314 = arith.constant 1.000000e+00 : f32
    %509 = vector.broadcast %cst_314 : f32 to vector<1x128xf32>
    %510 = arith.subf %509, %503 : vector<1x128xf32>
    %511 = arith.mulf %510, %508 : vector<1x128xf32>
    %512 = arith.mulf %503, %448 : vector<1x128xf32>
    %513 = arith.addf %511, %512 : vector<1x128xf32>
    %c0_315 = arith.constant 0 : index
    %c0_316 = arith.constant 0 : index
    %514 = vector.load %arg17[%c0_315, %c0_316] : memref<128x64xf32, #tpu.memory_space<vmem>>, vector<128x64xf32>
    %cst_317 = arith.constant dense<0.000000e+00> : vector<1x64xf32>
    %515 = tpu.matmul %513, %514, %cst_317 {dimension_numbers = #tpu.dot_dimension_numbers<[1], [0], [0], [1], [0, 0, 1, 1], [], []>} : vector<1x128xf32>, vector<128x64xf32>, vector<1x64xf32> -> vector<1x64xf32>
    %c0_318 = arith.constant 0 : index
    %c0_319 = arith.constant 0 : index
    %516 = vector.load %arg18[%c0_318, %c0_319] : memref<1x64xf32, #tpu.memory_space<vmem>>, vector<1x64xf32>
    %517 = arith.addf %515, %516 : vector<1x64xf32>
    %cst_320 = arith.constant 0.000000e+00 : f32
    %518 = vector.broadcast %cst_320 : f32 to vector<1x64xf32>
    %519 = arith.maximumf %517, %518 : vector<1x64xf32>
    %c0_321 = arith.constant 0 : index
    %c0_322 = arith.constant 0 : index
    %520 = vector.load %arg19[%c0_321, %c0_322] : memref<64x5xf32, #tpu.memory_space<vmem>>, vector<64x5xf32>
    %cst_323 = arith.constant dense<0.000000e+00> : vector<1x5xf32>
    %521 = tpu.matmul %519, %520, %cst_323 {dimension_numbers = #tpu.dot_dimension_numbers<[1], [0], [0], [1], [0, 0, 1, 1], [], []>} : vector<1x64xf32>, vector<64x5xf32>, vector<1x5xf32> -> vector<1x5xf32>
    %c0_324 = arith.constant 0 : index
    %c0_325 = arith.constant 0 : index
    %522 = vector.load %arg20[%c0_324, %c0_325] : memref<1x5xf32, #tpu.memory_space<vmem>>, vector<1x5xf32>
    %523 = arith.addf %521, %522 : vector<1x5xf32>
    %c0_326 = arith.constant 0 : index
    %c0_327 = arith.constant 0 : index
    %524 = vector.load %arg21[%c0_326, %c0_327] : memref<1x5xf32, #tpu.memory_space<vmem>>, vector<1x5xf32>
    tpu.vector_store %arg21[%c0_326, %c0_327], %523 {strides = array<i32>} : memref<1x5xf32, #tpu.memory_space<vmem>>, vector<1x5xf32>,
    return
  }
}

</mosaic_0001>

<bundles_post_ra>
// kernel: forward.1
= control target key start
LH: loop header
LB: loop body
LE: loop exit
PB: predicated region body
PF: predicated region fallthrough
CT: control target
= control target key end

     0   :  { %s16929_s0 = inlined_call_operand.vmem [shape: f32[400,4], index: 0, kind: input, shape index: {}]   ;;  %s16930_s1 = inlined_call_operand.vmem [shape: f32[10,4,128], index: 1, kind: input, shape index: {}]   ;;  %s16931_s2 = inlined_call_operand.vmem [shape: f32[1,128], index: 2, kind: input, shape index: {}]   ;;  %s16932_s3 = inlined_call_operand.vmem [shape: f32[5,128,128], index: 3, kind: input, shape index: {}]   ;;  %s16933_s4 = inlined_call_operand.vmem [shape: f32[1,128], index: 4, kind: input, shape index: {}]   ;;  %s16934_s5 = inlined_call_operand.hbm [shape: f32[5,128,128], index: 5, kind: input, shape index: {}]   ;;  %s16935_s6 = inlined_call_operand.vmem [shape: f32[1,128], index: 6, kind: input, shape index: {}]   ;;  %s16936_s7 = inlined_call_operand.hbm [shape: f32[3,128,128], index: 7, kind: input, shape index: {}]   ;;  %s16937_s8 = inlined_call_operand.vmem [shape: f32[1,128], index: 8, kind: input, shape index: {}]   ;;  %s16938_s9 = inlined_call_operand.hbm [shape: f32[128,384], index: 9, kind: input, shape index: {}]   ;;  %s16939_s10 = inlined_call_operand.hbm [shape: f32[128,384], index: 10, kind: input, shape index: {}]   ;;  %s16940_s11 = inlined_call_operand.vmem [shape: f32[1,384], index: 11, kind: input, shape index: {}]   ;;  %s16941_s12 = inlined_call_operand.vmem [shape: f32[1,384], index: 12, kind: input, shape index: {}]   ;;  %s16942_s13 = inlined_call_operand.hbm [shape: f32[128,384], index: 13, kind: input, shape index: {}]   ;;  %s16943_s14 = inlined_call_operand.hbm [shape: f32[128,384], index: 14, kind: input, shape index: {}]   ;;  %s16944_s15 = inlined_call_operand.vmem [shape: f32[1,384], index: 15, kind: input, shape index: {}]   ;;  %s16945_s16 = inlined_call_operand.vmem [shape: f32[1,384], index: 16, kind: input, shape index: {}]   ;;  %s16946_s17 = inlined_call_operand.vmem [shape: f32[128,64], index: 17, kind: input, shape index: {}]   ;;  %s16947_s18 = inlined_call_operand.hbm [shape: f32[1,64], index: 18, kind: input, shape index: {}]   ;;  %s16948_s19 = inlined_call_operand.vmem [shape: f32[64,5], index: 19, kind: input, shape index: {}]   ;;  %s16949_s20 = inlined_call_operand.hbm [shape: f32[1,5], index: 20, kind: input, shape index: {}]   ;;  %s16950_s21 = inlined_call_operand.hbm [shape: f32[1,5], index: 21, kind: output, shape index: {}]  }
   0x1   :  { %17066 = sst [smem:[#allocation85_spill]] %s16929_s0 }
   0x2   :  { %17067 = sst [smem:[#allocation86_spill]] %s16930_s1 }
   0x3   :  { %17068 = sst [smem:[#allocation87_spill]] %s16931_s2 }
   0x4   :  { %17069 = sst [smem:[#allocation88_spill]] %s16932_s3 }
   0x5   :  { %17070 = sst [smem:[#allocation89_spill]] %s16933_s4 }
   0x6   :  { %17071 = sst [smem:[#allocation90_spill]] %s16934_s5 }
   0x7   :  { %17072 = sst [smem:[#allocation91_spill]] %s16950_s21 }
   0x8   :  { %26 = vsyncpa [#allocation6], 0 }
   0x9   :  { %27 = vsyncpa [#allocation9], 0 }
   0xa   :  { %28 = vsyncpa [#allocation12], 0 }
   0xb   :  { %29 = vsyncpa [#allocation15], 0 }
   0xc   :  { %30 = vsyncpa [#allocation18], 0 }
   0xd   :  { %31 = vsyncpa [#allocation7], 0  ;;  %s13271_s2 = smov [#allocation8]   ;;  %s13061_s3 = scalar_lea.hbm %s16936_s7, 6144 }
   0xe   :  { %s61_s25 = sshll.u32 %s13271_s2, 4  ;;  %p13062_p0 = scmp.ne.s32.totalorder %s16936_s7, %s13061_s3  ;;  %s62_s25 = int_to_ptr.vmem [resolvable:$true] %s61_s25 }
   0xf   :  { %p13065_p1 = scmp.lt.u32.totalorder %s13061_s3, %s16936_s7 }
  0x11   :  { %p13067_p2 = pnand %p13065_p1, %p13062_p0 }
  0x13   :  { %13070 = shalt.err (!%p13067_p2)
}
  0x14   :  { %s13071_s30 = scalar_lea.vmem %s62_s25, 6144  ;;  %p13076_p4 = scmp.lt.s32.totalorder %s62_s25, %s62_s25 }
  0x15   :  { %p13072_p3 = scmp.ne.s32.totalorder %s62_s25, %s13071_s30  ;;  %p13077_p5 = scmp.lt.s32.totalorder %s13071_s30, %s13071_s30 }
  0x17   :  { %p13078_p6 = por %p13077_p5, %p13076_p4 }
  0x19   :  { %p13079_p7 = pnand %p13078_p6, %p13072_p3 }
  0x1b   :  { %13082 = shalt.err (!%p13079_p7)
}
  0x1c   :  { %s16956_s5 = smov 128   ;;  %s13273_s22 = smov 8  }
  0x1d   :  { %67 = dma.hbm_to_vmem [thread:$0]  %s16936_s7, 6144, %s62_s25, [#allocation9], %s16956_s5, %s16956_s5, %s13273_s22  }
  0x1e   :  { %s13274_s24 = smov [#allocation11]   ;;  %s13275_s26 = smov [#allocation14]  }
  0x1f   :  { %s87_s2 = sshll.u32 %s13274_s24, 4  ;;  %s115_s27 = sshll.u32 %s13275_s26, 4  ;;  %s88_s2 = int_to_ptr.vmem [resolvable:$true] %s87_s2  ;;  %s116_s27 = int_to_ptr.vmem [resolvable:$true] %s115_s27 }
  0x20   :  { %s13083_s29 = scalar_lea.hbm %s16939_s10, 6144 }
  0x21   :  { %p13084_p8 = scmp.ne.s32.totalorder %s16939_s10, %s13083_s29  ;;  %p13087_p9 = scmp.lt.u32.totalorder %s13083_s29, %s16939_s10 }
  0x23   :  { %p13089_p10 = pnand %p13087_p9, %p13084_p8 }
  0x25   :  { %13092 = shalt.err (!%p13089_p10)
}
  0x26   :  { %s13093_s7 = scalar_lea.vmem %s88_s2, 6144  ;;  %p13098_p12 = scmp.lt.s32.totalorder %s88_s2, %s88_s2 }
  0x27   :  { %p13094_p11 = scmp.ne.s32.totalorder %s88_s2, %s13093_s7  ;;  %p13099_p13 = scmp.lt.s32.totalorder %s13093_s7, %s13093_s7 }
  0x29   :  { %p13100_p0 = por %p13099_p13, %p13098_p12 }
  0x2b   :  { %p13101_p1 = pnand %p13100_p0, %p13094_p11 }
  0x2d   :  { %13104 = shalt.err (!%p13101_p1)
}
  0x2e   :  { %s13276_s25 = smov 384   ;;  %s13277_s23 = smov 24  }
  0x2f   :  { %93 = dma.hbm_to_vmem [thread:$0]  %s16939_s10, 6144, %s88_s2, [#allocation12], %s13276_s25, %s13276_s25, %s13277_s23  }
  0x30   :  { %s13105_s3 = scalar_lea.hbm %s16943_s14, 6144 }
  0x31   :  { %p13106_p2 = scmp.ne.s32.totalorder %s16943_s14, %s13105_s3  ;;  %p13109_p3 = scmp.lt.u32.totalorder %s13105_s3, %s16943_s14 }
  0x33   :  { %p13111_p4 = pnand %p13109_p3, %p13106_p2 }
  0x35   :  { %13114 = shalt.err (!%p13111_p4)
}
  0x36   :  { %s13115_s30 = scalar_lea.vmem %s116_s27, 6144  ;;  %p13120_p6 = scmp.lt.s32.totalorder %s116_s27, %s116_s27 }
  0x37   :  { %p13116_p5 = scmp.ne.s32.totalorder %s116_s27, %s13115_s30  ;;  %p13121_p7 = scmp.lt.s32.totalorder %s13115_s30, %s13115_s30 }
  0x39   :  { %p13122_p8 = por %p13121_p7, %p13120_p6 }
  0x3b   :  { %p13123_p9 = pnand %p13122_p8, %p13116_p5 }
  0x3d   :  { %13126 = shalt.err (!%p13123_p9)
}
  0x3e   :  { %121 = dma.hbm_to_vmem [thread:$0]  %s16943_s14, 6144, %s116_s27, [#allocation15], %s13276_s25, %s13276_s25, %s13277_s23  }
  0x3f   :  { %s13278_s7 = smov [#allocation5]   ;;  %s13279_s24 = smov [#allocation10]  }
  0x40   :  { %s47_s1 = sshll.u32 %s13278_s7, 4  ;;  %s75_s21 = sshll.u32 %s13279_s24, 4  ;;  %s48_s1 = int_to_ptr.vmem [resolvable:$true] %s47_s1  ;;  %s76_s21 = int_to_ptr.vmem [resolvable:$true] %s75_s21 }
  0x41   :  { %s17073_s28 = sld [smem:[#allocation90_spill]] }
  0x47   :  { %s13127_s29 = scalar_lea.hbm %s17073_s28, 10240 }
  0x48   :  { %p13128_p10 = scmp.ne.s32.totalorder %s17073_s28, %s13127_s29  ;;  %p13131_p11 = scmp.lt.u32.totalorder %s13127_s29, %s17073_s28 }
  0x4a   :  { %p13133_p12 = pnand %p13131_p11, %p13128_p10 }
  0x4c   :  { %13136 = shalt.err (!%p13133_p12)
}
  0x4d   :  { %s13137_s14 = scalar_lea.vmem %s48_s1, 10240  ;;  %p13142_p0 = scmp.lt.s32.totalorder %s48_s1, %s48_s1 }
  0x4e   :  { %p13138_p13 = scmp.ne.s32.totalorder %s48_s1, %s13137_s14  ;;  %p13143_p1 = scmp.lt.s32.totalorder %s13137_s14, %s13137_s14 }
  0x50   :  { %p13144_p2 = por %p13143_p1, %p13142_p0 }
  0x52   :  { %p13145_p3 = pnand %p13144_p2, %p13138_p13 }
  0x54   :  { %13148 = shalt.err (!%p13145_p3)
}
  0x55   :  { %s17074_s27 = smov 128   ;;  %s13149_s24 = scalar_lea.hbm %s16938_s9, 6144 }
  0x56   :  { %53 = dma.hbm_to_vmem [thread:$0]  %s17073_s28, 10240, %s48_s1, [#allocation6], %s17074_s27, %s17074_s27, %s13273_s22  }
  0x57   :  { %p13150_p4 = scmp.ne.s32.totalorder %s16938_s9, %s13149_s24  ;;  %p13153_p5 = scmp.lt.u32.totalorder %s13149_s24, %s16938_s9 }
  0x59   :  { %p13155_p6 = pnand %p13153_p5, %p13150_p4 }
  0x5b   :  { %13158 = shalt.err (!%p13155_p6)
}
  0x5c   :  { %s13159_s4 = scalar_lea.vmem %s76_s21, 6144  ;;  %p13164_p8 = scmp.lt.s32.totalorder %s76_s21, %s76_s21 }
  0x5d   :  { %p13160_p7 = scmp.ne.s32.totalorder %s76_s21, %s13159_s4  ;;  %p13165_p9 = scmp.lt.s32.totalorder %s13159_s4, %s13159_s4 }
  0x5f   :  { %p13166_p10 = por %p13165_p9, %p13164_p8 }
  0x61   :  { %p13167_p11 = pnand %p13166_p10, %p13160_p7 }
  0x63   :  { %13170 = shalt.err (!%p13167_p11)
}
  0x64   :  { %81 = dma.hbm_to_vmem [thread:$0]  %s16938_s9, 6144, %s76_s21, [#allocation9], %s13276_s25, %s13276_s25, %s13277_s23  }
  0x65   :  { %s13280_s28 = smov [#allocation13]   ;;  %s13281_s14 = smov [#allocation16]  }
  0x66   :  { %s103_s30 = sshll.u32 %s13280_s28, 4  ;;  %s134_s27 = sshll.u32 %s13281_s14, 4  ;;  %s104_s30 = int_to_ptr.vmem [resolvable:$true] %s103_s30  ;;  %s135_s27 = int_to_ptr.vmem [resolvable:$true] %s134_s27 }
  0x67   :  { %s13171_s7 = scalar_lea.hbm %s16942_s13, 6144 }
  0x68   :  { %p13172_p12 = scmp.ne.s32.totalorder %s16942_s13, %s13171_s7  ;;  %p13175_p13 = scmp.lt.u32.totalorder %s13171_s7, %s16942_s13 }
  0x6a   :  { %p13177_p0 = pnand %p13175_p13, %p13172_p12 }
  0x6c   :  { %13180 = shalt.err (!%p13177_p0)
}
  0x6d   :  { %s13181_s9 = scalar_lea.vmem %s104_s30, 6144  ;;  %p13186_p2 = scmp.lt.s32.totalorder %s104_s30, %s104_s30 }
  0x6e   :  { %p13182_p1 = scmp.ne.s32.totalorder %s104_s30, %s13181_s9  ;;  %p13187_p3 = scmp.lt.s32.totalorder %s13181_s9, %s13181_s9 }
  0x70   :  { %p13188_p4 = por %p13187_p3, %p13186_p2 }
  0x72   :  { %p13189_p5 = pnand %p13188_p4, %p13182_p1 }
  0x74   :  { %13192 = shalt.err (!%p13189_p5)
}
  0x75   :  { %109 = dma.hbm_to_vmem [thread:$0]  %s16942_s13, 6144, %s104_s30, [#allocation12], %s13276_s25, %s13276_s25, %s13277_s23  }
  0x76   :  { %s13193_s22 = scalar_lea.hbm %s16947_s18, 16 }
  0x77   :  { %p13194_p6 = scmp.ne.s32.totalorder %s16947_s18, %s13193_s22  ;;  %p13197_p7 = scmp.lt.u32.totalorder %s13193_s22, %s16947_s18 }
  0x79   :  { %p13199_p8 = pnand %p13197_p7, %p13194_p6 }
  0x7b   :  { %13202 = shalt.err (!%p13199_p8)
}
  0x7c   :  { %s13203_s2 = scalar_lea.vmem %s135_s27, 16  ;;  %s13207_s7 = scalar_lea.vmem %s135_s27, 32 }
  0x7d   :  { %p13204_p9 = scmp.ne.s32.totalorder %s135_s27, %s13203_s2  ;;  %p13208_p10 = scmp.lt.s32.totalorder %s135_s27, %s135_s27 }
  0x7e   :  { %p13209_p11 = scmp.lt.s32.totalorder %s13207_s7, %s13203_s2 }
  0x80   :  { %p13210_p12 = por %p13209_p11, %p13208_p10 }
  0x82   :  { %p13211_p13 = pnand %p13210_p12, %p13204_p9 }
  0x84   :  { %13214 = shalt.err (!%p13211_p13)
}
  0x85   :  { %137 = dma.hbm_to_vmem [thread:$0]  %s16947_s18, 16, %s135_s27, [#allocation15]  }
  0x86   :  { %s13282_s23 = smov [#allocation17]   ;;  %s13215_s26 = scalar_lea.hbm %s16949_s20, 16 }
  0x87   :  { %s146_s30 = sshll.u32 %s13282_s23, 4  ;;  %p13216_p0 = scmp.ne.s32.totalorder %s16949_s20, %s13215_s26  ;;  %s147_s30 = int_to_ptr.vmem [resolvable:$true] %s146_s30 }
  0x88   :  { %p13219_p1 = scmp.lt.u32.totalorder %s13215_s26, %s16949_s20 }
  0x8a   :  { %p13221_p2 = pnand %p13219_p1, %p13216_p0 }
  0x8c   :  { %13224 = shalt.err (!%p13221_p2)
}
  0x8d   :  { %s13225_s0 = scalar_lea.vmem %s147_s30, 16  ;;  %s13229_s18 = scalar_lea.vmem %s147_s30, 32 }
  0x8e   :  { %p13226_p3 = scmp.ne.s32.totalorder %s147_s30, %s13225_s0  ;;  %p13230_p4 = scmp.lt.s32.totalorder %s147_s30, %s147_s30 }
  0x8f   :  { %p13231_p5 = scmp.lt.s32.totalorder %s13229_s18, %s13225_s0 }
  0x91   :  { %p13232_p6 = por %p13231_p5, %p13230_p4 }
  0x93   :  { %p13233_p7 = pnand %p13232_p6, %p13226_p3 }
  0x95   :  { %13236 = shalt.err (!%p13233_p7)
}
  0x96   :  { %149 = dma.hbm_to_vmem [thread:$0]  %s16949_s20, 16, %s147_s30, [#allocation18]  }
  0x97   :  { %13259 = dma.done.wait [#allocation6], 10240  }
  0x98   :  { %13260 = vsyncadd [#allocation6], 4294957056 }
  0x99   :  { %13261 = dma.done.wait [#allocation9], 12288  }
  0x9a   :  { %13262 = vsyncadd [#allocation9], 4294955008 }
  0x9b   :  { %13263 = dma.done.wait [#allocation12], 12288  }
  0x9c   :  { %13264 = vsyncadd [#allocation12], 4294955008 }
  0x9d   :  { %13265 = dma.done.wait [#allocation15], 6160  }
  0x9e   :  { %13266 = vsyncadd [#allocation15], 4294961136 }
  0x9f   :  { %13267 = dma.done.wait [#allocation18], 16  }
  0xa0   :  { %13268 = vsyncadd [#allocation18], 4294967280  ;;  %v16957_v0 = vmov 0.0   ;;  %vm13284_vm0 = vmmov 0   ;;  %vm247_vm1 = vcmask 1043456   ;;  %vm393_vm2 = vcmask 31744  }
  0xa1   :  { %9953 = vmatprep.subr.mxu0 %v16957_v0  ;;  %9955 = vmatprep.mubr.msk.f32.mxu0 %vm13284_vm0, %v16957_v0  ;;  %s17075_s1 = sld [smem:[#allocation86_spill]]  ;;  %s17076_s10 = sld [smem:[#allocation85_spill]]  ;;  %vm227_vm3 = vcmask 1045504   ;;  %vm267_vm4 = vcmask 1041408   ;;  %vm3922_vm5 = vcmask 1044480   ;;  %vm3946_vm6 = vcmask 1046528  }
  0xa2   :  { %10024 = vmatprep.subr.mxu1 %v16957_v0  ;;  %10026 = vmatprep.mubr.msk.f32.mxu1 %vm13284_vm0, %v16957_v0  ;;  %s17077_s29 = sld [smem:[#allocation88_spill]]  ;;  %vm4981_vm7 = vcmask 1040384   ;;  %vm4996_vm8 = vcmask 1042432   ;;  %vm6078_vm9 = vcmask 1047556   ;;  %vm8504_vm10 = vcmask 523264   ;;  %s13286_s20 = smov [#allocation19]  }
  0xa3   :  { %vm8578_vm11 = vcmask 32768  }
  0xa7   :  { %v8646_v1 = vld [vmem:[%s17075_s1 + $0x4] sm:$0xf]  ;;  %v283_v3 = vld [vmem:[%s17075_s1] sm:$0xf]  ;;  %v8719_v5 = vld [vmem:[%s17075_s1 + $0x8] sm:$0xf] }
  0xa8   :  { %v8622_v2 = vld [vmem:[%s17076_s10 + $0x1] ss:$2 sm:$0xff]  ;;  %9954 = vmatpush3.msk.msra.mxu0 %vm247_vm1, %v8646_v1  ;;  %10025 = vmatpush3.msk.msra.mxu1 %vm247_vm1, %v283_v3  ;;  %v174_v4 = vld [vmem:[%s17076_s10] ss:$2 sm:$0xff]  ;;  %v8623_v7 = vld [vmem:[%s17076_s10 + $0x11] ss:$2 sm:$0xff] }
  0xa9   :  { %9956 = vmatmul.mubr.msk.f32.vlgmr.msra.gmra.mrb[0].mxu0 %vm393_vm2, %v8622_v2  ;;  %10095 = vmatprep.subr.mxu0 %v16957_v0  ;;  %v8768_v6 = vld [vmem:[%s17075_s1 + $0xc] sm:$0xf]  ;;  %v8599_v8 = vld [vmem:[%s17076_s10 + $0x10] ss:$2 sm:$0xff]  ;;  %v8625_v11 = vld [vmem:[%s17076_s10 + $0x31] ss:$2 sm:$0xff] }
  0xaa   :  { %10027 = vmatmul.mubr.msk.f32.vlgmr.msra.gmra.mrb[0].mxu1 %vm393_vm2, %v174_v4  ;;  %10096 = vmatpush3.msk.msra.mxu0 %vm247_vm1, %v8719_v5  ;;  %v8624_v9 = vld [vmem:[%s17076_s10 + $0x21] ss:$2 sm:$0xff]  ;;  %v8600_v10 = vld [vmem:[%s17076_s10 + $0x20] ss:$2 sm:$0xff]  ;;  %v8601_v12 = vld [vmem:[%s17076_s10 + $0x30] ss:$2 sm:$0xff] }
  0xab   :  { %10166 = vmatprep.subr.mxu1 %v16957_v0  ;;  %9958 = vmatprep.mubr.msk.f32.mxu0 %vm13284_vm0, %v16957_v0  ;;  %v8628_v13 = vld [vmem:[%s17076_s10 + $0x65] ss:$2 sm:$0xff]  ;;  %v8604_v14 = vld [vmem:[%s17076_s10 + $0x64] ss:$2 sm:$0xff]  ;;  %v8629_v20 = vld [vmem:[%s17076_s10 + $0x75] ss:$2 sm:$0xff] }
  0xac   :  { %10167 = vmatpush3.msk.msra.mxu1 %vm247_vm1, %v8768_v6  ;;  %10029 = vmatprep.mubr.msk.f32.mxu1 %vm13284_vm0, %v16957_v0  ;;  %v8626_v15 = vld [vmem:[%s17076_s10 + $0x41] ss:$2 sm:$0xff]  ;;  %v8602_v16 = vld [vmem:[%s17076_s10 + $0x40] ss:$2 sm:$0xff]  ;;  %v338_v17 = vrot.slane %v8628_v13, 2  ;;  %v228_v19 = vrot.slane %v8604_v14, 2 }
  0xad   :  { %9959 = vmatmul.mubr.msk.f32.gmra.mrb[2].mxu0 %vm393_vm2, %v8623_v7  ;;  %10237 = vmatprep.subr.mxu0 %v16957_v0  ;;  %v8627_v18 = vld [vmem:[%s17076_s10 + $0x51] ss:$2 sm:$0x3f]  ;;  %v8603_v21 = vld [vmem:[%s17076_s10 + $0x50] ss:$2 sm:$0x3f] }
  0xae   :  { %10030 = vmatmul.mubr.msk.f32.gmra.mrb[2].mxu1 %vm393_vm2, %v8599_v8  ;;  %9961 = vmatprep.mubr.msk.f32.mxu0 %vm13284_vm0, %v16957_v0  ;;  %v8605_v22 = vld [vmem:[%s17076_s10 + $0x74] ss:$2 sm:$0xff]  ;;  %v388_v23 = vsel %vm227_vm3, %v8627_v18, %v338_v17  ;;  %v339_v24 = vrot.slane %v8629_v20, 2  ;;  %v280_v25 = vsel %vm227_vm3, %v8603_v21, %v228_v19  ;;  %v8630_v27 = vld [vmem:[%s17076_s10 + $0x85] ss:$2 sm:$0xff] }
  0xaf   :  { %10032 = vmatprep.mubr.msk.f32.mxu1 %vm13284_vm0, %v16957_v0  ;;  %10308 = vmatprep.subr.mxu1 %v16957_v0  ;;  %v229_v26 = vrot.slane %v8605_v22, 2  ;;  %v8606_v28 = vld [vmem:[%s17076_s10 + $0x84] ss:$2 sm:$0xff]  ;;  %v341_v30 = vrot.slane %v8630_v27, 2  ;;  %v8631_v33 = vld [vmem:[%s17076_s10 + $0x95] ss:$2 sm:$0xff] }
  0xb0   :  { %v340_v29 = vsel %vm227_vm3, %v338_v17, %v339_v24  ;;  %v231_v32 = vrot.slane %v8606_v28, 2  ;;  %v8607_v34 = vld [vmem:[%s17076_s10 + $0x94] ss:$2 sm:$0xff]  ;;  %v343_v36 = vrot.slane %v8631_v33, 2  ;;  %v8632_v39 = vld [vmem:[%s17076_s10 + $0xa5] ss:$2 sm:$0xff] }
  0xb1   :  { %9962 = vmatmul.mubr.msk.f32.gmra.mrb[4].mxu0 %vm393_vm2, %v8624_v9  ;;  %v230_v31 = vsel %vm227_vm3, %v228_v19, %v229_v26  ;;  %v342_v35 = vsel %vm227_vm3, %v339_v24, %v341_v30  ;;  %v233_v38 = vrot.slane %v8607_v34, 2  ;;  %v8608_v40 = vld [vmem:[%s17076_s10 + $0xa4] ss:$2 sm:$0xff]  ;;  %v345_v42 = vrot.slane %v8632_v39, 2  ;;  %v8634_v51 = vld [vmem:[%s17076_s10 + $0xc9] ss:$2 sm:$0xff] }
  0xb2   :  { %10033 = vmatmul.mubr.msk.f32.gmra.mrb[4].mxu1 %vm393_vm2, %v8600_v10  ;;  %9964 = vmatprep.mubr.msk.f32.mxu0 %vm13284_vm0, %v16957_v0  ;;  %v232_v37 = vsel %vm227_vm3, %v229_v26, %v231_v32  ;;  %v344_v41 = vsel %vm227_vm3, %v341_v30, %v343_v36  ;;  %v235_v44 = vrot.slane %v8608_v40, 2  ;;  %v8633_v45 = vld [vmem:[%s17076_s10 + $0xb5] ss:$2 sm:$0x3f]  ;;  %v8610_v52 = vld [vmem:[%s17076_s10 + $0xc8] ss:$2 sm:$0xff] }
  0xb3   :  { %10035 = vmatprep.mubr.msk.f32.mxu1 %vm13284_vm0, %v16957_v0  ;;  %v234_v43 = vsel %vm227_vm3, %v231_v32, %v233_v38  ;;  %v8609_v46 = vld [vmem:[%s17076_s10 + $0xb4] ss:$2 sm:$0x3f]  ;;  %v346_v47 = vsel %vm227_vm3, %v343_v36, %v345_v42  ;;  %v347_v48 = vrot.slane %v8633_v45, 2  ;;  %v357_v54 = vrot.slane %v8634_v51, 4 }
  0xb4   :  { %v236_v49 = vsel %vm227_vm3, %v233_v38, %v235_v44  ;;  %v237_v50 = vrot.slane %v8609_v46, 2  ;;  %v248_v56 = vrot.slane %v8610_v52, 4  ;;  %v8635_v57 = vld [vmem:[%s17076_s10 + $0xd9] ss:$2 sm:$0xff]  ;;  %v8611_v58 = vld [vmem:[%s17076_s10 + $0xd8] ss:$2 sm:$0xff] }
  0xb5   :  { %9965 = vmatmul.mubr.msk.f32.gmra.mrb[6].mxu0 %vm393_vm2, %v8625_v11  ;;  %v348_v53 = vsel %vm227_vm3, %v345_v42, %v347_v48  ;;  %v389_v59 = vsel %vm247_vm1, %v347_v48, %v357_v54  ;;  %v358_v60 = vrot.slane %v8635_v57, 4  ;;  %v249_v62 = vrot.slane %v8611_v58, 4  ;;  %v8636_v63 = vld [vmem:[%s17076_s10 + $0xe9] ss:$2 sm:$0xff]  ;;  %v8612_v1 = vld [vmem:[%s17076_s10 + $0xe8] ss:$2 sm:$0xff] }
  0xb6   :  { %10036 = vmatmul.mubr.msk.f32.gmra.mrb[6].mxu1 %vm393_vm2, %v8601_v12  ;;  %9967 = vmatprep.mubr.msk.f32.mxu0 %vm13284_vm0, %v16957_v0  ;;  %v238_v55 = vsel %vm227_vm3, %v235_v44, %v237_v50  ;;  %v281_v61 = vsel %vm247_vm1, %v237_v50, %v248_v56  ;;  %v360_v3 = vrot.slane %v8636_v63, 4  ;;  %v251_v5 = vrot.slane %v8612_v1, 4  ;;  %v8637_v6 = vld [vmem:[%s17076_s10 + $0xf9] ss:$2 sm:$0xff]  ;;  %v8613_v7 = vld [vmem:[%s17076_s10 + $0xf8] ss:$2 sm:$0xff] }
  0xb7   :  { %10038 = vmatprep.mubr.msk.f32.mxu1 %vm13284_vm0, %v16957_v0  ;;  %v359_v2 = vsel %vm247_vm1, %v357_v54, %v358_v60  ;;  %v250_v4 = vsel %vm247_vm1, %v248_v56, %v249_v62  ;;  %v362_v9 = vrot.slane %v8637_v6, 4  ;;  %v253_v11 = vrot.slane %v8613_v7, 4  ;;  %v8638_v12 = vld [vmem:[%s17076_s10 + $0x109] ss:$2 sm:$0xff]  ;;  %v8614_v13 = vld [vmem:[%s17076_s10 + $0x108] ss:$2 sm:$0xff] }
  0xb8   :  { %v361_v8 = vsel %vm247_vm1, %v358_v60, %v360_v3  ;;  %v252_v10 = vsel %vm247_vm1, %v249_v62, %v251_v5  ;;  %v255_v17 = vrot.slane %v8614_v13, 4  ;;  %v8639_v18 = vld [vmem:[%s17076_s10 + $0x119] ss:$2 sm:$0x3f]  ;;  %v8695_v62 = vld [vmem:[%s17076_s10 + $0x2] ss:$2 sm:$0xff] }
  0xb9   :  { %9968 = vmatmul.mubr.msk.f32.gmra.mrb[8].mxu0 %vm393_vm2, %v8626_v15  ;;  %v363_v14 = vsel %vm247_vm1, %v360_v3, %v362_v9  ;;  %v364_v15 = vrot.slane %v8638_v12, 4  ;;  %v8615_v19 = vld [vmem:[%s17076_s10 + $0x118] ss:$2 sm:$0x3f]  ;;  %v366_v21 = vrot.slane %v8639_v18, 4 }
  0xba   :  { %10039 = vmatmul.mubr.msk.f32.gmra.mrb[8].mxu1 %vm393_vm2, %v8602_v16  ;;  %9970 = vmatprep.mubr.msk.f32.mxu0 %vm13284_vm0, %v16957_v0  ;;  %v254_v16 = vsel %vm247_vm1, %v251_v5, %v253_v11  ;;  %v256_v22 = vsel %vm247_vm1, %v253_v11, %v255_v17  ;;  %v8640_v24 = vld [vmem:[%s17076_s10 + $0x12d] ss:$2 sm:$0xff]  ;;  %v8641_v30 = vld [vmem:[%s17076_s10 + $0x13d] ss:$2 sm:$0xff]  ;;  %v8696_v3 = vld [vmem:[%s17076_s10 + $0x12] ss:$2 sm:$0xff] }
  0xbb   :  { %10041 = vmatprep.mubr.msk.f32.mxu1 %vm13284_vm0, %v16957_v0  ;;  %v365_v20 = vsel %vm247_vm1, %v362_v9, %v364_v15  ;;  %v367_v26 = vsel %vm247_vm1, %v364_v15, %v366_v21  ;;  %v376_v27 = vrot.slane %v8640_v24, 6  ;;  %v377_v33 = vrot.slane %v8641_v30, 6  ;;  %v8642_v36 = vld [vmem:[%s17076_s10 + $0x14d] ss:$2 sm:$0xff]  ;;  %v8643_v42 = vld [vmem:[%s17076_s10 + $0x15d] ss:$2 sm:$0xff] }
  0xbc   :  { %v379_v39 = vrot.slane %v8642_v36, 6  ;;  %v381_v45 = vrot.slane %v8643_v42, 6  ;;  %v8644_v48 = vld [vmem:[%s17076_s10 + $0x16d] ss:$2 sm:$0xff]  ;;  %v8697_v5 = vld [vmem:[%s17076_s10 + $0x22] ss:$2 sm:$0xff] }
  0xbd   :  { %9971 = vmatmul.mubr.msk.f32.gmra.mrb[10].mxu0 %vm393_vm2, %v388_v23  ;;  %v257_v23 = vrot.slane %v8615_v19, 4  ;;  %v390_v32 = vsel %vm267_vm4, %v366_v21, %v376_v27  ;;  %v378_v38 = vsel %vm267_vm4, %v376_v27, %v377_v33  ;;  %v383_v51 = vrot.slane %v8644_v48, 6  ;;  %v8645_v54 = vld [vmem:[%s17076_s10 + $0x17d] ss:$2 sm:$0x3f] }
  0xbe   :  { %10042 = vmatmul.mubr.msk.f32.gmra.mrb[10].mxu1 %vm393_vm2, %v280_v25  ;;  %9973 = vmatprep.mubr.msk.f32.mxu0 %vm13284_vm0, %v16957_v0  ;;  %v8616_v25 = vld [vmem:[%s17076_s10 + $0x12c] ss:$2 sm:$0xff]  ;;  %v380_v44 = vsel %vm267_vm4, %v377_v33, %v379_v39  ;;  %v382_v50 = vsel %vm267_vm4, %v379_v39, %v381_v45  ;;  %v385_v57 = vrot.slane %v8645_v54, 6  ;;  %v8744_v1 = vld [vmem:[%s17076_s10 + $0x3] ss:$2 sm:$0xff] }
  0xbf   :  { %10044 = vmatprep.mubr.msk.f32.mxu1 %vm13284_vm0, %v16957_v0  ;;  %v258_v28 = vsel %vm247_vm1, %v255_v17, %v257_v23  ;;  %v384_v56 = vsel %vm267_vm4, %v381_v45, %v383_v51  ;;  %v8817_v63 = vld [vmem:[%s17075_s1 + $0x10] sm:$0xf]  ;;  %v8751_v18 = vld [vmem:[%s17076_s10 + $0x77] ss:$2 sm:$0xff] }
  0xc0   :  { %v386_v60 = vsel %vm267_vm4, %v383_v51, %v385_v57  ;;  %v8746_v6 = vld [vmem:[%s17076_s10 + $0x23] ss:$2 sm:$0xff]  ;;  %v8698_v7 = vld [vmem:[%s17076_s10 + $0x32] ss:$2 sm:$0xff]  ;;  %v8699_v11 = vld [vmem:[%s17076_s10 + $0x42] ss:$2 sm:$0xff] }
  0xc1   :  { %9974 = vmatmul.mubr.msk.f32.gmra.mrb[12].mxu0 %vm393_vm2, %v340_v29  ;;  %v268_v29 = vrot.slane %v8616_v25, 6  ;;  %v8701_v9 = vld [vmem:[%s17076_s10 + $0x66] ss:$2 sm:$0xff]  ;;  %v8748_v12 = vld [vmem:[%s17076_s10 + $0x43] ss:$2 sm:$0xff] }
  0xc2   :  { %10045 = vmatmul.mubr.msk.f32.gmra.mrb[12].mxu1 %vm393_vm2, %v230_v31  ;;  %9976 = vmatprep.mubr.msk.f32.mxu0 %vm13284_vm0, %v16957_v0  ;;  %v8617_v31 = vld [vmem:[%s17076_s10 + $0x13c] ss:$2 sm:$0xff]  ;;  %v922_v13 = vrot.slane %v8701_v9, 2  ;;  %v8749_v17 = vld [vmem:[%s17076_s10 + $0x53] ss:$2 sm:$0x3f] }
  0xc3   :  { %10047 = vmatprep.mubr.msk.f32.mxu1 %vm13284_vm0, %v16957_v0  ;;  %v282_v34 = vsel %vm267_vm4, %v257_v23, %v268_v29  ;;  %v8703_v23 = vld [vmem:[%s17076_s10 + $0x86] ss:$2 sm:$0xff]  ;;  %v8752_v24 = vld [vmem:[%s17076_s10 + $0x87] ss:$2 sm:$0xff]  ;;  %v8753_v30 = vld [vmem:[%s17076_s10 + $0x97] ss:$2 sm:$0xff] }
  0xc4   :  { %v8754_v36 = vld [vmem:[%s17076_s10 + $0xa7] ss:$2 sm:$0xff]  ;;  %v8755_v42 = vld [vmem:[%s17076_s10 + $0xb7] ss:$2 sm:$0x3f] }
  0xc5   :  { %9977 = vmatmul.mubr.msk.f32.gmra.mrb[14].mxu0 %vm393_vm2, %v342_v35  ;;  %v269_v35 = vrot.slane %v8617_v31, 6  ;;  %v8756_v48 = vld [vmem:[%s17076_s10 + $0xcb] ss:$2 sm:$0xff]  ;;  %v8757_v54 = vld [vmem:[%s17076_s10 + $0xdb] ss:$2 sm:$0xff] }
  0xc6   :  { %10048 = vmatmul.mubr.msk.f32.gmra.mrb[14].mxu1 %vm393_vm2, %v232_v37  ;;  %9979 = vmatprep.mubr.msk.f32.mxu0 %vm13284_vm0, %v16957_v0  ;;  %v8618_v37 = vld [vmem:[%s17076_s10 + $0x14c] ss:$2 sm:$0xff]  ;;  %v8760_v9 = vld [vmem:[%s17076_s10 + $0x10b] ss:$2 sm:$0xff] }
  0xc7   :  { %10050 = vmatprep.mubr.msk.f32.mxu1 %vm13284_vm0, %v16957_v0  ;;  %v270_v40 = vsel %vm267_vm4, %v268_v29, %v269_v35  ;;  %v8704_v29 = vld [vmem:[%s17076_s10 + $0x96] ss:$2 sm:$0xff] }
  0xc9   :  { %9980 = vmatmul.mubr.msk.f32.gmra.mrb[16].mxu0 %vm393_vm2, %v344_v41  ;;  %v271_v41 = vrot.slane %v8618_v37, 6 }
  0xca   :  { %10051 = vmatmul.mubr.msk.f32.gmra.mrb[16].mxu1 %vm393_vm2, %v234_v43  ;;  %9982 = vmatprep.mubr.msk.f32.mxu0 %vm13284_vm0, %v16957_v0  ;;  %v8619_v43 = vld [vmem:[%s17076_s10 + $0x15c] ss:$2 sm:$0xff] }
  0xcb   :  { %10053 = vmatprep.mubr.msk.f32.mxu1 %vm13284_vm0, %v16957_v0  ;;  %v272_v46 = vsel %vm267_vm4, %v269_v35, %v271_v41  ;;  %v8705_v35 = vld [vmem:[%s17076_s10 + $0xa6] ss:$2 sm:$0xff] }
  0xcd   :  { %9983 = vmatmul.mubr.msk.f32.gmra.mrb[18].mxu0 %vm393_vm2, %v346_v47  ;;  %v273_v47 = vrot.slane %v8619_v43, 6 }
  0xce   :  { %10054 = vmatmul.mubr.msk.f32.gmra.mrb[18].mxu1 %vm393_vm2, %v236_v49  ;;  %9985 = vmatprep.mubr.msk.f32.mxu0 %vm13284_vm0, %v16957_v0  ;;  %v8620_v49 = vld [vmem:[%s17076_s10 + $0x16c] ss:$2 sm:$0xff] }
  0xcf   :  { %10056 = vmatprep.mubr.msk.f32.mxu1 %vm13284_vm0, %v16957_v0  ;;  %v274_v52 = vsel %vm267_vm4, %v271_v41, %v273_v47  ;;  %v8706_v41 = vld [vmem:[%s17076_s10 + $0xb6] ss:$2 sm:$0x3f] }
  0xd1   :  { %9986 = vmatmul.mubr.msk.f32.gmra.mrb[20].mxu0 %vm393_vm2, %v348_v53  ;;  %v275_v53 = vrot.slane %v8620_v49, 6 }
  0xd2   :  { %10057 = vmatmul.mubr.msk.f32.gmra.mrb[20].mxu1 %vm393_vm2, %v238_v55  ;;  %9988 = vmatprep.mubr.msk.f32.mxu0 %vm13284_vm0, %v16957_v0  ;;  %v8621_v55 = vld [vmem:[%s17076_s10 + $0x17c] ss:$2 sm:$0x3f] }
  0xd3   :  { %10059 = vmatprep.mubr.msk.f32.mxu1 %vm13284_vm0, %v16957_v0  ;;  %v276_v58 = vsel %vm267_vm4, %v273_v47, %v275_v53  ;;  %v8707_v47 = vld [vmem:[%s17076_s10 + $0xca] ss:$2 sm:$0xff] }
  0xd5   :  { %9989 = vmatmul.mubr.msk.f32.gmra.mrb[22].mxu0 %vm393_vm2, %v389_v59  ;;  %v277_v59 = vrot.slane %v8621_v55, 6 }
  0xd6   :  { %10060 = vmatmul.mubr.msk.f32.gmra.mrb[22].mxu1 %vm393_vm2, %v281_v61  ;;  %9991 = vmatprep.mubr.msk.f32.mxu0 %vm13284_vm0, %v16957_v0 }
  0xd7   :  { %10062 = vmatprep.mubr.msk.f32.mxu1 %vm13284_vm0, %v16957_v0  ;;  %v278_v61 = vsel %vm267_vm4, %v275_v53, %v277_v59  ;;  %v8708_v53 = vld [vmem:[%s17076_s10 + $0xda] ss:$2 sm:$0xff]  ;;  %v8709_v59 = vld [vmem:[%s17076_s10 + $0xea] ss:$2 sm:$0xff] }
  0xd9   :  { %9992 = vmatmul.mubr.msk.f32.gmra.mrb[24].mxu0 %vm393_vm2, %v359_v2  ;;  %v8866_v2 = vld [vmem:[%s17075_s1 + $0x14] sm:$0xf] }
  0xda   :  { %10063 = vmatmul.mubr.msk.f32.gmra.mrb[24].mxu1 %vm393_vm2, %v250_v4  ;;  %9994 = vmatprep.mubr.msk.f32.mxu0 %vm13284_vm0, %v16957_v0  ;;  %v8745_v4 = vld [vmem:[%s17076_s10 + $0x13] ss:$2 sm:$0xff] }
  0xdb   :  { %10065 = vmatprep.mubr.msk.f32.mxu1 %vm13284_vm0, %v16957_v0 }
  0xdd   :  { %9995 = vmatmul.mubr.msk.f32.gmra.mrb[26].mxu0 %vm393_vm2, %v361_v8  ;;  %v8747_v8 = vld [vmem:[%s17076_s10 + $0x33] ss:$2 sm:$0xff] }
  0xde   :  { %10066 = vmatmul.mubr.msk.f32.gmra.mrb[26].mxu1 %vm393_vm2, %v252_v10  ;;  %9997 = vmatprep.mubr.msk.f32.mxu0 %vm13284_vm0, %v16957_v0  ;;  %v8750_v10 = vld [vmem:[%s17076_s10 + $0x67] ss:$2 sm:$0xff] }
  0xdf   :  { %10068 = vmatprep.mubr.msk.f32.mxu1 %vm13284_vm0, %v16957_v0  ;;  %v1291_v15 = vrot.slane %v8750_v10, 2 }
  0xe1   :  { %9998 = vmatmul.mubr.msk.f32.gmra.mrb[28].mxu0 %vm393_vm2, %v363_v14  ;;  %v8700_v14 = vld [vmem:[%s17076_s10 + $0x52] ss:$2 sm:$0x3f]  ;;  %v1341_v21 = vsel %vm227_vm3, %v8749_v17, %v1291_v15 }
  0xe2   :  { %10069 = vmatmul.mubr.msk.f32.gmra.mrb[28].mxu1 %vm393_vm2, %v254_v16  ;;  %10000 = vmatprep.mubr.msk.f32.mxu0 %vm13284_vm0, %v16957_v0  ;;  %v8702_v16 = vld [vmem:[%s17076_s10 + $0x76] ss:$2 sm:$0xff]  ;;  %v972_v19 = vsel %vm227_vm3, %v8700_v14, %v922_v13 }
  0xe3   :  { %10071 = vmatprep.mubr.msk.f32.mxu1 %vm13284_vm0, %v16957_v0  ;;  %v8712_v14 = vld [vmem:[%s17076_s10 + $0x11a] ss:$2 sm:$0x3f] }
  0xe4   :  { %v950_v17 = vrot.slane %v8712_v14, 4  ;;  %v8849_v14 = vld [vmem:[%s17076_s10 + $0x79] ss:$2 sm:$0xff] }
  0xe5   :  { %10001 = vmatmul.mubr.msk.f32.gmra.mrb[30].mxu0 %vm393_vm2, %v365_v20  ;;  %v923_v20 = vrot.slane %v8702_v16, 2 }
  0xe6   :  { %10072 = vmatmul.mubr.msk.f32.gmra.mrb[30].mxu1 %vm393_vm2, %v256_v22  ;;  %10003 = vmatprep.mubr.msk.f32.mxu0 %vm13284_vm0, %v16957_v0  ;;  %v1292_v22 = vrot.slane %v8751_v18, 2 }
  0xe7   :  { %10074 = vmatprep.mubr.msk.f32.mxu1 %vm13284_vm0, %v16957_v0  ;;  %v924_v25 = vsel %vm227_vm3, %v922_v13, %v923_v20  ;;  %v1317_v13 = vrot.slane %v8760_v9, 4 }
  0xe8   :  { %v1293_v27 = vsel %vm227_vm3, %v1291_v15, %v1292_v22  ;;  %v8761_v15 = vld [vmem:[%s17076_s10 + $0x11b] ss:$2 sm:$0x3f] }
  0xe9   :  { %10004 = vmatmul.mubr.msk.f32.gmra.mrb[32].mxu0 %vm393_vm2, %v367_v26  ;;  %v925_v26 = vrot.slane %v8703_v23, 2 }
  0xea   :  { %10075 = vmatmul.mubr.msk.f32.gmra.mrb[32].mxu1 %vm393_vm2, %v258_v28  ;;  %10006 = vmatprep.mubr.msk.f32.mxu0 %vm13284_vm0, %v16957_v0  ;;  %v1294_v28 = vrot.slane %v8752_v24, 2 }
  0xeb   :  { %10077 = vmatprep.mubr.msk.f32.mxu1 %vm13284_vm0, %v16957_v0  ;;  %v926_v31 = vsel %vm227_vm3, %v923_v20, %v925_v26  ;;  %v8713_v20 = vld [vmem:[%s17076_s10 + $0x12e] ss:$2 sm:$0xff] }
  0xec   :  { %v1295_v33 = vsel %vm227_vm3, %v1292_v22, %v1294_v28  ;;  %v960_v23 = vrot.slane %v8713_v20, 6  ;;  %v8850_v20 = vld [vmem:[%s17076_s10 + $0x89] ss:$2 sm:$0xff] }
  0xed   :  { %10007 = vmatmul.mubr.msk.f32.gmra.mrb[34].mxu0 %vm393_vm2, %v390_v32  ;;  %v927_v32 = vrot.slane %v8704_v29, 2 }
  0xee   :  { %10078 = vmatmul.mubr.msk.f32.gmra.mrb[34].mxu1 %vm393_vm2, %v282_v34  ;;  %10009 = vmatprep.mubr.msk.f32.mxu0 %vm13284_vm0, %v16957_v0  ;;  %v1296_v34 = vrot.slane %v8753_v30, 2 }
  0xef   :  { %10080 = vmatprep.mubr.msk.f32.mxu1 %vm13284_vm0, %v16957_v0  ;;  %v928_v37 = vsel %vm227_vm3, %v925_v26, %v927_v32  ;;  %v8714_v26 = vld [vmem:[%s17076_s10 + $0x13e] ss:$2 sm:$0xff] }
  0xf0   :  { %v1297_v39 = vsel %vm227_vm3, %v1294_v28, %v1296_v34  ;;  %v974_v28 = vsel %vm267_vm4, %v950_v17, %v960_v23  ;;  %v961_v29 = vrot.slane %v8714_v26, 6  ;;  %v8851_v26 = vld [vmem:[%s17076_s10 + $0x99] ss:$2 sm:$0xff] }
  0xf1   :  { %10010 = vmatmul.mubr.msk.f32.gmra.mrb[36].mxu0 %vm393_vm2, %v378_v38  ;;  %v929_v38 = vrot.slane %v8705_v35, 2 }
  0xf2   :  { %10081 = vmatmul.mubr.msk.f32.gmra.mrb[36].mxu1 %vm393_vm2, %v270_v40  ;;  %10012 = vmatprep.mubr.msk.f32.mxu0 %vm13284_vm0, %v16957_v0  ;;  %v1298_v40 = vrot.slane %v8754_v36, 2 }
  0xf3   :  { %10083 = vmatprep.mubr.msk.f32.mxu1 %vm13284_vm0, %v16957_v0  ;;  %v930_v43 = vsel %vm227_vm3, %v927_v32, %v929_v38  ;;  %v8715_v32 = vld [vmem:[%s17076_s10 + $0x14e] ss:$2 sm:$0xff] }
  0xf4   :  { %v1299_v45 = vsel %vm227_vm3, %v1296_v34, %v1298_v40  ;;  %v962_v34 = vsel %vm267_vm4, %v960_v23, %v961_v29  ;;  %v963_v35 = vrot.slane %v8715_v32, 6 }
  0xf5   :  { %10013 = vmatmul.mubr.msk.f32.gmra.mrb[38].mxu0 %vm393_vm2, %v380_v44  ;;  %v931_v44 = vrot.slane %v8706_v41, 2 }
  0xf6   :  { %10084 = vmatmul.mubr.msk.f32.gmra.mrb[38].mxu1 %vm393_vm2, %v272_v46  ;;  %10015 = vmatprep.mubr.msk.f32.mxu0 %vm13284_vm0, %v16957_v0  ;;  %v1300_v46 = vrot.slane %v8755_v42, 2 }
  0xf7   :  { %10086 = vmatprep.mubr.msk.f32.mxu1 %vm13284_vm0, %v16957_v0  ;;  %v932_v49 = vsel %vm227_vm3, %v929_v38, %v931_v44  ;;  %v8716_v38 = vld [vmem:[%s17076_s10 + $0x15e] ss:$2 sm:$0xff] }
  0xf8   :  { %v1301_v51 = vsel %vm227_vm3, %v1298_v40, %v1300_v46  ;;  %v964_v40 = vsel %vm267_vm4, %v961_v29, %v963_v35  ;;  %v965_v41 = vrot.slane %v8716_v38, 6 }
  0xf9   :  { %10016 = vmatmul.mubr.msk.f32.gmra.mrb[40].mxu0 %vm393_vm2, %v382_v50  ;;  %v941_v50 = vrot.slane %v8707_v47, 4 }
  0xfa   :  { %10087 = vmatmul.mubr.msk.f32.gmra.mrb[40].mxu1 %vm393_vm2, %v274_v52  ;;  %10018 = vmatprep.mubr.msk.f32.mxu0 %vm13284_vm0, %v16957_v0  ;;  %v1310_v52 = vrot.slane %v8756_v48, 4 }
  0xfb   :  { %10089 = vmatprep.mubr.msk.f32.mxu1 %vm13284_vm0, %v16957_v0  ;;  %v973_v55 = vsel %vm247_vm1, %v931_v44, %v941_v50  ;;  %v8717_v44 = vld [vmem:[%s17076_s10 + $0x16e] ss:$2 sm:$0xff] }
  0xfc   :  { %v1342_v57 = vsel %vm247_vm1, %v1300_v46, %v1310_v52  ;;  %v966_v46 = vsel %vm267_vm4, %v963_v35, %v965_v41  ;;  %v967_v47 = vrot.slane %v8717_v44, 6  ;;  %v8853_v44 = vld [vmem:[%s17076_s10 + $0xb9] ss:$2 sm:$0x3f] }
  0xfd   :  { %10019 = vmatmul.mubr.msk.f32.gmra.mrb[42].mxu0 %vm393_vm2, %v384_v56  ;;  %v942_v56 = vrot.slane %v8708_v53, 4 }
  0xfe   :  { %10090 = vmatmul.mubr.msk.f32.gmra.mrb[42].mxu1 %vm393_vm2, %v276_v58  ;;  %10021 = vmatprep.mubr.msk.f32.mxu0 %vm13284_vm0, %v16957_v0  ;;  %v1311_v58 = vrot.slane %v8757_v54, 4 }
  0xff   :  { %10092 = vmatprep.mubr.msk.f32.mxu1 %vm13284_vm0, %v16957_v0 }
 0x101   :  { %10022 = vmatmul.mubr.msk.f32.gmra.mrb[44].mxu0 %vm393_vm2, %v386_v60  ;;  %v8758_v60 = vld [vmem:[%s17076_s10 + $0xeb] ss:$2 sm:$0xff] }
 0x102   :  { %10093 = vmatmul.mubr.msk.f32.gmra.mrb[44].mxu1 %vm393_vm2, %v278_v61  ;;  %10097 = vmatprep.mubr.msk.f32.mxu0 %vm13284_vm0, %v16957_v0  ;;  %v943_v61 = vsel %vm247_vm1, %v941_v50, %v942_v56  ;;  %v8718_v50 = vld [vmem:[%s17076_s10 + $0x17e] ss:$2 sm:$0x3f] }
 0x103   :  { %10168 = vmatprep.mubr.msk.f32.mxu1 %vm13284_vm0, %v16957_v0  ;;  %v969_v53 = vrot.slane %v8718_v50, 6 }
 0x105   :  { %10098 = vmatmul.mubr.msk.f32.vlgmr.msra.gmra.mrb[46].mxu0 %vm393_vm2, %v8695_v62  ;;  %v944_v62 = vrot.slane %v8709_v59, 4  ;;  %v8915_v59 = vld [vmem:[%s17075_s1 + $0x18] sm:$0xf] }
 0x106   :  { %10238 = vmatpush3.msk.msra.mxu0 %vm247_vm1, %v8817_v63  ;;  %10169 = vmatmul.mubr.msk.f32.vlgmr.msra.gmra.mrb[46].mxu1 %vm393_vm2, %v8744_v1  ;;  %v1312_v63 = vsel %vm247_vm1, %v1310_v52, %v1311_v58  ;;  %v1313_v1 = vrot.slane %v8758_v60, 4  ;;  %v968_v52 = vsel %vm267_vm4, %v965_v41, %v967_v47  ;;  %v8842_v60 = vld [vmem:[%s17076_s10 + $0x5] ss:$2 sm:$0xff] }
 0x107   :  { %10100 = vmatprep.mubr.msk.f32.mxu0 %vm13284_vm0, %v16957_v0  ;;  %10309 = vmatpush3.msk.msra.mxu1 %vm247_vm1, %v8866_v2  ;;  %v8710_v2 = vld [vmem:[%s17076_s10 + $0xfa] ss:$2 sm:$0xff] }
 0x108   :  { %10171 = vmatprep.mubr.msk.f32.mxu1 %vm13284_vm0, %v16957_v0  ;;  %10379 = vmatprep.subr.mxu0 %v16957_v0 }
 0x109   :  { %10101 = vmatmul.mubr.msk.f32.gmra.mrb[48].mxu0 %vm393_vm2, %v8696_v3  ;;  %10450 = vmatprep.subr.mxu1 %v16957_v0  ;;  %v8759_v3 = vld [vmem:[%s17076_s10 + $0xfb] ss:$2 sm:$0xff] }
 0x10a   :  { %10172 = vmatmul.mubr.msk.f32.gmra.mrb[48].mxu1 %vm393_vm2, %v8745_v4  ;;  %10103 = vmatprep.mubr.msk.f32.mxu0 %vm13284_vm0, %v16957_v0  ;;  %v945_v4 = vsel %vm247_vm1, %v942_v56, %v944_v62  ;;  %v970_v56 = vsel %vm267_vm4, %v967_v47, %v969_v53  ;;  %v8805_v53 = vld [vmem:[%s17076_s10 + $0xcc] ss:$2 sm:$0xff] }
 0x10b   :  { %10174 = vmatprep.mubr.msk.f32.mxu1 %vm13284_vm0, %v16957_v0 }
 0x10d   :  { %10104 = vmatmul.mubr.msk.f32.gmra.mrb[50].mxu0 %vm393_vm2, %v8697_v5  ;;  %v946_v5 = vrot.slane %v8710_v2, 4  ;;  %v8844_v2 = vld [vmem:[%s17076_s10 + $0x25] ss:$2 sm:$0xff] }
 0x10e   :  { %10175 = vmatmul.mubr.msk.f32.gmra.mrb[50].mxu1 %vm393_vm2, %v8746_v6  ;;  %10106 = vmatprep.mubr.msk.f32.mxu0 %vm13284_vm0, %v16957_v0  ;;  %v1314_v6 = vsel %vm247_vm1, %v1311_v58, %v1313_v1  ;;  %v8793_v58 = vld [vmem:[%s17076_s10 + $0x4] ss:$2 sm:$0xff] }
 0x10f   :  { %10177 = vmatprep.mubr.msk.f32.mxu1 %vm13284_vm0, %v16957_v0  ;;  %v947_v10 = vsel %vm247_vm1, %v944_v62, %v946_v5  ;;  %v8794_v62 = vld [vmem:[%s17076_s10 + $0x14] ss:$2 sm:$0xff] }
 0x111   :  { %10107 = vmatmul.mubr.msk.f32.gmra.mrb[52].mxu0 %vm393_vm2, %v8698_v7  ;;  %v1315_v7 = vrot.slane %v8759_v3, 4  ;;  %v8796_v3 = vld [vmem:[%s17076_s10 + $0x34] ss:$2 sm:$0xff] }
 0x112   :  { %10178 = vmatmul.mubr.msk.f32.gmra.mrb[52].mxu1 %vm393_vm2, %v8747_v8  ;;  %10109 = vmatprep.mubr.msk.f32.mxu0 %vm13284_vm0, %v16957_v0  ;;  %v8711_v8 = vld [vmem:[%s17076_s10 + $0x10a] ss:$2 sm:$0xff] }
 0x113   :  { %10180 = vmatprep.mubr.msk.f32.mxu1 %vm13284_vm0, %v16957_v0  ;;  %v1318_v18 = vsel %vm247_vm1, %v1315_v7, %v1317_v13 }
 0x115   :  { %10110 = vmatmul.mubr.msk.f32.gmra.mrb[54].mxu0 %vm393_vm2, %v8699_v11  ;;  %v948_v11 = vrot.slane %v8711_v8, 4  ;;  %v8846_v8 = vld [vmem:[%s17076_s10 + $0x45] ss:$2 sm:$0xff] }
 0x116   :  { %10181 = vmatmul.mubr.msk.f32.gmra.mrb[54].mxu1 %vm393_vm2, %v8748_v12  ;;  %10112 = vmatprep.mubr.msk.f32.mxu0 %vm13284_vm0, %v16957_v0  ;;  %v1316_v12 = vsel %vm247_vm1, %v1313_v1, %v1315_v7  ;;  %v8795_v1 = vld [vmem:[%s17076_s10 + $0x24] ss:$2 sm:$0xff] }
 0x117   :  { %10183 = vmatprep.mubr.msk.f32.mxu1 %vm13284_vm0, %v16957_v0  ;;  %v949_v16 = vsel %vm247_vm1, %v946_v5, %v948_v11  ;;  %v951_v22 = vsel %vm247_vm1, %v948_v11, %v950_v17  ;;  %v8799_v5 = vld [vmem:[%s17076_s10 + $0x68] ss:$2 sm:$0xff] }
 0x118   :  { %v8797_v7 = vld [vmem:[%s17076_s10 + $0x44] ss:$2 sm:$0xff]  ;;  %v1660_v9 = vrot.slane %v8799_v5, 2 }
 0x119   :  { %10113 = vmatmul.mubr.msk.f32.gmra.mrb[56].mxu0 %vm393_vm2, %v972_v19  ;;  %v1319_v19 = vrot.slane %v8761_v15, 4 }
 0x11a   :  { %10184 = vmatmul.mubr.msk.f32.gmra.mrb[56].mxu1 %vm393_vm2, %v1341_v21  ;;  %10115 = vmatprep.mubr.msk.f32.mxu0 %vm13284_vm0, %v16957_v0  ;;  %v8762_v21 = vld [vmem:[%s17076_s10 + $0x12f] ss:$2 sm:$0xff] }
 0x11b   :  { %10186 = vmatprep.mubr.msk.f32.mxu1 %vm13284_vm0, %v16957_v0  ;;  %v1320_v24 = vsel %vm247_vm1, %v1317_v13, %v1319_v19  ;;  %v8847_v13 = vld [vmem:[%s17076_s10 + $0x55] ss:$2 sm:$0x3f] }
 0x11d   :  { %10116 = vmatmul.mubr.msk.f32.gmra.mrb[58].mxu0 %vm393_vm2, %v924_v25  ;;  %v1329_v25 = vrot.slane %v8762_v21, 6 }
 0x11e   :  { %10187 = vmatmul.mubr.msk.f32.gmra.mrb[58].mxu1 %vm393_vm2, %v1293_v27  ;;  %10118 = vmatprep.mubr.msk.f32.mxu0 %vm13284_vm0, %v16957_v0  ;;  %v8763_v27 = vld [vmem:[%s17076_s10 + $0x13f] ss:$2 sm:$0xff] }
 0x11f   :  { %10189 = vmatprep.mubr.msk.f32.mxu1 %vm13284_vm0, %v16957_v0  ;;  %v1343_v30 = vsel %vm267_vm4, %v1319_v19, %v1329_v25  ;;  %v8801_v19 = vld [vmem:[%s17076_s10 + $0x88] ss:$2 sm:$0xff] }
 0x121   :  { %10119 = vmatmul.mubr.msk.f32.gmra.mrb[60].mxu0 %vm393_vm2, %v926_v31  ;;  %v1330_v31 = vrot.slane %v8763_v27, 6 }
 0x122   :  { %10190 = vmatmul.mubr.msk.f32.gmra.mrb[60].mxu1 %vm393_vm2, %v1295_v33  ;;  %10121 = vmatprep.mubr.msk.f32.mxu0 %vm13284_vm0, %v16957_v0  ;;  %v8764_v33 = vld [vmem:[%s17076_s10 + $0x14f] ss:$2 sm:$0xff] }
 0x123   :  { %10192 = vmatprep.mubr.msk.f32.mxu1 %vm13284_vm0, %v16957_v0  ;;  %v1331_v36 = vsel %vm267_vm4, %v1329_v25, %v1330_v31  ;;  %v8802_v25 = vld [vmem:[%s17076_s10 + $0x98] ss:$2 sm:$0xff] }
 0x125   :  { %10122 = vmatmul.mubr.msk.f32.gmra.mrb[62].mxu0 %vm393_vm2, %v928_v37  ;;  %v1332_v37 = vrot.slane %v8764_v33, 6  ;;  %v8852_v33 = vld [vmem:[%s17076_s10 + $0xa9] ss:$2 sm:$0xff] }
 0x126   :  { %10193 = vmatmul.mubr.msk.f32.gmra.mrb[62].mxu1 %vm393_vm2, %v1297_v39  ;;  %10124 = vmatprep.mubr.msk.f32.mxu0 %vm13284_vm0, %v16957_v0  ;;  %v8765_v39 = vld [vmem:[%s17076_s10 + $0x15f] ss:$2 sm:$0xff]  ;;  %v2036_v41 = vrot.slane %v8852_v33, 2 }
 0x127   :  { %10195 = vmatprep.mubr.msk.f32.mxu1 %vm13284_vm0, %v16957_v0  ;;  %v1333_v42 = vsel %vm267_vm4, %v1330_v31, %v1332_v37  ;;  %v8803_v31 = vld [vmem:[%s17076_s10 + $0xa8] ss:$2 sm:$0xff] }
 0x129   :  { %10125 = vmatmul.mubr.msk.f32.gmra.mrb[64].mxu0 %vm393_vm2, %v930_v43  ;;  %v1334_v43 = vrot.slane %v8765_v39, 6  ;;  %v1667_v39 = vrot.slane %v8803_v31, 2 }
 0x12a   :  { %10196 = vmatmul.mubr.msk.f32.gmra.mrb[64].mxu1 %vm393_vm2, %v1299_v45  ;;  %10127 = vmatprep.mubr.msk.f32.mxu0 %vm13284_vm0, %v16957_v0  ;;  %v8766_v45 = vld [vmem:[%s17076_s10 + $0x16f] ss:$2 sm:$0xff] }
 0x12b   :  { %10198 = vmatprep.mubr.msk.f32.mxu1 %vm13284_vm0, %v16957_v0  ;;  %v1335_v48 = vsel %vm267_vm4, %v1332_v37, %v1334_v43 }
 0x12d   :  { %10128 = vmatmul.mubr.msk.f32.gmra.mrb[66].mxu0 %vm393_vm2, %v932_v49  ;;  %v1336_v49 = vrot.slane %v8766_v45, 6 }
 0x12e   :  { %10199 = vmatmul.mubr.msk.f32.gmra.mrb[66].mxu1 %vm393_vm2, %v1301_v51  ;;  %10130 = vmatprep.mubr.msk.f32.mxu0 %vm13284_vm0, %v16957_v0  ;;  %v8767_v51 = vld [vmem:[%s17076_s10 + $0x17f] ss:$2 sm:$0x3f] }
 0x12f   :  { %10201 = vmatprep.mubr.msk.f32.mxu1 %vm13284_vm0, %v16957_v0  ;;  %v1337_v54 = vsel %vm267_vm4, %v1334_v43, %v1336_v49 }
 0x131   :  { %10131 = vmatmul.mubr.msk.f32.gmra.mrb[68].mxu0 %vm393_vm2, %v973_v55  ;;  %v1338_v55 = vrot.slane %v8767_v51, 6 }
 0x132   :  { %10202 = vmatmul.mubr.msk.f32.gmra.mrb[68].mxu1 %vm393_vm2, %v1342_v57  ;;  %10133 = vmatprep.mubr.msk.f32.mxu0 %vm13284_vm0, %v16957_v0 }
 0x133   :  { %10204 = vmatprep.mubr.msk.f32.mxu1 %vm13284_vm0, %v16957_v0  ;;  %v1339_v57 = vsel %vm267_vm4, %v1336_v49, %v1338_v55  ;;  %v8854_v55 = vld [vmem:[%s17076_s10 + $0xcd] ss:$2 sm:$0xff] }
 0x135   :  { %10134 = vmatmul.mubr.msk.f32.gmra.mrb[70].mxu0 %vm393_vm2, %v943_v61  ;;  %v8964_v61 = vld [vmem:[%s17075_s1 + $0x1c] sm:$0xf] }
 0x136   :  { %10205 = vmatmul.mubr.msk.f32.gmra.mrb[70].mxu1 %vm393_vm2, %v1312_v63  ;;  %10136 = vmatprep.mubr.msk.f32.mxu0 %vm13284_vm0, %v16957_v0  ;;  %v8843_v63 = vld [vmem:[%s17076_s10 + $0x15] ss:$2 sm:$0xff] }
 0x137   :  { %10207 = vmatprep.mubr.msk.f32.mxu1 %vm13284_vm0, %v16957_v0 }
 0x139   :  { %10137 = vmatmul.mubr.msk.f32.gmra.mrb[72].mxu0 %vm393_vm2, %v945_v4  ;;  %v8845_v4 = vld [vmem:[%s17076_s10 + $0x35] ss:$2 sm:$0xff] }
 0x13a   :  { %10208 = vmatmul.mubr.msk.f32.gmra.mrb[72].mxu1 %vm393_vm2, %v1314_v6  ;;  %10139 = vmatprep.mubr.msk.f32.mxu0 %vm13284_vm0, %v16957_v0  ;;  %v8848_v6 = vld [vmem:[%s17076_s10 + $0x69] ss:$2 sm:$0xff] }
 0x13b   :  { %10210 = vmatprep.mubr.msk.f32.mxu1 %vm13284_vm0, %v16957_v0  ;;  %v2029_v11 = vrot.slane %v8848_v6, 2 }
 0x13d   :  { %10140 = vmatmul.mubr.msk.f32.gmra.mrb[74].mxu0 %vm393_vm2, %v947_v10  ;;  %v8798_v10 = vld [vmem:[%s17076_s10 + $0x54] ss:$2 sm:$0x3f]  ;;  %v2079_v17 = vsel %vm227_vm3, %v8847_v13, %v2029_v11 }
 0x13e   :  { %10211 = vmatmul.mubr.msk.f32.gmra.mrb[74].mxu1 %vm393_vm2, %v1316_v12  ;;  %10142 = vmatprep.mubr.msk.f32.mxu0 %vm13284_vm0, %v16957_v0  ;;  %v8800_v12 = vld [vmem:[%s17076_s10 + $0x78] ss:$2 sm:$0xff]  ;;  %v1710_v15 = vsel %vm227_vm3, %v8798_v10, %v1660_v9 }
 0x13f   :  { %10213 = vmatprep.mubr.msk.f32.mxu1 %vm13284_vm0, %v16957_v0 }
 0x141   :  { %10143 = vmatmul.mubr.msk.f32.gmra.mrb[76].mxu0 %vm393_vm2, %v949_v16  ;;  %v1661_v16 = vrot.slane %v8800_v12, 2  ;;  %v8807_v12 = vld [vmem:[%s17076_s10 + $0xec] ss:$2 sm:$0xff] }
 0x142   :  { %10214 = vmatmul.mubr.msk.f32.gmra.mrb[76].mxu1 %vm393_vm2, %v1318_v18  ;;  %10145 = vmatprep.mubr.msk.f32.mxu0 %vm13284_vm0, %v16957_v0  ;;  %v2030_v18 = vrot.slane %v8849_v14, 2  ;;  %v8856_v14 = vld [vmem:[%s17076_s10 + $0xed] ss:$2 sm:$0xff] }
 0x143   :  { %10216 = vmatprep.mubr.msk.f32.mxu1 %vm13284_vm0, %v16957_v0  ;;  %v1662_v21 = vsel %vm227_vm3, %v1660_v9, %v1661_v16 }
 0x144   :  { %v2031_v23 = vsel %vm227_vm3, %v2029_v11, %v2030_v18 }
 0x145   :  { %10146 = vmatmul.mubr.msk.f32.gmra.mrb[78].mxu0 %vm393_vm2, %v951_v22  ;;  %v1663_v22 = vrot.slane %v8801_v19, 2 }
 0x146   :  { %10217 = vmatmul.mubr.msk.f32.gmra.mrb[78].mxu1 %vm393_vm2, %v1320_v24  ;;  %10148 = vmatprep.mubr.msk.f32.mxu0 %vm13284_vm0, %v16957_v0  ;;  %v2032_v24 = vrot.slane %v8850_v20, 2  ;;  %v1682_v20 = vrot.slane %v8807_v12, 4 }
 0x147   :  { %10219 = vmatprep.mubr.msk.f32.mxu1 %vm13284_vm0, %v16957_v0  ;;  %v1664_v27 = vsel %vm227_vm3, %v1661_v16, %v1663_v22 }
 0x148   :  { %v2033_v29 = vsel %vm227_vm3, %v2030_v18, %v2032_v24 }
 0x149   :  { %10149 = vmatmul.mubr.msk.f32.gmra.mrb[80].mxu0 %vm393_vm2, %v974_v28  ;;  %v1665_v28 = vrot.slane %v8802_v25, 2  ;;  %v8857_v25 = vld [vmem:[%s17076_s10 + $0xfd] ss:$2 sm:$0xff] }
 0x14a   :  { %10220 = vmatmul.mubr.msk.f32.gmra.mrb[80].mxu1 %vm393_vm2, %v1343_v30  ;;  %10151 = vmatprep.mubr.msk.f32.mxu0 %vm13284_vm0, %v16957_v0  ;;  %v2034_v30 = vrot.slane %v8851_v26, 2  ;;  %v2053_v33 = vrot.slane %v8857_v25, 4 }
 0x14b   :  { %10222 = vmatprep.mubr.msk.f32.mxu1 %vm13284_vm0, %v16957_v0  ;;  %v1666_v38 = vsel %vm227_vm3, %v1663_v22, %v1665_v28  ;;  %v1668_v49 = vsel %vm227_vm3, %v1665_v28, %v1667_v39  ;;  %v2051_v22 = vrot.slane %v8856_v14, 4 }
 0x14c   :  { %v2037_v51 = vsel %vm227_vm3, %v2034_v30, %v2036_v41 }
 0x14d   :  { %10152 = vmatmul.mubr.msk.f32.gmra.mrb[82].mxu0 %vm393_vm2, %v962_v34 }
 0x14e   :  { %10223 = vmatmul.mubr.msk.f32.gmra.mrb[82].mxu1 %vm393_vm2, %v1331_v36  ;;  %10154 = vmatprep.mubr.msk.f32.mxu0 %vm13284_vm0, %v16957_v0 }
 0x14f   :  { %10225 = vmatprep.mubr.msk.f32.mxu1 %vm13284_vm0, %v16957_v0 }
 0x151   :  { %10155 = vmatmul.mubr.msk.f32.gmra.mrb[84].mxu0 %vm393_vm2, %v964_v40  ;;  %v2035_v40 = vsel %vm227_vm3, %v2032_v24, %v2034_v30 }
 0x152   :  { %10226 = vmatmul.mubr.msk.f32.gmra.mrb[84].mxu1 %vm393_vm2, %v1333_v42  ;;  %10157 = vmatprep.mubr.msk.f32.mxu0 %vm13284_vm0, %v16957_v0  ;;  %v8804_v42 = vld [vmem:[%s17076_s10 + $0xb8] ss:$2 sm:$0x3f] }
 0x153   :  { %10228 = vmatprep.mubr.msk.f32.mxu1 %vm13284_vm0, %v16957_v0  ;;  %v1669_v50 = vrot.slane %v8804_v42, 2 }
 0x155   :  { %10158 = vmatmul.mubr.msk.f32.gmra.mrb[86].mxu0 %vm393_vm2, %v966_v46 }
 0x156   :  { %10229 = vmatmul.mubr.msk.f32.gmra.mrb[86].mxu1 %vm393_vm2, %v1335_v48  ;;  %10160 = vmatprep.mubr.msk.f32.mxu0 %vm13284_vm0, %v16957_v0 }
 0x157   :  { %10231 = vmatprep.mubr.msk.f32.mxu1 %vm13284_vm0, %v16957_v0 }
 0x159   :  { %10161 = vmatmul.mubr.msk.f32.gmra.mrb[88].mxu0 %vm393_vm2, %v968_v52  ;;  %v2038_v52 = vrot.slane %v8853_v44, 2  ;;  %v2054_v44 = vsel %vm247_vm1, %v2051_v22, %v2053_v33 }
 0x15a   :  { %10232 = vmatmul.mubr.msk.f32.gmra.mrb[88].mxu1 %vm393_vm2, %v1337_v54  ;;  %10163 = vmatprep.mubr.msk.f32.mxu0 %vm13284_vm0, %v16957_v0 }
 0x15b   :  { %10234 = vmatprep.mubr.msk.f32.mxu1 %vm13284_vm0, %v16957_v0 }
 0x15d   :  { %10164 = vmatmul.mubr.msk.f32.gmra.mrb[90].mxu0 %vm393_vm2, %v970_v56 }
 0x15e   :  { %10235 = vmatmul.mubr.msk.f32.gmra.mrb[90].mxu1 %vm393_vm2, %v1339_v57  ;;  %10239 = vmatprep.mubr.msk.f32.mxu0 %vm13284_vm0, %v16957_v0 }
 0x15f   :  { %10310 = vmatprep.mubr.msk.f32.mxu1 %vm13284_vm0, %v16957_v0 }
 0x161   :  { %10240 = vmatmul.mubr.msk.f32.vlgmr.msra.gmra.mrb[92].mxu0 %vm393_vm2, %v8793_v58 }
 0x162   :  { %10380 = vmatpush3.msk.msra.mxu0 %vm247_vm1, %v8915_v59  ;;  %10311 = vmatmul.mubr.msk.f32.vlgmr.msra.gmra.mrb[92].mxu1 %vm393_vm2, %v8842_v60  ;;  %v1670_v60 = vsel %vm227_vm3, %v1667_v39, %v1669_v50 }
 0x163   :  { %10242 = vmatprep.mubr.msk.f32.mxu0 %vm13284_vm0, %v16957_v0  ;;  %10451 = vmatpush3.msk.msra.mxu1 %vm247_vm1, %v8964_v61  ;;  %v1679_v61 = vrot.slane %v8805_v53, 4 }
 0x164   :  { %10313 = vmatprep.mubr.msk.f32.mxu1 %vm13284_vm0, %v16957_v0  ;;  %10521 = vmatprep.subr.mxu0 %v16957_v0 }
 0x165   :  { %10243 = vmatmul.mubr.msk.f32.gmra.mrb[94].mxu0 %vm393_vm2, %v8794_v62  ;;  %10592 = vmatprep.subr.mxu1 %v16957_v0  ;;  %v2039_v62 = vsel %vm227_vm3, %v2036_v41, %v2038_v52 }
 0x166   :  { %10314 = vmatmul.mubr.msk.f32.gmra.mrb[94].mxu1 %vm393_vm2, %v8843_v63  ;;  %10245 = vmatprep.mubr.msk.f32.mxu0 %vm13284_vm0, %v16957_v0  ;;  %v2048_v63 = vrot.slane %v8854_v55, 4 }
 0x167   :  { %10316 = vmatprep.mubr.msk.f32.mxu1 %vm13284_vm0, %v16957_v0 }
 0x168   :  { %v2080_v10 = vsel %vm247_vm1, %v2038_v52, %v2048_v63 }
 0x169   :  { %10246 = vmatmul.mubr.msk.f32.gmra.mrb[96].mxu0 %vm393_vm2, %v8795_v1  ;;  %v8806_v1 = vld [vmem:[%s17076_s10 + $0xdc] ss:$2 sm:$0xff] }
 0x16a   :  { %10317 = vmatmul.mubr.msk.f32.gmra.mrb[96].mxu1 %vm393_vm2, %v8844_v2  ;;  %10248 = vmatprep.mubr.msk.f32.mxu0 %vm13284_vm0, %v16957_v0  ;;  %v1680_v9 = vrot.slane %v8806_v1, 4 }
 0x16b   :  { %10319 = vmatprep.mubr.msk.f32.mxu1 %vm13284_vm0, %v16957_v0 }
 0x16c   :  { %v1681_v19 = vsel %vm247_vm1, %v1679_v61, %v1680_v9  ;;  %v1683_v30 = vsel %vm247_vm1, %v1680_v9, %v1682_v20 }
 0x16d   :  { %10249 = vmatmul.mubr.msk.f32.gmra.mrb[98].mxu0 %vm393_vm2, %v8796_v3  ;;  %v8855_v3 = vld [vmem:[%s17076_s10 + $0xdd] ss:$2 sm:$0xff] }
 0x16e   :  { %10320 = vmatmul.mubr.msk.f32.gmra.mrb[98].mxu1 %vm393_vm2, %v8845_v4  ;;  %10251 = vmatprep.mubr.msk.f32.mxu0 %vm13284_vm0, %v16957_v0  ;;  %v2049_v11 = vrot.slane %v8855_v3, 4 }
 0x16f   :  { %10322 = vmatprep.mubr.msk.f32.mxu1 %vm13284_vm0, %v16957_v0 }
 0x171   :  { %10252 = vmatmul.mubr.msk.f32.gmra.mrb[100].mxu0 %vm393_vm2, %v8797_v7 }
 0x172   :  { %10323 = vmatmul.mubr.msk.f32.gmra.mrb[100].mxu1 %vm393_vm2, %v8846_v8  ;;  %10254 = vmatprep.mubr.msk.f32.mxu0 %vm13284_vm0, %v16957_v0  ;;  %v1711_v8 = vsel %vm247_vm1, %v1669_v50, %v1679_v61  ;;  %v8860_v61 = vld [vmem:[%s17076_s10 + $0x131] ss:$2 sm:$0xff] }
 0x173   :  { %10325 = vmatprep.mubr.msk.f32.mxu1 %vm13284_vm0, %v16957_v0 }
 0x175   :  { %10255 = vmatmul.mubr.msk.f32.gmra.mrb[102].mxu0 %vm393_vm2, %v1710_v15 }
 0x176   :  { %10326 = vmatmul.mubr.msk.f32.gmra.mrb[102].mxu1 %vm393_vm2, %v2079_v17  ;;  %10257 = vmatprep.mubr.msk.f32.mxu0 %vm13284_vm0, %v16957_v0 }
 0x177   :  { %10328 = vmatprep.mubr.msk.f32.mxu1 %vm13284_vm0, %v16957_v0 }
 0x179   :  { %10258 = vmatmul.mubr.msk.f32.gmra.mrb[104].mxu0 %vm393_vm2, %v1662_v21  ;;  %v2050_v21 = vsel %vm247_vm1, %v2048_v63, %v2049_v11 }
 0x17a   :  { %10329 = vmatmul.mubr.msk.f32.gmra.mrb[104].mxu1 %vm393_vm2, %v2031_v23  ;;  %10260 = vmatprep.mubr.msk.f32.mxu0 %vm13284_vm0, %v16957_v0  ;;  %v8808_v23 = vld [vmem:[%s17076_s10 + $0xfc] ss:$2 sm:$0xff] }
 0x17b   :  { %10331 = vmatprep.mubr.msk.f32.mxu1 %vm13284_vm0, %v16957_v0  ;;  %v1684_v31 = vrot.slane %v8808_v23, 4 }
 0x17c   :  { %v517_v32 = vpop.f32.mrb[0].mxu0 }
 0x17d   :  { %v9957_v34 = vpop.f32.mrb[1].mxu0  ;;  %v754_v35 = vpop.f32.mrb[0].mxu1  ;;  %10261 = vmatmul.mubr.msk.f32.gmra.mrb[106].mxu0 %vm393_vm2, %v1664_v27  ;;  %v1685_v42 = vsel %vm247_vm1, %v1682_v20, %v1684_v31  ;;  %v8813_v20 = vld [vmem:[%s17076_s10 + $0x150] ss:$2 sm:$0xff] }
 0x17e   :  { %v14308_v36 = vadd.f32 %v754_v35, %v517_v32  ;;  %v10028_v37 = vpop.f32.mrb[1].mxu1  ;;  %10332 = vmatmul.mubr.msk.f32.gmra.mrb[106].mxu1 %vm393_vm2, %v2033_v29  ;;  %10263 = vmatprep.mubr.msk.f32.mxu0 %vm13284_vm0, %v16957_v0  ;;  %v2052_v32 = vsel %vm247_vm1, %v2049_v11, %v2051_v22  ;;  %v8809_v34 = vld [vmem:[%s17076_s10 + $0x10c] ss:$2 sm:$0xff]  ;;  %v8862_v22 = vld [vmem:[%s17076_s10 + $0x151] ss:$2 sm:$0xff] }
 0x17f   :  { %10334 = vmatprep.mubr.msk.f32.mxu1 %vm13284_vm0, %v16957_v0  ;;  %v8858_v37 = vld [vmem:[%s17076_s10 + $0x10d] ss:$2 sm:$0xff] }
 0x180   :  { %v522_v43 = vpop.f32.mrb[2].mxu0 }
 0x181   :  { %v9960_v45 = vpop.f32.mrb[3].mxu0  ;;  %v759_v46 = vpop.f32.mrb[2].mxu1  ;;  %10264 = vmatmul.mubr.msk.f32.gmra.mrb[108].mxu0 %vm393_vm2, %v1666_v38 }
 0x182   :  { %v14324_v47 = vadd.f32 %v759_v46, %v522_v43  ;;  %v10031_v48 = vpop.f32.mrb[3].mxu1  ;;  %10335 = vmatmul.mubr.msk.f32.gmra.mrb[108].mxu1 %vm393_vm2, %v2035_v40  ;;  %10266 = vmatprep.mubr.msk.f32.mxu0 %vm13284_vm0, %v16957_v0  ;;  %v1686_v43 = vrot.slane %v8809_v34, 4  ;;  %v2055_v45 = vrot.slane %v8858_v37, 4  ;;  %v8810_v46 = vld [vmem:[%s17076_s10 + $0x11c] ss:$2 sm:$0x3f] }
 0x183   :  { %10337 = vmatprep.mubr.msk.f32.mxu1 %vm13284_vm0, %v16957_v0  ;;  %v1688_v55 = vrot.slane %v8810_v46, 4  ;;  %v8863_v34 = vld [vmem:[%s17076_s10 + $0x161] ss:$2 sm:$0xff] }
 0x184   :  { %v527_v54 = vpop.f32.mrb[4].mxu0 }
 0x185   :  { %v9963_v56 = vpop.f32.mrb[5].mxu0  ;;  %v764_v57 = vpop.f32.mrb[4].mxu1  ;;  %10267 = vmatmul.mubr.msk.f32.gmra.mrb[110].mxu0 %vm393_vm2, %v1668_v49  ;;  %v8859_v49 = vld [vmem:[%s17076_s10 + $0x11d] ss:$2 sm:$0x3f]  ;;  %v1689_v3 = vsel %vm247_vm1, %v1686_v43, %v1688_v55 }
 0x186   :  { %v14340_v58 = vadd.f32 %v764_v57, %v527_v54  ;;  %v10034_v59 = vpop.f32.mrb[5].mxu1  ;;  %10338 = vmatmul.mubr.msk.f32.gmra.mrb[110].mxu1 %vm393_vm2, %v2037_v51  ;;  %10269 = vmatprep.mubr.msk.f32.mxu0 %vm13284_vm0, %v16957_v0  ;;  %v1687_v54 = vsel %vm247_vm1, %v1684_v31, %v1686_v43  ;;  %v2056_v56 = vsel %vm247_vm1, %v2053_v33, %v2055_v45  ;;  %v2057_v57 = vrot.slane %v8859_v49, 4 }
 0x187   :  { %10340 = vmatprep.mubr.msk.f32.mxu1 %vm13284_vm0, %v16957_v0  ;;  %v8811_v59 = vld [vmem:[%s17076_s10 + $0x130] ss:$2 sm:$0xff]  ;;  %v2070_v31 = vrot.slane %v8862_v22, 6 }
 0x188   :  { %v532_v2 = vpop.f32.mrb[6].mxu0 }
 0x189   :  { %v9966_v4 = vpop.f32.mrb[7].mxu0  ;;  %v769_v5 = vpop.f32.mrb[6].mxu1  ;;  %10270 = vmatmul.mubr.msk.f32.gmra.mrb[112].mxu0 %vm393_vm2, %v1670_v60 }
 0x18a   :  { %v14356_v6 = vadd.f32 %v769_v5, %v532_v2  ;;  %v10037_v7 = vpop.f32.mrb[7].mxu1  ;;  %10341 = vmatmul.mubr.msk.f32.gmra.mrb[112].mxu1 %vm393_vm2, %v2039_v62  ;;  %10272 = vmatprep.mubr.msk.f32.mxu0 %vm13284_vm0, %v16957_v0  ;;  %v1698_v4 = vrot.slane %v8811_v59, 6  ;;  %v2058_v5 = vsel %vm247_vm1, %v2055_v45, %v2057_v57  ;;  %v8815_v45 = vld [vmem:[%s17076_s10 + $0x170] ss:$2 sm:$0xff] }
 0x18b   :  { %10343 = vmatprep.mubr.msk.f32.mxu1 %vm13284_vm0, %v16957_v0  ;;  %v2067_v7 = vrot.slane %v8860_v61, 6  ;;  %v8816_v59 = vld [vmem:[%s17076_s10 + $0x180] ss:$2 sm:$0x3f] }
 0x18c   :  { %v537_v13 = vpop.f32.mrb[8].mxu0  ;;  %v8865_v61 = vld [vmem:[%s17076_s10 + $0x181] ss:$2 sm:$0x3f] }
 0x18d   :  { %v9969_v15 = vpop.f32.mrb[9].mxu0  ;;  %v774_v16 = vpop.f32.mrb[8].mxu1  ;;  %10273 = vmatmul.mubr.msk.f32.gmra.mrb[114].mxu0 %vm393_vm2, %v1711_v8  ;;  %v8812_v8 = vld [vmem:[%s17076_s10 + $0x140] ss:$2 sm:$0xff] }
 0x18e   :  { %v14372_v17 = vadd.f32 %v774_v16, %v537_v13  ;;  %v10040_v18 = vpop.f32.mrb[9].mxu1  ;;  %10344 = vmatmul.mubr.msk.f32.gmra.mrb[114].mxu1 %vm393_vm2, %v2080_v10  ;;  %10275 = vmatprep.mubr.msk.f32.mxu0 %vm13284_vm0, %v16957_v0  ;;  %v8861_v10 = vld [vmem:[%s17076_s10 + $0x141] ss:$2 sm:$0xff]  ;;  %v1712_v15 = vsel %vm267_vm4, %v1688_v55, %v1698_v4  ;;  %v1699_v16 = vrot.slane %v8812_v8, 6  ;;  %v1705_v55 = vrot.slane %v8815_v45, 6 }
 0x18f   :  { %10346 = vmatprep.mubr.msk.f32.mxu1 %vm13284_vm0, %v16957_v0  ;;  %v2081_v18 = vsel %vm267_vm4, %v2057_v57, %v2067_v7  ;;  %v2076_v8 = vrot.slane %v8865_v61, 6  ;;  %v8942_v45 = vld [vmem:[%s17076_s10 + $0x27] ss:$2 sm:$0xff] }
 0x190   :  { %v542_v24 = vpop.f32.mrb[10].mxu0 }
 0x191   :  { %v9972_v26 = vpop.f32.mrb[11].mxu0  ;;  %v779_v27 = vpop.f32.mrb[10].mxu1  ;;  %10276 = vmatmul.mubr.msk.f32.gmra.mrb[116].mxu0 %vm393_vm2, %v1681_v19  ;;  %v2068_v19 = vrot.slane %v8861_v10, 6 }
 0x192   :  { %v14388_v28 = vadd.f32 %v779_v27, %v542_v24  ;;  %v10043_v29 = vpop.f32.mrb[11].mxu1  ;;  %10347 = vmatmul.mubr.msk.f32.gmra.mrb[116].mxu1 %vm393_vm2, %v2050_v21  ;;  %10278 = vmatprep.mubr.msk.f32.mxu0 %vm13284_vm0, %v16957_v0  ;;  %v1700_v27 = vsel %vm267_vm4, %v1698_v4, %v1699_v16 }
 0x193   :  { %10349 = vmatprep.mubr.msk.f32.mxu1 %vm13284_vm0, %v16957_v0  ;;  %v1701_v29 = vrot.slane %v8813_v20, 6  ;;  %v2071_v43 = vsel %vm267_vm4, %v2068_v19, %v2070_v31 }
 0x194   :  { %v547_v35 = vpop.f32.mrb[12].mxu0 }
 0x195   :  { %v9975_v38 = vpop.f32.mrb[13].mxu0  ;;  %v784_v39 = vpop.f32.mrb[12].mxu1  ;;  %10279 = vmatmul.mubr.msk.f32.gmra.mrb[118].mxu0 %vm393_vm2, %v1683_v30  ;;  %v2069_v30 = vsel %vm267_vm4, %v2067_v7, %v2068_v19 }
 0x196   :  { %v14404_v40 = vadd.f32 %v784_v39, %v547_v35  ;;  %v10046_v41 = vpop.f32.mrb[13].mxu1  ;;  %10350 = vmatmul.mubr.msk.f32.gmra.mrb[118].mxu1 %vm393_vm2, %v2052_v32  ;;  %10281 = vmatprep.mubr.msk.f32.mxu0 %vm13284_vm0, %v16957_v0  ;;  %v8814_v32 = vld [vmem:[%s17076_s10 + $0x160] ss:$2 sm:$0xff] }
 0x197   :  { %10352 = vmatprep.mubr.msk.f32.mxu1 %vm13284_vm0, %v16957_v0  ;;  %v1702_v41 = vsel %vm267_vm4, %v1699_v16, %v1701_v29 }
 0x198   :  { %v552_v48 = vpop.f32.mrb[14].mxu0 }
 0x199   :  { %v9978_v50 = vpop.f32.mrb[15].mxu0  ;;  %v789_v51 = vpop.f32.mrb[14].mxu1  ;;  %10282 = vmatmul.mubr.msk.f32.gmra.mrb[120].mxu0 %vm393_vm2, %v1685_v42  ;;  %v1703_v42 = vrot.slane %v8814_v32, 6 }
 0x19a   :  { %v14420_v52 = vadd.f32 %v789_v51, %v552_v48  ;;  %v10049_v53 = vpop.f32.mrb[15].mxu1  ;;  %10353 = vmatmul.mubr.msk.f32.gmra.mrb[120].mxu1 %vm393_vm2, %v2054_v44  ;;  %10284 = vmatprep.mubr.msk.f32.mxu0 %vm13284_vm0, %v16957_v0  ;;  %v2072_v44 = vrot.slane %v8863_v34, 6  ;;  %v8864_v48 = vld [vmem:[%s17076_s10 + $0x171] ss:$2 sm:$0xff]  ;;  %v8892_v34 = vld [vmem:[%s17076_s10 + $0x16] ss:$2 sm:$0xff] }
 0x19b   :  { %10355 = vmatprep.mubr.msk.f32.mxu1 %vm13284_vm0, %v16957_v0  ;;  %v2074_v57 = vrot.slane %v8864_v48, 6  ;;  %v1706_v4 = vsel %vm267_vm4, %v1703_v42, %v1705_v55 }
 0x19c   :  { %v557_v60 = vpop.f32.mrb[16].mxu0 }
 0x19d   :  { %v9981_v62 = vpop.f32.mrb[17].mxu0  ;;  %v794_v63 = vpop.f32.mrb[16].mxu1  ;;  %10285 = vmatmul.mubr.msk.f32.gmra.mrb[122].mxu0 %vm393_vm2, %v1687_v54  ;;  %v1704_v54 = vsel %vm267_vm4, %v1701_v29, %v1703_v42  ;;  %v2075_v7 = vsel %vm267_vm4, %v2072_v44, %v2074_v57  ;;  %v2077_v16 = vsel %vm267_vm4, %v2074_v57, %v2076_v8  ;;  %v9062_v29 = vld [vmem:[%s17075_s1 + $0x24] sm:$0xf] }
 0x19e   :  { %v14436_v1 = vadd.f32 %v794_v63, %v557_v60  ;;  %v10052_v2 = vpop.f32.mrb[17].mxu1  ;;  %10356 = vmatmul.mubr.msk.f32.gmra.mrb[122].mxu1 %vm393_vm2, %v2056_v56  ;;  %10287 = vmatprep.mubr.msk.f32.mxu0 %vm13284_vm0, %v16957_v0  ;;  %v2073_v56 = vsel %vm267_vm4, %v2070_v31, %v2072_v44  ;;  %v8893_v44 = vld [vmem:[%s17076_s10 + $0x26] ss:$2 sm:$0xff] }
 0x19f   :  { %10358 = vmatprep.mubr.msk.f32.mxu1 %vm13284_vm0, %v16957_v0 }
 0x1a0   :  { %v562_v9 = vpop.f32.mrb[18].mxu0 }
 0x1a1   :  { %v9984_v11 = vpop.f32.mrb[19].mxu0  ;;  %v799_v12 = vpop.f32.mrb[18].mxu1  ;;  %10288 = vmatmul.mubr.msk.f32.gmra.mrb[124].mxu0 %vm393_vm2, %v1689_v3 }
 0x1a2   :  { %v14452_v13 = vadd.f32 %v799_v12, %v562_v9  ;;  %v10055_v14 = vpop.f32.mrb[19].mxu1  ;;  %10359 = vmatmul.mubr.msk.f32.gmra.mrb[124].mxu1 %vm393_vm2, %v2058_v5  ;;  %10290 = vmatprep.mubr.msk.f32.mxu0 %vm13284_vm0, %v16957_v0  ;;  %v1707_v5 = vrot.slane %v8816_v59, 6  ;;  %v8946_v59 = vld [vmem:[%s17076_s10 + $0x6b] ss:$2 sm:$0xff] }
 0x1a3   :  { %10361 = vmatprep.mubr.msk.f32.mxu1 %vm13284_vm0, %v16957_v0  ;;  %v2767_v8 = vrot.slane %v8946_v59, 2  ;;  %v8901_v59 = vld [vmem:[%s17076_s10 + $0xaa] ss:$2 sm:$0xff] }
 0x1a4   :  { %v567_v21 = vpop.f32.mrb[20].mxu0 }
 0x1a5   :  { %v9987_v23 = vpop.f32.mrb[21].mxu0  ;;  %v804_v24 = vpop.f32.mrb[20].mxu1  ;;  %10291 = vmatmul.mubr.msk.f32.gmra.mrb[126].mxu0 %vm393_vm2, %v1712_v15  ;;  %v1708_v15 = vsel %vm267_vm4, %v1705_v55, %v1707_v5  ;;  %v8943_v55 = vld [vmem:[%s17076_s10 + $0x37] ss:$2 sm:$0xff] }
 0x1a6   :  { %v14468_v25 = vadd.f32 %v804_v24, %v567_v21  ;;  %v10058_v26 = vpop.f32.mrb[21].mxu1  ;;  %10362 = vmatmul.mubr.msk.f32.gmra.mrb[126].mxu1 %vm393_vm2, %v2081_v18  ;;  %10293 = vmatprep.mubr.msk.f32.mxu0 %vm13284_vm0, %v16957_v0  ;;  %v8891_v23 = vld [vmem:[%s17076_s10 + $0x6] ss:$2 sm:$0xff]  ;;  %v9013_v24 = vld [vmem:[%s17075_s1 + $0x20] sm:$0xf]  ;;  %s17079_s1 = sld [smem:[#allocation89_spill]] }
 0x1a7   :  { %10364 = vmatprep.mubr.msk.f32.mxu1 %vm13284_vm0, %v16957_v0  ;;  %v8940_v26 = vld [vmem:[%s17076_s10 + $0x7] ss:$2 sm:$0xff] }
 0x1a8   :  { %v572_v33 = vpop.f32.mrb[22].mxu0 }
 0x1a9   :  { %v9990_v35 = vpop.f32.mrb[23].mxu0  ;;  %v809_v37 = vpop.f32.mrb[22].mxu1  ;;  %10294 = vmatmul.mubr.msk.f32.gmra.mrb[128].mxu0 %vm393_vm2, %v1700_v27 }
 0x1aa   :  { %v14484_v38 = vadd.f32 %v809_v37, %v572_v33  ;;  %v10061_v39 = vpop.f32.mrb[23].mxu1  ;;  %10365 = vmatmul.mubr.msk.f32.gmra.mrb[128].mxu1 %vm393_vm2, %v2069_v30  ;;  %10296 = vmatprep.mubr.msk.f32.mxu0 %vm13284_vm0, %v16957_v0  ;;  %v8941_v35 = vld [vmem:[%s17076_s10 + $0x17] ss:$2 sm:$0xff] }
 0x1ab   :  { %10367 = vmatprep.mubr.msk.f32.mxu1 %vm13284_vm0, %v16957_v0 }
 0x1ac   :  { %v577_v46 = vpop.f32.mrb[24].mxu0 }
 0x1ad   :  { %v9993_v49 = vpop.f32.mrb[25].mxu0  ;;  %v814_v50 = vpop.f32.mrb[24].mxu1  ;;  %10297 = vmatmul.mubr.msk.f32.gmra.mrb[130].mxu0 %vm393_vm2, %v1702_v41 }
 0x1ae   :  { %v14500_v51 = vadd.f32 %v814_v50, %v577_v46  ;;  %v10064_v53 = vpop.f32.mrb[25].mxu1  ;;  %10368 = vmatmul.mubr.msk.f32.gmra.mrb[130].mxu1 %vm393_vm2, %v2071_v43  ;;  %10299 = vmatprep.mubr.msk.f32.mxu0 %vm13284_vm0, %v16957_v0 }
 0x1af   :  { %10370 = vmatprep.mubr.msk.f32.mxu1 %vm13284_vm0, %v16957_v0  ;;  %v8894_v53 = vld [vmem:[%s17076_s10 + $0x36] ss:$2 sm:$0xff] }
 0x1b0   :  { %v582_v60 = vpop.f32.mrb[26].mxu0 }
 0x1b1   :  { %v9996_v62 = vpop.f32.mrb[27].mxu0  ;;  %v819_v63 = vpop.f32.mrb[26].mxu1  ;;  %10300 = vmatmul.mubr.msk.f32.gmra.mrb[132].mxu0 %vm393_vm2, %v1704_v54 }
 0x1b2   :  { %v14516_v2 = vadd.f32 %v819_v63, %v582_v60  ;;  %v10067_v3 = vpop.f32.mrb[27].mxu1  ;;  %10371 = vmatmul.mubr.msk.f32.gmra.mrb[132].mxu1 %vm393_vm2, %v2073_v56  ;;  %10302 = vmatprep.mubr.msk.f32.mxu0 %vm13284_vm0, %v16957_v0  ;;  %v8897_v56 = vld [vmem:[%s17076_s10 + $0x6a] ss:$2 sm:$0xff] }
 0x1b3   :  { %10373 = vmatprep.mubr.msk.f32.mxu1 %vm13284_vm0, %v16957_v0  ;;  %v8895_v63 = vld [vmem:[%s17076_s10 + $0x46] ss:$2 sm:$0xff]  ;;  %v8944_v3 = vld [vmem:[%s17076_s10 + $0x47] ss:$2 sm:$0xff] }
 0x1b4   :  { %v587_v9 = vpop.f32.mrb[28].mxu0 }
 0x1b5   :  { %v9999_v10 = vpop.f32.mrb[29].mxu0  ;;  %v824_v11 = vpop.f32.mrb[28].mxu1  ;;  %10303 = vmatmul.mubr.msk.f32.gmra.mrb[134].mxu0 %vm393_vm2, %v1706_v4  ;;  %v2398_v4 = vrot.slane %v8897_v56, 2 }
 0x1b6   :  { %v14526_v12 = vadd.f32 %v824_v11, %v587_v9  ;;  %v10070_v14 = vpop.f32.mrb[29].mxu1  ;;  %10374 = vmatmul.mubr.msk.f32.gmra.mrb[134].mxu1 %vm393_vm2, %v2075_v7  ;;  %10305 = vmatprep.mubr.msk.f32.mxu0 %vm13284_vm0, %v16957_v0  ;;  %v8896_v7 = vld [vmem:[%s17076_s10 + $0x56] ss:$2 sm:$0x3f] }
 0x1b7   :  { %10376 = vmatprep.mubr.msk.f32.mxu1 %vm13284_vm0, %v16957_v0  ;;  %v8898_v9 = vld [vmem:[%s17076_s10 + $0x7a] ss:$2 sm:$0xff]  ;;  %v8945_v11 = vld [vmem:[%s17076_s10 + $0x57] ss:$2 sm:$0x3f] }
 0x1b8   :  { %v592_v18 = vpop.f32.mrb[30].mxu0  ;;  %v8947_v14 = vld [vmem:[%s17076_s10 + $0x7b] ss:$2 sm:$0xff] }
 0x1b9   :  { %v10002_v19 = vpop.f32.mrb[31].mxu0  ;;  %v829_v20 = vpop.f32.mrb[30].mxu1  ;;  %10306 = vmatmul.mubr.msk.f32.gmra.mrb[136].mxu0 %vm393_vm2, %v1708_v15 }
 0x1ba   :  { %v14536_v21 = vadd.f32 %v829_v20, %v592_v18  ;;  %v10073_v22 = vpop.f32.mrb[31].mxu1  ;;  %10377 = vmatmul.mubr.msk.f32.gmra.mrb[136].mxu1 %vm393_vm2, %v2077_v16  ;;  %10381 = vmatprep.mubr.msk.f32.mxu0 %vm13284_vm0, %v16957_v0  ;;  %v2448_v19 = vsel %vm227_vm3, %v8896_v7, %v2398_v4  ;;  %v2399_v20 = vrot.slane %v8898_v9, 2 }
 0x1bb   :  { %10452 = vmatprep.mubr.msk.f32.mxu1 %vm13284_vm0, %v16957_v0 }
 0x1bc   :  { %v597_v27 = vpop.f32.mrb[32].mxu0 }
 0x1bd   :  { %v10005_v30 = vpop.f32.mrb[33].mxu0  ;;  %v834_v31 = vpop.f32.mrb[32].mxu1  ;;  %10382 = vmatmul.mubr.msk.f32.vlgmr.msra.gmra.mrb[138].mxu0 %vm393_vm2, %v8891_v23  ;;  %v2817_v23 = vsel %vm227_vm3, %v8945_v11, %v2767_v8 }
 0x1be   :  { %v14556_v32 = vadd.f32 %v834_v31, %v597_v27  ;;  %10522 = vmatpush3.msk.msra.mxu0 %vm247_vm1, %v9013_v24  ;;  %v10076_v33 = vpop.f32.mrb[33].mxu1  ;;  %10453 = vmatmul.mubr.msk.f32.vlgmr.msra.gmra.mrb[138].mxu1 %vm393_vm2, %v8940_v26  ;;  %v2768_v24 = vrot.slane %v8947_v14, 2  ;;  %v8899_v26 = vld [vmem:[%s17076_s10 + $0x8a] ss:$2 sm:$0xff] }
 0x1bf   :  { %10384 = vmatprep.mubr.msk.f32.mxu0 %vm13284_vm0, %v16957_v0  ;;  %10593 = vmatpush3.msk.msra.mxu1 %vm247_vm1, %v9062_v29  ;;  %v8948_v29 = vld [vmem:[%s17076_s10 + $0x8b] ss:$2 sm:$0xff] }
 0x1c0   :  { %v602_v37 = vpop.f32.mrb[34].mxu0  ;;  %10455 = vmatprep.mubr.msk.f32.mxu1 %vm13284_vm0, %v16957_v0 }
 0x1c1   :  { %v10008_v39 = vpop.f32.mrb[35].mxu0  ;;  %v839_v41 = vpop.f32.mrb[34].mxu1  ;;  %10385 = vmatmul.mubr.msk.f32.gmra.mrb[140].mxu0 %vm393_vm2, %v8892_v34  ;;  %v2400_v34 = vsel %vm227_vm3, %v2398_v4, %v2399_v20 }
 0x1c2   :  { %v14572_v42 = vadd.f32 %v839_v41, %v602_v37  ;;  %v10079_v43 = vpop.f32.mrb[35].mxu1  ;;  %10456 = vmatmul.mubr.msk.f32.gmra.mrb[140].mxu1 %vm393_vm2, %v8941_v35  ;;  %10387 = vmatprep.mubr.msk.f32.mxu0 %vm13284_vm0, %v16957_v0  ;;  %v2401_v35 = vrot.slane %v8899_v26, 2  ;;  %v2769_v39 = vsel %vm227_vm3, %v2767_v8, %v2768_v24  ;;  %v2770_v41 = vrot.slane %v8948_v29, 2 }
 0x1c3   :  { %10458 = vmatprep.mubr.msk.f32.mxu1 %vm13284_vm0, %v16957_v0  ;;  %v8900_v43 = vld [vmem:[%s17076_s10 + $0x9a] ss:$2 sm:$0xff]  ;;  %v2405_v8 = vrot.slane %v8901_v59, 2 }
 0x1c4   :  { %v607_v46 = vpop.f32.mrb[36].mxu0  ;;  %v2771_v56 = vsel %vm227_vm3, %v2768_v24, %v2770_v41 }
 0x1c5   :  { %v10011_v48 = vpop.f32.mrb[37].mxu0  ;;  %v844_v49 = vpop.f32.mrb[36].mxu1  ;;  %10388 = vmatmul.mubr.msk.f32.gmra.mrb[142].mxu0 %vm393_vm2, %v8893_v44 }
 0x1c6   :  { %v10082_v50 = vpop.f32.mrb[37].mxu1  ;;  %10459 = vmatmul.mubr.msk.f32.gmra.mrb[142].mxu1 %vm393_vm2, %v8942_v45  ;;  %10390 = vmatprep.mubr.msk.f32.mxu0 %vm13284_vm0, %v16957_v0  ;;  %v14592_v54 = vadd.f32 %v844_v49, %v607_v46  ;;  %v8949_v45 = vld [vmem:[%s17076_s10 + $0x9b] ss:$2 sm:$0xff] }
 0x1c7   :  { %10461 = vmatprep.mubr.msk.f32.mxu1 %vm13284_vm0, %v16957_v0  ;;  %v2402_v50 = vsel %vm227_vm3, %v2399_v20, %v2401_v35 }
 0x1c8   :  { %v612_v57 = vpop.f32.mrb[38].mxu0 }
 0x1c9   :  { %v10014_v60 = vpop.f32.mrb[39].mxu0  ;;  %v849_v61 = vpop.f32.mrb[38].mxu1  ;;  %10391 = vmatmul.mubr.msk.f32.gmra.mrb[144].mxu0 %vm393_vm2, %v8894_v53  ;;  %v2403_v53 = vrot.slane %v8900_v43, 2 }
 0x1ca   :  { %v10085_v62 = vpop.f32.mrb[39].mxu1  ;;  %10462 = vmatmul.mubr.msk.f32.gmra.mrb[144].mxu1 %vm393_vm2, %v8943_v55  ;;  %10393 = vmatprep.mubr.msk.f32.mxu0 %vm13284_vm0, %v16957_v0  ;;  %v14615_v5 = vadd.f32 %v849_v61, %v612_v57  ;;  %v2772_v57 = vrot.slane %v8949_v45, 2  ;;  %v8950_v61 = vld [vmem:[%s17076_s10 + $0xab] ss:$2 sm:$0xff] }
 0x1cb   :  { %10464 = vmatprep.mubr.msk.f32.mxu1 %vm13284_vm0, %v16957_v0  ;;  %v2404_v7 = vsel %vm227_vm3, %v2401_v35, %v2403_v53 }
 0x1cc   :  { %v617_v10 = vpop.f32.mrb[40].mxu0  ;;  %v2773_v9 = vsel %vm227_vm3, %v2770_v41, %v2772_v57 }
 0x1cd   :  { %v10017_v15 = vpop.f32.mrb[41].mxu0  ;;  %v854_v16 = vpop.f32.mrb[40].mxu1  ;;  %10394 = vmatmul.mubr.msk.f32.gmra.mrb[146].mxu0 %vm393_vm2, %v8895_v63 }
 0x1ce   :  { %v10088_v18 = vpop.f32.mrb[41].mxu1  ;;  %10465 = vmatmul.mubr.msk.f32.gmra.mrb[146].mxu1 %vm393_vm2, %v8944_v3  ;;  %10396 = vmatprep.mubr.msk.f32.mxu0 %vm13284_vm0, %v16957_v0  ;;  %v14636_v22 = vadd.f32 %v854_v16, %v617_v10  ;;  %v2774_v10 = vrot.slane %v8950_v61, 2  ;;  %v8951_v15 = vld [vmem:[%s17076_s10 + $0xbb] ss:$2 sm:$0x3f] }
 0x1cf   :  { %10467 = vmatprep.mubr.msk.f32.mxu1 %vm13284_vm0, %v16957_v0 }
 0x1d0   :  { %v622_v27 = vpop.f32.mrb[42].mxu0  ;;  %v2775_v26 = vsel %vm227_vm3, %v2772_v57, %v2774_v10 }
 0x1d1   :  { %v10020_v30 = vpop.f32.mrb[43].mxu0  ;;  %v859_v31 = vpop.f32.mrb[42].mxu1  ;;  %10397 = vmatmul.mubr.msk.f32.gmra.mrb[148].mxu0 %vm393_vm2, %v2448_v19 }
 0x1d2   :  { %v10091_v33 = vpop.f32.mrb[43].mxu1  ;;  %10468 = vmatmul.mubr.msk.f32.gmra.mrb[148].mxu1 %vm393_vm2, %v2817_v23  ;;  %10399 = vmatprep.mubr.msk.f32.mxu0 %vm13284_vm0, %v16957_v0  ;;  %v14652_v37 = vadd.f32 %v859_v31, %v622_v27  ;;  %v2406_v23 = vsel %vm227_vm3, %v2403_v53, %v2405_v8  ;;  %v2776_v27 = vrot.slane %v8951_v15, 2  ;;  %v8952_v31 = vld [vmem:[%s17076_s10 + $0xcf] ss:$2 sm:$0xff] }
 0x1d3   :  { %10470 = vmatprep.mubr.msk.f32.mxu1 %vm13284_vm0, %v16957_v0  ;;  %v2786_v45 = vrot.slane %v8952_v31, 4 }
 0x1d4   :  { %v627_v44 = vpop.f32.mrb[44].mxu0 }
 0x1d5   :  { %v10023_v46 = vpop.f32.mrb[45].mxu0  ;;  %v864_v48 = vpop.f32.mrb[44].mxu1  ;;  %10400 = vmatmul.mubr.msk.f32.gmra.mrb[150].mxu0 %vm393_vm2, %v2400_v34  ;;  %v2818_v61 = vsel %vm247_vm1, %v2776_v27, %v2786_v45 }
 0x1d6   :  { %v10094_v49 = vpop.f32.mrb[45].mxu1  ;;  %10471 = vmatmul.mubr.msk.f32.gmra.mrb[150].mxu1 %vm393_vm2, %v2769_v39  ;;  %10402 = vmatprep.mubr.msk.f32.mxu0 %vm13284_vm0, %v16957_v0  ;;  %v14668_v55 = vadd.f32 %v864_v48, %v627_v44  ;;  %v2777_v44 = vsel %vm227_vm3, %v2774_v10, %v2776_v27 }
 0x1d7   :  { %10473 = vmatprep.mubr.msk.f32.mxu1 %vm13284_vm0, %v16957_v0  ;;  %v8953_v49 = vld [vmem:[%s17076_s10 + $0xdf] ss:$2 sm:$0xff] }
 0x1d8   :  { %v1100_v60 = vpop.f32.mrb[46].mxu0 }
 0x1d9   :  { %v1214_v62 = vadd.f32 %v1100_v60, %v14308_v36  ;;  %v10099_v63 = vpop.f32.mrb[47].mxu0  ;;  %10403 = vmatmul.mubr.msk.f32.gmra.mrb[152].mxu0 %vm393_vm2, %v2402_v50  ;;  %v1469_v3 = vpop.f32.mrb[46].mxu1  ;;  %v8902_v36 = vld [vmem:[%s17076_s10 + $0xba] ss:$2 sm:$0x3f] }
 0x1da   :  { %v10170_v4 = vpop.f32.mrb[47].mxu1  ;;  %10474 = vmatmul.mubr.msk.f32.gmra.mrb[152].mxu1 %vm393_vm2, %v2771_v56  ;;  %10405 = vmatprep.mubr.msk.f32.mxu0 %vm13284_vm0, %v16957_v0  ;;  %v2407_v24 = vrot.slane %v8902_v36, 2 }
 0x1db   :  { %10476 = vmatprep.mubr.msk.f32.mxu1 %vm13284_vm0, %v16957_v0  ;;  %v14691_v11 = vadd.f32 %v1469_v3, %v1214_v62  ;;  %v2787_v62 = vrot.slane %v8953_v49, 4  ;;  %v8954_v4 = vld [vmem:[%s17076_s10 + $0xef] ss:$2 sm:$0xff] }
 0x1dc   :  { %v1105_v14 = vpop.f32.mrb[48].mxu0  ;;  %v2408_v41 = vsel %vm227_vm3, %v2405_v8, %v2407_v24 }
 0x1dd   :  { %v1215_v16 = vadd.f32 %v1105_v14, %v14324_v47  ;;  %v10102_v18 = vpop.f32.mrb[49].mxu0  ;;  %10406 = vmatmul.mubr.msk.f32.gmra.mrb[154].mxu0 %vm393_vm2, %v2404_v7  ;;  %v1474_v19 = vpop.f32.mrb[48].mxu1  ;;  %v8903_v47 = vld [vmem:[%s17076_s10 + $0xce] ss:$2 sm:$0xff]  ;;  %v2788_v15 = vsel %vm247_vm1, %v2786_v45, %v2787_v62 }
 0x1de   :  { %v10173_v20 = vpop.f32.mrb[49].mxu1  ;;  %10477 = vmatmul.mubr.msk.f32.gmra.mrb[154].mxu1 %vm393_vm2, %v2773_v9  ;;  %10408 = vmatprep.mubr.msk.f32.mxu0 %vm13284_vm0, %v16957_v0  ;;  %v2417_v43 = vrot.slane %v8903_v47, 4 }
 0x1df   :  { %10479 = vmatprep.mubr.msk.f32.mxu1 %vm13284_vm0, %v16957_v0  ;;  %v14708_v29 = vadd.f32 %v1474_v19, %v1215_v16  ;;  %v2789_v16 = vrot.slane %v8954_v4, 4  ;;  %v8955_v20 = vld [vmem:[%s17076_s10 + $0xff] ss:$2 sm:$0xff] }
 0x1e0   :  { %v1110_v30 = vpop.f32.mrb[50].mxu0  ;;  %v2449_v59 = vsel %vm247_vm1, %v2407_v24, %v2417_v43 }
 0x1e1   :  { %v1216_v33 = vadd.f32 %v1110_v30, %v14340_v58  ;;  %v10105_v34 = vpop.f32.mrb[51].mxu0  ;;  %10409 = vmatmul.mubr.msk.f32.gmra.mrb[156].mxu0 %vm393_vm2, %v2406_v23  ;;  %v1479_v35 = vpop.f32.mrb[50].mxu1  ;;  %v8904_v58 = vld [vmem:[%s17076_s10 + $0xde] ss:$2 sm:$0xff]  ;;  %v2790_v31 = vsel %vm247_vm1, %v2787_v62, %v2789_v16 }
 0x1e2   :  { %v10176_v39 = vpop.f32.mrb[51].mxu1  ;;  %10480 = vmatmul.mubr.msk.f32.gmra.mrb[156].mxu1 %vm393_vm2, %v2775_v26  ;;  %10411 = vmatprep.mubr.msk.f32.mxu0 %vm13284_vm0, %v16957_v0  ;;  %v2418_v60 = vrot.slane %v8904_v58, 4 }
 0x1e3   :  { %10482 = vmatprep.mubr.msk.f32.mxu1 %vm13284_vm0, %v16957_v0  ;;  %v14725_v46 = vadd.f32 %v1479_v35, %v1216_v33  ;;  %v2791_v33 = vrot.slane %v8955_v20, 4  ;;  %v8956_v39 = vld [vmem:[%s17076_s10 + $0x10f] ss:$2 sm:$0xff] }
 0x1e4   :  { %v1115_v48 = vpop.f32.mrb[52].mxu0  ;;  %v2419_v36 = vsel %vm247_vm1, %v2417_v43, %v2418_v60 }
 0x1e5   :  { %v1217_v50 = vadd.f32 %v1115_v48, %v14356_v6  ;;  %v10108_v53 = vpop.f32.mrb[53].mxu0  ;;  %10412 = vmatmul.mubr.msk.f32.gmra.mrb[158].mxu0 %vm393_vm2, %v2408_v41  ;;  %v1484_v56 = vpop.f32.mrb[52].mxu1  ;;  %v8905_v6 = vld [vmem:[%s17076_s10 + $0xee] ss:$2 sm:$0xff]  ;;  %v2792_v49 = vsel %vm247_vm1, %v2789_v16, %v2791_v33 }
 0x1e6   :  { %v10179_v57 = vpop.f32.mrb[53].mxu1  ;;  %10483 = vmatmul.mubr.msk.f32.gmra.mrb[158].mxu1 %vm393_vm2, %v2777_v44  ;;  %10414 = vmatprep.mubr.msk.f32.mxu0 %vm13284_vm0, %v16957_v0  ;;  %v2420_v14 = vrot.slane %v8905_v6, 4 }
 0x1e7   :  { %10485 = vmatprep.mubr.msk.f32.mxu1 %vm13284_vm0, %v16957_v0  ;;  %v14742_v63 = vadd.f32 %v1484_v56, %v1217_v50  ;;  %v2793_v50 = vrot.slane %v8956_v39, 4  ;;  %v8957_v57 = vld [vmem:[%s17076_s10 + $0x11f] ss:$2 sm:$0x3f] }
 0x1e8   :  { %v1120_v3 = vpop.f32.mrb[54].mxu0  ;;  %v2421_v47 = vsel %vm247_vm1, %v2418_v60, %v2420_v14 }
 0x1e9   :  { %v1218_v7 = vadd.f32 %v1120_v3, %v14372_v17  ;;  %v10111_v8 = vpop.f32.mrb[55].mxu0  ;;  %10415 = vmatmul.mubr.msk.f32.gmra.mrb[160].mxu0 %vm393_vm2, %v2449_v59  ;;  %v1489_v9 = vpop.f32.mrb[54].mxu1  ;;  %v8906_v17 = vld [vmem:[%s17076_s10 + $0xfe] ss:$2 sm:$0xff]  ;;  %v2794_v4 = vsel %vm247_vm1, %v2791_v33, %v2793_v50 }
 0x1ea   :  { %v10182_v10 = vpop.f32.mrb[55].mxu1  ;;  %10486 = vmatmul.mubr.msk.f32.gmra.mrb[160].mxu1 %vm393_vm2, %v2818_v61  ;;  %10417 = vmatprep.mubr.msk.f32.mxu0 %vm13284_vm0, %v16957_v0  ;;  %v2422_v30 = vrot.slane %v8906_v17, 4 }
 0x1eb   :  { %10488 = vmatprep.mubr.msk.f32.mxu1 %vm13284_vm0, %v16957_v0  ;;  %v14759_v18 = vadd.f32 %v1489_v9, %v1218_v7  ;;  %v2795_v7 = vrot.slane %v8957_v57, 4  ;;  %v8958_v10 = vld [vmem:[%s17076_s10 + $0x133] ss:$2 sm:$0xff] }
 0x1ec   :  { %v1125_v19 = vpop.f32.mrb[56].mxu0  ;;  %v2423_v58 = vsel %vm247_vm1, %v2420_v14, %v2422_v30 }
 0x1ed   :  { %v1219_v23 = vadd.f32 %v1125_v19, %v14388_v28  ;;  %v10114_v24 = vpop.f32.mrb[57].mxu0  ;;  %10418 = vmatmul.mubr.msk.f32.gmra.mrb[162].mxu0 %vm393_vm2, %v2419_v36  ;;  %v1494_v26 = vpop.f32.mrb[56].mxu1  ;;  %v8907_v28 = vld [vmem:[%s17076_s10 + $0x10e] ss:$2 sm:$0xff]  ;;  %v2796_v20 = vsel %vm247_vm1, %v2793_v50, %v2795_v7 }
 0x1ee   :  { %v10185_v27 = vpop.f32.mrb[57].mxu1  ;;  %10489 = vmatmul.mubr.msk.f32.gmra.mrb[162].mxu1 %vm393_vm2, %v2788_v15  ;;  %10420 = vmatprep.mubr.msk.f32.mxu0 %vm13284_vm0, %v16957_v0  ;;  %v2424_v48 = vrot.slane %v8907_v28, 4 }
 0x1ef   :  { %10491 = vmatprep.mubr.msk.f32.mxu1 %vm13284_vm0, %v16957_v0  ;;  %v14776_v34 = vadd.f32 %v1494_v26, %v1219_v23  ;;  %v2805_v23 = vrot.slane %v8958_v10, 6  ;;  %v8959_v27 = vld [vmem:[%s17076_s10 + $0x143] ss:$2 sm:$0xff] }
 0x1f0   :  { %v1130_v35 = vpop.f32.mrb[58].mxu0  ;;  %v2425_v6 = vsel %vm247_vm1, %v2422_v30, %v2424_v48 }
 0x1f1   :  { %v1220_v41 = vadd.f32 %v1130_v35, %v14404_v40  ;;  %v10117_v43 = vpop.f32.mrb[59].mxu0  ;;  %10421 = vmatmul.mubr.msk.f32.gmra.mrb[164].mxu0 %vm393_vm2, %v2421_v47  ;;  %v1499_v44 = vpop.f32.mrb[58].mxu1  ;;  %v8908_v40 = vld [vmem:[%s17076_s10 + $0x11e] ss:$2 sm:$0x3f]  ;;  %v2819_v39 = vsel %vm267_vm4, %v2795_v7, %v2805_v23 }
 0x1f2   :  { %v10188_v45 = vpop.f32.mrb[59].mxu1  ;;  %10492 = vmatmul.mubr.msk.f32.gmra.mrb[164].mxu1 %vm393_vm2, %v2790_v31  ;;  %10423 = vmatprep.mubr.msk.f32.mxu0 %vm13284_vm0, %v16957_v0  ;;  %v2426_v3 = vrot.slane %v8908_v40, 4 }
 0x1f3   :  { %10494 = vmatprep.mubr.msk.f32.mxu1 %vm13284_vm0, %v16957_v0  ;;  %v14793_v53 = vadd.f32 %v1499_v44, %v1220_v41  ;;  %v2806_v41 = vrot.slane %v8959_v27, 6  ;;  %v8960_v45 = vld [vmem:[%s17076_s10 + $0x153] ss:$2 sm:$0xff] }
 0x1f4   :  { %v1135_v56 = vpop.f32.mrb[60].mxu0  ;;  %v2427_v17 = vsel %vm247_vm1, %v2424_v48, %v2426_v3 }
 0x1f5   :  { %v1221_v59 = vadd.f32 %v1135_v56, %v14420_v52  ;;  %v10120_v60 = vpop.f32.mrb[61].mxu0  ;;  %10424 = vmatmul.mubr.msk.f32.gmra.mrb[166].mxu0 %vm393_vm2, %v2423_v58  ;;  %v1504_v61 = vpop.f32.mrb[60].mxu1  ;;  %v8909_v52 = vld [vmem:[%s17076_s10 + $0x132] ss:$2 sm:$0xff]  ;;  %v2807_v57 = vsel %vm267_vm4, %v2805_v23, %v2806_v41 }
 0x1f6   :  { %v10191_v62 = vpop.f32.mrb[61].mxu1  ;;  %10495 = vmatmul.mubr.msk.f32.gmra.mrb[166].mxu1 %vm393_vm2, %v2792_v49  ;;  %10426 = vmatprep.mubr.msk.f32.mxu0 %vm13284_vm0, %v16957_v0  ;;  %v2436_v19 = vrot.slane %v8909_v52, 6  ;;  %v8912_v60 = vld [vmem:[%s17076_s10 + $0x162] ss:$2 sm:$0xff] }
 0x1f7   :  { %10497 = vmatprep.mubr.msk.f32.mxu1 %vm13284_vm0, %v16957_v0  ;;  %v14810_v8 = vadd.f32 %v1504_v61, %v1221_v59  ;;  %v2808_v59 = vrot.slane %v8960_v45, 6  ;;  %v8961_v62 = vld [vmem:[%s17076_s10 + $0x163] ss:$2 sm:$0xff] }
 0x1f8   :  { %v1140_v9 = vpop.f32.mrb[62].mxu0  ;;  %v2450_v28 = vsel %vm267_vm4, %v2426_v3, %v2436_v19 }
 0x1f9   :  { %v1222_v36 = vadd.f32 %v1140_v9, %v14436_v1  ;;  %v10123_v14 = vpop.f32.mrb[63].mxu0  ;;  %10427 = vmatmul.mubr.msk.f32.gmra.mrb[168].mxu0 %vm393_vm2, %v2425_v6  ;;  %v1509_v15 = vpop.f32.mrb[62].mxu1  ;;  %v8910_v1 = vld [vmem:[%s17076_s10 + $0x142] ss:$2 sm:$0xff]  ;;  %v2441_v9 = vrot.slane %v8912_v60, 6  ;;  %v2809_v10 = vsel %vm267_vm4, %v2806_v41, %v2808_v59 }
 0x1fa   :  { %v10194_v16 = vpop.f32.mrb[63].mxu1  ;;  %10498 = vmatmul.mubr.msk.f32.gmra.mrb[168].mxu1 %vm393_vm2, %v2794_v4  ;;  %10429 = vmatprep.mubr.msk.f32.mxu0 %vm13284_vm0, %v16957_v0  ;;  %v2437_v35 = vrot.slane %v8910_v1, 6 }
 0x1fb   :  { %10500 = vmatprep.mubr.msk.f32.mxu1 %vm13284_vm0, %v16957_v0  ;;  %v14827_v24 = vadd.f32 %v1509_v15, %v1222_v36  ;;  %v2810_v36 = vrot.slane %v8961_v62, 6  ;;  %v8962_v16 = vld [vmem:[%s17076_s10 + $0x173] ss:$2 sm:$0xff] }
 0x1fc   :  { %v1145_v26 = vpop.f32.mrb[64].mxu0  ;;  %v2438_v40 = vsel %vm267_vm4, %v2436_v19, %v2437_v35 }
 0x1fd   :  { %v1223_v47 = vadd.f32 %v1145_v26, %v14452_v13  ;;  %v10126_v30 = vpop.f32.mrb[65].mxu0  ;;  %10430 = vmatmul.mubr.msk.f32.gmra.mrb[170].mxu0 %vm393_vm2, %v2427_v17  ;;  %v1514_v31 = vpop.f32.mrb[64].mxu1  ;;  %v8911_v13 = vld [vmem:[%s17076_s10 + $0x152] ss:$2 sm:$0xff]  ;;  %v2811_v27 = vsel %vm267_vm4, %v2808_v59, %v2810_v36 }
 0x1fe   :  { %v10197_v33 = vpop.f32.mrb[65].mxu1  ;;  %10501 = vmatmul.mubr.msk.f32.gmra.mrb[170].mxu1 %vm393_vm2, %v2796_v20  ;;  %10432 = vmatprep.mubr.msk.f32.mxu0 %vm13284_vm0, %v16957_v0  ;;  %v2439_v56 = vrot.slane %v8911_v13, 6  ;;  %v8914_v30 = vld [vmem:[%s17076_s10 + $0x182] ss:$2 sm:$0x3f] }
 0x1ff   :  { %10503 = vmatprep.mubr.msk.f32.mxu1 %vm13284_vm0, %v16957_v0  ;;  %v14844_v43 = vadd.f32 %v1514_v31, %v1223_v47  ;;  %v2812_v47 = vrot.slane %v8962_v16, 6  ;;  %v8963_v33 = vld [vmem:[%s17076_s10 + $0x183] ss:$2 sm:$0x3f] }
 0x200   :  { %v1150_v44 = vpop.f32.mrb[66].mxu0  ;;  %v2440_v52 = vsel %vm267_vm4, %v2437_v35, %v2439_v56  ;;  %v2442_v1 = vsel %vm267_vm4, %v2439_v56, %v2441_v9 }
 0x201   :  { %v10129_v58 = vpop.f32.mrb[67].mxu0  ;;  %10433 = vmatmul.mubr.msk.f32.gmra.mrb[172].mxu0 %vm393_vm2, %v2450_v28  ;;  %v1519_v48 = vpop.f32.mrb[66].mxu1  ;;  %v1224_v49 = vadd.f32 %v1150_v44, %v14468_v25  ;;  %v2445_v44 = vrot.slane %v8914_v30, 6  ;;  %v2813_v45 = vsel %vm267_vm4, %v2810_v36, %v2812_v47 }
 0x202   :  { %v10200_v50 = vpop.f32.mrb[67].mxu1  ;;  %10504 = vmatmul.mubr.msk.f32.gmra.mrb[172].mxu1 %vm393_vm2, %v2819_v39  ;;  %10435 = vmatprep.mubr.msk.f32.mxu0 %vm13284_vm0, %v16957_v0  ;;  %v2814_v58 = vrot.slane %v8963_v33, 6 }
 0x203   :  { %10506 = vmatprep.mubr.msk.f32.mxu1 %vm13284_vm0, %v16957_v0  ;;  %v14861_v25 = vadd.f32 %v1519_v48, %v1224_v49 }
 0x204   :  { %v1155_v61 = vpop.f32.mrb[68].mxu0  ;;  %v2815_v59 = vsel %vm267_vm4, %v2812_v47, %v2814_v58 }
 0x205   :  { %v1225_v6 = vadd.f32 %v1155_v61, %v14484_v38  ;;  %v10132_v3 = vpop.f32.mrb[69].mxu0  ;;  %10436 = vmatmul.mubr.msk.f32.gmra.mrb[174].mxu0 %vm393_vm2, %v2438_v40  ;;  %v1524_v4 = vpop.f32.mrb[68].mxu1  ;;  %v8913_v38 = vld [vmem:[%s17076_s10 + $0x172] ss:$2 sm:$0xff] }
 0x206   :  { %v10203_v7 = vpop.f32.mrb[69].mxu1  ;;  %10507 = vmatmul.mubr.msk.f32.gmra.mrb[174].mxu1 %vm393_vm2, %v2807_v57  ;;  %10438 = vmatprep.mubr.msk.f32.mxu0 %vm13284_vm0, %v16957_v0  ;;  %v2443_v26 = vrot.slane %v8913_v38, 6 }
 0x207   :  { %10509 = vmatprep.mubr.msk.f32.mxu1 %vm13284_vm0, %v16957_v0  ;;  %v14878_v14 = vadd.f32 %v1524_v4, %v1225_v6  ;;  %v8989_v4 = vld [vmem:[%s17076_s10 + $0x8] ss:$2 sm:$0xff] }
 0x208   :  { %v1160_v15 = vpop.f32.mrb[70].mxu0  ;;  %v2444_v13 = vsel %vm267_vm4, %v2441_v9, %v2443_v26  ;;  %v2446_v57 = vsel %vm267_vm4, %v2443_v26, %v2445_v44  ;;  %v8991_v26 = vld [vmem:[%s17076_s10 + $0x28] ss:$2 sm:$0xff]  ;;  %v9044_v44 = vld [vmem:[%s17076_s10 + $0x6d] ss:$2 sm:$0xff] }
 0x209   :  { %v10135_v17 = vpop.f32.mrb[71].mxu0  ;;  %10439 = vmatmul.mubr.msk.f32.gmra.mrb[176].mxu0 %vm393_vm2, %v2440_v52  ;;  %v1529_v19 = vpop.f32.mrb[70].mxu1  ;;  %v1226_v20 = vadd.f32 %v1160_v15, %v14500_v51  ;;  %v8990_v15 = vld [vmem:[%s17076_s10 + $0x18] ss:$2 sm:$0xff] }
 0x20a   :  { %v10206_v23 = vpop.f32.mrb[71].mxu1  ;;  %10510 = vmatmul.mubr.msk.f32.gmra.mrb[176].mxu1 %vm393_vm2, %v2809_v10  ;;  %10441 = vmatprep.mubr.msk.f32.mxu0 %vm13284_vm0, %v16957_v0 }
 0x20b   :  { %10512 = vmatprep.mubr.msk.f32.mxu1 %vm13284_vm0, %v16957_v0  ;;  %v14895_v51 = vadd.f32 %v1529_v19, %v1226_v20 }
 0x20c   :  { %v1165_v31 = vpop.f32.mrb[72].mxu0 }
 0x20d   :  { %v1227_v28 = vadd.f32 %v1165_v31, %v14516_v2  ;;  %v10138_v35 = vpop.f32.mrb[73].mxu0  ;;  %10442 = vmatmul.mubr.msk.f32.gmra.mrb[178].mxu0 %vm393_vm2, %v2442_v1  ;;  %v1534_v39 = vpop.f32.mrb[72].mxu1 }
 0x20e   :  { %v10209_v41 = vpop.f32.mrb[73].mxu1  ;;  %10513 = vmatmul.mubr.msk.f32.gmra.mrb[178].mxu1 %vm393_vm2, %v2811_v27  ;;  %10444 = vmatprep.mubr.msk.f32.mxu0 %vm13284_vm0, %v16957_v0  ;;  %v8992_v35 = vld [vmem:[%s17076_s10 + $0x38] ss:$2 sm:$0xff] }
 0x20f   :  { %10515 = vmatprep.mubr.msk.f32.mxu1 %vm13284_vm0, %v16957_v0  ;;  %v14909_v2 = vadd.f32 %v1534_v39, %v1227_v28  ;;  %v8995_v41 = vld [vmem:[%s17076_s10 + $0x6c] ss:$2 sm:$0xff] }
 0x210   :  { %v1170_v48 = vpop.f32.mrb[74].mxu0 }
 0x211   :  { %v10141_v49 = vpop.f32.mrb[75].mxu0  ;;  %10445 = vmatmul.mubr.msk.f32.gmra.mrb[180].mxu0 %vm393_vm2, %v2444_v13  ;;  %v1539_v50 = vpop.f32.mrb[74].mxu1  ;;  %v1228_v40 = vadd.f32 %v1170_v48, %v14526_v12 }
 0x212   :  { %v10212_v56 = vpop.f32.mrb[75].mxu1  ;;  %10516 = vmatmul.mubr.msk.f32.gmra.mrb[180].mxu1 %vm393_vm2, %v2813_v45  ;;  %10447 = vmatprep.mubr.msk.f32.mxu0 %vm13284_vm0, %v16957_v0 }
 0x213   :  { %10518 = vmatprep.mubr.msk.f32.mxu1 %vm13284_vm0, %v16957_v0  ;;  %v14920_v60 = vadd.f32 %v1539_v50, %v1228_v40  ;;  %v8993_v50 = vld [vmem:[%s17076_s10 + $0x48] ss:$2 sm:$0xff]  ;;  %v9042_v40 = vld [vmem:[%s17076_s10 + $0x49] ss:$2 sm:$0xff]  ;;  %v3136_v56 = vrot.slane %v8995_v41, 2 }
 0x214   :  { %v1175_v61 = vpop.f32.mrb[76].mxu0 }
 0x215   :  { %v10144_v62 = vpop.f32.mrb[77].mxu0  ;;  %10448 = vmatmul.mubr.msk.f32.gmra.mrb[182].mxu0 %vm393_vm2, %v2446_v57  ;;  %v1229_v12 = vadd.f32 %v1175_v61, %v14536_v21  ;;  %v1544_v6 = vpop.f32.mrb[76].mxu1  ;;  %v9038_v21 = vld [vmem:[%s17076_s10 + $0x9] ss:$2 sm:$0xff]  ;;  %v8996_v61 = vld [vmem:[%s17076_s10 + $0x7c] ss:$2 sm:$0xff] }
 0x216   :  { %v10215_v3 = vpop.f32.mrb[77].mxu1  ;;  %10519 = vmatmul.mubr.msk.f32.gmra.mrb[182].mxu1 %vm393_vm2, %v2815_v59  ;;  %10523 = vmatprep.mubr.msk.f32.mxu0 %vm13284_vm0, %v16957_v0  ;;  %v8994_v57 = vld [vmem:[%s17076_s10 + $0x58] ss:$2 sm:$0x3f]  ;;  %v3505_v59 = vrot.slane %v9044_v44, 2 }
 0x217   :  { %v14930_v7 = vadd.f32 %v1544_v6, %v1229_v12  ;;  %10594 = vmatprep.mubr.msk.f32.mxu1 %vm13284_vm0, %v16957_v0  ;;  %v9043_v12 = vld [vmem:[%s17076_s10 + $0x59] ss:$2 sm:$0x3f] }
 0x218   :  { %v1180_v52 = vpop.f32.mrb[78].mxu0  ;;  %v9045_v6 = vld [vmem:[%s17076_s10 + $0x7d] ss:$2 sm:$0xff] }
 0x219   :  { %v10147_v9 = vpop.f32.mrb[79].mxu0  ;;  %10524 = vmatmul.mubr.msk.f32.vlgmr.msra.gmra.mrb[184].mxu0 %vm393_vm2, %v8989_v4  ;;  %v1230_v10 = vadd.f32 %v1180_v52, %v14556_v32  ;;  %v1549_v36 = vpop.f32.mrb[78].mxu1  ;;  %v9039_v32 = vld [vmem:[%s17076_s10 + $0x19] ss:$2 sm:$0xff] }
 0x21a   :  { %v10218_v38 = vpop.f32.mrb[79].mxu1  ;;  %10595 = vmatmul.mubr.msk.f32.vlgmr.msra.gmra.mrb[184].mxu1 %vm393_vm2, %v9038_v21  ;;  %10526 = vmatprep.mubr.msk.f32.mxu0 %vm13284_vm0, %v16957_v0  ;;  %v3186_v9 = vsel %vm227_vm3, %v8994_v57, %v3136_v56 }
 0x21b   :  { %v14945_v16 = vadd.f32 %v1549_v36, %v1230_v10  ;;  %10597 = vmatprep.mubr.msk.f32.mxu1 %vm13284_vm0, %v16957_v0  ;;  %v3137_v10 = vrot.slane %v8996_v61, 2  ;;  %v3506_v38 = vrot.slane %v9045_v6, 2 }
 0x21c   :  { %v1185_v17 = vpop.f32.mrb[80].mxu0 }
 0x21d   :  { %v10150_v19 = vpop.f32.mrb[81].mxu0  ;;  %10527 = vmatmul.mubr.msk.f32.gmra.mrb[186].mxu0 %vm393_vm2, %v8990_v15  ;;  %v1231_v20 = vadd.f32 %v1185_v17, %v14572_v42  ;;  %v1554_v23 = vpop.f32.mrb[80].mxu1  ;;  %v9040_v42 = vld [vmem:[%s17076_s10 + $0x29] ss:$2 sm:$0xff]  ;;  %v8997_v15 = vld [vmem:[%s17076_s10 + $0x8c] ss:$2 sm:$0xff] }
 0x21e   :  { %v10221_v1 = vpop.f32.mrb[81].mxu1  ;;  %10598 = vmatmul.mubr.msk.f32.gmra.mrb[186].mxu1 %vm393_vm2, %v9039_v32  ;;  %10529 = vmatprep.mubr.msk.f32.mxu0 %vm13284_vm0, %v16957_v0  ;;  %v9046_v17 = vld [vmem:[%s17076_s10 + $0x8d] ss:$2 sm:$0xff] }
 0x21f   :  { %v14960_v27 = vadd.f32 %v1554_v23, %v1231_v20  ;;  %10600 = vmatprep.mubr.msk.f32.mxu1 %vm13284_vm0, %v16957_v0 }
 0x220   :  { %v1190_v47 = vpop.f32.mrb[82].mxu0 }
 0x221   :  { %v1232_v30 = vadd.f32 %v1190_v47, %v14592_v54  ;;  %v10153_v31 = vpop.f32.mrb[83].mxu0  ;;  %10530 = vmatmul.mubr.msk.f32.gmra.mrb[188].mxu0 %vm393_vm2, %v8991_v26  ;;  %v1559_v33 = vpop.f32.mrb[82].mxu1  ;;  %v9041_v54 = vld [vmem:[%s17076_s10 + $0x39] ss:$2 sm:$0xff]  ;;  %v3138_v26 = vsel %vm227_vm3, %v3136_v56, %v3137_v10 }
 0x222   :  { %v10224_v28 = vpop.f32.mrb[83].mxu1  ;;  %10601 = vmatmul.mubr.msk.f32.gmra.mrb[188].mxu1 %vm393_vm2, %v9040_v42  ;;  %10532 = vmatprep.mubr.msk.f32.mxu0 %vm13284_vm0, %v16957_v0  ;;  %v3139_v42 = vrot.slane %v8997_v15, 2  ;;  %v8998_v31 = vld [vmem:[%s17076_s10 + $0x9c] ss:$2 sm:$0xff] }
 0x223   :  { %v14975_v39 = vadd.f32 %v1559_v33, %v1232_v30  ;;  %10603 = vmatprep.mubr.msk.f32.mxu1 %vm13284_vm0, %v16957_v0  ;;  %v3508_v30 = vrot.slane %v9046_v17, 2  ;;  %v9047_v28 = vld [vmem:[%s17076_s10 + $0x9d] ss:$2 sm:$0xff] }
 0x224   :  { %v1195_v13 = vpop.f32.mrb[84].mxu0  ;;  %v3140_v44 = vsel %vm227_vm3, %v3137_v10, %v3139_v42 }
 0x225   :  { %v1233_v45 = vadd.f32 %v1195_v13, %v14615_v5  ;;  %v10156_v58 = vpop.f32.mrb[85].mxu0  ;;  %10533 = vmatmul.mubr.msk.f32.gmra.mrb[190].mxu0 %vm393_vm2, %v8992_v35  ;;  %v1564_v48 = vpop.f32.mrb[84].mxu1 }
 0x226   :  { %v10227_v49 = vpop.f32.mrb[85].mxu1  ;;  %10604 = vmatmul.mubr.msk.f32.gmra.mrb[190].mxu1 %vm393_vm2, %v9041_v54  ;;  %10535 = vmatprep.mubr.msk.f32.mxu0 %vm13284_vm0, %v16957_v0 }
 0x227   :  { %v14999_v5 = vadd.f32 %v1564_v48, %v1233_v45  ;;  %10606 = vmatprep.mubr.msk.f32.mxu1 %vm13284_vm0, %v16957_v0  ;;  %v3141_v45 = vrot.slane %v8998_v31, 2  ;;  %v3510_v48 = vrot.slane %v9047_v28, 2  ;;  %v8999_v49 = vld [vmem:[%s17076_s10 + $0xac] ss:$2 sm:$0xff] }
 0x228   :  { %v1200_v62 = vpop.f32.mrb[86].mxu0 }
 0x229   :  { %v1234_v3 = vadd.f32 %v1200_v62, %v14636_v22  ;;  %v10159_v4 = vpop.f32.mrb[87].mxu0  ;;  %10536 = vmatmul.mubr.msk.f32.gmra.mrb[192].mxu0 %vm393_vm2, %v8993_v50  ;;  %v1569_v21 = vpop.f32.mrb[86].mxu1  ;;  %v3555_v22 = vsel %vm227_vm3, %v9043_v12, %v3505_v59  ;;  %v3142_v62 = vsel %vm227_vm3, %v3139_v42, %v3141_v45  ;;  %v3143_v12 = vrot.slane %v8999_v49, 2 }
 0x22a   :  { %v10230_v52 = vpop.f32.mrb[87].mxu1  ;;  %10607 = vmatmul.mubr.msk.f32.gmra.mrb[192].mxu1 %vm393_vm2, %v9042_v40  ;;  %10538 = vmatprep.mubr.msk.f32.mxu0 %vm13284_vm0, %v16957_v0  ;;  %v9048_v40 = vld [vmem:[%s17076_s10 + $0xad] ss:$2 sm:$0xff]  ;;  %v9000_v4 = vld [vmem:[%s17076_s10 + $0xbc] ss:$2 sm:$0x3f] }
 0x22b   :  { %v15021_v36 = vadd.f32 %v1569_v21, %v1234_v3  ;;  %10609 = vmatprep.mubr.msk.f32.mxu1 %vm13284_vm0, %v16957_v0  ;;  %v3512_v3 = vrot.slane %v9048_v40, 2  ;;  %v9049_v52 = vld [vmem:[%s17076_s10 + $0xbd] ss:$2 sm:$0x3f]  ;;  %v3144_v15 = vsel %vm227_vm3, %v3141_v45, %v3143_v12 }
 0x22c   :  { %v1205_v32 = vpop.f32.mrb[88].mxu0 }
 0x22d   :  { %v1235_v19 = vadd.f32 %v1205_v32, %v14652_v37  ;;  %v10162_v20 = vpop.f32.mrb[89].mxu0  ;;  %10539 = vmatmul.mubr.msk.f32.gmra.mrb[194].mxu0 %vm393_vm2, %v3186_v9  ;;  %v1574_v23 = vpop.f32.mrb[88].mxu1  ;;  %v3507_v37 = vsel %vm227_vm3, %v3505_v59, %v3506_v38  ;;  %v3145_v32 = vrot.slane %v9000_v4, 2 }
 0x22e   :  { %v10233_v1 = vpop.f32.mrb[89].mxu1  ;;  %10610 = vmatmul.mubr.msk.f32.gmra.mrb[194].mxu1 %vm393_vm2, %v3555_v22  ;;  %10541 = vmatprep.mubr.msk.f32.mxu0 %vm13284_vm0, %v16957_v0  ;;  %v9001_v20 = vld [vmem:[%s17076_s10 + $0xd0] ss:$2 sm:$0xff] }
 0x22f   :  { %v15038_v47 = vadd.f32 %v1574_v23, %v1235_v19  ;;  %10612 = vmatprep.mubr.msk.f32.mxu1 %vm13284_vm0, %v16957_v0  ;;  %v3514_v19 = vrot.slane %v9049_v52, 2  ;;  %v9050_v1 = vld [vmem:[%s17076_s10 + $0xd1] ss:$2 sm:$0xff]  ;;  %v3146_v31 = vsel %vm227_vm3, %v3143_v12, %v3145_v32 }
 0x230   :  { %v1210_v33 = vpop.f32.mrb[90].mxu0 }
 0x231   :  { %v1236_v35 = vadd.f32 %v1210_v33, %v14668_v55  ;;  %v10165_v54 = vpop.f32.mrb[91].mxu0  ;;  %10542 = vmatmul.mubr.msk.f32.gmra.mrb[196].mxu0 %vm393_vm2, %v3138_v26  ;;  %v1579_v41 = vpop.f32.mrb[90].mxu1  ;;  %v3509_v55 = vsel %vm227_vm3, %v3506_v38, %v3508_v30  ;;  %v3155_v33 = vrot.slane %v9001_v20, 4 }
 0x232   :  { %v10236_v13 = vpop.f32.mrb[91].mxu1  ;;  %10613 = vmatmul.mubr.msk.f32.gmra.mrb[196].mxu1 %vm393_vm2, %v3507_v37  ;;  %10544 = vmatprep.mubr.msk.f32.mxu0 %vm13284_vm0, %v16957_v0  ;;  %v9002_v54 = vld [vmem:[%s17076_s10 + $0xe0] ss:$2 sm:$0xff] }
 0x233   :  { %v15055_v58 = vadd.f32 %v1579_v41, %v1236_v35  ;;  %10615 = vmatprep.mubr.msk.f32.mxu1 %vm13284_vm0, %v16957_v0  ;;  %v3524_v35 = vrot.slane %v9050_v1, 4  ;;  %v9051_v13 = vld [vmem:[%s17076_s10 + $0xe1] ss:$2 sm:$0xff]  ;;  %v3187_v49 = vsel %vm247_vm1, %v3145_v32, %v3155_v33 }
 0x234   :  { %v1838_v50 = vpop.f32.mrb[92].mxu0 }
 0x235   :  { %v1952_v56 = vadd.f32 %v1838_v50, %v14691_v11  ;;  %v10241_v57 = vpop.f32.mrb[93].mxu0  ;;  %10545 = vmatmul.mubr.msk.f32.gmra.mrb[198].mxu0 %vm393_vm2, %v3140_v44  ;;  %v2207_v59 = vpop.f32.mrb[92].mxu1  ;;  %v3511_v11 = vsel %vm227_vm3, %v3508_v30, %v3510_v48  ;;  %v3156_v50 = vrot.slane %v9002_v54, 4 }
 0x236   :  { %v10312_v61 = vpop.f32.mrb[93].mxu1  ;;  %10616 = vmatmul.mubr.msk.f32.gmra.mrb[198].mxu1 %vm393_vm2, %v3509_v55  ;;  %10547 = vmatprep.mubr.msk.f32.mxu0 %vm13284_vm0, %v16957_v0  ;;  %v9003_v57 = vld [vmem:[%s17076_s10 + $0xf0] ss:$2 sm:$0xff] }
 0x237   :  { %v15072_v6 = vadd.f32 %v2207_v59, %v1952_v56  ;;  %10618 = vmatprep.mubr.msk.f32.mxu1 %vm13284_vm0, %v16957_v0  ;;  %v3525_v56 = vrot.slane %v9051_v13, 4  ;;  %v9052_v61 = vld [vmem:[%s17076_s10 + $0xf1] ss:$2 sm:$0xff]  ;;  %v3157_v4 = vsel %vm247_vm1, %v3155_v33, %v3156_v50 }
 0x238   :  { %v1843_v21 = vpop.f32.mrb[94].mxu0 }
 0x239   :  { %v1953_v9 = vadd.f32 %v1843_v21, %v14708_v29  ;;  %v10244_v10 = vpop.f32.mrb[95].mxu0  ;;  %10548 = vmatmul.mubr.msk.f32.gmra.mrb[200].mxu0 %vm393_vm2, %v3142_v62  ;;  %v2212_v22 = vpop.f32.mrb[94].mxu1  ;;  %v3513_v29 = vsel %vm227_vm3, %v3510_v48, %v3512_v3  ;;  %v3158_v21 = vrot.slane %v9003_v57, 4 }
 0x23a   :  { %v10315_v38 = vpop.f32.mrb[95].mxu1  ;;  %10619 = vmatmul.mubr.msk.f32.gmra.mrb[200].mxu1 %vm393_vm2, %v3511_v11  ;;  %10550 = vmatprep.mubr.msk.f32.mxu0 %vm13284_vm0, %v16957_v0  ;;  %v9004_v10 = vld [vmem:[%s17076_s10 + $0x100] ss:$2 sm:$0xff] }
 0x23b   :  { %v15089_v17 = vadd.f32 %v2212_v22, %v1953_v9  ;;  %10621 = vmatprep.mubr.msk.f32.mxu1 %vm13284_vm0, %v16957_v0  ;;  %v3527_v9 = vrot.slane %v9052_v61, 4  ;;  %v9053_v38 = vld [vmem:[%s17076_s10 + $0x101] ss:$2 sm:$0xff]  ;;  %v3159_v20 = vsel %vm247_vm1, %v3156_v50, %v3158_v21 }
 0x23c   :  { %v1848_v23 = vpop.f32.mrb[96].mxu0 }
 0x23d   :  { %v1954_v26 = vadd.f32 %v1848_v23, %v14725_v46  ;;  %v10247_v42 = vpop.f32.mrb[97].mxu0  ;;  %10551 = vmatmul.mubr.msk.f32.gmra.mrb[202].mxu0 %vm393_vm2, %v3144_v15  ;;  %v2217_v37 = vpop.f32.mrb[96].mxu1  ;;  %v3515_v46 = vsel %vm227_vm3, %v3512_v3, %v3514_v19  ;;  %v3160_v23 = vrot.slane %v9004_v10, 4 }
 0x23e   :  { %v10318_v30 = vpop.f32.mrb[97].mxu1  ;;  %10622 = vmatmul.mubr.msk.f32.gmra.mrb[202].mxu1 %vm393_vm2, %v3513_v29  ;;  %10553 = vmatprep.mubr.msk.f32.mxu0 %vm13284_vm0, %v16957_v0  ;;  %v9005_v42 = vld [vmem:[%s17076_s10 + $0x110] ss:$2 sm:$0xff] }
 0x23f   :  { %v15106_v28 = vadd.f32 %v2217_v37, %v1954_v26  ;;  %10624 = vmatprep.mubr.msk.f32.mxu1 %vm13284_vm0, %v16957_v0  ;;  %v3529_v26 = vrot.slane %v9053_v38, 4  ;;  %v9054_v30 = vld [vmem:[%s17076_s10 + $0x111] ss:$2 sm:$0xff]  ;;  %v3161_v54 = vsel %vm247_vm1, %v3158_v21, %v3160_v23 }
 0x240   :  { %v1853_v41 = vpop.f32.mrb[98].mxu0 }
 0x241   :  { %v1955_v44 = vadd.f32 %v1853_v41, %v14742_v63  ;;  %v10250_v45 = vpop.f32.mrb[99].mxu0  ;;  %10554 = vmatmul.mubr.msk.f32.gmra.mrb[204].mxu0 %vm393_vm2, %v3146_v31  ;;  %v2222_v55 = vpop.f32.mrb[98].mxu1  ;;  %v3556_v63 = vsel %vm247_vm1, %v3514_v19, %v3524_v35  ;;  %v3162_v41 = vrot.slane %v9005_v42, 4  ;;  %v9089_v42 = vld [vmem:[%s17077_s29 + $0x88] sm:$0xff] }
 0x242   :  { %v10321_v48 = vpop.f32.mrb[99].mxu1  ;;  %10625 = vmatmul.mubr.msk.f32.gmra.mrb[204].mxu1 %vm393_vm2, %v3515_v46  ;;  %10556 = vmatprep.mubr.msk.f32.mxu0 %vm13284_vm0, %v16957_v0  ;;  %v9006_v45 = vld [vmem:[%s17076_s10 + $0x120] ss:$2 sm:$0x3f] }
 0x243   :  { %v15123_v40 = vadd.f32 %v2222_v55, %v1955_v44  ;;  %10627 = vmatprep.mubr.msk.f32.mxu1 %vm13284_vm0, %v16957_v0  ;;  %v3531_v44 = vrot.slane %v9054_v30, 4  ;;  %v9055_v48 = vld [vmem:[%s17076_s10 + $0x121] ss:$2 sm:$0x3f]  ;;  %v3163_v57 = vsel %vm247_vm1, %v3160_v23, %v3162_v41 }
 0x244   :  { %v1858_v59 = vpop.f32.mrb[100].mxu0 }
 0x245   :  { %v1956_v62 = vadd.f32 %v1858_v59, %v14759_v18  ;;  %v10253_v12 = vpop.f32.mrb[101].mxu0  ;;  %10557 = vmatmul.mubr.msk.f32.gmra.mrb[206].mxu0 %vm393_vm2, %v3187_v49  ;;  %v2227_v11 = vpop.f32.mrb[100].mxu1  ;;  %v3526_v18 = vsel %vm247_vm1, %v3524_v35, %v3525_v56  ;;  %v3164_v59 = vrot.slane %v9006_v45, 4 }
 0x246   :  { %v10324_v3 = vpop.f32.mrb[101].mxu1  ;;  %10628 = vmatmul.mubr.msk.f32.gmra.mrb[206].mxu1 %vm393_vm2, %v3556_v63  ;;  %10559 = vmatprep.mubr.msk.f32.mxu0 %vm13284_vm0, %v16957_v0  ;;  %v9007_v12 = vld [vmem:[%s17076_s10 + $0x134] ss:$2 sm:$0xff] }
 0x247   :  { %v15140_v52 = vadd.f32 %v2227_v11, %v1956_v62  ;;  %10630 = vmatprep.mubr.msk.f32.mxu1 %vm13284_vm0, %v16957_v0  ;;  %v3533_v62 = vrot.slane %v9055_v48, 4  ;;  %v9056_v3 = vld [vmem:[%s17076_s10 + $0x135] ss:$2 sm:$0xff]  ;;  %v3165_v10 = vsel %vm247_vm1, %v3162_v41, %v3164_v59  ;;  %v16959_v41 = vmov 0.0|0.0  }
 0x248   :  { %v1863_v22 = vpop.f32.mrb[102].mxu0  ;;  %11837 = vmatprep.subr.bf16.mxu0 %v16959_v41  ;;  %11861 = vmatprep.subr.bf16.mxu1 %v16959_v41 }
 0x249   :  { %v1957_v15 = vadd.f32 %v1863_v22, %v14776_v34  ;;  %v10256_v32 = vpop.f32.mrb[103].mxu0  ;;  %10560 = vmatmul.mubr.msk.f32.gmra.mrb[208].mxu0 %vm393_vm2, %v3157_v4  ;;  %v2232_v29 = vpop.f32.mrb[102].mxu1  ;;  %v3528_v34 = vsel %vm247_vm1, %v3525_v56, %v3527_v9  ;;  %v3174_v22 = vrot.slane %v9007_v12, 6  ;;  %v3959_v12 = vld [vmem:[%s17077_s29] sm:$0xff] }
 0x24a   :  { %v10327_v19 = vpop.f32.mrb[103].mxu1  ;;  %10631 = vmatmul.mubr.msk.f32.gmra.mrb[208].mxu1 %vm393_vm2, %v3526_v18  ;;  %10562 = vmatprep.mubr.msk.f32.mxu0 %vm13284_vm0, %v16957_v0  ;;  %v9008_v32 = vld [vmem:[%s17076_s10 + $0x144] ss:$2 sm:$0xff] }
 0x24b   :  { %v15157_v1 = vadd.f32 %v2232_v29, %v1957_v15  ;;  %10633 = vmatprep.mubr.msk.f32.mxu1 %vm13284_vm0, %v16957_v0  ;;  %v3543_v15 = vrot.slane %v9056_v3, 6  ;;  %v9057_v19 = vld [vmem:[%s17076_s10 + $0x145] ss:$2 sm:$0xff]  ;;  %v3175_v30 = vrot.slane %v9008_v32, 6  ;;  %v15288_v32 = vld [vmem:[%s17076_s10 + $0x174] ss:$2 sm:$0xff] }
 0x24c   :  { %v1868_v37 = vpop.f32.mrb[104].mxu0 }
 0x24d   :  { %v1958_v31 = vadd.f32 %v1868_v37, %v14793_v53  ;;  %v10259_v33 = vpop.f32.mrb[105].mxu0  ;;  %10563 = vmatmul.mubr.msk.f32.gmra.mrb[210].mxu0 %vm393_vm2, %v3159_v20  ;;  %v2237_v46 = vpop.f32.mrb[104].mxu1  ;;  %v3530_v53 = vsel %vm247_vm1, %v3527_v9, %v3529_v26 }
 0x24e   :  { %v10330_v35 = vpop.f32.mrb[105].mxu1  ;;  %10634 = vmatmul.mubr.msk.f32.gmra.mrb[210].mxu1 %vm393_vm2, %v3528_v34  ;;  %10565 = vmatprep.mubr.msk.f32.mxu0 %vm13284_vm0, %v16957_v0 }
 0x24f   :  { %v15174_v13 = vadd.f32 %v2237_v46, %v1958_v31  ;;  %10636 = vmatprep.mubr.msk.f32.mxu1 %vm13284_vm0, %v16957_v0  ;;  %v3557_v46 = vsel %vm267_vm4, %v3533_v62, %v3543_v15  ;;  %v3544_v35 = vrot.slane %v9057_v19, 6 }
 0x250   :  { %v1873_v55 = vpop.f32.mrb[106].mxu0 }
 0x251   :  { %v1959_v49 = vadd.f32 %v1873_v55, %v14810_v8  ;;  %v10262_v50 = vpop.f32.mrb[107].mxu0  ;;  %10566 = vmatmul.mubr.msk.f32.gmra.mrb[212].mxu0 %vm393_vm2, %v3161_v54  ;;  %v2242_v63 = vpop.f32.mrb[106].mxu1  ;;  %v3532_v8 = vsel %vm247_vm1, %v3529_v26, %v3531_v44  ;;  %v9088_v26 = vld [vmem:[%s17077_s29 + $0x80] sm:$0xff] }
 0x252   :  { %v10333_v56 = vpop.f32.mrb[107].mxu1  ;;  %10637 = vmatmul.mubr.msk.f32.gmra.mrb[212].mxu1 %vm393_vm2, %v3530_v53  ;;  %10568 = vmatprep.mubr.msk.f32.mxu0 %vm13284_vm0, %v16957_v0  ;;  %v11838_v31 = vpack.c.bf16 %v9089_v42, %v9088_v26  ;;  %v9009_v54 = vld [vmem:[%s17076_s10 + $0x154] ss:$2 sm:$0xff]  ;;  %v3176_v50 = vsel %vm267_vm4, %v3174_v22, %v3175_v30 }
 0x253   :  { %v15191_v61 = vadd.f32 %v2242_v63, %v1959_v49  ;;  %10639 = vmatprep.mubr.msk.f32.mxu1 %vm13284_vm0, %v16957_v0  ;;  %v3177_v63 = vrot.slane %v9009_v54, 6 }
 0x254   :  { %v1878_v11 = vpop.f32.mrb[108].mxu0  ;;  %11839 = vmatpush3.bf16.msra.mxu0 %v11838_v31 }
 0x255   :  { %v1960_v4 = vadd.f32 %v1878_v11, %v14827_v24  ;;  %v10265_v21 = vpop.f32.mrb[109].mxu0  ;;  %10569 = vmatmul.mubr.msk.f32.gmra.mrb[214].mxu0 %vm393_vm2, %v3163_v57  ;;  %v2247_v18 = vpop.f32.mrb[108].mxu1  ;;  %v3534_v24 = vsel %vm247_vm1, %v3531_v44, %v3533_v62  ;;  %v9058_v44 = vld [vmem:[%s17076_s10 + $0x155] ss:$2 sm:$0xff]  ;;  %11840 = vmatprep.subr.bf16.mxu0 %v16959_v41  ;;  %v15264_v62 = vld [vmem:[%s17076_s10 + $0x165] ss:$2 sm:$0xff] }
 0x256   :  { %v10336_v9 = vpop.f32.mrb[109].mxu1  ;;  %10640 = vmatmul.mubr.msk.f32.gmra.mrb[214].mxu1 %vm393_vm2, %v3532_v8  ;;  %10571 = vmatprep.mubr.msk.f32.mxu0 %vm13284_vm0, %v16957_v0  ;;  %v3546_v57 = vrot.slane %v9058_v44, 6  ;;  %v3960_v11 = vld [vmem:[%s17077_s29 + $0x8] sm:$0xff] }
 0x257   :  { %v15208_v38 = vadd.f32 %v2247_v18, %v1960_v4  ;;  %10642 = vmatprep.mubr.msk.f32.mxu1 %vm13284_vm0, %v16957_v0  ;;  %v11862_v18 = vpack.c.bf16 %v3960_v11, %v3959_v12 }
 0x258   :  { %v1883_v29 = vpop.f32.mrb[110].mxu0 }
 0x259   :  { %v1961_v20 = vadd.f32 %v1883_v29, %v14844_v43  ;;  %v10268_v23 = vpop.f32.mrb[111].mxu0  ;;  %10572 = vmatmul.mubr.msk.f32.gmra.mrb[216].mxu0 %vm393_vm2, %v3165_v10  ;;  %v2252_v34 = vpop.f32.mrb[110].mxu1  ;;  %v3188_v43 = vsel %vm267_vm4, %v3164_v59, %v3174_v22  ;;  %v15259_v59 = vld [vmem:[%s17076_s10 + $0x164] ss:$2 sm:$0xff]  ;;  %v3178_v10 = vsel %vm267_vm4, %v3175_v30, %v3177_v63  ;;  %v15293_v29 = vld [vmem:[%s17076_s10 + $0x175] ss:$2 sm:$0xff]  ;;  %11863 = vmatpush3.bf16.msra.mxu1 %v11862_v18 }
 0x25a   :  { %v10339_v37 = vpop.f32.mrb[111].mxu1  ;;  %10643 = vmatmul.mubr.msk.f32.gmra.mrb[216].mxu1 %vm393_vm2, %v3534_v24  ;;  %10574 = vmatprep.mubr.msk.f32.mxu0 %vm13284_vm0, %v16957_v0  ;;  %v3179_v22 = vrot.slane %v15259_v59, 6  ;;  %v9091_v23 = vld [vmem:[%s17077_s29 + $0x98] sm:$0xff] }
 0x25b   :  { %v15231_v33 = vadd.f32 %v2252_v34, %v1961_v20  ;;  %10645 = vmatprep.mubr.msk.f32.mxu1 %vm13284_vm0, %v16957_v0  ;;  %v9090_v20 = vld [vmem:[%s17077_s29 + $0x90] sm:$0xff]  ;;  %11864 = vmatprep.subr.bf16.mxu1 %v16959_v41  ;;  %v3962_v30 = vld [vmem:[%s17077_s29 + $0x18] sm:$0xff] }
 0x25c   :  { %v1888_v53 = vpop.f32.mrb[112].mxu0  ;;  %v3961_v34 = vld [vmem:[%s17077_s29 + $0x10] sm:$0xff] }
 0x25d   :  { %v1962_v45 = vadd.f32 %v1888_v53, %v14861_v25  ;;  %v10271_v55 = vpop.f32.mrb[113].mxu0  ;;  %10575 = vmatmul.mubr.msk.f32.gmra.mrb[218].mxu0 %vm393_vm2, %v3188_v43  ;;  %v2257_v48 = vpop.f32.mrb[112].mxu1  ;;  %v3545_v25 = vsel %vm267_vm4, %v3543_v15, %v3544_v35  ;;  %v3548_v15 = vrot.slane %v15264_v62, 6  ;;  %v11841_v43 = vpack.c.bf16 %v9091_v23, %v9090_v20  ;;  %v3964_v62 = vld [vmem:[%s17077_s29 + $0x28] sm:$0xff]  ;;  %v3966_v20 = vld [vmem:[%s17077_s29 + $0x38] sm:$0xff] }
 0x25e   :  { %v10342_v49 = vpop.f32.mrb[113].mxu1  ;;  %10646 = vmatmul.mubr.msk.f32.gmra.mrb[218].mxu1 %vm393_vm2, %v3557_v46  ;;  %10577 = vmatprep.mubr.msk.f32.mxu0 %vm13284_vm0, %v16957_v0  ;;  %v3180_v46 = vsel %vm267_vm4, %v3177_v63, %v3179_v22  ;;  %v11865_v54 = vpack.c.bf16 %v3962_v30, %v3961_v34  ;;  %v9061_v55 = vld [vmem:[%s17076_s10 + $0x185] ss:$2 sm:$0x3f] }
 0x25f   :  { %v15251_v56 = vadd.f32 %v2257_v48, %v1962_v45  ;;  %10648 = vmatprep.mubr.msk.f32.mxu1 %vm13284_vm0, %v16957_v0  ;;  %v3549_v44 = vsel %vm267_vm4, %v3546_v57, %v3548_v15  ;;  %v9012_v45 = vld [vmem:[%s17076_s10 + $0x184] ss:$2 sm:$0x3f]  ;;  %11842 = vmatpush3.bf16.msra.mxu0 %v11841_v43  ;;  %v3552_v18 = vrot.slane %v9061_v55, 6  ;;  %s17078_s10 = sld [smem:[#allocation87_spill]] }
 0x260   :  { %v1893_v8 = vpop.f32.mrb[114].mxu0  ;;  %11866 = vmatpush3.bf16.msra.mxu1 %v11865_v54  ;;  %11843 = vmatprep.subr.bf16.mxu0 %v16959_v41  ;;  %v9092_v49 = vld [vmem:[%s17077_s29 + $0xa0] sm:$0xff]  ;;  %v9097_v30 = vld [vmem:[%s17077_s29 + $0xc8] sm:$0xff] }
 0x261   :  { %v1963_v3 = vadd.f32 %v1893_v8, %v14878_v14  ;;  %v10274_v4 = vpop.f32.mrb[115].mxu0  ;;  %10578 = vmatmul.mubr.msk.f32.gmra.mrb[220].mxu0 %vm393_vm2, %v3176_v50  ;;  %v2262_v21 = vpop.f32.mrb[114].mxu1  ;;  %v3547_v14 = vsel %vm267_vm4, %v3544_v35, %v3546_v57  ;;  %v3181_v35 = vrot.slane %v15288_v32, 6  ;;  %v9093_v50 = vld [vmem:[%s17077_s29 + $0xa8] sm:$0xff]  ;;  %v3963_v63 = vld [vmem:[%s17077_s29 + $0x20] sm:$0xff]  ;;  %11867 = vmatprep.subr.bf16.mxu1 %v16959_v41 }
 0x262   :  { %v10345_v9 = vpop.f32.mrb[115].mxu1  ;;  %10649 = vmatmul.mubr.msk.f32.gmra.mrb[220].mxu1 %vm393_vm2, %v3545_v25  ;;  %10580 = vmatprep.mubr.msk.f32.mxu0 %vm13284_vm0, %v16957_v0  ;;  %v11844_v8 = vpack.c.bf16 %v9093_v50, %v9092_v49  ;;  %v9096_v43 = vld [vmem:[%s17077_s29 + $0xc0] sm:$0xff]  ;;  %v9098_v49 = vld [vmem:[%s17077_s29 + $0xd0] sm:$0xff]  ;;  %v9099_v50 = vld [vmem:[%s17077_s29 + $0xd8] sm:$0xff] }
 0x263   :  { %v15279_v24 = vadd.f32 %v2262_v21, %v1963_v3  ;;  %10651 = vmatprep.mubr.msk.f32.mxu1 %vm13284_vm0, %v16957_v0  ;;  %v3182_v11 = vsel %vm267_vm4, %v3179_v22, %v3181_v35  ;;  %v11868_v3 = vpack.c.bf16 %v3964_v62, %v3963_v63  ;;  %v9095_v22 = vld [vmem:[%s17077_s29 + $0xb8] sm:$0xff]  ;;  %v11850_v54 = vpack.c.bf16 %v9097_v30, %v9096_v43  ;;  %v3969_v63 = vld [vmem:[%s17077_s29 + $0x50] sm:$0xff] }
 0x264   :  { %v1898_v19 = vpop.f32.mrb[116].mxu0  ;;  %11845 = vmatpush3.bf16.msra.mxu0 %v11844_v8  ;;  %v11853_v8 = vpack.c.bf16 %v9099_v50, %v9098_v49  ;;  %v3970_v62 = vld [vmem:[%s17077_s29 + $0x58] sm:$0xff] }
 0x265   :  { %v1964_v26 = vadd.f32 %v1898_v19, %v14895_v51  ;;  %v10277_v42 = vpop.f32.mrb[117].mxu0  ;;  %10581 = vmatmul.mubr.msk.f32.gmra.mrb[222].mxu0 %vm393_vm2, %v3178_v10  ;;  %v2267_v37 = vpop.f32.mrb[116].mxu1  ;;  %v3550_v51 = vrot.slane %v15293_v29, 6  ;;  %11869 = vmatpush3.bf16.msra.mxu1 %v11868_v3  ;;  %v9094_v10 = vld [vmem:[%s17077_s29 + $0xb0] sm:$0xff]  ;;  %v3974_v30 = vld [vmem:[%s17077_s29 + $0x78] sm:$0xff] }
 0x266   :  { %v10348_v31 = vpop.f32.mrb[117].mxu1  ;;  %10652 = vmatmul.mubr.msk.f32.gmra.mrb[222].mxu1 %vm393_vm2, %v3547_v14  ;;  %10583 = vmatprep.mubr.msk.f32.mxu0 %vm13284_vm0, %v16957_v0  ;;  %v3965_v14 = vld [vmem:[%s17077_s29 + $0x30] sm:$0xff]  ;;  %v11847_v19 = vpack.c.bf16 %v9095_v22, %v9094_v10 }
 0x267   :  { %v15316_v53 = vadd.f32 %v2267_v37, %v1964_v26  ;;  %10654 = vmatprep.mubr.msk.f32.mxu1 %vm13284_vm0, %v16957_v0  ;;  %v3551_v21 = vsel %vm267_vm4, %v3548_v15, %v3550_v51  ;;  %11846 = vmatprep.subr.bf16.mxu0 %v16959_v41  ;;  %v3553_v42 = vsel %vm267_vm4, %v3550_v51, %v3552_v18  ;;  %v3967_v31 = vld [vmem:[%s17077_s29 + $0x40] sm:$0xff] }
 0x268   :  { %v1903_v48 = vpop.f32.mrb[118].mxu0  ;;  %11870 = vmatprep.subr.bf16.mxu1 %v16959_v41  ;;  %11848 = vmatpush3.bf16.msra.mxu0 %v11847_v19  ;;  %v3971_v18 = vld [vmem:[%s17077_s29 + $0x60] sm:$0xff] }
 0x269   :  { %v1965_v25 = vadd.f32 %v1903_v48, %v14909_v2  ;;  %v10280_v57 = vpop.f32.mrb[119].mxu0  ;;  %10584 = vmatmul.mubr.msk.f32.gmra.mrb[224].mxu0 %vm393_vm2, %v3180_v46  ;;  %v2272_v59 = vpop.f32.mrb[118].mxu1  ;;  %v3183_v2 = vrot.slane %v9012_v45, 6  ;;  %11849 = vmatprep.subr.bf16.mxu0 %v16959_v41 }
 0x26a   :  { %v10351_v12 = vpop.f32.mrb[119].mxu1  ;;  %10655 = vmatmul.mubr.msk.f32.gmra.mrb[224].mxu1 %vm393_vm2, %v3549_v44  ;;  %10586 = vmatprep.mubr.msk.f32.mxu0 %vm13284_vm0, %v16957_v0  ;;  %v3968_v44 = vld [vmem:[%s17077_s29 + $0x48] sm:$0xff] }
 0x26b   :  { %v15347_v4 = vadd.f32 %v2272_v59, %v1965_v25  ;;  %10657 = vmatprep.mubr.msk.f32.mxu1 %vm13284_vm0, %v16957_v0  ;;  %v3184_v34 = vsel %vm267_vm4, %v3181_v35, %v3183_v2  ;;  %v11874_v55 = vpack.c.bf16 %v3968_v44, %v3967_v31 }
 0x26c   :  { %v1908_v9 = vpop.f32.mrb[120].mxu0  ;;  %11851 = vmatpush3.bf16.msra.mxu0 %v11850_v54 }
 0x26d   :  { %v1966_v15 = vadd.f32 %v1908_v9, %v14920_v60  ;;  %v10283_v32 = vpop.f32.mrb[121].mxu0  ;;  %10587 = vmatmul.mubr.msk.f32.gmra.mrb[226].mxu0 %vm393_vm2, %v3182_v11  ;;  %v2277_v29 = vpop.f32.mrb[120].mxu1  ;;  %v11871_v60 = vpack.c.bf16 %v3966_v20, %v3965_v14  ;;  %11852 = vmatprep.subr.bf16.mxu0 %v16959_v41  ;;  %v11877_v11 = vpack.c.bf16 %v3970_v62, %v3969_v63 }
 0x26e   :  { %v10354_v23 = vpop.f32.mrb[121].mxu1  ;;  %10658 = vmatmul.mubr.msk.f32.gmra.mrb[226].mxu1 %vm393_vm2, %v3551_v21  ;;  %10589 = vmatprep.mubr.msk.f32.mxu0 %vm13284_vm0, %v16957_v0  ;;  %v9101_v21 = vld [vmem:[%s17077_s29 + $0xe8] sm:$0xff] }
 0x26f   :  { %v15372_v26 = vadd.f32 %v2277_v29, %v1966_v15  ;;  %10660 = vmatprep.mubr.msk.f32.mxu1 %vm13284_vm0, %v16957_v0  ;;  %11872 = vmatpush3.bf16.msra.mxu1 %v11871_v60  ;;  %v3972_v15 = vld [vmem:[%s17077_s29 + $0x68] sm:$0xff]  ;;  %v9103_v23 = vld [vmem:[%s17077_s29 + $0xf8] sm:$0xff] }
 0x270   :  { %v1913_v37 = vpop.f32.mrb[122].mxu0  ;;  %11873 = vmatprep.subr.bf16.mxu1 %v16959_v41  ;;  %11854 = vmatpush3.bf16.msra.mxu0 %v11853_v8  ;;  %v11880_v29 = vpack.c.bf16 %v3972_v15, %v3971_v18 }
 0x271   :  { %v1967_v46 = vadd.f32 %v1913_v37, %v14930_v7  ;;  %v10286_v35 = vpop.f32.mrb[123].mxu0  ;;  %10590 = vmatmul.mubr.msk.f32.gmra.mrb[228].mxu0 %vm393_vm2, %v3184_v34  ;;  %v2282_v51 = vpop.f32.mrb[122].mxu1  ;;  %11855 = vmatprep.subr.bf16.mxu0 %v16959_v41  ;;  %v3973_v34 = vld [vmem:[%s17077_s29 + $0x70] sm:$0xff] }
 0x272   :  { %v10357_v45 = vpop.f32.mrb[123].mxu1  ;;  %10661 = vmatmul.mubr.msk.f32.gmra.mrb[228].mxu1 %vm393_vm2, %v3553_v42  ;;  %10695 = vmatprep.mubr.msk.f32.mxu0 %vm13284_vm0, %v16957_v0 }
 0x273   :  { %v15396_v48 = vadd.f32 %v2282_v51, %v1967_v46  ;;  %10760 = vmatprep.mubr.msk.f32.mxu1 %vm13284_vm0, %v16957_v0  ;;  %11875 = vmatpush3.bf16.msra.mxu1 %v11874_v55  ;;  %v11883_v46 = vpack.c.bf16 %v3974_v30, %v3973_v34 }
 0x274   :  { %v1918_v7 = vpop.f32.mrb[124].mxu0  ;;  %11876 = vmatprep.subr.bf16.mxu1 %v16959_v41 }
 0x275   :  { %v1968_v25 = vadd.f32 %v1918_v7, %v14945_v16  ;;  %v10289_v57 = vpop.f32.mrb[125].mxu0  ;;  %v2287_v59 = vpop.f32.mrb[124].mxu1  ;;  %v9100_v16 = vld [vmem:[%s17077_s29 + $0xe0] sm:$0xff] }
 0x276   :  { %v10360_v12 = vpop.f32.mrb[125].mxu1  ;;  %v11856_v14 = vpack.c.bf16 %v9101_v21, %v9100_v16 }
 0x277   :  { %v15415_v2 = vadd.f32 %v2287_v59, %v1968_v25  ;;  %11878 = vmatpush3.bf16.msra.mxu1 %v11877_v11 }
 0x278   :  { %v1923_v3 = vpop.f32.mrb[126].mxu0  ;;  %11879 = vmatprep.subr.bf16.mxu1 %v16959_v41  ;;  %11857 = vmatpush3.bf16.msra.mxu0 %v11856_v14 }
 0x279   :  { %v1969_v9 = vadd.f32 %v1923_v3, %v14960_v27  ;;  %v10292_v10 = vpop.f32.mrb[127].mxu0  ;;  %v2292_v22 = vpop.f32.mrb[126].mxu1  ;;  %11858 = vmatprep.subr.bf16.mxu0 %v16959_v41  ;;  %v9102_v27 = vld [vmem:[%s17077_s29 + $0xf0] sm:$0xff] }
 0x27a   :  { %v10363_v32 = vpop.f32.mrb[127].mxu1  ;;  %v11859_v43 = vpack.c.bf16 %v9103_v23, %v9102_v27 }
 0x27b   :  { %v15432_v19 = vadd.f32 %v2292_v22, %v1969_v9  ;;  %11881 = vmatpush3.bf16.msra.mxu1 %v11880_v29 }
 0x27c   :  { %v1928_v20 = vpop.f32.mrb[128].mxu0  ;;  %11882 = vmatprep.subr.bf16.mxu1 %v16959_v41  ;;  %11860 = vmatpush3.bf16.msra.mxu0 %v11859_v43 }
 0x27d   :  { %v1970_v60 = vadd.f32 %v1928_v20, %v14975_v39  ;;  %v10295_v42 = vpop.f32.mrb[129].mxu0  ;;  %v2297_v37 = vpop.f32.mrb[128].mxu1  ;;  %11885 = vmatprep.subr.bf16.mxu0 %v16959_v41 }
 0x27e   :  { %v10366_v31 = vpop.f32.mrb[129].mxu1 }
 0x27f   :  { %v15449_v35 = vadd.f32 %v2297_v37, %v1970_v60  ;;  %11884 = vmatpush3.bf16.msra.mxu1 %v11883_v46 }
 0x280   :  { %v1933_v51 = vpop.f32.mrb[130].mxu0  ;;  %11909 = vmatprep.subr.bf16.mxu1 %v16959_v41 }
 0x281   :  { %v1971_v39 = vadd.f32 %v1933_v51, %v14999_v5  ;;  %v10298_v54 = vpop.f32.mrb[131].mxu0  ;;  %v2302_v44 = vpop.f32.mrb[130].mxu1 }
 0x282   :  { %v10369_v45 = vpop.f32.mrb[131].mxu1 }
 0x283   :  { %v15454_v55 = vadd.f32 %v2302_v44, %v1971_v39 }
 0x284   :  { %v1938_v7 = vpop.f32.mrb[132].mxu0 }
 0x285   :  { %v1972_v49 = vadd.f32 %v1938_v7, %v15021_v36  ;;  %v10301_v50 = vpop.f32.mrb[133].mxu0  ;;  %v2307_v63 = vpop.f32.mrb[132].mxu1 }
 0x286   :  { %v10372_v25 = vpop.f32.mrb[133].mxu1 }
 0x287   :  { %v15457_v57 = vadd.f32 %v2307_v63, %v1972_v49 }
 0x288   :  { %v1943_v59 = vpop.f32.mrb[134].mxu0 }
 0x289   :  { %v1973_v8 = vadd.f32 %v1943_v59, %v15038_v47  ;;  %v10304_v62 = vpop.f32.mrb[135].mxu0  ;;  %v2312_v5 = vpop.f32.mrb[134].mxu1 }
 0x28a   :  { %v10375_v12 = vpop.f32.mrb[135].mxu1 }
 0x28b   :  { %v15460_v11 = vadd.f32 %v2312_v5, %v1973_v8 }
 0x28c   :  { %v1948_v3 = vpop.f32.mrb[136].mxu0 }
 0x28d   :  { %v1974_v16 = vadd.f32 %v1948_v3, %v15055_v58  ;;  %v10307_v21 = vpop.f32.mrb[137].mxu0  ;;  %v2317_v18 = vpop.f32.mrb[136].mxu1 }
 0x28e   :  { %v10378_v9 = vpop.f32.mrb[137].mxu1 }
 0x28f   :  { %v15463_v36 = vadd.f32 %v2317_v18, %v1974_v16 }
 0x290   :  { %v2576_v10 = vpop.f32.mrb[138].mxu0 }
 0x291   :  { %v2690_v22 = vadd.f32 %v2576_v10, %v15072_v6  ;;  %v10383_v14 = vpop.f32.mrb[139].mxu0  ;;  %v2945_v15 = vpop.f32.mrb[138].mxu1 }
 0x292   :  { %v10454_v32 = vpop.f32.mrb[139].mxu1 }
 0x293   :  { %v15466_v47 = vadd.f32 %v2945_v15, %v2690_v22 }
 0x294   :  { %v2581_v29 = vpop.f32.mrb[140].mxu0 }
 0x295   :  { %v2691_v20 = vadd.f32 %v2581_v29, %v15089_v17  ;;  %v10386_v27 = vpop.f32.mrb[141].mxu0  ;;  %v2950_v23 = vpop.f32.mrb[140].mxu1 }
 0x296   :  { %v10457_v34 = vpop.f32.mrb[141].mxu1 }
 0x297   :  { %v15469_v58 = vadd.f32 %v2950_v23, %v2691_v20 }
 0x298   :  { %v2586_v60 = vpop.f32.mrb[142].mxu0 }
 0x299   :  { %v2692_v42 = vadd.f32 %v2586_v60, %v15106_v28  ;;  %v10389_v37 = vpop.f32.mrb[143].mxu0  ;;  %v2955_v43 = vpop.f32.mrb[142].mxu1 }
 0x29a   :  { %v10460_v30 = vpop.f32.mrb[143].mxu1 }
 0x29b   :  { %v15472_v6 = vadd.f32 %v2955_v43, %v2692_v42 }
 0x29c   :  { %v2591_v31 = vpop.f32.mrb[144].mxu0 }
 0x29d   :  { %v2693_v46 = vadd.f32 %v2591_v31, %v15123_v40  ;;  %v10392_v51 = vpop.f32.mrb[145].mxu0  ;;  %v2960_v39 = vpop.f32.mrb[144].mxu1 }
 0x29e   :  { %v10463_v54 = vpop.f32.mrb[145].mxu1 }
 0x29f   :  { %v15475_v17 = vadd.f32 %v2960_v39, %v2693_v46 }
 0x2a0   :  { %v2596_v44 = vpop.f32.mrb[146].mxu0 }
 0x2a1   :  { %v2694_v45 = vadd.f32 %v2596_v44, %v15140_v52  ;;  %v10395_v7 = vpop.f32.mrb[147].mxu0  ;;  %v2965_v49 = vpop.f32.mrb[146].mxu1 }
 0x2a2   :  { %v10466_v50 = vpop.f32.mrb[147].mxu1 }
 0x2a3   :  { %v15478_v28 = vadd.f32 %v2965_v49, %v2694_v45 }
 0x2a4   :  { %v2601_v63 = vpop.f32.mrb[148].mxu0 }
 0x2a5   :  { %v2695_v25 = vadd.f32 %v2601_v63, %v15157_v1  ;;  %v10398_v59 = vpop.f32.mrb[149].mxu0  ;;  %v2970_v8 = vpop.f32.mrb[148].mxu1 }
 0x2a6   :  { %v10469_v62 = vpop.f32.mrb[149].mxu1 }
 0x2a7   :  { %v15481_v40 = vadd.f32 %v2970_v8, %v2695_v25 }
 0x2a8   :  { %v2606_v5 = vpop.f32.mrb[150].mxu0 }
 0x2a9   :  { %v2696_v12 = vadd.f32 %v2606_v5, %v15174_v13  ;;  %v10401_v3 = vpop.f32.mrb[151].mxu0  ;;  %v2975_v16 = vpop.f32.mrb[150].mxu1 }
 0x2aa   :  { %v10472_v21 = vpop.f32.mrb[151].mxu1 }
 0x2ab   :  { %v15484_v52 = vadd.f32 %v2975_v16, %v2696_v12 }
 0x2ac   :  { %v2611_v18 = vpop.f32.mrb[152].mxu0 }
 0x2ad   :  { %v2697_v9 = vadd.f32 %v2611_v18, %v15191_v61  ;;  %v10404_v10 = vpop.f32.mrb[153].mxu0  ;;  %v2980_v22 = vpop.f32.mrb[152].mxu1 }
 0x2ae   :  { %v10475_v14 = vpop.f32.mrb[153].mxu1 }
 0x2af   :  { %v15487_v1 = vadd.f32 %v2980_v22, %v2697_v9 }
 0x2b0   :  { %v2616_v15 = vpop.f32.mrb[154].mxu0 }
 0x2b1   :  { %v2698_v32 = vadd.f32 %v2616_v15, %v15208_v38  ;;  %v10407_v29 = vpop.f32.mrb[155].mxu0  ;;  %v2985_v20 = vpop.f32.mrb[154].mxu1 }
 0x2b2   :  { %v10478_v27 = vpop.f32.mrb[155].mxu1 }
 0x2b3   :  { %v15490_v13 = vadd.f32 %v2985_v20, %v2698_v32 }
 0x2b4   :  { %v2621_v23 = vpop.f32.mrb[156].mxu0 }
 0x2b5   :  { %v2699_v34 = vadd.f32 %v2621_v23, %v15231_v33  ;;  %v10410_v60 = vpop.f32.mrb[157].mxu0  ;;  %v2990_v42 = vpop.f32.mrb[156].mxu1 }
 0x2b6   :  { %v10481_v37 = vpop.f32.mrb[157].mxu1 }
 0x2b7   :  { %v15493_v61 = vadd.f32 %v2990_v42, %v2699_v34 }
 0x2b8   :  { %v2626_v43 = vpop.f32.mrb[158].mxu0 }
 0x2b9   :  { %v2700_v30 = vadd.f32 %v2626_v43, %v15251_v56  ;;  %v10413_v31 = vpop.f32.mrb[159].mxu0  ;;  %v2995_v46 = vpop.f32.mrb[158].mxu1 }
 0x2ba   :  { %v10484_v51 = vpop.f32.mrb[159].mxu1 }
 0x2bb   :  { %v15496_v38 = vadd.f32 %v2995_v46, %v2700_v30 }
 0x2bc   :  { %v2631_v39 = vpop.f32.mrb[160].mxu0 }
 0x2bd   :  { %v2701_v54 = vadd.f32 %v2631_v39, %v15279_v24  ;;  %v10416_v44 = vpop.f32.mrb[161].mxu0  ;;  %v3000_v45 = vpop.f32.mrb[160].mxu1 }
 0x2be   :  { %v10487_v7 = vpop.f32.mrb[161].mxu1 }
 0x2bf   :  { %v15499_v33 = vadd.f32 %v3000_v45, %v2701_v54 }
 0x2c0   :  { %v2636_v49 = vpop.f32.mrb[162].mxu0 }
 0x2c1   :  { %v2702_v50 = vadd.f32 %v2636_v49, %v15316_v53  ;;  %v10419_v63 = vpop.f32.mrb[163].mxu0  ;;  %v3005_v25 = vpop.f32.mrb[162].mxu1 }
 0x2c2   :  { %v10490_v59 = vpop.f32.mrb[163].mxu1 }
 0x2c3   :  { %v15502_v56 = vadd.f32 %v3005_v25, %v2702_v50 }
 0x2c4   :  { %v2641_v8 = vpop.f32.mrb[164].mxu0 }
 0x2c5   :  { %v2703_v62 = vadd.f32 %v2641_v8, %v15347_v4  ;;  %v10422_v5 = vpop.f32.mrb[165].mxu0  ;;  %v3010_v12 = vpop.f32.mrb[164].mxu1 }
 0x2c6   :  { %v10493_v3 = vpop.f32.mrb[165].mxu1 }
 0x2c7   :  { %v15505_v24 = vadd.f32 %v3010_v12, %v2703_v62 }
 0x2c8   :  { %v2646_v16 = vpop.f32.mrb[166].mxu0 }
 0x2c9   :  { %v2704_v21 = vadd.f32 %v2646_v16, %v15372_v26  ;;  %v10425_v18 = vpop.f32.mrb[167].mxu0  ;;  %v3015_v9 = vpop.f32.mrb[166].mxu1 }
 0x2ca   :  { %v10496_v10 = vpop.f32.mrb[167].mxu1 }
 0x2cb   :  { %v15508_v53 = vadd.f32 %v3015_v9, %v2704_v21 }
 0x2cc   :  { %v2651_v22 = vpop.f32.mrb[168].mxu0 }
 0x2cd   :  { %v2705_v14 = vadd.f32 %v2651_v22, %v15396_v48  ;;  %v10428_v15 = vpop.f32.mrb[169].mxu0  ;;  %v3020_v32 = vpop.f32.mrb[168].mxu1 }
 0x2ce   :  { %v10499_v29 = vpop.f32.mrb[169].mxu1 }
 0x2cf   :  { %v15511_v4 = vadd.f32 %v3020_v32, %v2705_v14 }
 0x2d0   :  { %v2656_v20 = vpop.f32.mrb[170].mxu0 }
 0x2d1   :  { %v2706_v27 = vadd.f32 %v2656_v20, %v15415_v2  ;;  %v10431_v23 = vpop.f32.mrb[171].mxu0  ;;  %v3025_v34 = vpop.f32.mrb[170].mxu1 }
 0x2d2   :  { %v10502_v60 = vpop.f32.mrb[171].mxu1 }
 0x2d3   :  { %v15514_v26 = vadd.f32 %v3025_v34, %v2706_v27 }
 0x2d4   :  { %v2661_v42 = vpop.f32.mrb[172].mxu0 }
 0x2d5   :  { %v2707_v37 = vadd.f32 %v2661_v42, %v15432_v19  ;;  %v10434_v43 = vpop.f32.mrb[173].mxu0  ;;  %v3030_v30 = vpop.f32.mrb[172].mxu1 }
 0x2d6   :  { %v10505_v31 = vpop.f32.mrb[173].mxu1 }
 0x2d7   :  { %v15517_v48 = vadd.f32 %v3030_v30, %v2707_v37 }
 0x2d8   :  { %v2666_v46 = vpop.f32.mrb[174].mxu0 }
 0x2d9   :  { %v2708_v51 = vadd.f32 %v2666_v46, %v15449_v35  ;;  %v10437_v39 = vpop.f32.mrb[175].mxu0  ;;  %v3035_v54 = vpop.f32.mrb[174].mxu1 }
 0x2da   :  { %v10508_v44 = vpop.f32.mrb[175].mxu1 }
 0x2db   :  { %v15520_v2 = vadd.f32 %v3035_v54, %v2708_v51 }
 0x2dc   :  { %v2671_v45 = vpop.f32.mrb[176].mxu0 }
 0x2dd   :  { %v2709_v7 = vadd.f32 %v2671_v45, %v15454_v55  ;;  %v10440_v49 = vpop.f32.mrb[177].mxu0  ;;  %v3040_v50 = vpop.f32.mrb[176].mxu1 }
 0x2de   :  { %v10511_v63 = vpop.f32.mrb[177].mxu1 }
 0x2df   :  { %v15523_v19 = vadd.f32 %v3040_v50, %v2709_v7 }
 0x2e0   :  { %v2676_v25 = vpop.f32.mrb[178].mxu0 }
 0x2e1   :  { %v2710_v59 = vadd.f32 %v2676_v25, %v15457_v57  ;;  %v10443_v8 = vpop.f32.mrb[179].mxu0  ;;  %v3045_v62 = vpop.f32.mrb[178].mxu1 }
 0x2e2   :  { %v10514_v5 = vpop.f32.mrb[179].mxu1 }
 0x2e3   :  { %v15526_v35 = vadd.f32 %v3045_v62, %v2710_v59 }
 0x2e4   :  { %v2681_v12 = vpop.f32.mrb[180].mxu0 }
 0x2e5   :  { %v2711_v3 = vadd.f32 %v2681_v12, %v15460_v11  ;;  %v10446_v16 = vpop.f32.mrb[181].mxu0  ;;  %v3050_v21 = vpop.f32.mrb[180].mxu1  ;;  %v15538_v11 = vld [vmem:[%s17078_s10] ss:$0 sm:$0xff] }
 0x2e6   :  { %v10517_v18 = vpop.f32.mrb[181].mxu1  ;;  %v9120_v16 = vld [vmem:[%s17077_s29 + $0x180] sm:$0xff] }
 0x2e7   :  { %v15529_v55 = vadd.f32 %v3050_v21, %v2711_v3  ;;  %v9105_v3 = vld [vmem:[%s17077_s29 + $0x108] sm:$0xff] }
 0x2e8   :  { %v2686_v9 = vpop.f32.mrb[182].mxu0 }
 0x2e9   :  { %v2712_v10 = vadd.f32 %v2686_v9, %v15463_v36  ;;  %v10449_v22 = vpop.f32.mrb[183].mxu0  ;;  %v3055_v14 = vpop.f32.mrb[182].mxu1 }
 0x2ea   :  { %v10520_v15 = vpop.f32.mrb[183].mxu1 }
 0x2eb   :  { %v15532_v57 = vadd.f32 %v3055_v14, %v2712_v10 }
 0x2ec   :  { %v3314_v32 = vpop.f32.mrb[184].mxu0 }
 0x2ed   :  { %v3428_v29 = vadd.f32 %v3314_v32, %v15466_v47  ;;  %v10525_v20 = vpop.f32.mrb[185].mxu0  ;;  %v3683_v27 = vpop.f32.mrb[184].mxu1 }
 0x2ee   :  { %v10596_v23 = vpop.f32.mrb[185].mxu1  ;;  %v9107_v20 = vld [vmem:[%s17077_s29 + $0x118] sm:$0xff] }
 0x2ef   :  { %v3797_v34 = vadd.f32 %v3683_v27, %v3428_v29  ;;  %v9106_v29 = vld [vmem:[%s17077_s29 + $0x110] sm:$0xff] }
 0x2f0   :  { %v3319_v60 = vpop.f32.mrb[186].mxu0  ;;  %v9122_v23 = vld [vmem:[%s17077_s29 + $0x190] sm:$0xff] }
 0x2f1   :  { %v3827_v36 = vadd.f32 %v15538_v11, %v3797_v34  ;;  %v3429_v42 = vadd.f32 %v3319_v60, %v15469_v58  ;;  %v10528_v37 = vpop.f32.mrb[187].mxu0  ;;  %v3688_v43 = vpop.f32.mrb[186].mxu1 }
 0x2f2   :  { %v10599_v30 = vpop.f32.mrb[187].mxu1 }
 0x2f3   :  { %v3850_v31 = vmax.f32 %v3827_v36, 0.0  ;;  %v3798_v46 = vadd.f32 %v3688_v43, %v3429_v42  ;;  %v9123_v36 = vld [vmem:[%s17077_s29 + $0x198] sm:$0xff] }
 0x2f4   :  { %v3324_v47 = vpop.f32.mrb[188].mxu0 }
 0x2f5   :  { %3873 = vst [vmem:[#allocation2] sm:$0xff] %v3850_v31  ;;  %v3828_v51 = vadd.f32 %v15538_v11, %v3798_v46  ;;  %v3430_v39 = vadd.f32 %v3324_v47, %v15472_v6  ;;  %v10531_v54 = vpop.f32.mrb[189].mxu0  ;;  %v3693_v44 = vpop.f32.mrb[188].mxu1  ;;  %v9104_v6 = vld [vmem:[%s17077_s29 + $0x100] sm:$0xff] }
 0x2f6   :  { %v10602_v45 = vpop.f32.mrb[189].mxu1  ;;  %v11886_v32 = vpack.c.bf16 %v9105_v3, %v9104_v6  ;;  %v9111_v6 = vld [vmem:[%s17077_s29 + $0x138] sm:$0xff] }
 0x2f7   :  { %v3851_v7 = vmax.f32 %v3828_v51, 0.0  ;;  %v3799_v49 = vadd.f32 %v3693_v44, %v3430_v39  ;;  %v11889_v51 = vpack.c.bf16 %v9107_v20, %v9106_v29  ;;  %v9108_v39 = vld [vmem:[%s17077_s29 + $0x120] sm:$0xff]  ;;  %v9109_v44 = vld [vmem:[%s17077_s29 + $0x128] sm:$0xff] }
 0x2f8   :  { %v3329_v50 = vpop.f32.mrb[190].mxu0  ;;  %v9124_v45 = vld [vmem:[%s17077_s29 + $0x1a0] sm:$0xff] }
 0x2f9   :  { %3874 = vst [vmem:[#allocation2 + $0x8] sm:$0xff] %v3851_v7  ;;  %v3829_v58 = vadd.f32 %v15538_v11, %v3799_v49  ;;  %v3431_v63 = vadd.f32 %v3329_v50, %v15475_v17  ;;  %v10534_v25 = vpop.f32.mrb[191].mxu0  ;;  %v3698_v59 = vpop.f32.mrb[190].mxu1  ;;  %v9121_v17 = vld [vmem:[%s17077_s29 + $0x188] sm:$0xff] }
 0x2fa   :  { %v10605_v8 = vpop.f32.mrb[191].mxu1  ;;  %v11910_v27 = vpack.c.bf16 %v9121_v17, %v9120_v16  ;;  %v9125_v7 = vld [vmem:[%s17077_s29 + $0x1a8] sm:$0xff] }
 0x2fb   :  { %v3852_v62 = vmax.f32 %v3829_v58, 0.0  ;;  %v3800_v5 = vadd.f32 %v3698_v59, %v3431_v63 }
 0x2fc   :  { %v3334_v12 = vpop.f32.mrb[192].mxu0 }
 0x2fd   :  { %3875 = vst [vmem:[#allocation2 + $0x10] sm:$0xff] %v3852_v62  ;;  %v3830_v21 = vadd.f32 %v15538_v11, %v3800_v5  ;;  %v3432_v18 = vadd.f32 %v3334_v12, %v15478_v28  ;;  %v10537_v9 = vpop.f32.mrb[193].mxu0  ;;  %v3703_v10 = vpop.f32.mrb[192].mxu1  ;;  %v11892_v62 = vpack.c.bf16 %v9109_v44, %v9108_v39  ;;  %v9110_v5 = vld [vmem:[%s17077_s29 + $0x130] sm:$0xff]  ;;  %v11916_v12 = vpack.c.bf16 %v9125_v7, %v9124_v45 }
 0x2fe   :  { %v10608_v22 = vpop.f32.mrb[193].mxu1  ;;  %v11895_v29 = vpack.c.bf16 %v9111_v6, %v9110_v5  ;;  %v9132_v5 = vld [vmem:[%s17077_s29 + $0x1e0] sm:$0xff]  ;;  %v9133_v6 = vld [vmem:[%s17077_s29 + $0x1e8] sm:$0xff] }
 0x2ff   :  { %v3853_v14 = vmax.f32 %v3830_v21, 0.0  ;;  %v3801_v15 = vadd.f32 %v3703_v10, %v3432_v18  ;;  %v9127_v21 = vld [vmem:[%s17077_s29 + $0x1b8] sm:$0xff] }
 0x300   :  { %v3339_v28 = vpop.f32.mrb[194].mxu0  ;;  %v3976_v34 = vld [vmem:[#allocation2 + $0x1] ss:$2 sm:$0xff]  ;;  %v3896_v60 = vld [vmem:[#allocation2] ss:$2 sm:$0xff] }
 0x301   :  { %3876 = vst [vmem:[#allocation2 + $0x18] sm:$0xff] %v3853_v14  ;;  %v3831_v42 = vadd.f32 %v15538_v11, %v3801_v15  ;;  %v3433_v37 = vadd.f32 %v3339_v28, %v15481_v40  ;;  %v10540_v43 = vpop.f32.mrb[195].mxu0  ;;  %10696 = vmatmul.mubr.f32.vlgmr.msra.gmra.mrb[230].mxu0 %v3976_v34  ;;  %10761 = vmatmul.mubr.f32.vlgmr.msra.gmra.mrb[230].mxu1 %v3896_v60  ;;  %v3708_v30 = vpop.f32.mrb[194].mxu1  ;;  %v9128_v28 = vld [vmem:[%s17077_s29 + $0x1c0] sm:$0xff]  ;;  %v9129_v34 = vld [vmem:[%s17077_s29 + $0x1c8] sm:$0xff] }
 0x302   :  { %v10611_v31 = vpop.f32.mrb[195].mxu1  ;;  %10698 = vmatprep.mubr.msk.f32.mxu0 %vm13284_vm0, %v16957_v0  ;;  %10763 = vmatprep.mubr.msk.f32.mxu1 %vm13284_vm0, %v16957_v0  ;;  %v11913_v40 = vpack.c.bf16 %v9123_v36, %v9122_v23  ;;  %v9113_v23 = vld [vmem:[%s17077_s29 + $0x148] sm:$0xff] }
 0x303   :  { %v3854_v46 = vmax.f32 %v3831_v42, 0.0  ;;  %v3802_v47 = vadd.f32 %v3708_v30, %v3433_v37  ;;  %11887 = vmatpush3.bf16.msra.mxu0 %v11886_v32  ;;  %11911 = vmatpush3.bf16.msra.mxu1 %v11910_v27 }
 0x304   :  { %v3344_v54 = vpop.f32.mrb[196].mxu0  ;;  %11888 = vmatprep.subr.bf16.mxu0 %v16959_v41  ;;  %11912 = vmatprep.subr.bf16.mxu1 %v16959_v41 }
 0x305   :  { %3877 = vst [vmem:[#allocation2 + $0x20] sm:$0xff] %v3854_v46  ;;  %v3832_v49 = vadd.f32 %v15538_v11, %v3802_v47  ;;  %v3434_v50 = vadd.f32 %v3344_v54, %v15484_v52  ;;  %v10543_v58 = vpop.f32.mrb[197].mxu0  ;;  %v3713_v63 = vpop.f32.mrb[196].mxu1  ;;  %v9126_v52 = vld [vmem:[%s17077_s29 + $0x1b0] sm:$0xff]  ;;  %v9131_v54 = vld [vmem:[%s17077_s29 + $0x1d8] sm:$0xff] }
 0x306   :  { %v10614_v25 = vpop.f32.mrb[197].mxu1  ;;  %v11919_v20 = vpack.c.bf16 %v9127_v21, %v9126_v52  ;;  %v9114_v47 = vld [vmem:[%s17077_s29 + $0x150] sm:$0xff] }
 0x307   :  { %v3855_v59 = vmax.f32 %v3832_v49, 0.0  ;;  %v3803_v8 = vadd.f32 %v3713_v63, %v3434_v50  ;;  %11890 = vmatpush3.bf16.msra.mxu0 %v11889_v51  ;;  %11914 = vmatpush3.bf16.msra.mxu1 %v11913_v40  ;;  %v11922_v51 = vpack.c.bf16 %v9129_v34, %v9128_v28  ;;  %v9130_v40 = vld [vmem:[%s17077_s29 + $0x1d0] sm:$0xff] }
 0x308   :  { %v3349_v3 = vpop.f32.mrb[198].mxu0  ;;  %v3978_v16 = vld [vmem:[#allocation2 + $0x11] ss:$2 sm:$0xff]  ;;  %v3898_v17 = vld [vmem:[#allocation2 + $0x10] ss:$2 sm:$0xff]  ;;  %11891 = vmatprep.subr.bf16.mxu0 %v16959_v41  ;;  %11915 = vmatprep.subr.bf16.mxu1 %v16959_v41 }
 0x309   :  { %3878 = vst [vmem:[#allocation2 + $0x28] sm:$0xff] %v3855_v59  ;;  %v3833_v18 = vadd.f32 %v15538_v11, %v3803_v8  ;;  %v3435_v9 = vadd.f32 %v3349_v3, %v15487_v1  ;;  %v10546_v10 = vpop.f32.mrb[199].mxu0  ;;  %10699 = vmatmul.mubr.f32.gmra.mrb[232].mxu0 %v3978_v16  ;;  %10764 = vmatmul.mubr.f32.gmra.mrb[232].mxu1 %v3898_v17  ;;  %v3718_v22 = vpop.f32.mrb[198].mxu1  ;;  %v9112_v1 = vld [vmem:[%s17077_s29 + $0x140] sm:$0xff]  ;;  %v9118_v21 = vld [vmem:[%s17077_s29 + $0x170] sm:$0xff] }
 0x30a   :  { %v10617_v14 = vpop.f32.mrb[199].mxu1  ;;  %10701 = vmatprep.mubr.msk.f32.mxu0 %vm13284_vm0, %v16957_v0  ;;  %10766 = vmatprep.mubr.msk.f32.mxu1 %vm13284_vm0, %v16957_v0  ;;  %v11898_v46 = vpack.c.bf16 %v9113_v23, %v9112_v1  ;;  %v11925_v59 = vpack.c.bf16 %v9131_v54, %v9130_v40  ;;  %v9116_v8 = vld [vmem:[%s17077_s29 + $0x160] sm:$0xff] }
 0x30b   :  { %v3856_v15 = vmax.f32 %v3833_v18, 0.0  ;;  %v3804_v32 = vadd.f32 %v3718_v22, %v3435_v9  ;;  %11893 = vmatpush3.bf16.msra.mxu0 %v11892_v62  ;;  %11917 = vmatpush3.bf16.msra.mxu1 %v11916_v12  ;;  %v11928_v22 = vpack.c.bf16 %v9133_v6, %v9132_v5  ;;  %v9119_v14 = vld [vmem:[%s17077_s29 + $0x178] sm:$0xff] }
 0x30c   :  { %v3354_v27 = vpop.f32.mrb[200].mxu0  ;;  %11894 = vmatprep.subr.bf16.mxu0 %v16959_v41  ;;  %11918 = vmatprep.subr.bf16.mxu1 %v16959_v41 }
 0x30d   :  { %3879 = vst [vmem:[#allocation2 + $0x30] sm:$0xff] %v3856_v15  ;;  %v3834_v60 = vadd.f32 %v15538_v11, %v3804_v32  ;;  %v3436_v36 = vadd.f32 %v3354_v27, %v15490_v13  ;;  %v10549_v42 = vpop.f32.mrb[201].mxu0  ;;  %v3723_v37 = vpop.f32.mrb[200].mxu1  ;;  %v9115_v13 = vld [vmem:[%s17077_s29 + $0x158] sm:$0xff] }
 0x30e   :  { %v10620_v43 = vpop.f32.mrb[201].mxu1  ;;  %v11901_v25 = vpack.c.bf16 %v9115_v13, %v9114_v47  ;;  %v9135_v15 = vld [vmem:[%s17077_s29 + $0x1f8] sm:$0xff] }
 0x30f   :  { %v3857_v30 = vmax.f32 %v3834_v60, 0.0  ;;  %v3805_v31 = vadd.f32 %v3723_v37, %v3436_v36  ;;  %11896 = vmatpush3.bf16.msra.mxu0 %v11895_v29  ;;  %11920 = vmatpush3.bf16.msra.mxu1 %v11919_v20  ;;  %v11907_v43 = vpack.c.bf16 %v9119_v14, %v9118_v21 }
 0x310   :  { %v3359_v39 = vpop.f32.mrb[202].mxu0  ;;  %11897 = vmatprep.subr.bf16.mxu0 %v16959_v41  ;;  %11921 = vmatprep.subr.bf16.mxu1 %v16959_v41  ;;  %v3980_v29 = vld [vmem:[#allocation2 + $0x21] ss:$2 sm:$0x1f] }
 0x311   :  { %3880 = vst [vmem:[#allocation2 + $0x38] sm:$0xff] %v3857_v30  ;;  %v3835_v44 = vadd.f32 %v15538_v11, %v3805_v31  ;;  %v3437_v45 = vadd.f32 %v3359_v39, %v15493_v61  ;;  %v10552_v7 = vpop.f32.mrb[203].mxu0  ;;  %v3728_v49 = vpop.f32.mrb[202].mxu1  ;;  %v9117_v61 = vld [vmem:[%s17077_s29 + $0x168] sm:$0xff] }
 0x312   :  { %v10623_v50 = vpop.f32.mrb[203].mxu1  ;;  %v11904_v10 = vpack.c.bf16 %v9117_v61, %v9116_v8  ;;  %v3900_v37 = vld [vmem:[#allocation2 + $0x20] ss:$2 sm:$0x1f] }
 0x313   :  { %v3858_v58 = vmax.f32 %v3835_v44, 0.0  ;;  %v3806_v63 = vadd.f32 %v3728_v49, %v3437_v45  ;;  %11899 = vmatpush3.bf16.msra.mxu0 %v11898_v46  ;;  %11923 = vmatpush3.bf16.msra.mxu1 %v11922_v51 }
 0x314   :  { %v3364_v62 = vpop.f32.mrb[204].mxu0  ;;  %11900 = vmatprep.subr.bf16.mxu0 %v16959_v41  ;;  %11924 = vmatprep.subr.bf16.mxu1 %v16959_v41 }
 0x315   :  { %3881 = vst [vmem:[#allocation2 + $0x40] sm:$0xff] %v3858_v58  ;;  %v3836_v12 = vadd.f32 %v15538_v11, %v3806_v63  ;;  %v3438_v52 = vadd.f32 %v3364_v62, %v15496_v38  ;;  %v10555_v3 = vpop.f32.mrb[205].mxu0  ;;  %v3733_v16 = vpop.f32.mrb[204].mxu1  ;;  %v9134_v38 = vld [vmem:[%s17077_s29 + $0x1f0] sm:$0xff] }
 0x316   :  { %v10626_v17 = vpop.f32.mrb[205].mxu1  ;;  %v11931_v30 = vpack.c.bf16 %v9135_v15, %v9134_v38 }
 0x317   :  { %v3859_v18 = vmax.f32 %v3836_v12, 0.0  ;;  %v3807_v9 = vadd.f32 %v3733_v16, %v3438_v52  ;;  %11902 = vmatpush3.bf16.msra.mxu0 %v11901_v25  ;;  %11926 = vmatpush3.bf16.msra.mxu1 %v11925_v59 }
 0x318   :  { %v3369_v32 = vpop.f32.mrb[206].mxu0  ;;  %v3982_v1 = vld [vmem:[#allocation2 + $0x2f] ss:$2 sm:$0xff]  ;;  %v3902_v20 = vld [vmem:[#allocation2 + $0x2e] ss:$2 sm:$0xff]  ;;  %11903 = vmatprep.subr.bf16.mxu0 %v16959_v41  ;;  %11927 = vmatprep.subr.bf16.mxu1 %v16959_v41 }
 0x319   :  { %3882 = vst [vmem:[#allocation2 + $0x48] sm:$0xff] %v3859_v18  ;;  %v3837_v27 = vadd.f32 %v15538_v11, %v3807_v9  ;;  %v3439_v23 = vadd.f32 %v3369_v32, %v15499_v33  ;;  %v10558_v28 = vpop.f32.mrb[207].mxu0  ;;  %v3738_v34 = vpop.f32.mrb[206].mxu1  ;;  %v4002_v60 = vrot.slane %v3982_v1, 3  ;;  %v3923_v36 = vrot.slane %v3902_v20, 3 }
 0x31a   :  { %v10629_v42 = vpop.f32.mrb[207].mxu1 }
 0x31b   :  { %v3860_v31 = vmax.f32 %v3837_v27, 0.0  ;;  %v3808_v46 = vadd.f32 %v3738_v34, %v3439_v23  ;;  %v4034_v47 = vsel %vm3922_vm5, %v3980_v29, %v4002_v60  ;;  %v3956_v51 = vsel %vm3922_vm5, %v3900_v37, %v3923_v36  ;;  %11905 = vmatpush3.bf16.msra.mxu0 %v11904_v10  ;;  %11929 = vmatpush3.bf16.msra.mxu1 %v11928_v22 }
 0x31c   :  { %v3374_v39 = vpop.f32.mrb[208].mxu0  ;;  %10702 = vmatmul.mubr.f32.gmra.mrb[234].mxu0 %v4034_v47  ;;  %10767 = vmatmul.mubr.f32.gmra.mrb[234].mxu1 %v3956_v51 }
 0x31d   :  { %3883 = vst [vmem:[#allocation2 + $0x50] sm:$0xff] %v3860_v31  ;;  %v3838_v33 = vadd.f32 %v15538_v11, %v3808_v46  ;;  %v3440_v13 = vadd.f32 %v3374_v39, %v15502_v56  ;;  %v10561_v40 = vpop.f32.mrb[209].mxu0  ;;  %v3743_v54 = vpop.f32.mrb[208].mxu1  ;;  %10704 = vmatprep.mubr.msk.f32.mxu0 %vm13284_vm0, %v16957_v0  ;;  %10769 = vmatprep.mubr.msk.f32.mxu1 %vm13284_vm0, %v16957_v0 }
 0x31e   :  { %v10632_v44 = vpop.f32.mrb[209].mxu1  ;;  %11906 = vmatprep.subr.bf16.mxu0 %v16959_v41  ;;  %11930 = vmatprep.subr.bf16.mxu1 %v16959_v41 }
 0x31f   :  { %v3861_v45 = vmax.f32 %v3838_v33, 0.0  ;;  %v3809_v7 = vadd.f32 %v3743_v54, %v3440_v13  ;;  %11908 = vmatpush3.bf16.msra.mxu0 %v11907_v43  ;;  %11932 = vmatpush3.bf16.msra.mxu1 %v11931_v30 }
 0x320   :  { %v3379_v49 = vpop.f32.mrb[210].mxu0  ;;  %v3984_v50 = vld [vmem:[#allocation2 + $0x3f] ss:$2 sm:$0xff]  ;;  %v3904_v56 = vld [vmem:[#allocation2 + $0x3e] ss:$2 sm:$0xff]  ;;  %11933 = vmatprep.subr.bf16.mxu0 %v16959_v41  ;;  %11957 = vmatprep.subr.bf16.mxu1 %v16959_v41 }
 0x321   :  { %3884 = vst [vmem:[#allocation2 + $0x58] sm:$0xff] %v3861_v45  ;;  %v3839_v58 = vadd.f32 %v15538_v11, %v3809_v7  ;;  %v3441_v63 = vadd.f32 %v3379_v49, %v15505_v24  ;;  %v10564_v25 = vpop.f32.mrb[211].mxu0  ;;  %v3748_v59 = vpop.f32.mrb[210].mxu1  ;;  %v4003_v8 = vrot.slane %v3984_v50, 3  ;;  %v3924_v62 = vrot.slane %v3904_v56, 3 }
 0x322   :  { %v10635_v61 = vpop.f32.mrb[211].mxu1 }
 0x323   :  { %v3862_v5 = vmax.f32 %v3839_v58, 0.0  ;;  %v3810_v6 = vadd.f32 %v3748_v59, %v3441_v63  ;;  %v4004_v12 = vsel %vm3922_vm5, %v4002_v60, %v4003_v8  ;;  %v3925_v52 = vsel %vm3922_vm5, %v3923_v36, %v3924_v62 }
 0x324   :  { %v3384_v3 = vpop.f32.mrb[212].mxu0  ;;  %10705 = vmatmul.mubr.f32.gmra.mrb[236].mxu0 %v4004_v12  ;;  %10770 = vmatmul.mubr.f32.gmra.mrb[236].mxu1 %v3925_v52  ;;  %v3986_v16 = vld [vmem:[#allocation2 + $0x4f] ss:$2 sm:$0x1f] }
 0x325   :  { %3885 = vst [vmem:[#allocation2 + $0x60] sm:$0xff] %v3862_v5  ;;  %v3840_v17 = vadd.f32 %v15538_v11, %v3810_v6  ;;  %v3442_v24 = vadd.f32 %v3384_v3, %v15508_v53  ;;  %v10567_v21 = vpop.f32.mrb[213].mxu0  ;;  %v3753_v18 = vpop.f32.mrb[212].mxu1  ;;  %10707 = vmatprep.mubr.msk.f32.mxu0 %vm13284_vm0, %v16957_v0  ;;  %10772 = vmatprep.mubr.msk.f32.mxu1 %vm13284_vm0, %v16957_v0  ;;  %v4005_v9 = vrot.slane %v3986_v16, 3 }
 0x326   :  { %v3906_v10 = vld [vmem:[#allocation2 + $0x4e] ss:$2 sm:$0x1f]  ;;  %v10638_v22 = vpop.f32.mrb[213].mxu1 }
 0x327   :  { %v3926_v14 = vrot.slane %v3906_v10, 3  ;;  %v3863_v38 = vmax.f32 %v3840_v17, 0.0  ;;  %v3811_v15 = vadd.f32 %v3753_v18, %v3442_v24  ;;  %v4006_v32 = vsel %vm3922_vm5, %v4003_v8, %v4005_v9 }
 0x328   :  { %v3389_v29 = vpop.f32.mrb[214].mxu0  ;;  %10708 = vmatmul.mubr.f32.gmra.mrb[238].mxu0 %v4006_v32 }
 0x329   :  { %v3927_v53 = vsel %vm3922_vm5, %v3924_v62, %v3926_v14  ;;  %3886 = vst [vmem:[#allocation2 + $0x68] sm:$0xff] %v3863_v38  ;;  %v3841_v1 = vadd.f32 %v15538_v11, %v3811_v15  ;;  %v3443_v20 = vadd.f32 %v3389_v29, %v15511_v4  ;;  %v10570_v27 = vpop.f32.mrb[215].mxu0  ;;  %v3758_v23 = vpop.f32.mrb[214].mxu1  ;;  %10710 = vmatprep.mubr.msk.f32.mxu0 %vm13284_vm0, %v16957_v0 }
 0x32a   :  { %10773 = vmatmul.mubr.f32.gmra.mrb[238].mxu1 %v3927_v53  ;;  %v10641_v28 = vpop.f32.mrb[215].mxu1 }
 0x32b   :  { %10775 = vmatprep.mubr.msk.f32.mxu1 %vm13284_vm0, %v16957_v0  ;;  %v3864_v34 = vmax.f32 %v3841_v1, 0.0  ;;  %v3812_v60 = vadd.f32 %v3758_v23, %v3443_v20 }
 0x32c   :  { %v3394_v36 = vpop.f32.mrb[216].mxu0 }
 0x32d   :  { %3887 = vst [vmem:[#allocation2 + $0x70] sm:$0xff] %v3864_v34  ;;  %v3842_v42 = vadd.f32 %v15538_v11, %v3812_v60  ;;  %v3444_v37 = vadd.f32 %v3394_v36, %v15514_v26  ;;  %v10573_v43 = vpop.f32.mrb[217].mxu0  ;;  %v3763_v4 = vpop.f32.mrb[216].mxu1 }
 0x32e   :  { %v10644_v30 = vpop.f32.mrb[217].mxu1 }
 0x32f   :  { %v3865_v31 = vmax.f32 %v3842_v42, 0.0  ;;  %v3813_v46 = vadd.f32 %v3763_v4, %v3444_v37 }
 0x330   :  { %v3399_v47 = vpop.f32.mrb[218].mxu0  ;;  %v3988_v51 = vld [vmem:[#allocation2 + $0x5d] ss:$2 sm:$0xff]  ;;  %v3908_v39 = vld [vmem:[#allocation2 + $0x5c] ss:$2 sm:$0xff] }
 0x331   :  { %3888 = vst [vmem:[#allocation2 + $0x78] sm:$0xff] %v3865_v31  ;;  %v3843_v33 = vadd.f32 %v15538_v11, %v3813_v46  ;;  %v3445_v13 = vadd.f32 %v3399_v47, %v15517_v48  ;;  %v10576_v40 = vpop.f32.mrb[219].mxu0  ;;  %v3768_v54 = vpop.f32.mrb[218].mxu1  ;;  %v4014_v44 = vrot.slane %v3988_v51, 6  ;;  %v3935_v45 = vrot.slane %v3908_v39, 6 }
 0x332   :  { %v10647_v7 = vpop.f32.mrb[219].mxu1 }
 0x333   :  { %v3866_v49 = vmax.f32 %v3843_v33, 0.0  ;;  %v3814_v26 = vadd.f32 %v3768_v54, %v3445_v13  ;;  %v4035_v50 = vsel %vm267_vm4, %v4005_v9, %v4014_v44  ;;  %v3957_v56 = vsel %vm267_vm4, %v3926_v14, %v3935_v45 }
 0x334   :  { %v3404_v58 = vpop.f32.mrb[220].mxu0  ;;  %10711 = vmatmul.mubr.f32.gmra.mrb[240].mxu0 %v4035_v50  ;;  %10776 = vmatmul.mubr.f32.gmra.mrb[240].mxu1 %v3957_v56 }
 0x335   :  { %3889 = vst [vmem:[#allocation2 + $0x80] sm:$0xff] %v3866_v49  ;;  %v3844_v63 = vadd.f32 %v15538_v11, %v3814_v26  ;;  %v3446_v25 = vadd.f32 %v3404_v58, %v15520_v2  ;;  %v10579_v48 = vpop.f32.mrb[221].mxu0  ;;  %v3773_v59 = vpop.f32.mrb[220].mxu1  ;;  %10713 = vmatprep.mubr.msk.f32.mxu0 %vm13284_vm0, %v16957_v0  ;;  %10778 = vmatprep.mubr.msk.f32.mxu1 %vm13284_vm0, %v16957_v0 }
 0x336   :  { %v10650_v8 = vpop.f32.mrb[221].mxu1 }
 0x337   :  { %v3867_v62 = vmax.f32 %v3844_v63, 0.0  ;;  %v3815_v61 = vadd.f32 %v3773_v59, %v3446_v25 }
 0x338   :  { %v3409_v5 = vpop.f32.mrb[222].mxu0  ;;  %v3990_v6 = vld [vmem:[#allocation2 + $0x6d] ss:$2 sm:$0xff]  ;;  %v3910_v12 = vld [vmem:[#allocation2 + $0x6c] ss:$2 sm:$0xff] }
 0x339   :  { %3890 = vst [vmem:[#allocation2 + $0x88] sm:$0xff] %v3867_v62  ;;  %v3845_v52 = vadd.f32 %v15538_v11, %v3815_v61  ;;  %v3447_v3 = vadd.f32 %v3409_v5, %v15523_v19  ;;  %v10582_v2 = vpop.f32.mrb[223].mxu0  ;;  %v3778_v16 = vpop.f32.mrb[222].mxu1  ;;  %v4015_v17 = vrot.slane %v3990_v6, 6  ;;  %v3936_v24 = vrot.slane %v3910_v12, 6  ;;  %v9136_v12 = vld [vmem:[%s17077_s29 + $0x200] sm:$0xff] }
 0x33a   :  { %v10653_v21 = vpop.f32.mrb[223].mxu1  ;;  %v9138_v2 = vld [vmem:[%s17077_s29 + $0x210] sm:$0xff] }
 0x33b   :  { %v3868_v18 = vmax.f32 %v3845_v52, 0.0  ;;  %v3816_v9 = vadd.f32 %v3778_v16, %v3447_v3  ;;  %v4016_v10 = vsel %vm267_vm4, %v4014_v44, %v4015_v17  ;;  %v3937_v22 = vsel %vm267_vm4, %v3935_v45, %v3936_v24  ;;  %v9137_v52 = vld [vmem:[%s17077_s29 + $0x208] sm:$0xff]  ;;  %v4301_v21 = vld [vmem:[#allocation2 + $0x30] ss:$2 sm:$0xff] }
 0x33c   :  { %v3414_v14 = vpop.f32.mrb[224].mxu0  ;;  %10714 = vmatmul.mubr.f32.gmra.mrb[242].mxu0 %v4016_v10  ;;  %10779 = vmatmul.mubr.f32.gmra.mrb[242].mxu1 %v3937_v22  ;;  %v3992_v60 = vld [vmem:[#allocation2 + $0x7d] ss:$2 sm:$0x1f]  ;;  %v11934_v3 = vpack.c.bf16 %v9137_v52, %v9136_v12  ;;  %v4295_v16 = vld [vmem:[#allocation2 + $0x2] ss:$2 sm:$0xff] }
 0x33d   :  { %3891 = vst [vmem:[#allocation2 + $0x90] sm:$0xff] %v3868_v18  ;;  %v3846_v38 = vadd.f32 %v15538_v11, %v3816_v9  ;;  %v3448_v15 = vadd.f32 %v3414_v14, %v15526_v35  ;;  %v10585_v19 = vpop.f32.mrb[225].mxu0  ;;  %v3783_v32 = vpop.f32.mrb[224].mxu1  ;;  %10716 = vmatprep.mubr.msk.f32.mxu0 %vm13284_vm0, %v16957_v0  ;;  %10781 = vmatprep.mubr.msk.f32.mxu1 %vm13284_vm0, %v16957_v0  ;;  %v3912_v37 = vld [vmem:[#allocation2 + $0x7c] ss:$2 sm:$0x1f] }
 0x33e   :  { %v10656_v29 = vpop.f32.mrb[225].mxu1  ;;  %v4017_v51 = vrot.slane %v3992_v60, 6  ;;  %v3938_v39 = vrot.slane %v3912_v37, 6  ;;  %v4511_v18 = vld [vmem:[#allocation2 + $0x31] ss:$2 sm:$0xff]  ;;  %v9140_v10 = vld [vmem:[%s17077_s29 + $0x220] sm:$0xff] }
 0x33f   :  { %v3869_v53 = vmax.f32 %v3846_v38, 0.0  ;;  %v3817_v1 = vadd.f32 %v3783_v32, %v3448_v15  ;;  %v9141_v22 = vld [vmem:[%s17077_s29 + $0x228] sm:$0xff]  ;;  %v4297_v14 = vld [vmem:[#allocation2 + $0x12] ss:$2 sm:$0xff]  ;;  %v4507_v38 = vld [vmem:[#allocation2 + $0x13] ss:$2 sm:$0xff] }
 0x340   :  { %v3419_v20 = vpop.f32.mrb[226].mxu0  ;;  %v4018_v7 = vsel %vm267_vm4, %v4015_v17, %v4017_v51  ;;  %v3939_v49 = vsel %vm267_vm4, %v3936_v24, %v3938_v39  ;;  %v4505_v17 = vld [vmem:[#allocation2 + $0x3] ss:$2 sm:$0xff]  ;;  %v9139_v24 = vld [vmem:[%s17077_s29 + $0x218] sm:$0xff]  ;;  %v4321_v15 = vrot.slane %v4301_v21, 3  ;;  %v4531_v19 = vrot.slane %v4511_v18, 3 }
 0x341   :  { %3892 = vst [vmem:[#allocation2 + $0x98] sm:$0xff] %v3869_v53  ;;  %v3847_v27 = vadd.f32 %v15538_v11, %v3817_v1  ;;  %v3449_v23 = vadd.f32 %v3419_v20, %v15529_v55  ;;  %v10588_v28 = vpop.f32.mrb[227].mxu0  ;;  %v3788_v34 = vpop.f32.mrb[226].mxu1  ;;  %v11937_v9 = vpack.c.bf16 %v9139_v24, %v9138_v2  ;;  %v4303_v32 = vld [vmem:[#allocation2 + $0x40] ss:$2 sm:$0xff]  ;;  %v11940_v20 = vpack.c.bf16 %v9141_v22, %v9140_v10  ;;  %v9143_v60 = vld [vmem:[%s17077_s29 + $0x238] sm:$0xff] }
 0x342   :  { %v10659_v35 = vpop.f32.mrb[227].mxu1  ;;  %v4513_v29 = vld [vmem:[#allocation2 + $0x41] ss:$2 sm:$0xff]  ;;  %v4299_v53 = vld [vmem:[#allocation2 + $0x22] ss:$2 sm:$0x1f] }
 0x343   :  { %v3870_v36 = vmax.f32 %v3847_v27, 0.0  ;;  %v3818_v42 = vadd.f32 %v3788_v34, %v3449_v23  ;;  %v4509_v1 = vld [vmem:[#allocation2 + $0x23] ss:$2 sm:$0x1f]  ;;  %v4353_v27 = vsel %vm3922_vm5, %v4299_v53, %v4321_v15  ;;  %v4322_v28 = vrot.slane %v4303_v32, 3  ;;  %v9142_v35 = vld [vmem:[%s17077_s29 + $0x230] sm:$0xff] }
 0x344   :  { %v3424_v43 = vpop.f32.mrb[228].mxu0  ;;  %v4563_v23 = vsel %vm3922_vm5, %v4509_v1, %v4531_v19  ;;  %v4532_v34 = vrot.slane %v4513_v29, 3  ;;  %v11943_v37 = vpack.c.bf16 %v9143_v60, %v9142_v35  ;;  %v4307_v51 = vld [vmem:[#allocation2 + $0x5e] ss:$2 sm:$0xff]  ;;  %v4517_v39 = vld [vmem:[#allocation2 + $0x5f] ss:$2 sm:$0xff] }
 0x345   :  { %3893 = vst [vmem:[#allocation2 + $0xa0] sm:$0xff] %v3870_v36  ;;  %v3848_v4 = vadd.f32 %v15538_v11, %v3818_v42  ;;  %v3450_v30 = vadd.f32 %v3424_v43, %v15532_v57  ;;  %v10591_v31 = vpop.f32.mrb[229].mxu0  ;;  %v3793_v46 = vpop.f32.mrb[228].mxu1  ;;  %v4305_v36 = vld [vmem:[#allocation2 + $0x50] ss:$2 sm:$0x1f]  ;;  %v4323_v43 = vsel %vm3922_vm5, %v4321_v15, %v4322_v28 }
 0x346   :  { %v10662_v47 = vpop.f32.mrb[229].mxu1  ;;  %v4515_v42 = vld [vmem:[#allocation2 + $0x51] ss:$2 sm:$0x1f]  ;;  %v4723_v60 = vld [vmem:[#allocation2 + $0x42] ss:$2 sm:$0xff] }
 0x347   :  { %v3871_v33 = vmax.f32 %v3848_v4, 0.0  ;;  %v3819_v55 = vadd.f32 %v3793_v46, %v3450_v30  ;;  %v4533_v4 = vsel %vm3922_vm5, %v4531_v19, %v4532_v34  ;;  %v4324_v30 = vrot.slane %v4305_v36, 3  ;;  %v9144_v46 = vld [vmem:[%s17077_s29 + $0x240] sm:$0xff]  ;;  %v9145_v47 = vld [vmem:[%s17077_s29 + $0x248] sm:$0xff]  ;;  %v9150_v2 = vld [vmem:[%s17077_s29 + $0x270] sm:$0xff] }
 0x348   :  { %v3994_v13 = vld [vmem:[#allocation2 + $0x8b] ss:$2 sm:$0xff]  ;;  %v3914_v40 = vld [vmem:[#allocation2 + $0x8a] ss:$2 sm:$0xff]  ;;  %v4534_v31 = vrot.slane %v4515_v42, 3 }
 0x349   :  { %3894 = vst [vmem:[#allocation2 + $0xa8] sm:$0xff] %v3871_v33  ;;  %v3849_v54 = vadd.f32 %v15538_v11, %v3819_v55  ;;  %v4025_v44 = vrot.slane %v3994_v13, 1  ;;  %v3947_v45 = vrot.slane %v3914_v40, 1  ;;  %v11946_v33 = vpack.c.bf16 %v9145_v47, %v9144_v46  ;;  %v9146_v55 = vld [vmem:[%s17077_s29 + $0x250] sm:$0xff]  ;;  %v9147_v13 = vld [vmem:[%s17077_s29 + $0x258] sm:$0xff] }
 0x34a   :  { %v4325_v40 = vsel %vm3922_vm5, %v4322_v28, %v4324_v30  ;;  %v4721_v28 = vld [vmem:[#allocation2 + $0x32] ss:$2 sm:$0xff]  ;;  %v4719_v36 = vld [vmem:[#allocation2 + $0x24] ss:$2 sm:$0x1f] }
 0x34b   :  { %v3872_v57 = vmax.f32 %v3849_v54, 0.0  ;;  %v4036_v26 = vsel %vm3946_vm6, %v4018_v7, %v4025_v44  ;;  %v3958_v50 = vsel %vm3946_vm6, %v3939_v49, %v3947_v45  ;;  %v4535_v54 = vsel %vm3922_vm5, %v4532_v34, %v4534_v31  ;;  %v4309_v7 = vld [vmem:[#allocation2 + $0x6e] ss:$2 sm:$0xff]  ;;  %v4519_v49 = vld [vmem:[#allocation2 + $0x6f] ss:$2 sm:$0xff] }
 0x34c   :  { %10717 = vmatmul.mubr.f32.gmra.mrb[244].mxu0 %v4036_v26  ;;  %10782 = vmatmul.mubr.f32.gmra.mrb[244].mxu1 %v3958_v50  ;;  %v4544_v26 = vrot.slane %v4519_v49, 6  ;;  %v11949_v50 = vpack.c.bf16 %v9147_v13, %v9146_v55  ;;  %v4717_v34 = vld [vmem:[#allocation2 + $0x14] ss:$2 sm:$0xff]  ;;  %v4741_v35 = vrot.slane %v4721_v28, 3  ;;  %v5305_v28 = vld [vmem:[#allocation5 + $0x130] sm:$0xff] }
 0x34d   :  { %3895 = vst [vmem:[#allocation2 + $0xb0] sm:$0xff] %v3872_v57  ;;  %10719 = vmatprep.mubr.msk.f32.mxu0 %vm13284_vm0, %v16957_v0  ;;  %10784 = vmatprep.mubr.msk.f32.mxu1 %vm13284_vm0, %v16957_v0  ;;  %v4334_v57 = vrot.slane %v4309_v7, 6  ;;  %v4731_v55 = vld [vmem:[#allocation2 + $0x80] ss:$2 sm:$0x1f] }
 0x34e   :  { %v4773_v42 = vsel %vm3922_vm5, %v4719_v36, %v4741_v35  ;;  %v4733_v13 = vld [vmem:[#allocation2 + $0x8e] ss:$2 sm:$0xff] }
 0x34f   :  { %v5072_v36 = vld [vmem:[#allocation5 + $0xd0] sm:$0xff] }
 0x350   :  { %v3996_v11 = vld [vmem:[#allocation2 + $0x9b] ss:$2 sm:$0xff]  ;;  %v3916_v56 = vld [vmem:[#allocation2 + $0x9a] ss:$2 sm:$0xff] }
 0x351   :  { %v4026_v58 = vrot.slane %v3996_v11, 1  ;;  %v3948_v63 = vrot.slane %v3916_v56, 1  ;;  %v9148_v11 = vld [vmem:[%s17077_s29 + $0x260] sm:$0xff]  ;;  %v9149_v56 = vld [vmem:[%s17077_s29 + $0x268] sm:$0xff] }
 0x352   :  { %v4525_v24 = vld [vmem:[#allocation2 + $0x9d] ss:$2 sm:$0xff] }
 0x353   :  { %v4027_v25 = vsel %vm3946_vm6, %v4025_v44, %v4026_v58  ;;  %v3949_v48 = vsel %vm3946_vm6, %v3947_v45, %v3948_v63  ;;  %v4333_v44 = vrot.slane %v4307_v51, 6  ;;  %v4543_v45 = vrot.slane %v4517_v39, 6  ;;  %v4729_v51 = vld [vmem:[#allocation2 + $0x70] ss:$2 sm:$0xff] }
 0x354   :  { %10720 = vmatmul.mubr.f32.gmra.mrb[246].mxu0 %v4027_v25  ;;  %10785 = vmatmul.mubr.f32.gmra.mrb[246].mxu1 %v3949_v48  ;;  %v3998_v59 = vld [vmem:[#allocation2 + $0xab] ss:$2 sm:$0x1f]  ;;  %v3918_v8 = vld [vmem:[#allocation2 + $0xaa] ss:$2 sm:$0x1f] }
 0x355   :  { %10722 = vmatprep.mubr.msk.f32.mxu0 %vm13284_vm0, %v16957_v0  ;;  %10787 = vmatprep.mubr.msk.f32.mxu1 %vm13284_vm0, %v16957_v0  ;;  %v4028_v62 = vrot.slane %v3998_v59, 1  ;;  %v3950_v61 = vrot.slane %v3918_v8, 1  ;;  %v4311_v25 = vld [vmem:[#allocation2 + $0x7e] ss:$2 sm:$0x1f]  ;;  %v4545_v12 = vsel %vm267_vm4, %v4543_v45, %v4544_v26 }
 0x356   :  { %v4521_v48 = vld [vmem:[#allocation2 + $0x7f] ss:$2 sm:$0x1f]  ;;  %v4313_v59 = vld [vmem:[#allocation2 + $0x8c] ss:$2 sm:$0xff] }
 0x357   :  { %v4029_v5 = vsel %vm3946_vm6, %v4026_v58, %v4028_v62  ;;  %v3951_v6 = vsel %vm3946_vm6, %v3948_v63, %v3950_v61  ;;  %v4354_v58 = vsel %vm267_vm4, %v4324_v30, %v4333_v44  ;;  %v4564_v63 = vsel %vm267_vm4, %v4534_v31, %v4543_v45  ;;  %v4523_v8 = vld [vmem:[#allocation2 + $0x8d] ss:$2 sm:$0xff]  ;;  %v4317_v15 = vld [vmem:[#allocation2 + $0xac] ss:$2 sm:$0x1f] }
 0x358   :  { %10723 = vmatmul.mubr.f32.gmra.mrb[248].mxu0 %v4029_v5  ;;  %10788 = vmatmul.mubr.f32.gmra.mrb[248].mxu1 %v3951_v6  ;;  %v11952_v5 = vpack.c.bf16 %v9149_v56, %v9148_v11  ;;  %v4335_v6 = vsel %vm267_vm4, %v4333_v44, %v4334_v57  ;;  %v4344_v52 = vrot.slane %v4313_v59, 1  ;;  %v4527_v19 = vld [vmem:[#allocation2 + $0xad] ss:$2 sm:$0x1f]  ;;  %v4347_v53 = vrot.slane %v4317_v15, 1 }
 0x359   :  { %10725 = vmatprep.mubr.msk.f32.mxu0 %vm13284_vm0, %v16957_v0  ;;  %10790 = vmatprep.mubr.msk.f32.mxu1 %vm13284_vm0, %v16957_v0  ;;  %v4557_v1 = vrot.slane %v4527_v19, 1  ;;  %v4727_v31 = vld [vmem:[#allocation2 + $0x60] ss:$2 sm:$0xff]  ;;  %v4764_v44 = vrot.slane %v4733_v13, 1 }
 0x35a   :  { %v4753_v47 = vrot.slane %v4727_v31, 6  ;;  %v4735_v45 = vld [vmem:[#allocation2 + $0x9e] ss:$2 sm:$0xff] }
 0x35b   :  { %v5068_v19 = vld [vmem:[#allocation5 + $0xb0] sm:$0xff]  ;;  %v5074_v31 = vld [vmem:[#allocation5 + $0xe0] sm:$0xff] }
 0x35c   :  { %10726 = vmatmul.mubr.f32.gmra.mrb[250].mxu0 %v4028_v62  ;;  %10791 = vmatmul.mubr.f32.gmra.mrb[250].mxu1 %v3950_v61  ;;  %v4336_v62 = vrot.slane %v4311_v25, 6  ;;  %v4546_v61 = vrot.slane %v4521_v48, 6 }
 0x35d   :  { %10825 = vmatprep.mubr.msk.f32.mxu0 %vm13284_vm0, %v16957_v0  ;;  %10890 = vmatprep.mubr.msk.f32.mxu1 %vm13284_vm0, %v16957_v0 }
 0x35e   :  { %v4337_v21 = vsel %vm267_vm4, %v4334_v57, %v4336_v62  ;;  %v4547_v18 = vsel %vm267_vm4, %v4544_v26, %v4546_v61  ;;  %v4765_v57 = vrot.slane %v4735_v45, 1  ;;  %v4737_v26 = vld [vmem:[#allocation2 + $0xae] ss:$2 sm:$0x1f] }
 0x35f   :  { %v4355_v10 = vsel %vm3946_vm6, %v4337_v21, %v4344_v52  ;;  %v4767_v11 = vrot.slane %v4737_v26, 1  ;;  %v5067_v21 = vld [vmem:[#allocation5 + $0xa8] sm:$0xff]  ;;  %v5076_v45 = vld [vmem:[#allocation5 + $0xf0] sm:$0xff] }
 0x360   :  { %10826 = vmatmul.mubr.f32.vlgmr.msra.gmra.mrb[252].mxu0 %v4295_v16  ;;  %10891 = vmatmul.mubr.f32.vlgmr.msra.gmra.mrb[252].mxu1 %v4505_v17  ;;  %v9151_v16 = vld [vmem:[%s17077_s29 + $0x278] sm:$0xff]  ;;  %v5312_v26 = vld [vmem:[#allocation5 + $0x168] sm:$0xff] }
 0x361   :  { %11935 = vmatpush3.bf16.msra.mxu0 %v11934_v3  ;;  %10828 = vmatprep.mubr.msk.f32.mxu0 %vm13284_vm0, %v16957_v0  ;;  %v4554_v3 = vrot.slane %v4523_v8, 1  ;;  %v4315_v17 = vld [vmem:[#allocation2 + $0x9c] ss:$2 sm:$0xff]  ;;  %v4768_v56 = vsel %vm3946_vm6, %v4765_v57, %v4767_v11 }
 0x362   :  { %10893 = vmatprep.mubr.msk.f32.mxu1 %vm13284_vm0, %v16957_v0  ;;  %11936 = vmatprep.subr.bf16.mxu0 %v16959_v41 }
 0x363   :  { %v4565_v22 = vsel %vm3946_vm6, %v4547_v18, %v4554_v3  ;;  %v5301_v18 = vld [vmem:[#allocation5 + $0x110] sm:$0xff] }
 0x364   :  { %10829 = vmatmul.mubr.f32.gmra.mrb[254].mxu0 %v4297_v14  ;;  %10894 = vmatmul.mubr.f32.gmra.mrb[254].mxu1 %v4507_v38  ;;  %v4345_v14 = vrot.slane %v4315_v17, 1  ;;  %v4555_v38 = vrot.slane %v4525_v24, 1  ;;  %v5066_v24 = vld [vmem:[#allocation5 + $0xa0] sm:$0xff] }
 0x365   :  { %10831 = vmatprep.mubr.msk.f32.mxu0 %vm13284_vm0, %v16957_v0  ;;  %10896 = vmatprep.mubr.msk.f32.mxu1 %vm13284_vm0, %v16957_v0 }
 0x366   :  { %11938 = vmatpush3.bf16.msra.mxu0 %v11937_v9  ;;  %v11955_v9 = vpack.c.bf16 %v9151_v16, %v9150_v2  ;;  %v4346_v32 = vsel %vm3946_vm6, %v4344_v52, %v4345_v14  ;;  %v4556_v29 = vsel %vm3946_vm6, %v4554_v3, %v4555_v38  ;;  %v5300_v3 = vld [vmem:[#allocation5 + $0x108] sm:$0xff] }
 0x367   :  { %11939 = vmatprep.subr.bf16.mxu0 %v16959_v41 }
 0x368   :  { %10832 = vmatmul.mubr.f32.gmra.mrb[0].mxu0 %v4353_v27  ;;  %10897 = vmatmul.mubr.f32.gmra.mrb[0].mxu1 %v4563_v23  ;;  %v4558_v27 = vsel %vm3946_vm6, %v4555_v38, %v4557_v1  ;;  %v4715_v23 = vld [vmem:[#allocation2 + $0x4] ss:$2 sm:$0xff] }
 0x369   :  { %10834 = vmatprep.mubr.msk.f32.mxu0 %vm13284_vm0, %v16957_v0  ;;  %10899 = vmatprep.mubr.msk.f32.mxu1 %vm13284_vm0, %v16957_v0  ;;  %v5302_v38 = vld [vmem:[#allocation5 + $0x118] sm:$0xff] }
 0x36a   :  { %11941 = vmatpush3.bf16.msra.mxu0 %v11940_v20  ;;  %v4348_v20 = vsel %vm3946_vm6, %v4345_v14, %v4347_v53  ;;  %v11964_v14 = vpack.c.bf16 %v5067_v21, %v5066_v24  ;;  %v12009_v15 = vpack.c.bf16 %v5302_v38, %v5301_v18 }
 0x36b   :  { %11942 = vmatprep.subr.bf16.mxu0 %v16959_v41 }
 0x36c   :  { %10835 = vmatmul.mubr.f32.gmra.mrb[2].mxu0 %v4323_v43  ;;  %10900 = vmatmul.mubr.f32.gmra.mrb[2].mxu1 %v4533_v4  ;;  %v4725_v43 = vld [vmem:[#allocation2 + $0x52] ss:$2 sm:$0x1f] }
 0x36d   :  { %10837 = vmatprep.mubr.msk.f32.mxu0 %vm13284_vm0, %v16957_v0  ;;  %10902 = vmatprep.mubr.msk.f32.mxu1 %vm13284_vm0, %v16957_v0  ;;  %v4744_v30 = vrot.slane %v4725_v43, 3 }
 0x36e   :  { %11944 = vmatpush3.bf16.msra.mxu0 %v11943_v37  ;;  %v4742_v37 = vrot.slane %v4723_v60, 3 }
 0x36f   :  { %11945 = vmatprep.subr.bf16.mxu0 %v16959_v41  ;;  %v4774_v39 = vsel %vm267_vm4, %v4744_v30, %v4753_v47 }
 0x370   :  { %10838 = vmatmul.mubr.f32.gmra.mrb[4].mxu0 %v4325_v40  ;;  %10903 = vmatmul.mubr.f32.gmra.mrb[4].mxu1 %v4535_v54  ;;  %v4743_v4 = vsel %vm3922_vm5, %v4741_v35, %v4742_v37  ;;  %v4745_v46 = vsel %vm3922_vm5, %v4742_v37, %v4744_v30  ;;  %v4756_v40 = vrot.slane %v4731_v55, 6  ;;  %v5306_v35 = vld [vmem:[#allocation5 + $0x138] sm:$0xff]  ;;  %v5307_v37 = vld [vmem:[#allocation5 + $0x140] sm:$0xff] }
 0x371   :  { %10840 = vmatprep.mubr.msk.f32.mxu0 %vm13284_vm0, %v16957_v0  ;;  %10905 = vmatprep.mubr.msk.f32.mxu1 %vm13284_vm0, %v16957_v0  ;;  %v12015_v60 = vpack.c.bf16 %v5306_v35, %v5305_v28 }
 0x372   :  { %11947 = vmatpush3.bf16.msra.mxu0 %v11946_v33  ;;  %v4754_v33 = vrot.slane %v4729_v51, 6 }
 0x373   :  { %11948 = vmatprep.subr.bf16.mxu0 %v16959_v41 }
 0x374   :  { %10841 = vmatmul.mubr.f32.gmra.mrb[6].mxu0 %v4354_v58  ;;  %10906 = vmatmul.mubr.f32.gmra.mrb[6].mxu1 %v4564_v63  ;;  %v4755_v54 = vsel %vm267_vm4, %v4753_v47, %v4754_v33  ;;  %v4757_v7 = vsel %vm267_vm4, %v4754_v33, %v4756_v40  ;;  %v5062_v58 = vld [vmem:[#allocation5 + $0x80] sm:$0xff]  ;;  %v5063_v63 = vld [vmem:[#allocation5 + $0x88] sm:$0xff]  ;;  %v5309_v47 = vld [vmem:[#allocation5 + $0x150] sm:$0xff] }
 0x375   :  { %10843 = vmatprep.mubr.msk.f32.mxu0 %vm13284_vm0, %v16957_v0  ;;  %10908 = vmatprep.mubr.msk.f32.mxu1 %vm13284_vm0, %v16957_v0  ;;  %v4775_v49 = vsel %vm3946_vm6, %v4757_v7, %v4764_v44  ;;  %v11958_v25 = vpack.c.bf16 %v5063_v63, %v5062_v58  ;;  %v5077_v7 = vld [vmem:[#allocation5 + $0xf8] sm:$0xff] }
 0x376   :  { %11950 = vmatpush3.bf16.msra.mxu0 %v11949_v50  ;;  %v4766_v50 = vsel %vm3946_vm6, %v4764_v44, %v4765_v57  ;;  %v11979_v57 = vpack.c.bf16 %v5077_v7, %v5076_v45 }
 0x377   :  { %11951 = vmatprep.subr.bf16.mxu0 %v16959_v41  ;;  %11959 = vmatpush3.bf16.msra.mxu1 %v11958_v25 }
 0x378   :  { %10844 = vmatmul.mubr.f32.gmra.mrb[8].mxu0 %v4335_v6  ;;  %10909 = vmatmul.mubr.f32.gmra.mrb[8].mxu1 %v4545_v12  ;;  %v5065_v6 = vld [vmem:[#allocation5 + $0x98] sm:$0xff]  ;;  %v5299_v12 = vld [vmem:[#allocation5 + $0x100] sm:$0xff] }
 0x379   :  { %10846 = vmatprep.mubr.msk.f32.mxu0 %vm13284_vm0, %v16957_v0  ;;  %10911 = vmatprep.mubr.msk.f32.mxu1 %vm13284_vm0, %v16957_v0  ;;  %v12006_v2 = vpack.c.bf16 %v5300_v3, %v5299_v12 }
 0x37a   :  { %11953 = vmatpush3.bf16.msra.mxu0 %v11952_v5  ;;  %11960 = vmatprep.subr.bf16.mxu1 %v16959_v41  ;;  %v5064_v5 = vld [vmem:[#allocation5 + $0x90] sm:$0xff] }
 0x37b   :  { %11954 = vmatprep.subr.bf16.mxu0 %v16959_v41  ;;  %v11961_v52 = vpack.c.bf16 %v5065_v6, %v5064_v5 }
 0x37c   :  { %10847 = vmatmul.mubr.f32.gmra.mrb[10].mxu0 %v4355_v10  ;;  %10912 = vmatmul.mubr.f32.gmra.mrb[10].mxu1 %v4565_v22 }
 0x37d   :  { %10849 = vmatprep.mubr.msk.f32.mxu0 %vm13284_vm0, %v16957_v0  ;;  %10914 = vmatprep.mubr.msk.f32.mxu1 %vm13284_vm0, %v16957_v0 }
 0x37e   :  { %11956 = vmatpush3.bf16.msra.mxu0 %v11955_v9  ;;  %11962 = vmatpush3.bf16.msra.mxu1 %v11961_v52 }
 0x37f   :  { %12005 = vmatprep.subr.bf16.mxu0 %v16959_v41  ;;  %11963 = vmatprep.subr.bf16.mxu1 %v16959_v41 }
 0x380   :  { %10850 = vmatmul.mubr.f32.gmra.mrb[12].mxu0 %v4346_v32  ;;  %10915 = vmatmul.mubr.f32.gmra.mrb[12].mxu1 %v4556_v29  ;;  %v5069_v32 = vld [vmem:[#allocation5 + $0xb8] sm:$0xff] }
 0x381   :  { %10852 = vmatprep.mubr.msk.f32.mxu0 %vm13284_vm0, %v16957_v0  ;;  %10917 = vmatprep.mubr.msk.f32.mxu1 %vm13284_vm0, %v16957_v0  ;;  %v11967_v29 = vpack.c.bf16 %v5069_v32, %v5068_v19 }
 0x382   :  { %11965 = vmatpush3.bf16.msra.mxu1 %v11964_v14 }
 0x383   :  { %11966 = vmatprep.subr.bf16.mxu1 %v16959_v41 }
 0x384   :  { %10853 = vmatmul.mubr.f32.gmra.mrb[14].mxu0 %v4348_v20  ;;  %10918 = vmatmul.mubr.f32.gmra.mrb[14].mxu1 %v4558_v27  ;;  %v5070_v27 = vld [vmem:[#allocation5 + $0xc0] sm:$0xff] }
 0x385   :  { %10855 = vmatprep.mubr.msk.f32.mxu0 %vm13284_vm0, %v16957_v0  ;;  %10920 = vmatprep.mubr.msk.f32.mxu1 %vm13284_vm0, %v16957_v0 }
 0x386   :  { %11968 = vmatpush3.bf16.msra.mxu1 %v11967_v29 }
 0x387   :  { %11969 = vmatprep.subr.bf16.mxu1 %v16959_v41 }
 0x388   :  { %10856 = vmatmul.mubr.f32.gmra.mrb[16].mxu0 %v4347_v53  ;;  %10921 = vmatmul.mubr.f32.gmra.mrb[16].mxu1 %v4557_v1  ;;  %v5303_v53 = vld [vmem:[#allocation5 + $0x120] sm:$0xff]  ;;  %v5304_v1 = vld [vmem:[#allocation5 + $0x128] sm:$0xff] }
 0x389   :  { %10955 = vmatprep.mubr.msk.f32.mxu0 %vm13284_vm0, %v16957_v0  ;;  %11020 = vmatprep.mubr.msk.f32.mxu1 %vm13284_vm0, %v16957_v0  ;;  %v12012_v20 = vpack.c.bf16 %v5304_v1, %v5303_v53 }
 0x38c   :  { %10956 = vmatmul.mubr.f32.vlgmr.msra.gmra.mrb[18].mxu0 %v4715_v23  ;;  %v5071_v23 = vld [vmem:[#allocation5 + $0xc8] sm:$0xff] }
 0x38d   :  { %10958 = vmatprep.mubr.msk.f32.mxu0 %vm13284_vm0, %v16957_v0  ;;  %12007 = vmatpush3.bf16.msra.mxu0 %v12006_v2 }
 0x38e   :  { %12008 = vmatprep.subr.bf16.mxu0 %v16959_v41 }
 0x390   :  { %10959 = vmatmul.mubr.f32.gmra.mrb[20].mxu0 %v4717_v34  ;;  %v11970_v34 = vpack.c.bf16 %v5071_v23, %v5070_v27 }
 0x391   :  { %10961 = vmatprep.mubr.msk.f32.mxu0 %vm13284_vm0, %v16957_v0  ;;  %12010 = vmatpush3.bf16.msra.mxu0 %v12009_v15 }
 0x392   :  { %12011 = vmatprep.subr.bf16.mxu0 %v16959_v41  ;;  %11971 = vmatpush3.bf16.msra.mxu1 %v11970_v34 }
 0x393   :  { %11972 = vmatprep.subr.bf16.mxu1 %v16959_v41 }
 0x394   :  { %10962 = vmatmul.mubr.f32.gmra.mrb[22].mxu0 %v4773_v42  ;;  %v5073_v42 = vld [vmem:[#allocation5 + $0xd8] sm:$0xff] }
 0x395   :  { %10964 = vmatprep.mubr.msk.f32.mxu0 %vm13284_vm0, %v16957_v0  ;;  %12013 = vmatpush3.bf16.msra.mxu0 %v12012_v20  ;;  %v11973_v43 = vpack.c.bf16 %v5073_v42, %v5072_v36 }
 0x396   :  { %12014 = vmatprep.subr.bf16.mxu0 %v16959_v41 }
 0x397   :  { %11974 = vmatpush3.bf16.msra.mxu1 %v11973_v43 }
 0x398   :  { %10965 = vmatmul.mubr.f32.gmra.mrb[24].mxu0 %v4743_v4  ;;  %v5308_v4 = vld [vmem:[#allocation5 + $0x148] sm:$0xff]  ;;  %11975 = vmatprep.subr.bf16.mxu1 %v16959_v41 }
 0x399   :  { %10967 = vmatprep.mubr.msk.f32.mxu0 %vm13284_vm0, %v16957_v0  ;;  %12016 = vmatpush3.bf16.msra.mxu0 %v12015_v60  ;;  %v12018_v30 = vpack.c.bf16 %v5308_v4, %v5307_v37 }
 0x39a   :  { %12017 = vmatprep.subr.bf16.mxu0 %v16959_v41 }
 0x39c   :  { %10968 = vmatmul.mubr.f32.gmra.mrb[26].mxu0 %v4745_v46  ;;  %v5075_v46 = vld [vmem:[#allocation5 + $0xe8] sm:$0xff] }
 0x39d   :  { %10970 = vmatprep.mubr.msk.f32.mxu0 %vm13284_vm0, %v16957_v0  ;;  %12019 = vmatpush3.bf16.msra.mxu0 %v12018_v30  ;;  %v11976_v51 = vpack.c.bf16 %v5075_v46, %v5074_v31 }
 0x39e   :  { %12020 = vmatprep.subr.bf16.mxu0 %v16959_v41 }
 0x39f   :  { %11977 = vmatpush3.bf16.msra.mxu1 %v11976_v51 }
 0x3a0   :  { %10971 = vmatmul.mubr.f32.gmra.mrb[28].mxu0 %v4774_v39  ;;  %v5310_v39 = vld [vmem:[#allocation5 + $0x158] sm:$0xff]  ;;  %11978 = vmatprep.subr.bf16.mxu1 %v16959_v41 }
 0x3a1   :  { %10973 = vmatprep.mubr.msk.f32.mxu0 %vm13284_vm0, %v16957_v0  ;;  %v12021_v33 = vpack.c.bf16 %v5310_v39, %v5309_v47 }
 0x3a3   :  { %12022 = vmatpush3.bf16.msra.mxu0 %v12021_v33  ;;  %11980 = vmatpush3.bf16.msra.mxu1 %v11979_v57 }
 0x3a4   :  { %10974 = vmatmul.mubr.f32.gmra.mrb[30].mxu0 %v4755_v54  ;;  %12023 = vmatprep.subr.bf16.mxu0 %v16959_v41 }
 0x3a5   :  { %10976 = vmatprep.mubr.msk.f32.mxu0 %vm13284_vm0, %v16957_v0  ;;  %11981 = vmatprep.subr.bf16.mxu1 %v16959_v41 }
 0x3a8   :  { %10977 = vmatmul.mubr.f32.gmra.mrb[32].mxu0 %v4775_v49  ;;  %v5311_v49 = vld [vmem:[#allocation5 + $0x160] sm:$0xff] }
 0x3a9   :  { %10979 = vmatprep.mubr.msk.f32.mxu0 %vm13284_vm0, %v16957_v0 }
 0x3ac   :  { %10980 = vmatmul.mubr.f32.gmra.mrb[34].mxu0 %v4766_v50  ;;  %v12024_v50 = vpack.c.bf16 %v5312_v26, %v5311_v49 }
 0x3ad   :  { %10982 = vmatprep.mubr.msk.f32.mxu0 %vm13284_vm0, %v16957_v0 }
 0x3ae   :  { %12025 = vmatpush3.bf16.msra.mxu0 %v12024_v50 }
 0x3af   :  { %12026 = vmatprep.subr.bf16.mxu0 %v16959_v41 }
 0x3b0   :  { %10983 = vmatmul.mubr.f32.gmra.mrb[36].mxu0 %v4768_v56  ;;  %v5314_v56 = vld [vmem:[#allocation5 + $0x178] sm:$0xff] }
 0x3b1   :  { %10985 = vmatprep.mubr.msk.f32.mxu0 %vm13284_vm0, %v16957_v0 }
 0x3b4   :  { %10986 = vmatmul.mubr.f32.gmra.mrb[38].mxu0 %v4767_v11  ;;  %v5313_v11 = vld [vmem:[#allocation5 + $0x170] sm:$0xff] }
 0x3b5   :  { %11114 = vmatprep.mubr.msk.f32.mxu0 %vm13284_vm0, %v16957_v0  ;;  %v12027_v58 = vpack.c.bf16 %v5314_v56, %v5313_v11 }
 0x3b7   :  { %12028 = vmatpush3.bf16.msra.mxu0 %v12027_v58 }
 0x3b8   :  { %12053 = vmatprep.subr.bf16.mxu0 %v16959_v41 }
 0x3d4   :  { %v4120_v48 = vpop.f32.mrb[230].mxu0  ;;  %v4240_v59 = vpop.f32.mrb[230].mxu1 }
 0x3d5   :  { %v15908_v8 = vadd.f32 %v4240_v59, %v4120_v48  ;;  %v10697_v62 = vpop.f32.mrb[231].mxu0  ;;  %v10762_v61 = vpop.f32.mrb[231].mxu1 }
 0x3dc   :  { %v4125_v16 = vpop.f32.mrb[232].mxu0  ;;  %v4245_v17 = vpop.f32.mrb[232].mxu1 }
 0x3dd   :  { %v15912_v9 = vadd.f32 %v4245_v17, %v4125_v16  ;;  %v10700_v10 = vpop.f32.mrb[233].mxu0  ;;  %v10765_v22 = vpop.f32.mrb[233].mxu1 }
 0x3ef   :  { %v4130_v55 = vpop.f32.mrb[234].mxu0  ;;  %v4250_v13 = vpop.f32.mrb[234].mxu1 }
 0x3f0   :  { %v15923_v40 = vadd.f32 %v4250_v13, %v4130_v55  ;;  %v10703_v54 = vpop.f32.mrb[235].mxu0  ;;  %v10768_v44 = vpop.f32.mrb[235].mxu1 }
 0x3f7   :  { %v4135_v63 = vpop.f32.mrb[236].mxu0  ;;  %v4255_v25 = vpop.f32.mrb[236].mxu1 }
 0x3f8   :  { %v4256_v48 = vadd.f32 %v4255_v25, %v4135_v63  ;;  %v10706_v59 = vpop.f32.mrb[237].mxu0  ;;  %v10771_v62 = vpop.f32.mrb[237].mxu1 }
 0x3fb   :  { %v4140_v61 = vpop.f32.mrb[238].mxu0 }
 0x3fc   :  { %v10709_v6 = vpop.f32.mrb[239].mxu0 }
 0x3fd   :  { %v4260_v5 = vpop.f32.mrb[238].mxu1 }
 0x3fe   :  { %v4261_v12 = vadd.f32 %v4260_v5, %v4140_v61  ;;  %v10774_v52 = vpop.f32.mrb[239].mxu1 }
 0x407   :  { %v4145_v3 = vpop.f32.mrb[240].mxu0  ;;  %v4265_v2 = vpop.f32.mrb[240].mxu1 }
 0x408   :  { %v4266_v16 = vadd.f32 %v4265_v2, %v4145_v3  ;;  %v10712_v17 = vpop.f32.mrb[241].mxu0  ;;  %v10777_v24 = vpop.f32.mrb[241].mxu1 }
 0x40f   :  { %v4150_v21 = vpop.f32.mrb[242].mxu0  ;;  %v4270_v18 = vpop.f32.mrb[242].mxu1 }
 0x410   :  { %v4271_v10 = vadd.f32 %v4270_v18, %v4150_v21  ;;  %v10715_v22 = vpop.f32.mrb[243].mxu0  ;;  %v10780_v14 = vpop.f32.mrb[243].mxu1 }
 0x41f   :  { %v4155_v38 = vpop.f32.mrb[244].mxu0  ;;  %v4275_v15 = vpop.f32.mrb[244].mxu1 }
 0x420   :  { %v4276_v19 = vadd.f32 %v4275_v15, %v4155_v38  ;;  %v10718_v32 = vpop.f32.mrb[245].mxu0  ;;  %v10783_v29 = vpop.f32.mrb[245].mxu1 }
 0x427   :  { %v4160_v53 = vpop.f32.mrb[246].mxu0  ;;  %v4280_v1 = vpop.f32.mrb[246].mxu1 }
 0x428   :  { %v15930_v20 = vadd.f32 %v4280_v1, %v4160_v53  ;;  %v10721_v27 = vpop.f32.mrb[247].mxu0  ;;  %v10786_v23 = vpop.f32.mrb[247].mxu1 }
 0x42b   :  { %v4165_v28 = vpop.f32.mrb[248].mxu0  ;;  %v4285_v34 = vpop.f32.mrb[248].mxu1 }
 0x42c   :  { %v15932_v35 = vadd.f32 %v4285_v34, %v4165_v28  ;;  %v10724_v60 = vpop.f32.mrb[249].mxu0  ;;  %v10789_v36 = vpop.f32.mrb[249].mxu1 }
 0x42f   :  { %v4170_v42 = vpop.f32.mrb[250].mxu0  ;;  %v4290_v37 = vpop.f32.mrb[250].mxu1 }
 0x430   :  { %v15934_v43 = vadd.f32 %v4290_v37, %v4170_v42  ;;  %v10727_v4 = vpop.f32.mrb[251].mxu0  ;;  %v10792_v30 = vpop.f32.mrb[251].mxu1 }
 0x433   :  { %v4439_v31 = vpop.f32.mrb[252].mxu0  ;;  %v4649_v46 = vpop.f32.mrb[252].mxu1 }
 0x434   :  { %v4493_v47 = vadd.f32 %v4439_v31, %v15908_v8  ;;  %v10827_v51 = vpop.f32.mrb[253].mxu0  ;;  %v10892_v39 = vpop.f32.mrb[253].mxu1 }
 0x436   :  { %v15937_v33 = vadd.f32 %v4649_v46, %v4493_v47 }
 0x437   :  { %v4444_v55 = vpop.f32.mrb[254].mxu0  ;;  %v4654_v13 = vpop.f32.mrb[254].mxu1 }
 0x438   :  { %v4494_v54 = vadd.f32 %v4444_v55, %v15912_v9  ;;  %v10830_v44 = vpop.f32.mrb[255].mxu0  ;;  %v10895_v45 = vpop.f32.mrb[255].mxu1 }
 0x43a   :  { %v4704_v7 = vadd.f32 %v4654_v13, %v4494_v54  ;;  %v15961_v54 = vld [vmem:[%s17079_s1] ss:$0 sm:$0xff] }
 0x43b   :  { %v4449_v49 = vpop.f32.mrb[0].mxu0  ;;  %v4659_v57 = vpop.f32.mrb[0].mxu1 }
 0x43c   :  { %v4495_v26 = vadd.f32 %v4449_v49, %v15923_v40  ;;  %v10833_v50 = vpop.f32.mrb[1].mxu0  ;;  %v10898_v11 = vpop.f32.mrb[1].mxu1 }
 0x43e   :  { %v4705_v56 = vadd.f32 %v4659_v57, %v4495_v26 }
 0x43f   :  { %v4454_v58 = vpop.f32.mrb[2].mxu0  ;;  %v4664_v8 = vpop.f32.mrb[2].mxu1 }
 0x440   :  { %v4496_v63 = vadd.f32 %v4454_v58, %v4256_v48  ;;  %v10836_v25 = vpop.f32.mrb[3].mxu0  ;;  %v10901_v59 = vpop.f32.mrb[3].mxu1 }
 0x442   :  { %v4706_v62 = vadd.f32 %v4664_v8, %v4496_v63 }
 0x443   :  { %v4459_v61 = vpop.f32.mrb[4].mxu0  ;;  %v4669_v5 = vpop.f32.mrb[4].mxu1 }
 0x444   :  { %v4497_v6 = vadd.f32 %v4459_v61, %v4261_v12  ;;  %v10839_v9 = vpop.f32.mrb[5].mxu0  ;;  %v10904_v52 = vpop.f32.mrb[5].mxu1 }
 0x445   :  { %v5006_v9 = vld [vmem:[#allocation5 + $0x8] sm:$0xff] }
 0x446   :  { %v15941_v3 = vadd.f32 %v4669_v5, %v4497_v6  ;;  %v5005_v6 = vld [vmem:[#allocation5] sm:$0xff] }
 0x447   :  { %v4464_v2 = vpop.f32.mrb[6].mxu0  ;;  %v4674_v17 = vpop.f32.mrb[6].mxu1 }
 0x448   :  { %v4498_v24 = vadd.f32 %v4464_v2, %v4266_v16  ;;  %v10842_v40 = vpop.f32.mrb[7].mxu0  ;;  %v10907_v21 = vpop.f32.mrb[7].mxu1  ;;  %v11982_v2 = vpack.c.bf16 %v5006_v9, %v5005_v6 }
 0x449   :  { %v5604_v21 = vld [vmem:[#allocation5 + $0x208] sm:$0xff] }
 0x44a   :  { %v15943_v18 = vadd.f32 %v4674_v17, %v4498_v24 }
 0x44b   :  { %v4469_v22 = vpop.f32.mrb[8].mxu0  ;;  %v4679_v14 = vpop.f32.mrb[8].mxu1 }
 0x44c   :  { %v4499_v48 = vadd.f32 %v4469_v22, %v4271_v10  ;;  %v10845_v38 = vpop.f32.mrb[9].mxu0  ;;  %v10910_v15 = vpop.f32.mrb[9].mxu1 }
 0x44e   :  { %v15945_v32 = vadd.f32 %v4679_v14, %v4499_v48  ;;  %v5007_v14 = vld [vmem:[#allocation5 + $0x10] sm:$0xff]  ;;  %v5008_v48 = vld [vmem:[#allocation5 + $0x18] sm:$0xff] }
 0x44f   :  { %v4474_v29 = vpop.f32.mrb[10].mxu0  ;;  %v4684_v12 = vpop.f32.mrb[10].mxu1 }
 0x450   :  { %v4500_v53 = vadd.f32 %v4474_v29, %v4276_v19  ;;  %v10848_v1 = vpop.f32.mrb[11].mxu0  ;;  %v10913_v27 = vpop.f32.mrb[11].mxu1 }
 0x451   :  { %v5605_v1 = vld [vmem:[#allocation5 + $0x210] sm:$0xff]  ;;  %v5606_v27 = vld [vmem:[#allocation5 + $0x218] sm:$0xff] }
 0x452   :  { %v15947_v23 = vadd.f32 %v4684_v12, %v4500_v53  ;;  %v11985_v53 = vpack.c.bf16 %v5008_v48, %v5007_v14  ;;  %v5613_v14 = vld [vmem:[#allocation5 + $0x250] sm:$0xff] }
 0x453   :  { %v4479_v28 = vpop.f32.mrb[12].mxu0  ;;  %v4689_v16 = vpop.f32.mrb[12].mxu1 }
 0x454   :  { %v4501_v34 = vadd.f32 %v4479_v28, %v15930_v20  ;;  %v10851_v60 = vpop.f32.mrb[13].mxu0  ;;  %v10916_v36 = vpop.f32.mrb[13].mxu1 }
 0x456   :  { %v15950_v42 = vadd.f32 %v4689_v16, %v4501_v34  ;;  %v5009_v16 = vld [vmem:[#allocation5 + $0x20] sm:$0xff]  ;;  %v5010_v34 = vld [vmem:[#allocation5 + $0x28] sm:$0xff] }
 0x457   :  { %v4484_v10 = vpop.f32.mrb[14].mxu0  ;;  %v4694_v37 = vpop.f32.mrb[14].mxu1 }
 0x458   :  { %v4502_v4 = vadd.f32 %v4484_v10, %v15932_v35  ;;  %v10854_v30 = vpop.f32.mrb[15].mxu0  ;;  %v10919_v31 = vpop.f32.mrb[15].mxu1  ;;  %v12057_v10 = vpack.c.bf16 %v5606_v27, %v5605_v1 }
 0x459   :  { %v11988_v30 = vpack.c.bf16 %v5010_v34, %v5009_v16  ;;  %v5607_v31 = vld [vmem:[#allocation5 + $0x220] sm:$0xff] }
 0x45a   :  { %v15953_v46 = vadd.f32 %v4694_v37, %v4502_v4 }
 0x45b   :  { %v4489_v19 = vpop.f32.mrb[16].mxu0  ;;  %v4699_v47 = vpop.f32.mrb[16].mxu1 }
 0x45c   :  { %v4503_v51 = vadd.f32 %v4489_v19, %v15934_v43  ;;  %v10857_v39 = vpop.f32.mrb[17].mxu0  ;;  %v10922_v55 = vpop.f32.mrb[17].mxu1  ;;  %v5608_v19 = vld [vmem:[#allocation5 + $0x228] sm:$0xff] }
 0x45e   :  { %v15956_v13 = vadd.f32 %v4699_v47, %v4503_v51  ;;  %v5011_v47 = vld [vmem:[#allocation5 + $0x30] sm:$0xff]  ;;  %v5012_v51 = vld [vmem:[#allocation5 + $0x38] sm:$0xff] }
 0x45f   :  { %v4859_v20 = vpop.f32.mrb[18].mxu0 }
 0x460   :  { %v4913_v35 = vadd.f32 %v4859_v20, %v15937_v33  ;;  %v10957_v44 = vpop.f32.mrb[19].mxu0  ;;  %v12060_v20 = vpack.c.bf16 %v5608_v19, %v5607_v31  ;;  %v5020_v19 = vld [vmem:[#allocation5 + $0x78] sm:$0xff] }
 0x462   :  { %v4931_v45 = vadd.f32 %v15961_v54, %v4913_v35  ;;  %v5609_v35 = vld [vmem:[#allocation5 + $0x230] sm:$0xff] }
 0x463   :  { %v4864_v49 = vpop.f32.mrb[20].mxu0 }
 0x464   :  { %v4942_v57 = vmax.f32 %v4931_v45, 0.0  ;;  %v4914_v26 = vadd.f32 %v4864_v49, %v4704_v7  ;;  %v10960_v50 = vpop.f32.mrb[21].mxu0  ;;  %v11991_v49 = vpack.c.bf16 %v5012_v51, %v5011_v47 }
 0x465   :  { %v5014_v50 = vld [vmem:[#allocation5 + $0x48] sm:$0xff] }
 0x466   :  { %4953 = vst [vmem:[#allocation3] sm:$0xff] %v4942_v57  ;;  %v4932_v43 = vadd.f32 %v15961_v54, %v4914_v26  ;;  %v5610_v57 = vld [vmem:[#allocation5 + $0x238] sm:$0xff]  ;;  %v5013_v26 = vld [vmem:[#allocation5 + $0x40] sm:$0xff] }
 0x467   :  { %v4869_v11 = vpop.f32.mrb[22].mxu0 }
 0x468   :  { %v4943_v58 = vmax.f32 %v4932_v43, 0.0  ;;  %v4915_v8 = vadd.f32 %v4869_v11, %v4705_v56  ;;  %v10963_v63 = vpop.f32.mrb[23].mxu0  ;;  %v5603_v56 = vld [vmem:[#allocation5 + $0x200] sm:$0xff] }
 0x469   :  { %v12054_v15 = vpack.c.bf16 %v5604_v21, %v5603_v56 }
 0x46a   :  { %4954 = vst [vmem:[#allocation3 + $0x8] sm:$0xff] %v4943_v58  ;;  %v4933_v25 = vadd.f32 %v15961_v54, %v4915_v8 }
 0x46b   :  { %v4874_v59 = vpop.f32.mrb[24].mxu0 }
 0x46c   :  { %v4944_v61 = vmax.f32 %v4933_v25, 0.0  ;;  %v4916_v33 = vadd.f32 %v4874_v59, %v4706_v62  ;;  %v10966_v5 = vpop.f32.mrb[25].mxu0 }
 0x46e   :  { %4955 = vst [vmem:[#allocation3 + $0x10] sm:$0xff] %v4944_v61  ;;  %v4934_v7 = vadd.f32 %v15961_v54, %v4916_v33  ;;  %v12063_v61 = vpack.c.bf16 %v5610_v57, %v5609_v35  ;;  %v11994_v33 = vpack.c.bf16 %v5014_v50, %v5013_v26  ;;  %v5617_v57 = vld [vmem:[#allocation5 + $0x270] sm:$0xff]  ;;  %v5618_v26 = vld [vmem:[#allocation5 + $0x278] sm:$0xff] }
 0x46f   :  { %v4879_v52 = vpop.f32.mrb[26].mxu0 }
 0x470   :  { %v4945_v17 = vmax.f32 %v4934_v7, 0.0  ;;  %v4917_v24 = vadd.f32 %v4879_v52, %v15941_v3  ;;  %v10969_v40 = vpop.f32.mrb[27].mxu0 }
 0x471   :  { %v5022_v22 = vld [vmem:[#allocation3 + $0x1] ss:$2 sm:$0xff]  ;;  %v5016_v40 = vld [vmem:[#allocation5 + $0x58] sm:$0xff] }
 0x472   :  { %4956 = vst [vmem:[#allocation3 + $0x18] sm:$0xff] %v4945_v17  ;;  %v4935_v62 = vadd.f32 %v15961_v54, %v4917_v24  ;;  %11021 = vmatmul.mubr.f32.vlgmr.msra.gmra.mrb[18].mxu1 %v5022_v22  ;;  %v5612_v17 = vld [vmem:[#allocation5 + $0x248] sm:$0xff]  ;;  %v5015_v24 = vld [vmem:[#allocation5 + $0x50] sm:$0xff] }
 0x473   :  { %v4884_v38 = vpop.f32.mrb[28].mxu0  ;;  %11983 = vmatpush3.bf16.msra.mxu1 %v11982_v2  ;;  %11023 = vmatprep.mubr.msk.f32.mxu1 %vm13284_vm0, %v16957_v0  ;;  %v5611_v2 = vld [vmem:[#allocation5 + $0x240] sm:$0xff] }
 0x474   :  { %v4946_v29 = vmax.f32 %v4935_v62, 0.0  ;;  %v4918_v12 = vadd.f32 %v4884_v38, %v15943_v18  ;;  %v10972_v3 = vpop.f32.mrb[29].mxu0  ;;  %11984 = vmatprep.subr.bf16.mxu1 %v16959_v41  ;;  %v12066_v22 = vpack.c.bf16 %v5612_v17, %v5611_v2  ;;  %v5452_v2 = vld [vmem:[#allocation5 + $0x188] sm:$0xff] }
 0x475   :  { %v5259_v28 = vld [vmem:[#allocation3 + $0x2] ss:$2 sm:$0xff]  ;;  %v5024_v8 = vld [vmem:[#allocation3 + $0x11] ss:$2 sm:$0x1] }
 0x476   :  { %4957 = vst [vmem:[#allocation3 + $0x20] sm:$0xff] %v4946_v29  ;;  %v4936_v60 = vadd.f32 %v15961_v54, %v4918_v12  ;;  %11115 = vmatmul.mubr.f32.vlgmr.msra.gmra.mrb[40].mxu0 %v5259_v28  ;;  %v5261_v59 = vld [vmem:[#allocation3 + $0x12] ss:$2 sm:$0x1]  ;;  %v11997_v29 = vpack.c.bf16 %v5016_v40, %v5015_v24  ;;  %v5614_v12 = vld [vmem:[#allocation5 + $0x258] sm:$0xff]  ;;  %v5017_v3 = vld [vmem:[#allocation5 + $0x60] sm:$0xff] }
 0x477   :  { %v4889_v36 = vpop.f32.mrb[30].mxu0  ;;  %12055 = vmatpush3.bf16.msra.mxu0 %v12054_v15  ;;  %11117 = vmatprep.mubr.msk.f32.mxu0 %vm13284_vm0, %v16957_v0  ;;  %v12069_v34 = vpack.c.bf16 %v5614_v12, %v5613_v14  ;;  %v4964_v14 = vld [vmem:[#allocation3] ss:$2 sm:$0xff] }
 0x478   :  { %v4947_v18 = vmax.f32 %v4936_v60, 0.0  ;;  %v4919_v37 = vadd.f32 %v4889_v36, %v15945_v32  ;;  %v10975_v4 = vpop.f32.mrb[31].mxu0  ;;  %11986 = vmatpush3.bf16.msra.mxu1 %v11985_v53  ;;  %12056 = vmatprep.subr.bf16.mxu0 %v16959_v41  ;;  %v5018_v53 = vld [vmem:[#allocation5 + $0x68] sm:$0xff] }
 0x479   :  { %11987 = vmatprep.subr.bf16.mxu1 %v16959_v41  ;;  %v5019_v4 = vld [vmem:[#allocation5 + $0x70] sm:$0xff] }
 0x47a   :  { %4958 = vst [vmem:[#allocation3 + $0x28] sm:$0xff] %v4947_v18  ;;  %v4937_v39 = vadd.f32 %v15961_v54, %v4919_v37  ;;  %v5615_v18 = vld [vmem:[#allocation5 + $0x260] sm:$0xff]  ;;  %v5616_v37 = vld [vmem:[#allocation5 + $0x268] sm:$0xff] }
 0x47b   :  { %v4894_v55 = vpop.f32.mrb[32].mxu0  ;;  %12058 = vmatpush3.bf16.msra.mxu0 %v12057_v10  ;;  %v12000_v10 = vpack.c.bf16 %v5018_v53, %v5017_v3  ;;  %v12072_v35 = vpack.c.bf16 %v5616_v37, %v5615_v18  ;;  %v5455_v3 = vld [vmem:[#allocation5 + $0x1a0] sm:$0xff] }
 0x47c   :  { %v4948_v44 = vmax.f32 %v4937_v39, 0.0  ;;  %v4920_v32 = vadd.f32 %v4894_v55, %v15947_v23  ;;  %v10978_v45 = vpop.f32.mrb[33].mxu0  ;;  %11989 = vmatpush3.bf16.msra.mxu1 %v11988_v30  ;;  %12059 = vmatprep.subr.bf16.mxu0 %v16959_v41 }
 0x47d   :  { %v15983_v43 = vld [vmem:[#allocation3 + $0x16] ss:$2 sm:$0xff]  ;;  %v15985_v11 = vld [vmem:[#allocation3 + $0x17] ss:$2 sm:$0xff]  ;;  %11990 = vmatprep.subr.bf16.mxu1 %v16959_v41 }
 0x47e   :  { %4959 = vst [vmem:[#allocation3 + $0x30] sm:$0xff] %v4948_v44  ;;  %v4938_v58 = vadd.f32 %v15961_v54, %v4920_v32  ;;  %v5039_v23 = vrot.slane %v15983_v43, 7  ;;  %v5276_v63 = vrot.slane %v15985_v11, 7  ;;  %v5028_v21 = vld [vmem:[#allocation3 + $0x26] ss:$2 sm:$0x1]  ;;  %v12075_v11 = vpack.c.bf16 %v5618_v26, %v5617_v57 }
 0x47f   :  { %v4899_v25 = vpop.f32.mrb[34].mxu0  ;;  %12061 = vmatpush3.bf16.msra.mxu0 %v12060_v20  ;;  %v5265_v15 = vld [vmem:[#allocation3 + $0x27] ss:$2 sm:$0x1]  ;;  %v5040_v28 = vrot.slane %v5028_v21, 7  ;;  %v5453_v21 = vld [vmem:[#allocation5 + $0x190] sm:$0xff] }
 0x480   :  { %v4949_v5 = vmax.f32 %v4938_v58, 0.0  ;;  %v4921_v6 = vadd.f32 %v4899_v25, %v15950_v42  ;;  %v10981_v9 = vpop.f32.mrb[35].mxu0  ;;  %v5058_v7 = vsel %vm4981_vm7, %v5024_v8, %v5039_v23  ;;  %v5295_v52 = vsel %vm4981_vm7, %v5261_v59, %v5276_v63  ;;  %11992 = vmatpush3.bf16.msra.mxu1 %v11991_v49  ;;  %12062 = vmatprep.subr.bf16.mxu0 %v16959_v41  ;;  %v4968_v40 = vld [vmem:[#allocation3 + $0x15] ss:$2 sm:$0xff] }
 0x481   :  { %11024 = vmatmul.mubr.f32.gmra.mrb[20].mxu1 %v5058_v7  ;;  %11118 = vmatmul.mubr.f32.gmra.mrb[42].mxu0 %v5295_v52  ;;  %v5277_v16 = vrot.slane %v5265_v15, 7  ;;  %v12003_v49 = vpack.c.bf16 %v5020_v19, %v5019_v4  ;;  %v5451_v52 = vld [vmem:[#allocation5 + $0x180] sm:$0xff] }
 0x482   :  { %4960 = vst [vmem:[#allocation3 + $0x38] sm:$0xff] %v4949_v5  ;;  %v4939_v42 = vadd.f32 %v15961_v54, %v4921_v6  ;;  %11026 = vmatprep.mubr.msk.f32.mxu1 %vm13284_vm0, %v16957_v0  ;;  %11993 = vmatprep.subr.bf16.mxu1 %v16959_v41  ;;  %v4970_v15 = vld [vmem:[#allocation3 + $0x25] ss:$2 sm:$0x1] }
 0x483   :  { %v4904_v56 = vpop.f32.mrb[36].mxu0  ;;  %12064 = vmatpush3.bf16.msra.mxu0 %v12063_v61  ;;  %11120 = vmatprep.mubr.msk.f32.mxu0 %vm13284_vm0, %v16957_v0  ;;  %v5278_v55 = vsel %vm4981_vm7, %v5276_v63, %v5277_v16  ;;  %v4983_v16 = vrot.slane %v4970_v15, 7 }
 0x484   :  { %v4950_v48 = vmax.f32 %v4939_v42, 0.0  ;;  %v4922_v62 = vadd.f32 %v4904_v56, %v15953_v46  ;;  %v10984_v38 = vpop.f32.mrb[37].mxu0  ;;  %11995 = vmatpush3.bf16.msra.mxu1 %v11994_v33  ;;  %12065 = vmatprep.subr.bf16.mxu0 %v16959_v41  ;;  %v5567_v42 = vld [vmem:[#allocation3 + $0x19] ss:$2 sm:$0xff]  ;;  %v12030_v56 = vpack.c.bf16 %v5452_v2, %v5451_v52  ;;  %v5465_v2 = vld [vmem:[#allocation5 + $0x1f0] sm:$0xff] }
 0x485   :  { %11996 = vmatprep.subr.bf16.mxu1 %v16959_v41  ;;  %v5580_v38 = vrot.slane %v5567_v42, 7  ;;  %v5411_v42 = vld [vmem:[#allocation3 + $0x3] ss:$2 sm:$0xff] }
 0x486   :  { %4961 = vst [vmem:[#allocation3 + $0x40] sm:$0xff] %v4950_v48  ;;  %v4940_v1 = vadd.f32 %v15961_v54, %v4922_v62  ;;  %v5563_v48 = vld [vmem:[#allocation3 + $0x4] ss:$2 sm:$0xff]  ;;  %v4982_v62 = vrot.slane %v4968_v40, 7 }
 0x487   :  { %v4909_v27 = vpop.f32.mrb[38].mxu0  ;;  %12067 = vmatpush3.bf16.msra.mxu0 %v12066_v22  ;;  %v5454_v22 = vld [vmem:[#allocation5 + $0x198] sm:$0xff] }
 0x488   :  { %v4951_v46 = vmax.f32 %v4940_v1, 0.0  ;;  %v4923_v60 = vadd.f32 %v4909_v27, %v15956_v13  ;;  %v10987_v36 = vpop.f32.mrb[39].mxu0  ;;  %11998 = vmatpush3.bf16.msra.mxu1 %v11997_v29  ;;  %12068 = vmatprep.subr.bf16.mxu0 %v16959_v41  ;;  %v5041_v13 = vsel %vm4981_vm7, %v5039_v23, %v5040_v28  ;;  %v5569_v29 = vld [vmem:[#allocation3 + $0x29] ss:$2 sm:$0x1]  ;;  %v12033_v27 = vpack.c.bf16 %v5454_v22, %v5453_v21 }
 0x489   :  { %v5030_v30 = vld [vmem:[#allocation3 + $0x2b] ss:$2 sm:$0xff]  ;;  %v5267_v31 = vld [vmem:[#allocation3 + $0x2c] ss:$2 sm:$0xff]  ;;  %11999 = vmatprep.subr.bf16.mxu1 %v16959_v41 }
 0x48a   :  { %4962 = vst [vmem:[#allocation3 + $0x48] sm:$0xff] %v4951_v46  ;;  %v4941_v47 = vadd.f32 %v15961_v54, %v4923_v60  ;;  %v5046_v51 = vrot.slane %v5030_v30, 6  ;;  %v5283_v39 = vrot.slane %v5267_v31, 6  ;;  %v5032_v20 = vld [vmem:[#allocation3 + $0x3b] ss:$2 sm:$0x1] }
 0x48b   :  { %12070 = vmatpush3.bf16.msra.mxu0 %v12069_v34  ;;  %v5269_v54 = vld [vmem:[#allocation3 + $0x3c] ss:$2 sm:$0x1]  ;;  %v5047_v50 = vrot.slane %v5032_v20, 6  ;;  %v4972_v12 = vld [vmem:[#allocation3 + $0x2a] ss:$2 sm:$0xff] }
 0x48c   :  { %v4952_v44 = vmax.f32 %v4941_v47, 0.0  ;;  %v5059_v32 = vsel %vm267_vm4, %v5041_v13, %v5046_v51  ;;  %v5296_v45 = vsel %vm267_vm4, %v5278_v55, %v5283_v39  ;;  %12001 = vmatpush3.bf16.msra.mxu1 %v12000_v10  ;;  %12071 = vmatprep.subr.bf16.mxu0 %v16959_v41  ;;  %v5284_v43 = vrot.slane %v5269_v54, 6  ;;  %v5571_v53 = vld [vmem:[#allocation3 + $0x2e] ss:$2 sm:$0xff]  ;;  %v5419_v22 = vld [vmem:[#allocation3 + $0x2d] ss:$2 sm:$0xff] }
 0x48d   :  { %11027 = vmatmul.mubr.f32.gmra.mrb[22].mxu1 %v5059_v32  ;;  %11121 = vmatmul.mubr.f32.gmra.mrb[44].mxu0 %v5296_v45  ;;  %v5048_v25 = vsel %vm267_vm4, %v5046_v51, %v5047_v50  ;;  %v4966_v1 = vld [vmem:[#allocation3 + $0x10] ss:$2 sm:$0x1]  ;;  %v5565_v28 = vld [vmem:[#allocation3 + $0x14] ss:$2 sm:$0x1]  ;;  %v4984_v47 = vsel %vm4981_vm7, %v4982_v62, %v4983_v16 }
 0x48e   :  { %4963 = vst [vmem:[#allocation3 + $0x50] sm:$0xf] %v4952_v44  ;;  %11029 = vmatprep.mubr.msk.f32.mxu1 %vm13284_vm0, %v16957_v0  ;;  %11123 = vmatprep.mubr.msk.f32.mxu0 %vm13284_vm0, %v16957_v0  ;;  %v5285_v59 = vsel %vm267_vm4, %v5283_v39, %v5284_v43  ;;  %v5456_v34 = vld [vmem:[#allocation5 + $0x1a8] sm:$0xff]  ;;  %v5581_v46 = vrot.slane %v5569_v29, 7  ;;  %v5002_v36 = vsel %vm4981_vm7, %v4966_v1, %v4982_v62  ;;  %v4989_v18 = vrot.slane %v4972_v12, 6  ;;  %v5457_v13 = vld [vmem:[#allocation5 + $0x1b0] sm:$0xff] }
 0x48f   :  { %12073 = vmatpush3.bf16.msra.mxu0 %v12072_v35  ;;  %12002 = vmatprep.subr.bf16.mxu1 %v16959_v41  ;;  %v4974_v60 = vld [vmem:[#allocation3 + $0x3a] ss:$2 sm:$0x1]  ;;  %v5599_v10 = vsel %vm4981_vm7, %v5565_v28, %v5580_v38  ;;  %v5587_v37 = vrot.slane %v5571_v53, 6  ;;  %v12036_v19 = vpack.c.bf16 %v5456_v34, %v5455_v3  ;;  %v5459_v43 = vld [vmem:[#allocation5 + $0x1c0] sm:$0xff] }
 0x490   :  { %12004 = vmatpush3.bf16.msra.mxu1 %v12003_v49  ;;  %12074 = vmatprep.subr.bf16.mxu0 %v16959_v41  ;;  %v5573_v4 = vld [vmem:[#allocation3 + $0x3e] ss:$2 sm:$0x1]  ;;  %v5582_v51 = vsel %vm4981_vm7, %v5580_v38, %v5581_v46  ;;  %v4990_v39 = vrot.slane %v4974_v60, 6  ;;  %v5003_v35 = vsel %vm267_vm4, %v4984_v47, %v4989_v18  ;;  %v5435_v38 = vrot.slane %v5419_v22, 6  ;;  %v5784_v60 = vld [vmem:[#allocation8 + $0x80] sm:$0xff] }
 0x491   :  { %v5034_v58 = vld [vmem:[#allocation3 + $0x40] ss:$2 sm:$0xff]  ;;  %v5271_v8 = vld [vmem:[#allocation3 + $0x41] ss:$2 sm:$0xff]  ;;  %12029 = vmatprep.subr.bf16.mxu1 %v16959_v41  ;;  %v5458_v55 = vld [vmem:[#allocation5 + $0x1b8] sm:$0xff]  ;;  %v5588_v20 = vrot.slane %v5573_v4, 6  ;;  %v5600_v44 = vsel %vm267_vm4, %v5582_v51, %v5587_v37 }
 0x492   :  { %v5053_v23 = vrot.slane %v5034_v58, 5  ;;  %v5290_v63 = vrot.slane %v5271_v8, 5  ;;  %v4976_v30 = vld [vmem:[#allocation3 + $0x3f] ss:$2 sm:$0xff]  ;;  %v12039_v57 = vpack.c.bf16 %v5458_v55, %v5457_v13  ;;  %v4991_v26 = vsel %vm267_vm4, %v4989_v18, %v4990_v39  ;;  %v5415_v40 = vld [vmem:[#allocation3 + $0x18] ss:$2 sm:$0xff] }
 0x493   :  { %12076 = vmatpush3.bf16.msra.mxu0 %v12075_v11  ;;  %v4997_v32 = vrot.slane %v4976_v30, 5  ;;  %v4978_v54 = vld [vmem:[#allocation3 + $0x4f] ss:$2 sm:$0x1]  ;;  %v5589_v50 = vsel %vm267_vm4, %v5587_v37, %v5588_v20  ;;  %v5786_v18 = vld [vmem:[#allocation8 + $0x90] sm:$0xff]  ;;  %v5787_v37 = vld [vmem:[#allocation8 + $0x98] sm:$0xff] }
 0x494   :  { %v5060_v61 = vsel %vm4996_vm8, %v5048_v25, %v5053_v23  ;;  %v5297_v33 = vsel %vm4996_vm8, %v5285_v59, %v5290_v63  ;;  %v5460_v11 = vld [vmem:[#allocation5 + $0x1c8] sm:$0xff]  ;;  %v5461_v59 = vld [vmem:[#allocation5 + $0x1d0] sm:$0xff]  ;;  %v5421_v15 = vld [vmem:[#allocation3 + $0x3d] ss:$2 sm:$0x1]  ;;  %v12081_v4 = vpack.c.bf16 %v5787_v37, %v5786_v18 }
 0x495   :  { %11030 = vmatmul.mubr.f32.gmra.mrb[24].mxu1 %v5060_v61  ;;  %11124 = vmatmul.mubr.f32.gmra.mrb[46].mxu0 %v5297_v33  ;;  %v5036_v5 = vld [vmem:[#allocation3 + $0x50] ss:$2 sm:$0x1]  ;;  %v5273_v6 = vld [vmem:[#allocation3 + $0x51] ss:$2 sm:$0x1]  ;;  %v5004_v58 = vsel %vm4996_vm8, %v4991_v26, %v4997_v32  ;;  %v12042_v25 = vpack.c.bf16 %v5460_v11, %v5459_v43 }
 0x496   :  { %11032 = vmatprep.mubr.msk.f32.mxu1 %vm13284_vm0, %v16957_v0  ;;  %11126 = vmatprep.mubr.msk.f32.mxu0 %vm13284_vm0, %v16957_v0  ;;  %v5054_v9 = vrot.slane %v5036_v5, 5  ;;  %v5291_v7 = vrot.slane %v5273_v6, 5  ;;  %v5575_v31 = vld [vmem:[#allocation3 + $0x43] ss:$2 sm:$0xff]  ;;  %v5462_v61 = vld [vmem:[#allocation5 + $0x1d8] sm:$0xff]  ;;  %v5436_v3 = vrot.slane %v5421_v15, 6 }
 0x497   :  { %v5594_v45 = vrot.slane %v5575_v31, 5  ;;  %v5577_v49 = vld [vmem:[#allocation3 + $0x53] ss:$2 sm:$0x1]  ;;  %v12045_v6 = vpack.c.bf16 %v5462_v61, %v5461_v59  ;;  %v5423_v29 = vld [vmem:[#allocation3 + $0x42] ss:$2 sm:$0xff] }
 0x498   :  { %v5055_v17 = vsel %vm4996_vm8, %v5053_v23, %v5054_v9  ;;  %v5292_v24 = vsel %vm4996_vm8, %v5290_v63, %v5291_v7  ;;  %v4998_v23 = vrot.slane %v4978_v54, 5  ;;  %v5595_v63 = vrot.slane %v5577_v49, 5  ;;  %v5463_v9 = vld [vmem:[#allocation5 + $0x1e0] sm:$0xff]  ;;  %v5464_v7 = vld [vmem:[#allocation5 + $0x1e8] sm:$0xff]  ;;  %v5790_v47 = vld [vmem:[#allocation8 + $0xb0] sm:$0xff] }
 0x499   :  { %11033 = vmatmul.mubr.f32.gmra.mrb[26].mxu1 %v5055_v17  ;;  %11127 = vmatmul.mubr.f32.gmra.mrb[48].mxu0 %v5292_v24  ;;  %v5601_v8 = vsel %vm4996_vm8, %v5589_v50, %v5594_v45  ;;  %v12048_v52 = vpack.c.bf16 %v5464_v7, %v5463_v9  ;;  %v5466_v17 = vld [vmem:[#allocation5 + $0x1f8] sm:$0xff]  ;;  %v5417_v21 = vld [vmem:[#allocation3 + $0x28] ss:$2 sm:$0x1]  ;;  %v5442_v1 = vrot.slane %v5423_v29, 5  ;;  %v5437_v28 = vsel %vm267_vm4, %v5435_v38, %v5436_v3  ;;  %v5788_v30 = vld [vmem:[#allocation8 + $0xa0] sm:$0xff] }
 0x49a   :  { %11067 = vmatprep.mubr.msk.f32.mxu1 %vm13284_vm0, %v16957_v0  ;;  %11208 = vmatprep.mubr.msk.f32.mxu0 %vm13284_vm0, %v16957_v0  ;;  %v4999_v33 = vsel %vm4996_vm8, %v4997_v32, %v4998_v23  ;;  %v5596_v5 = vsel %vm4996_vm8, %v5594_v45, %v5595_v63  ;;  %v12051_v24 = vpack.c.bf16 %v5466_v17, %v5465_v2  ;;  %v5789_v31 = vld [vmem:[#allocation8 + $0xa8] sm:$0xff]  ;;  %v5791_v51 = vld [vmem:[#allocation8 + $0xb8] sm:$0xff]  ;;  %v5792_v13 = vld [vmem:[#allocation8 + $0xc0] sm:$0xff] }
 0x49b   :  { %v5449_v16 = vsel %vm4996_vm8, %v5437_v28, %v5442_v1  ;;  %v12089_v39 = vpack.c.bf16 %v5791_v51, %v5790_v47  ;;  %v5793_v55 = vld [vmem:[#allocation8 + $0xc8] sm:$0xff]  ;;  %v5796_v45 = vld [vmem:[#allocation8 + $0xe0] sm:$0xff]  ;;  %v5799_v26 = vld [vmem:[#allocation8 + $0xf8] sm:$0xff] }
 0x49c   :  { %v12093_v20 = vpack.c.bf16 %v5793_v55, %v5792_v13  ;;  %v5797_v54 = vld [vmem:[#allocation8 + $0xe8] sm:$0xff]  ;;  %v5751_v43 = vld [vmem:[#allocation8] sm:$0xff] }
 0x49d   :  { %11068 = vmatmul.mubr.f32.vlgmr.msra.gmra.mrb[28].mxu1 %v4964_v14  ;;  %11209 = vmatmul.mubr.f32.vlgmr.msra.gmra.mrb[50].mxu0 %v5563_v48  ;;  %v5413_v14 = vld [vmem:[#allocation3 + $0x13] ss:$2 sm:$0x1]  ;;  %v5429_v48 = vrot.slane %v5417_v21, 7  ;;  %v12101_v49 = vpack.c.bf16 %v5797_v54, %v5796_v45  ;;  %v5752_v11 = vld [vmem:[#allocation8 + $0x8] sm:$0xff]  ;;  %v6119_v47 = vld [vmem:[#allocation10 + $0x80] sm:$0xff] }
 0x49e   :  { %12031 = vmatpush3.bf16.msra.mxu1 %v12030_v56  ;;  %11070 = vmatprep.mubr.msk.f32.mxu1 %vm13284_vm0, %v16957_v0  ;;  %v5428_v56 = vrot.slane %v5415_v40, 7  ;;  %v6118_v45 = vld [vmem:[#allocation10 + $0x78] sm:$0xff] }
 0x49f   :  { %12032 = vmatprep.subr.bf16.mxu1 %v16959_v41  ;;  %11211 = vmatprep.mubr.msk.f32.mxu0 %vm13284_vm0, %v16957_v0 }
 0x4a0   :  { %v5447_v62 = vsel %vm4981_vm7, %v5413_v14, %v5428_v56  ;;  %v5430_v12 = vsel %vm4981_vm7, %v5428_v56, %v5429_v48 }
 0x4a1   :  { %11071 = vmatmul.mubr.f32.gmra.mrb[30].mxu1 %v5002_v36  ;;  %11212 = vmatmul.mubr.f32.gmra.mrb[52].mxu0 %v5599_v10  ;;  %v5448_v53 = vsel %vm267_vm4, %v5430_v12, %v5435_v38  ;;  %v5785_v36 = vld [vmem:[#allocation8 + $0x88] sm:$0xff] }
 0x4a2   :  { %12034 = vmatpush3.bf16.msra.mxu1 %v12033_v27  ;;  %11073 = vmatprep.mubr.msk.f32.mxu1 %vm13284_vm0, %v16957_v0  ;;  %v5425_v27 = vld [vmem:[#allocation3 + $0x52] ss:$2 sm:$0x1]  ;;  %v12077_v10 = vpack.c.bf16 %v5785_v36, %v5784_v60  ;;  %v6106_v60 = vld [vmem:[#allocation10 + $0x18] sm:$0xff] }
 0x4a3   :  { %12035 = vmatprep.subr.bf16.mxu1 %v16959_v41  ;;  %11214 = vmatprep.mubr.msk.f32.mxu0 %vm13284_vm0, %v16957_v0  ;;  %v5443_v34 = vrot.slane %v5425_v27, 5  ;;  %v6103_v27 = vld [vmem:[#allocation10] sm:$0xff]  ;;  %v6110_v36 = vld [vmem:[#allocation10 + $0x38] sm:$0xff] }
 0x4a4   :  { %v12175_v18 = vpack.c.bf16 %v6106_v60, %v6103_v27 }
 0x4a5   :  { %11074 = vmatmul.mubr.f32.gmra.mrb[32].mxu1 %v5003_v35  ;;  %11215 = vmatmul.mubr.f32.gmra.mrb[54].mxu0 %v5600_v44  ;;  %v5444_v46 = vsel %vm4996_vm8, %v5442_v1, %v5443_v34  ;;  %v5794_v35 = vld [vmem:[#allocation8 + $0xd0] sm:$0xff]  ;;  %v5795_v44 = vld [vmem:[#allocation8 + $0xd8] sm:$0xff]  ;;  %v6107_v1 = vld [vmem:[#allocation10 + $0x20] sm:$0xff] }
 0x4a6   :  { %12037 = vmatpush3.bf16.msra.mxu1 %v12036_v19  ;;  %11076 = vmatprep.mubr.msk.f32.mxu1 %vm13284_vm0, %v16957_v0  ;;  %v12085_v19 = vpack.c.bf16 %v5789_v31, %v5788_v30  ;;  %v12097_v32 = vpack.c.bf16 %v5795_v44, %v5794_v35  ;;  %v6112_v30 = vld [vmem:[#allocation10 + $0x48] sm:$0xff] }
 0x4a7   :  { %12038 = vmatprep.subr.bf16.mxu1 %v16959_v41  ;;  %11217 = vmatprep.mubr.msk.f32.mxu0 %vm13284_vm0, %v16957_v0  ;;  %v6116_v31 = vld [vmem:[#allocation10 + $0x68] sm:$0xff] }
 0x4a8   :  { %v12181_v44 = vpack.c.bf16 %v6119_v47, %v6116_v31  ;;  %v5754_v47 = vld [vmem:[#allocation8 + $0x18] sm:$0xff] }
 0x4a9   :  { %11077 = vmatmul.mubr.f32.gmra.mrb[34].mxu1 %v5004_v58  ;;  %11218 = vmatmul.mubr.f32.gmra.mrb[56].mxu0 %v5601_v8  ;;  %v16095_v58 = vpack.c.bf16 %v5752_v11, %v5751_v43 }
 0x4aa   :  { %12040 = vmatpush3.bf16.msra.mxu1 %v12039_v57  ;;  %11079 = vmatprep.mubr.msk.f32.mxu1 %vm13284_vm0, %v16957_v0  ;;  %v5798_v57 = vld [vmem:[#allocation8 + $0xf0] sm:$0xff] }
 0x4ab   :  { %12041 = vmatprep.subr.bf16.mxu1 %v16959_v41  ;;  %11220 = vmatprep.mubr.msk.f32.mxu0 %vm13284_vm0, %v16957_v0  ;;  %v12105_v50 = vpack.c.bf16 %v5799_v26, %v5798_v57 }
 0x4ad   :  { %11080 = vmatmul.mubr.f32.gmra.mrb[36].mxu1 %v4999_v33  ;;  %11221 = vmatmul.mubr.f32.gmra.mrb[58].mxu0 %v5596_v5 }
 0x4ae   :  { %12043 = vmatpush3.bf16.msra.mxu1 %v12042_v25  ;;  %11161 = vmatprep.mubr.msk.f32.mxu1 %vm13284_vm0, %v16957_v0 }
 0x4af   :  { %12044 = vmatprep.subr.bf16.mxu1 %v16959_v41  ;;  %6232 = vmatprep.mubr.f32.mxu0 %v16957_v0 }
 0x4b2   :  { %12046 = vmatpush3.bf16.msra.mxu1 %v12045_v6 }
 0x4b3   :  { %12047 = vmatprep.subr.bf16.mxu1 %v16959_v41 }
 0x4b6   :  { %12049 = vmatpush3.bf16.msra.mxu1 %v12048_v52 }
 0x4b7   :  { %12050 = vmatprep.subr.bf16.mxu1 %v16959_v41 }
 0x4ba   :  { %12052 = vmatpush3.bf16.msra.mxu1 %v12051_v24 }
 0x4bb   :  { %12078 = vmatprep.subr.bf16.mxu1 %v12077_v10 }
 0x4bd   :  { %11162 = vmatmul.mubr.f32.vlgmr.msra.gmra.mrb[38].mxu1 %v5411_v42 }
 0x4be   :  { %11164 = vmatprep.mubr.msk.f32.mxu1 %vm13284_vm0, %v16957_v0  ;;  %12080 = vmatpush3.bf16.msra.mxu1 %v12077_v10  ;;  %v6113_v10 = vld [vmem:[#allocation10 + $0x50] sm:$0xff] }
 0x4bf   :  { %12082 = vmatprep.subr.bf16.mxu1 %v12081_v4  ;;  %v12177_v37 = vpack.c.bf16 %v6113_v10, %v6110_v36 }
 0x4c1   :  { %11165 = vmatmul.mubr.f32.gmra.mrb[40].mxu1 %v5447_v62 }
 0x4c2   :  { %11167 = vmatprep.mubr.msk.f32.mxu1 %vm13284_vm0, %v16957_v0  ;;  %12084 = vmatpush3.bf16.msra.mxu1 %v12081_v4  ;;  %v6109_v4 = vld [vmem:[#allocation10 + $0x30] sm:$0xff] }
 0x4c3   :  { %12086 = vmatprep.subr.bf16.mxu1 %v12085_v19  ;;  %v12179_v13 = vpack.c.bf16 %v6112_v30, %v6109_v4 }
 0x4c5   :  { %11168 = vmatmul.mubr.f32.gmra.mrb[42].mxu1 %v5448_v53  ;;  %v6104_v53 = vld [vmem:[#allocation10 + $0x8] sm:$0xff] }
 0x4c6   :  { %11170 = vmatprep.mubr.msk.f32.mxu1 %vm13284_vm0, %v16957_v0  ;;  %12088 = vmatpush3.bf16.msra.mxu1 %v12085_v19 }
 0x4c7   :  { %12090 = vmatprep.subr.bf16.mxu1 %v12089_v39 }
 0x4c9   :  { %11171 = vmatmul.mubr.f32.gmra.mrb[44].mxu1 %v5449_v16 }
 0x4ca   :  { %11173 = vmatprep.mubr.msk.f32.mxu1 %vm13284_vm0, %v16957_v0  ;;  %12092 = vmatpush3.bf16.msra.mxu1 %v12089_v39 }
 0x4cb   :  { %12094 = vmatprep.subr.bf16.mxu1 %v12093_v20 }
 0x4cd   :  { %11174 = vmatmul.mubr.f32.gmra.mrb[46].mxu1 %v5444_v46  ;;  %v12173_v46 = vpack.c.bf16 %v6107_v1, %v6104_v53 }
 0x4ce   :  { %12096 = vmatpush3.bf16.msra.mxu1 %v12093_v20 }
 0x4cf   :  { %12098 = vmatprep.subr.bf16.mxu1 %v12097_v32  ;;  %12174 = vmatprep.subr.bf16.mxu0 %v12173_v46 }
 0x4d0   :  { %12176 = vmatpush1.bf16.msra.mxu0 %v12175_v18 }
 0x4d1   :  { %12178 = vmatprep.subr.bf16.mxu0 %v12177_v37 }
 0x4d2   :  { %12100 = vmatpush3.bf16.msra.mxu1 %v12097_v32  ;;  %v6115_v32 = vld [vmem:[#allocation10 + $0x60] sm:$0xff] }
 0x4d3   :  { %12102 = vmatprep.subr.bf16.mxu1 %v12101_v49  ;;  %v12183_v26 = vpack.c.bf16 %v6118_v45, %v6115_v32  ;;  %v5755_v32 = vld [vmem:[#allocation8 + $0x20] sm:$0xff]  ;;  %v5756_v45 = vld [vmem:[#allocation8 + $0x28] sm:$0xff] }
 0x4d4   :  { %12180 = vmatpush1.bf16.msra.mxu0 %v12179_v13 }
 0x4d5   :  { %12182 = vmatprep.subr.bf16.mxu0 %v12181_v44 }
 0x4d6   :  { %12104 = vmatpush3.bf16.msra.mxu1 %v12101_v49 }
 0x4d7   :  { %12106 = vmatprep.subr.bf16.mxu1 %v12105_v50 }
 0x4d8   :  { %12184 = vmatpush1.bf16.msra.mxu0 %v12183_v26  ;;  %v5758_v26 = vld [vmem:[#allocation8 + $0x38] sm:$0xff] }
 0x4da   :  { %12108 = vmatpush3.bf16.msra.mxu1 %v12105_v50 }
 0x4db   :  { %12110 = vmatprep.subr.bf16.mxu1 %v16095_v58 }
 0x545   :  { %v5144_v8 = vpop.f32.mrb[18].mxu1 }
 0x546   :  { %v11022_v23 = vpop.f32.mrb[19].mxu1 }
 0x549   :  { %v5381_v63 = vpop.f32.mrb[40].mxu0 }
 0x54a   :  { %v11116_v25 = vpop.f32.mrb[41].mxu0 }
 0x554   :  { %v5149_v59 = vpop.f32.mrb[20].mxu1  ;;  %v5386_v61 = vpop.f32.mrb[42].mxu0 }
 0x555   :  { %v11025_v33 = vpop.f32.mrb[21].mxu1  ;;  %v11119_v5 = vpop.f32.mrb[43].mxu0 }
 0x560   :  { %v5154_v6 = vpop.f32.mrb[22].mxu1  ;;  %v5391_v9 = vpop.f32.mrb[44].mxu0 }
 0x561   :  { %v11028_v7 = vpop.f32.mrb[23].mxu1  ;;  %v11122_v52 = vpop.f32.mrb[45].mxu0 }
 0x568   :  { %v5159_v2 = vpop.f32.mrb[24].mxu1  ;;  %v5396_v17 = vpop.f32.mrb[46].mxu0 }
 0x569   :  { %v11031_v24 = vpop.f32.mrb[25].mxu1  ;;  %v11125_v40 = vpop.f32.mrb[47].mxu0 }
 0x56c   :  { %v5164_v42 = vpop.f32.mrb[26].mxu1  ;;  %v5401_v56 = vpop.f32.mrb[48].mxu0 }
 0x56d   :  { %v11034_v21 = vpop.f32.mrb[27].mxu1  ;;  %v11128_v22 = vpop.f32.mrb[49].mxu0 }
 0x570   :  { %v5234_v14 = vpop.f32.mrb[28].mxu1  ;;  %v5685_v48 = vpop.f32.mrb[50].mxu0 }
 0x571   :  { %v5235_v62 = vadd.f32 %v5234_v14, %v5144_v8  ;;  %v11069_v38 = vpop.f32.mrb[29].mxu1  ;;  %v11210_v15 = vpop.f32.mrb[51].mxu0 }
 0x573   :  { %v5405_v29 = vadd.f32 %v5381_v63, %v5235_v62 }
 0x574   :  { %v5239_v12 = vpop.f32.mrb[30].mxu1  ;;  %v5690_v3 = vpop.f32.mrb[52].mxu0 }
 0x575   :  { %v5240_v28 = vadd.f32 %v5239_v12, %v5149_v59  ;;  %v11072_v16 = vpop.f32.mrb[31].mxu1  ;;  %v11213_v34 = vpop.f32.mrb[53].mxu0 }
 0x577   :  { %v5406_v19 = vadd.f32 %v5386_v61, %v5240_v28 }
 0x578   :  { %v5244_v51 = vpop.f32.mrb[32].mxu1  ;;  %v5695_v39 = vpop.f32.mrb[54].mxu0 }
 0x579   :  { %v5245_v55 = vadd.f32 %v5244_v51, %v5154_v6  ;;  %v11075_v20 = vpop.f32.mrb[33].mxu1  ;;  %v11216_v35 = vpop.f32.mrb[55].mxu0 }
 0x57b   :  { %v5407_v54 = vadd.f32 %v5391_v9, %v5245_v55  ;;  %v9153_v9 = vld [vmem:[%s16935_s6] ss:$0 sm:$0xff]  ;;  %s8586_s6 = sshll.u32 %s13286_s20, 4  ;;  %s8587_s6 = int_to_ptr.vmem [resolvable:$true] %s8586_s6 }
 0x57c   :  { %v5249_v49 = vpop.f32.mrb[34].mxu1  ;;  %v5700_v57 = vpop.f32.mrb[56].mxu0  ;;  %s13237_s22 = scalar_lea.vmem %s8587_s6, 16  ;;  %p13242_p9 = scmp.lt.s32.totalorder %s8587_s6, %s8587_s6 }
 0x57d   :  { %v5250_v50 = vadd.f32 %v5249_v49, %v5159_v2  ;;  %v11078_v43 = vpop.f32.mrb[35].mxu1  ;;  %v11219_v11 = vpop.f32.mrb[57].mxu0  ;;  %v12117_v49 = vpack.c.bf16 %v5756_v45, %v5755_v32  ;;  %v6131_v32 = vld [vmem:[#allocation10 + $0xe0] sm:$0xff]  ;;  %p13238_p8 = scmp.ne.s32.totalorder %s8587_s6, %s13237_s22 }
 0x57e   :  { %v5759_v43 = vld [vmem:[#allocation8 + $0x40] sm:$0xff]  ;;  %v5760_v11 = vld [vmem:[#allocation8 + $0x48] sm:$0xff] }
 0x57f   :  { %v5408_v8 = vadd.f32 %v5396_v17, %v5250_v50 }
 0x580   :  { %v5254_v23 = vpop.f32.mrb[36].mxu1  ;;  %v5705_v63 = vpop.f32.mrb[58].mxu0 }
 0x581   :  { %v5255_v25 = vadd.f32 %v5254_v23, %v5164_v42  ;;  %v11081_v59 = vpop.f32.mrb[37].mxu1  ;;  %v11222_v61 = vpop.f32.mrb[59].mxu0  ;;  %v5761_v23 = vld [vmem:[#allocation8 + $0x50] sm:$0xff] }
 0x582   :  { %v5763_v59 = vld [vmem:[#allocation8 + $0x60] sm:$0xff] }
 0x583   :  { %v5409_v33 = vadd.f32 %v5401_v56, %v5255_v25 }
 0x590   :  { %v5533_v5 = vpop.f32.mrb[38].mxu1 }
 0x591   :  { %v5557_v6 = vadd.f32 %v5533_v5, %v5405_v29  ;;  %v11163_v7 = vpop.f32.mrb[39].mxu1  ;;  %v5766_v5 = vld [vmem:[#allocation8 + $0x78] sm:$0xff] }
 0x592   :  { %v5967_v7 = vld [vmem:[#allocation8 + $0x100] sm:$0xff] }
 0x593   :  { %v5709_v52 = vadd.f32 %v5685_v48, %v5557_v6 }
 0x594   :  { %v5538_v2 = vpop.f32.mrb[40].mxu1 }
 0x595   :  { %v5721_v24 = vadd.f32 %v9153_v9, %v5709_v52  ;;  %v5558_v40 = vadd.f32 %v5538_v2, %v5406_v19  ;;  %v11166_v21 = vpop.f32.mrb[41].mxu1  ;;  %v5753_v19 = vld [vmem:[#allocation8 + $0x10] sm:$0xff] }
 0x596   :  { %v12113_v20 = vpack.c.bf16 %v5754_v47, %v5753_v19  ;;  %v5969_v21 = vld [vmem:[#allocation8 + $0x110] sm:$0xff] }
 0x597   :  { %v5726_v17 = vmax.f32 %v5721_v24, 0.0  ;;  %v5710_v22 = vadd.f32 %v5690_v3, %v5558_v40 }
 0x598   :  { %v5543_v14 = vpop.f32.mrb[42].mxu1 }
 0x599   :  { %5731 = vst [vmem:[#allocation4] sm:$0xff] %v5726_v17  ;;  %v5722_v42 = vadd.f32 %v9153_v9, %v5710_v22  ;;  %v5559_v62 = vadd.f32 %v5543_v14, %v5407_v54  ;;  %v11169_v38 = vpop.f32.mrb[43].mxu1  ;;  %v5970_v17 = vld [vmem:[#allocation8 + $0x118] sm:$0xff] }
 0x59b   :  { %v5727_v56 = vmax.f32 %v5722_v42, 0.0  ;;  %v5711_v15 = vadd.f32 %v5695_v39, %v5559_v62  ;;  %v12145_v42 = vpack.c.bf16 %v5970_v17, %v5969_v21  ;;  %v6317_v17 = vld [vmem:[#allocation11 + $0x40] sm:$0xff] }
 0x59c   :  { %v5548_v29 = vpop.f32.mrb[44].mxu1 }
 0x59d   :  { %5732 = vst [vmem:[#allocation4 + $0x8] sm:$0xff] %v5727_v56  ;;  %v5723_v12 = vadd.f32 %v9153_v9, %v5711_v15  ;;  %v5560_v53 = vadd.f32 %v5548_v29, %v5408_v8  ;;  %v11172_v1 = vpop.f32.mrb[45].mxu1  ;;  %v12125_v8 = vpack.c.bf16 %v5760_v11, %v5759_v43  ;;  %v5971_v56 = vld [vmem:[#allocation8 + $0x120] sm:$0xff]  ;;  %v5972_v15 = vld [vmem:[#allocation8 + $0x128] sm:$0xff]  ;;  %v6133_v11 = vld [vmem:[#allocation10 + $0xf0] sm:$0xff] }
 0x59e   :  { %v5974_v1 = vld [vmem:[#allocation8 + $0x138] sm:$0xff] }
 0x59f   :  { %v5728_v27 = vmax.f32 %v5723_v12, 0.0  ;;  %v5712_v48 = vadd.f32 %v5700_v57, %v5560_v53  ;;  %v5757_v57 = vld [vmem:[#allocation8 + $0x30] sm:$0xff]  ;;  %v12149_v12 = vpack.c.bf16 %v5972_v15, %v5971_v56  ;;  %v6329_v56 = vld [vmem:[#allocation11 + $0xa0] sm:$0xff]  ;;  %v6332_v15 = vld [vmem:[#allocation11 + $0xb8] sm:$0xff] }
 0x5a0   :  { %v5553_v28 = vpop.f32.mrb[46].mxu1  ;;  %v5768_v4 = vld [vmem:[#allocation4 + $0x1] ss:$2 sm:$0xf]  ;;  %v12121_v50 = vpack.c.bf16 %v5758_v26, %v5757_v57  ;;  %v5973_v53 = vld [vmem:[#allocation8 + $0x130] sm:$0xff] }
 0x5a1   :  { %5733 = vst [vmem:[#allocation4 + $0x10] sm:$0xff] %v5728_v27  ;;  %v5724_v16 = vadd.f32 %v9153_v9, %v5712_v48  ;;  %v5561_v34 = vadd.f32 %v5553_v28, %v5409_v33  ;;  %v11175_v46 = vpop.f32.mrb[47].mxu1  ;;  %v5736_v44 = vld [vmem:[#allocation4] ss:$2 sm:$0xf]  ;;  %v5765_v33 = vld [vmem:[#allocation8 + $0x70] sm:$0xff]  ;;  %v12153_v27 = vpack.c.bf16 %v5974_v1, %v5973_v53 }
 0x5a2   :  { %v12137_v6 = vpack.c.bf16 %v5766_v5, %v5765_v33  ;;  %v5975_v48 = vld [vmem:[#allocation8 + $0x140] sm:$0xff]  ;;  %v5976_v28 = vld [vmem:[#allocation8 + $0x148] sm:$0xff]  ;;  %v5978_v46 = vld [vmem:[#allocation8 + $0x158] sm:$0xff] }
 0x5a3   :  { %v5729_v3 = vmax.f32 %v5724_v16, 0.0  ;;  %v5713_v60 = vadd.f32 %v5705_v63, %v5561_v34  ;;  %v5762_v63 = vld [vmem:[#allocation8 + $0x58] sm:$0xff]  ;;  %v12157_v16 = vpack.c.bf16 %v5976_v28, %v5975_v48  ;;  %v5977_v34 = vld [vmem:[#allocation8 + $0x150] sm:$0xff]  ;;  %v6338_v53 = vld [vmem:[#allocation11 + $0xe8] sm:$0xff] }
 0x5a4   :  { %v5738_v31 = vld [vmem:[#allocation4 + $0x9] ss:$2 sm:$0xf]  ;;  %v12129_v25 = vpack.c.bf16 %v5762_v63, %v5761_v23  ;;  %v5951_v38 = vld [vmem:[#allocation4 + $0x2] ss:$2 sm:$0xf] }
 0x5a5   :  { %5734 = vst [vmem:[#allocation4 + $0x18] sm:$0xff] %v5729_v3  ;;  %v5725_v36 = vadd.f32 %v9153_v9, %v5713_v60  ;;  %v5744_v39 = vrot.slane %v5738_v31, 4  ;;  %v5968_v9 = vld [vmem:[#allocation8 + $0x108] sm:$0xff]  ;;  %v12161_v3 = vpack.c.bf16 %v5978_v46, %v5977_v34  ;;  %v5979_v60 = vld [vmem:[#allocation8 + $0x160] sm:$0xff]  ;;  %v6134_v26 = vld [vmem:[#allocation10 + $0xf8] sm:$0xff] }
 0x5a6   :  { %v12141_v24 = vpack.c.bf16 %v5968_v9, %v5967_v7  ;;  %v6140_v63 = vld [vmem:[#allocation10 + $0x128] sm:$0xff]  ;;  %v6146_v5 = vld [vmem:[#allocation10 + $0x158] sm:$0xff]  ;;  %v6145_v9 = vld [vmem:[#allocation10 + $0x150] sm:$0xff] }
 0x5a7   :  { %v5730_v10 = vmax.f32 %v5725_v36, 0.0  ;;  %v5749_v54 = vsel %vm247_vm1, %v5736_v44, %v5744_v39  ;;  %v5980_v36 = vld [vmem:[#allocation8 + $0x168] sm:$0xff]  ;;  %v6125_v39 = vld [vmem:[#allocation10 + $0xb0] sm:$0xff]  ;;  %v6344_v48 = vld [vmem:[#allocation11 + $0x118] sm:$0xff] }
 0x5a8   :  { %v5770_v18 = vld [vmem:[#allocation4 + $0xa] ss:$2 sm:$0xf]  ;;  %v5953_v2 = vld [vmem:[#allocation4 + $0xb] ss:$2 sm:$0xf] }
 0x5a9   :  { %5735 = vst [vmem:[#allocation4 + $0x20] sm:$0xf] %v5730_v10  ;;  %v5776_v37 = vrot.slane %v5770_v18, 4  ;;  %v5959_v22 = vrot.slane %v5953_v2, 4  ;;  %v12165_v10 = vpack.c.bf16 %v5980_v36, %v5979_v60  ;;  %v5981_v18 = vld [vmem:[#allocation8 + $0x170] sm:$0xff]  ;;  %v6128_v44 = vld [vmem:[#allocation10 + $0xc8] sm:$0xff] }
 0x5aa   :  { %v12189_v45 = vpack.c.bf16 %v6131_v32, %v6128_v44  ;;  %v6350_v34 = vld [vmem:[#allocation11 + $0x148] sm:$0xff]  ;;  %v6356_v60 = vld [vmem:[#allocation11 + $0x178] sm:$0xff] }
 0x5ab   :  { %v5781_v30 = vsel %vm247_vm1, %v5768_v4, %v5776_v37  ;;  %v5964_v29 = vsel %vm247_vm1, %v5951_v38, %v5959_v22  ;;  %v5982_v37 = vld [vmem:[#allocation8 + $0x178] sm:$0xff] }
 0x5ac   :  { %11255 = vmatprep.mubr.f32.mxu1 %v5781_v30  ;;  %v5772_v55 = vld [vmem:[#allocation4 + $0x13] ss:$2 sm:$0xf]  ;;  %v5740_v14 = vld [vmem:[#allocation4 + $0x12] ss:$2 sm:$0xf]  ;;  %v12169_v4 = vpack.c.bf16 %v5982_v37, %v5981_v18 }
 0x5ad   :  { %v5955_v19 = vld [vmem:[#allocation4 + $0x14] ss:$2 sm:$0xf]  ;;  %v6320_v22 = vld [vmem:[#allocation11 + $0x58] sm:$0xff] }
 0x5b0   :  { %v5774_v51 = vld [vmem:[#allocation4 + $0x1c] ss:$2 sm:$0xf]  ;;  %v5742_v52 = vld [vmem:[#allocation4 + $0x1b] ss:$2 sm:$0xf] }
 0x5b1   :  { %v5779_v13 = vrot.slane %v5774_v51, 4  ;;  %v5747_v40 = vrot.slane %v5742_v52, 4  ;;  %v5957_v30 = vld [vmem:[#allocation4 + $0x1d] ss:$2 sm:$0xf]  ;;  %v6148_v52 = vld [vmem:[#allocation10 + $0x168] sm:$0xff] }
 0x5b2   :  { %v5962_v31 = vrot.slane %v5957_v30, 4  ;;  %v6122_v51 = vld [vmem:[#allocation10 + $0x98] sm:$0xff]  ;;  %v12203_v2 = vpack.c.bf16 %v6148_v52, %v6145_v9 }
 0x5b3   :  { %v5782_v35 = vsel %vm247_vm1, %v5772_v55, %v5779_v13  ;;  %v5750_v62 = vsel %vm247_vm1, %v5740_v14, %v5747_v40  ;;  %v12185_v13 = vpack.c.bf16 %v6125_v39, %v6122_v51  ;;  %v6121_v55 = vld [vmem:[#allocation10 + $0x90] sm:$0xff]  ;;  %v6314_v40 = vld [vmem:[#allocation11 + $0x28] sm:$0xff]  ;;  %v16116_v14 = vpack.c.bf16 %v6320_v22, %v6317_v17  ;;  %v6111_v17 = vld [vmem:[#allocation10 + $0x40] sm:$0xff] }
 0x5b4   :  { %11256 = vmatmul.mubr.f32.vlgmr.msra.gmra.mrb[48].mxu1 %v5782_v35  ;;  %v5965_v47 = vsel %vm247_vm1, %v5955_v19, %v5962_v31  ;;  %v6114_v22 = vld [vmem:[#allocation10 + $0x58] sm:$0xff] }
 0x5b5   :  { %12112 = vmatpush3.bf16.msra.mxu1 %v16095_v58  ;;  %11290 = vmatprep.mubr.f32.mxu1 %v5749_v54  ;;  %v5764_v58 = vld [vmem:[#allocation8 + $0x68] sm:$0xff]  ;;  %v6127_v54 = vld [vmem:[#allocation10 + $0xc0] sm:$0xff] }
 0x5b6   :  { %12114 = vmatprep.subr.bf16.mxu1 %v12113_v20  ;;  %v12133_v61 = vpack.c.bf16 %v5764_v58, %v5763_v59  ;;  %12186 = vmatprep.subr.bf16.mxu0 %v12185_v13  ;;  %v6139_v58 = vld [vmem:[#allocation10 + $0x120] sm:$0xff] }
 0x5b9   :  { %12116 = vmatpush3.bf16.msra.mxu1 %v12113_v20  ;;  %v6124_v20 = vld [vmem:[#allocation10 + $0xa8] sm:$0xff] }
 0x5ba   :  { %12118 = vmatprep.subr.bf16.mxu1 %v12117_v49  ;;  %v12187_v35 = vpack.c.bf16 %v6124_v20, %v6121_v55 }
 0x5bc   :  { %12188 = vmatpush1.bf16.msra.mxu0 %v12187_v35 }
 0x5bd   :  { %12120 = vmatpush3.bf16.msra.mxu1 %v12117_v49  ;;  %v6130_v49 = vld [vmem:[#allocation10 + $0xd8] sm:$0xff]  ;;  %12190 = vmatprep.subr.bf16.mxu0 %v12189_v45 }
 0x5be   :  { %12122 = vmatprep.subr.bf16.mxu1 %v12121_v50  ;;  %v12191_v57 = vpack.c.bf16 %v6130_v49, %v6127_v54 }
 0x5c0   :  { %12192 = vmatpush1.bf16.msra.mxu0 %v12191_v57 }
 0x5c1   :  { %12124 = vmatpush3.bf16.msra.mxu1 %v12121_v50  ;;  %v6137_v50 = vld [vmem:[#allocation10 + $0x110] sm:$0xff] }
 0x5c2   :  { %12126 = vmatprep.subr.bf16.mxu1 %v12125_v8  ;;  %v12193_v43 = vpack.c.bf16 %v6137_v50, %v6134_v26 }
 0x5c4   :  { %12194 = vmatprep.subr.bf16.mxu0 %v12193_v43 }
 0x5c5   :  { %12128 = vmatpush3.bf16.msra.mxu1 %v12125_v8  ;;  %v6136_v8 = vld [vmem:[#allocation10 + $0x108] sm:$0xff] }
 0x5c6   :  { %12130 = vmatprep.subr.bf16.mxu1 %v12129_v25  ;;  %v12195_v23 = vpack.c.bf16 %v6136_v8, %v6133_v11 }
 0x5c8   :  { %12196 = vmatpush1.bf16.msra.mxu0 %v12195_v23 }
 0x5c9   :  { %12132 = vmatpush3.bf16.msra.mxu1 %v12129_v25  ;;  %v6143_v25 = vld [vmem:[#allocation10 + $0x140] sm:$0xff] }
 0x5ca   :  { %12134 = vmatprep.subr.bf16.mxu1 %v12133_v61  ;;  %v12197_v59 = vpack.c.bf16 %v6143_v25, %v6140_v63 }
 0x5cc   :  { %12198 = vmatprep.subr.bf16.mxu0 %v12197_v59 }
 0x5cd   :  { %12136 = vmatpush3.bf16.msra.mxu1 %v12133_v61  ;;  %v6142_v61 = vld [vmem:[#allocation10 + $0x138] sm:$0xff] }
 0x5ce   :  { %12138 = vmatprep.subr.bf16.mxu1 %v12137_v6  ;;  %v12199_v33 = vpack.c.bf16 %v6142_v61, %v6139_v58 }
 0x5d0   :  { %12200 = vmatpush1.bf16.msra.mxu0 %v12199_v33  ;;  %v6105_v33 = vld [vmem:[#allocation10 + $0x10] sm:$0xff] }
 0x5d1   :  { %12140 = vmatpush3.bf16.msra.mxu1 %v12137_v6  ;;  %v6149_v6 = vld [vmem:[#allocation10 + $0x170] sm:$0xff] }
 0x5d2   :  { %12142 = vmatprep.subr.bf16.mxu1 %v12141_v24  ;;  %v12201_v7 = vpack.c.bf16 %v6149_v6, %v6146_v5  ;;  %v6108_v5 = vld [vmem:[#allocation10 + $0x28] sm:$0xff] }
 0x5d4   :  { %11291 = vmatmul.mubr.f32.vlgmr.msra.gmra.mrb[48].mxu1 %v5750_v62  ;;  %12202 = vmatprep.subr.bf16.mxu0 %v12201_v7  ;;  %v6326_v62 = vld [vmem:[#allocation11 + $0x88] sm:$0xff] }
 0x5d5   :  { %12144 = vmatpush3.bf16.msra.mxu1 %v12141_v24  ;;  %11325 = vmatprep.mubr.f32.mxu1 %v5964_v29  ;;  %v6311_v24 = vld [vmem:[#allocation11 + $0x10] sm:$0xff]  ;;  %v16123_v29 = vpack.c.bf16 %v6332_v15, %v6329_v56  ;;  %v6120_v15 = vld [vmem:[#allocation10 + $0x88] sm:$0xff] }
 0x5d6   :  { %12146 = vmatprep.subr.bf16.mxu1 %v12145_v42  ;;  %12204 = vmatpush1.bf16.msra.mxu0 %v12203_v2  ;;  %v16112_v21 = vpack.c.bf16 %v6314_v40, %v6311_v24  ;;  %v12206_v24 = vpack.c.bf16 %v6108_v5, %v6105_v33  ;;  %v6117_v56 = vld [vmem:[#allocation10 + $0x70] sm:$0xff]  ;;  %v6334_v33 = vld [vmem:[#allocation11 + $0xc8] sm:$0xff]  ;;  %v6337_v5 = vld [vmem:[#allocation11 + $0xe0] sm:$0xff] }
 0x5d7   :  { %12205 = vmatprep.subr.bf16.mxu0 %v16959_v41 }
 0x5d9   :  { %12148 = vmatpush3.bf16.msra.mxu1 %v12145_v42  ;;  %v6323_v42 = vld [vmem:[#allocation11 + $0x70] sm:$0xff] }
 0x5da   :  { %12150 = vmatprep.subr.bf16.mxu1 %v12149_v12  ;;  %v16119_v38 = vpack.c.bf16 %v6326_v62, %v6323_v42  ;;  %v12209_v62 = vpack.c.bf16 %v6114_v22, %v6111_v17  ;;  %v6339_v22 = vld [vmem:[#allocation11 + $0xf0] sm:$0xff] }
 0x5dd   :  { %12152 = vmatpush3.bf16.msra.mxu1 %v12149_v12  ;;  %v6335_v12 = vld [vmem:[#allocation11 + $0xd0] sm:$0xff] }
 0x5de   :  { %12154 = vmatprep.subr.bf16.mxu1 %v12153_v27  ;;  %v16127_v1 = vpack.c.bf16 %v6338_v53, %v6335_v12  ;;  %v12212_v12 = vpack.c.bf16 %v6120_v15, %v6117_v56  ;;  %v6123_v53 = vld [vmem:[#allocation10 + $0xa0] sm:$0xff] }
 0x5df   :  { %v6349_v56 = vld [vmem:[#allocation11 + $0x140] sm:$0xff] }
 0x5e0   :  { %17080 = vst [vmem:[#allocation26_spill] sm:$0xff] %v16127_v1 }
 0x5e1   :  { %12156 = vmatpush3.bf16.msra.mxu1 %v12153_v27  ;;  %v6341_v27 = vld [vmem:[#allocation11 + $0x100] sm:$0xff] }
 0x5e2   :  { %12158 = vmatprep.subr.bf16.mxu1 %v12157_v16  ;;  %v16131_v28 = vpack.c.bf16 %v6344_v48, %v6341_v27  ;;  %v6126_v27 = vld [vmem:[#allocation10 + $0xb8] sm:$0xff] }
 0x5e3   :  { %v12215_v48 = vpack.c.bf16 %v6126_v27, %v6123_v53  ;;  %v6345_v53 = vld [vmem:[#allocation11 + $0x120] sm:$0xff]  ;;  %v6348_v27 = vld [vmem:[#allocation11 + $0x138] sm:$0xff] }
 0x5e4   :  { %17081 = vst [vmem:[#allocation27_spill] sm:$0xff] %v16131_v28 }
 0x5e5   :  { %12160 = vmatpush3.bf16.msra.mxu1 %v12157_v16  ;;  %v6347_v16 = vld [vmem:[#allocation11 + $0x130] sm:$0xff] }
 0x5e6   :  { %12162 = vmatprep.subr.bf16.mxu1 %v12161_v3  ;;  %v16135_v46 = vpack.c.bf16 %v6350_v34, %v6347_v16  ;;  %v6129_v16 = vld [vmem:[#allocation10 + $0xd0] sm:$0xff]  ;;  %v6132_v34 = vld [vmem:[#allocation10 + $0xe8] sm:$0xff] }
 0x5e8   :  { %17082 = vst [vmem:[#allocation28_spill] sm:$0xff] %v16135_v46 }
 0x5e9   :  { %12164 = vmatpush3.bf16.msra.mxu1 %v12161_v3  ;;  %v6353_v3 = vld [vmem:[#allocation11 + $0x160] sm:$0xff] }
 0x5ea   :  { %12166 = vmatprep.subr.bf16.mxu1 %v12165_v10  ;;  %v16139_v36 = vpack.c.bf16 %v6356_v60, %v6353_v3  ;;  %v12218_v3 = vpack.c.bf16 %v6132_v34, %v6129_v16  ;;  %v6135_v60 = vld [vmem:[#allocation10 + $0x100] sm:$0xff]  ;;  %v6355_v16 = vld [vmem:[#allocation11 + $0x170] sm:$0xff]  ;;  %v16203_v34 = vpack.c.bf16 %v6348_v27, %v6345_v53  ;;  %v6557_v53 = vld [vmem:[#allocation13 + $0xa8] sm:$0xff] }
 0x5eb   :  { %v6556_v27 = vld [vmem:[#allocation13 + $0xa0] sm:$0xff] }
 0x5ec   :  { %17083 = vst [vmem:[#allocation29_spill] sm:$0xff] %v16139_v36  ;;  %17089 = vst [vmem:[#allocation35_spill] sm:$0xff] %v16203_v34 }
 0x5ed   :  { %12168 = vmatpush3.bf16.msra.mxu1 %v12165_v10  ;;  %v9154_v10 = vld [vmem:[%s16937_s8] ss:$0 sm:$0xff] }
 0x5ee   :  { %12170 = vmatprep.subr.bf16.mxu1 %v12169_v4 }
 0x5f1   :  { %12172 = vmatpush3.bf16.msra.mxu1 %v12169_v4 }
 0x5f2   :  { %12261 = vmatprep.subr.bf16.mxu1 %v16959_v41 }
 0x5f4   :  { %11326 = vmatmul.mubr.f32.vlgmr.msra.gmra.mrb[48].mxu1 %v5965_v47 }
 0x5f5   :  { %11395 = vmatprep.mubr.msk.f32.mxu1 %vm13284_vm0, %v16957_v0  ;;  %12263 = vmatpush3.bf16.msra.mxu1 %v16112_v21 }
 0x5f6   :  { %12264 = vmatprep.subr.bf16.mxu1 %v16959_v41 }
 0x5f9   :  { %12266 = vmatpush3.bf16.msra.mxu1 %v16116_v14 }
 0x5fa   :  { %12267 = vmatprep.subr.bf16.mxu1 %v16959_v41 }
 0x5fd   :  { %12269 = vmatpush3.bf16.msra.mxu1 %v16119_v38 }
 0x5fe   :  { %12270 = vmatprep.subr.bf16.mxu1 %v16959_v41 }
 0x601   :  { %12272 = vmatpush3.bf16.msra.mxu1 %v16123_v29 }
 0x602   :  { %12273 = vmatprep.subr.bf16.mxu1 %v16959_v41 }
 0x605   :  { %12275 = vmatpush3.bf16.msra.mxu1 %v16127_v1 }
 0x606   :  { %12276 = vmatprep.subr.bf16.mxu1 %v16959_v41 }
 0x609   :  { %12278 = vmatpush3.bf16.msra.mxu1 %v16131_v28 }
 0x60a   :  { %12279 = vmatprep.subr.bf16.mxu1 %v16959_v41 }
 0x60d   :  { %12281 = vmatpush3.bf16.msra.mxu1 %v16135_v46 }
 0x60e   :  { %12282 = vmatprep.subr.bf16.mxu1 %v16959_v41 }
 0x611   :  { %12284 = vmatpush3.bf16.msra.mxu1 %v16139_v36 }
 0x612   :  { %12317 = vmatprep.subr.bf16.mxu1 %v16959_v41 }
 0x614   :  { %11396 = vmatmul.mubr.f32.vlgmr.msra.gmra.mrb[50].mxu1 %v16957_v0 }
 0x615   :  { %11430 = vmatprep.mubr.msk.f32.mxu1 %vm13284_vm0, %v16957_v0 }
 0x6c7   :  { %v11327_v18 = vpop.f32.mrb[48].mxu1 }
 0x6c8   :  { %v6068_v37 = vadd.f32 %v11327_v18, %v9154_v10  ;;  %v6049_v4 = vpop.f32.mrb[49].mxu1 }
 0x6c9   :  { %v6067_v30 = vadd.f32 %v9154_v10, %v6049_v4  ;;  %v6138_v10 = vld [vmem:[#allocation10 + $0x118] sm:$0xff]  ;;  %v6144_v4 = vld [vmem:[#allocation10 + $0x148] sm:$0xff] }
 0x6ca   :  { %v6070_v31 = vmax.f32 %v6068_v37, 0.0  ;;  %v12221_v18 = vpack.c.bf16 %v6138_v10, %v6135_v60  ;;  %v6141_v37 = vld [vmem:[#allocation10 + $0x130] sm:$0xff]  ;;  %v6354_v10 = vld [vmem:[#allocation11 + $0x168] sm:$0xff] }
 0x6cb   :  { %v6069_v19 = vmax.f32 %v6067_v30, 0.0  ;;  %v12224_v30 = vpack.c.bf16 %v6144_v4, %v6141_v37  ;;  %v6351_v60 = vld [vmem:[#allocation11 + $0x150] sm:$0xff]  ;;  %v6537_v37 = vld [vmem:[#allocation13 + $0x8] sm:$0xff]  ;;  %v6540_v4 = vld [vmem:[#allocation13 + $0x20] sm:$0xff] }
 0x6cc   :  { %v6086_v47 = vsel %vm247_vm1, %v6070_v31, -inf  ;;  %v6093_v51 = vsel %vm6078_vm9, %v6070_v31, -inf  ;;  %v6147_v31 = vld [vmem:[#allocation10 + $0x160] sm:$0xff] }
 0x6cd   :  { %v6087_v39 = vrot.slane %v6086_v47, 4  ;;  %v6094_v13 = vrot.slane %v6093_v51, 4  ;;  %v6071_v55 = vsel %vm247_vm1, %v6069_v19, -inf  ;;  %v6079_v20 = vsel %vm6078_vm9, %v6069_v19, -inf  ;;  %v6150_v19 = vld [vmem:[#allocation10 + $0x178] sm:$0xff] }
 0x6ce   :  { %v6072_v35 = vrot.slane %v6071_v55, 4  ;;  %v6080_v44 = vrot.slane %v6079_v20, 4 }
 0x6cf   :  { %v6088_v32 = vmax.f32 %v6086_v47, %v6087_v39  ;;  %v6095_v45 = vmax.f32 %v6093_v51, %v6094_v13  ;;  %v6310_v47 = vld [vmem:[#allocation11 + $0x8] sm:$0xff]  ;;  %v6313_v51 = vld [vmem:[#allocation11 + $0x20] sm:$0xff]  ;;  %v12227_v39 = vpack.c.bf16 %v6150_v19, %v6147_v31  ;;  %v6539_v19 = vld [vmem:[#allocation13 + $0x18] sm:$0xff] }
 0x6d0   :  { %v6073_v54 = vmax.f32 %v6071_v55, %v6072_v35  ;;  %v6081_v49 = vmax.f32 %v6079_v20, %v6080_v44  ;;  %v16164_v13 = vpack.c.bf16 %v6313_v51, %v6310_v47  ;;  %v6309_v55 = vld [vmem:[#allocation11] sm:$0xff]  ;;  %v6312_v20 = vld [vmem:[#allocation11 + $0x18] sm:$0xff]  ;;  %v6319_v44 = vld [vmem:[#allocation11 + $0x50] sm:$0xff] }
 0x6d1   :  { %v6089_v57 = vrot.slane %v6088_v32, 2  ;;  %v6096_v26 = vrot.slane %v6095_v45, 2  ;;  %v6316_v35 = vld [vmem:[#allocation11 + $0x38] sm:$0xff]  ;;  %v6536_v31 = vld [vmem:[#allocation13] sm:$0xff]  ;;  %v6538_v47 = vld [vmem:[#allocation13 + $0x10] sm:$0xff] }
 0x6d2   :  { %v6074_v50 = vrot.slane %v6073_v54, 2  ;;  %v6082_v43 = vrot.slane %v6081_v49, 2  ;;  %v16217_v51 = vpack.c.bf16 %v6539_v19, %v6536_v31  ;;  %v6560_v19 = vld [vmem:[#allocation13 + $0xc0] sm:$0xff] }
 0x6d3   :  { %v6090_v11 = vmax.f32 %v6088_v32, %v6089_v57  ;;  %v6097_v8 = vmax.f32 %v6095_v45, %v6096_v26  ;;  %v16166_v32 = vpack.c.bf16 %v6312_v20, %v6309_v55  ;;  %v16169_v45 = vpack.c.bf16 %v6319_v44, %v6316_v35  ;;  %v6322_v57 = vld [vmem:[#allocation11 + $0x68] sm:$0xff]  ;;  %v6325_v26 = vld [vmem:[#allocation11 + $0x80] sm:$0xff]  ;;  %v6543_v20 = vld [vmem:[#allocation13 + $0x38] sm:$0xff] }
 0x6d4   :  { %v6075_v23 = vmax.f32 %v6073_v54, %v6074_v50  ;;  %v6083_v63 = vmax.f32 %v6081_v49, %v6082_v43  ;;  %v6315_v54 = vld [vmem:[#allocation11 + $0x30] sm:$0xff]  ;;  %v6318_v49 = vld [vmem:[#allocation11 + $0x48] sm:$0xff]  ;;  %v16176_v43 = vpack.c.bf16 %v6325_v26, %v6322_v57  ;;  %17093 = vst [vmem:[#allocation39_spill] sm:$0xff] %v16217_v51  ;;  %v6544_v57 = vld [vmem:[#allocation13 + $0x40] sm:$0xff] }
 0x6d5   :  { %v6091_v25 = vrot.slane %v6090_v11, 1  ;;  %v6098_v59 = vrot.slane %v6097_v8, 1  ;;  %v16172_v50 = vpack.c.bf16 %v6318_v49, %v6315_v54  ;;  %v6546_v35 = vld [vmem:[#allocation13 + $0x50] sm:$0xff]  ;;  %v6545_v49 = vld [vmem:[#allocation13 + $0x48] sm:$0xff] }
 0x6d6   :  { %v6076_v58 = vrot.slane %v6075_v23, 1  ;;  %v6084_v61 = vrot.slane %v6083_v63, 1  ;;  %v16224_v44 = vpack.c.bf16 %v6546_v35, %v6543_v20  ;;  %v6542_v54 = vld [vmem:[#allocation13 + $0x30] sm:$0xff]  ;;  %v6565_v35 = vld [vmem:[#allocation13 + $0xe8] sm:$0xff] }
 0x6d7   :  { %v6092_v9 = vmax.f32 %v6090_v11, %v6091_v25  ;;  %v6099_v52 = vmax.f32 %v6097_v8, %v6098_v59  ;;  %v6321_v11 = vld [vmem:[#allocation11 + $0x60] sm:$0xff]  ;;  %v6324_v8 = vld [vmem:[#allocation11 + $0x78] sm:$0xff]  ;;  %v16227_v26 = vpack.c.bf16 %v6545_v49, %v6542_v54 }
 0x6d8   :  { %v6077_v6 = vmax.f32 %v6075_v23, %v6076_v58  ;;  %v6085_v7 = vmax.f32 %v6083_v63, %v6084_v61  ;;  %v6328_v23 = vld [vmem:[#allocation11 + $0x98] sm:$0xff]  ;;  %v6331_v63 = vld [vmem:[#allocation11 + $0xb0] sm:$0xff]  ;;  %v16179_v25 = vpack.c.bf16 %v6324_v8, %v6321_v11  ;;  %v6330_v61 = vld [vmem:[#allocation11 + $0xa8] sm:$0xff]  ;;  %17095 = vst [vmem:[#allocation41_spill] sm:$0xff] %v16224_v44 }
 0x6d9   :  { %v16182_v59 = vpack.c.bf16 %v6331_v63, %v6328_v23  ;;  %v6327_v58 = vld [vmem:[#allocation11 + $0x90] sm:$0xff]  ;;  %17096 = vst [vmem:[#allocation42_spill] sm:$0xff] %v16227_v26  ;;  %v6547_v11 = vld [vmem:[#allocation13 + $0x58] sm:$0xff]  ;;  %v6549_v23 = vld [vmem:[#allocation13 + $0x68] sm:$0xff] }
 0x6da   :  { %v6100_v2 = vsel %vm4981_vm7, %v6077_v6, %v6085_v7  ;;  %v16185_v6 = vpack.c.bf16 %v6330_v61, %v6327_v58  ;;  %v16188_v7 = vpack.c.bf16 %v6337_v5, %v6334_v33  ;;  %v16230_v8 = vpack.c.bf16 %v6547_v11, %v6544_v57  ;;  %v6552_v63 = vld [vmem:[#allocation13 + $0x80] sm:$0xff]  ;;  %v6551_v33 = vld [vmem:[#allocation13 + $0x78] sm:$0xff]  ;;  %v6550_v5 = vld [vmem:[#allocation13 + $0x70] sm:$0xff] }
 0x6db   :  { %v6101_v40 = vsel %vm267_vm4, %v6100_v2, %v6092_v9  ;;  %v6333_v9 = vld [vmem:[#allocation11 + $0xc0] sm:$0xff]  ;;  %v6340_v2 = vld [vmem:[#allocation11 + $0xf8] sm:$0xff]  ;;  %v16234_v58 = vpack.c.bf16 %v6552_v63, %v6549_v23  ;;  %v6570_v57 = vld [vmem:[#allocation13 + $0x110] sm:$0xff] }
 0x6dc   :  { %v6102_v42 = vsel %vm4996_vm8, %v6101_v40, %v6099_v52  ;;  %17084 = vst [vmem:[#allocation30_spill] sm:$0xff] %v16188_v7  ;;  %v6336_v52 = vld [vmem:[#allocation11 + $0xd8] sm:$0xff]  ;;  %17097 = vst [vmem:[#allocation43_spill] sm:$0xff] %v16230_v8  ;;  %v6548_v61 = vld [vmem:[#allocation13 + $0x60] sm:$0xff] }
 0x6dd   :  { %6233 = vmatmul.mubr.f32.vlgmr.msra.gmra.mrb[60].mxu0 %v6102_v42  ;;  %v16191_v40 = vpack.c.bf16 %v6336_v52, %v6333_v9  ;;  %17098 = vst [vmem:[#allocation44_spill] sm:$0xff] %v16234_v58  ;;  %v16237_v9 = vpack.c.bf16 %v6551_v33, %v6548_v61  ;;  %v6553_v52 = vld [vmem:[#allocation13 + $0x88] sm:$0xff]  ;;  %v6567_v49 = vld [vmem:[#allocation13 + $0xf8] sm:$0xff]  ;;  %v6566_v23 = vld [vmem:[#allocation13 + $0xf0] sm:$0xff] }
 0x6de   :  { %12207 = vmatpush3.bf16.msra.mxu0 %v12206_v24  ;;  %11360 = vmatprep.mubr.msk.f32.mxu0 %vm13284_vm0, %v16957_v0  ;;  %v6343_v24 = vld [vmem:[#allocation11 + $0x110] sm:$0xff]  ;;  %v16266_v11 = vpack.c.bf16 %v6570_v57, %v6567_v49  ;;  %v6569_v63 = vld [vmem:[#allocation13 + $0x108] sm:$0xff]  ;;  %v6568_v61 = vld [vmem:[#allocation13 + $0x100] sm:$0xff] }
 0x6df   :  { %12208 = vmatprep.subr.bf16.mxu0 %v16959_v41  ;;  %17085 = vst [vmem:[#allocation31_spill] sm:$0xff] %v16191_v40  ;;  %v16194_v17 = vpack.c.bf16 %v6343_v24, %v6340_v2  ;;  %17099 = vst [vmem:[#allocation45_spill] sm:$0xff] %v16237_v9  ;;  %v16240_v2 = vpack.c.bf16 %v6553_v52, %v6550_v5  ;;  %v6555_v24 = vld [vmem:[#allocation13 + $0x98] sm:$0xff]  ;;  %v16269_v33 = vpack.c.bf16 %v6569_v63, %v6566_v23  ;;  %v6581_v49 = vld [vmem:[#allocation13 + $0x168] sm:$0xff] }
 0x6e0   :  { %17107 = vst [vmem:[#allocation53_spill] sm:$0xff] %v16266_v11  ;;  %v6571_v5 = vld [vmem:[#allocation13 + $0x118] sm:$0xff]  ;;  %v6580_v57 = vld [vmem:[#allocation13 + $0x160] sm:$0xff] }
 0x6e1   :  { %17086 = vst [vmem:[#allocation32_spill] sm:$0xff] %v16194_v17  ;;  %17100 = vst [vmem:[#allocation46_spill] sm:$0xff] %v16240_v2  ;;  %v16272_v52 = vpack.c.bf16 %v6571_v5, %v6568_v61  ;;  %v6583_v63 = vld [vmem:[#allocation13 + $0x178] sm:$0xff]  ;;  %v6743_v61 = vld [vmem:[#allocation14 + $0x8] sm:$0xff] }
 0x6e2   :  { %12210 = vmatpush3.bf16.msra.mxu0 %v12209_v62  ;;  %v6346_v62 = vld [vmem:[#allocation11 + $0x128] sm:$0xff]  ;;  %17108 = vst [vmem:[#allocation54_spill] sm:$0xff] %v16269_v33  ;;  %v6746_v5 = vld [vmem:[#allocation14 + $0x20] sm:$0xff] }
 0x6e3   :  { %12211 = vmatprep.subr.bf16.mxu0 %v16959_v41  ;;  %17109 = vst [vmem:[#allocation55_spill] sm:$0xff] %v16272_v52 }
 0x6e6   :  { %12213 = vmatpush3.bf16.msra.mxu0 %v12212_v12  ;;  %v16200_v12 = vpack.c.bf16 %v6349_v56, %v6346_v62  ;;  %v6554_v56 = vld [vmem:[#allocation13 + $0x90] sm:$0xff] }
 0x6e7   :  { %12214 = vmatprep.subr.bf16.mxu0 %v16959_v41 }
 0x6e8   :  { %17088 = vst [vmem:[#allocation34_spill] sm:$0xff] %v16200_v12 }
 0x6ea   :  { %12216 = vmatpush3.bf16.msra.mxu0 %v12215_v48  ;;  %v6352_v48 = vld [vmem:[#allocation11 + $0x158] sm:$0xff] }
 0x6eb   :  { %12217 = vmatprep.subr.bf16.mxu0 %v16959_v41 }
 0x6ee   :  { %12219 = vmatpush3.bf16.msra.mxu0 %v12218_v3  ;;  %v16206_v3 = vpack.c.bf16 %v6355_v16, %v6352_v48  ;;  %v16249_v16 = vpack.c.bf16 %v6557_v53, %v6554_v56  ;;  %v6572_v53 = vld [vmem:[#allocation13 + $0x120] sm:$0xff] }
 0x6ef   :  { %12220 = vmatprep.subr.bf16.mxu0 %v16959_v41 }
 0x6f0   :  { %17090 = vst [vmem:[#allocation36_spill] sm:$0xff] %v16206_v3  ;;  %17102 = vst [vmem:[#allocation48_spill] sm:$0xff] %v16249_v16 }
 0x6f2   :  { %12222 = vmatpush3.bf16.msra.mxu0 %v12221_v18  ;;  %v16209_v18 = vpack.c.bf16 %v6354_v10, %v6351_v60  ;;  %v6559_v60 = vld [vmem:[#allocation13 + $0xb8] sm:$0xff] }
 0x6f3   :  { %12223 = vmatprep.subr.bf16.mxu0 %v16959_v41  ;;  %v16252_v10 = vpack.c.bf16 %v6559_v60, %v6556_v27  ;;  %v6575_v27 = vld [vmem:[#allocation13 + $0x138] sm:$0xff] }
 0x6f4   :  { %17091 = vst [vmem:[#allocation37_spill] sm:$0xff] %v16209_v18  ;;  %v16279_v60 = vpack.c.bf16 %v6575_v27, %v6572_v53 }
 0x6f5   :  { %17103 = vst [vmem:[#allocation49_spill] sm:$0xff] %v16252_v10 }
 0x6f6   :  { %12225 = vmatpush3.bf16.msra.mxu0 %v12224_v30  ;;  %v16215_v30 = vpack.c.bf16 %v6540_v4, %v6537_v37  ;;  %v6561_v37 = vld [vmem:[#allocation13 + $0xc8] sm:$0xff]  ;;  %v6564_v4 = vld [vmem:[#allocation13 + $0xe0] sm:$0xff]  ;;  %17111 = vst [vmem:[#allocation57_spill] sm:$0xff] %v16279_v60 }
 0x6f7   :  { %12226 = vmatprep.subr.bf16.mxu0 %v16959_v41  ;;  %v16256_v31 = vpack.c.bf16 %v6564_v4, %v6561_v37  ;;  %v6577_v37 = vld [vmem:[#allocation13 + $0x148] sm:$0xff] }
 0x6f8   :  { %17092 = vst [vmem:[#allocation38_spill] sm:$0xff] %v16215_v30 }
 0x6f9   :  { %17104 = vst [vmem:[#allocation50_spill] sm:$0xff] %v16256_v31 }
 0x6fa   :  { %12228 = vmatpush3.bf16.msra.mxu0 %v12227_v39  ;;  %v6541_v39 = vld [vmem:[#allocation13 + $0x28] sm:$0xff] }
 0x6fb   :  { %12230 = vmatprep.subr.bf16.mxu0 %v16164_v13  ;;  %v16220_v55 = vpack.c.bf16 %v6541_v39, %v6538_v47  ;;  %v6563_v47 = vld [vmem:[#allocation13 + $0xd8] sm:$0xff]  ;;  %v6562_v39 = vld [vmem:[#allocation13 + $0xd0] sm:$0xff] }
 0x6fc   :  { %v16259_v20 = vpack.c.bf16 %v6563_v47, %v6560_v19  ;;  %v16262_v54 = vpack.c.bf16 %v6565_v35, %v6562_v39  ;;  %v6579_v19 = vld [vmem:[#allocation13 + $0x158] sm:$0xff]  ;;  %v6582_v47 = vld [vmem:[#allocation13 + $0x170] sm:$0xff] }
 0x6fd   :  { %11361 = vmatmul.mubr.f32.vlgmr.msra.gmra.mrb[62].mxu0 %v6102_v42  ;;  %v6342_v42 = vld [vmem:[#allocation11 + $0x108] sm:$0xff]  ;;  %17094 = vst [vmem:[#allocation40_spill] sm:$0xff] %v16220_v55  ;;  %12319 = vmatpush3.bf16.msra.mxu1 %v16220_v55  ;;  %v16286_v39 = vpack.c.bf16 %v6582_v47, %v6579_v19  ;;  %v6578_v35 = vld [vmem:[#allocation13 + $0x150] sm:$0xff]  ;;  %v6153_v19 = vlaneseq }
 0x6fe   :  { %12232 = vmatpush1.bf16.msra.mxu0 %v16166_v32  ;;  %6438 = vmatprep.mubr.f32.mxu0 %v16957_v0  ;;  %v16197_v15 = vpack.c.bf16 %v6342_v42, %v6339_v22  ;;  %v6558_v22 = vld [vmem:[#allocation13 + $0xb0] sm:$0xff]  ;;  %v16244_v42 = vpop.f32.mrb[50].mxu1  ;;  %17105 = vst [vmem:[#allocation51_spill] sm:$0xff] %v16259_v20  ;;  %17106 = vst [vmem:[#allocation52_spill] sm:$0xff] %v16262_v54  ;;  %v16289_v23 = vpack.c.bf16 %v6581_v49, %v6578_v35  ;;  %v6151_v49 = vld [vmem:[%s16940_s11] sm:$0x7] }
 0x6ff   :  { %12234 = vmatprep.subr.bf16.mxu0 %v16169_v45  ;;  %12320 = vmatprep.subr.bf16.mxu1 %v16959_v41  ;;  %v16246_v62 = vpack.c.bf16 %v6558_v22, %v6555_v24  ;;  %v11397_v48 = vpop.f32.mrb[51].mxu1  ;;  %v6573_v24 = vld [vmem:[#allocation13 + $0x128] sm:$0xff]  ;;  %v6576_v22 = vld [vmem:[#allocation13 + $0x140] sm:$0xff]  ;;  %17113 = vst [vmem:[#allocation59_spill] sm:$0xff] %v16286_v39  ;;  %v6154_v47 = vshrl.u32 %v6153_v19, 7 }
 0x700   :  { %17087 = vst [vmem:[#allocation33_spill] sm:$0xff] %v16197_v15  ;;  %v16276_v56 = vpack.c.bf16 %v6576_v22, %v6573_v24  ;;  %v6574_v48 = vld [vmem:[#allocation13 + $0x130] sm:$0xff]  ;;  %17114 = vst [vmem:[#allocation60_spill] sm:$0xff] %v16289_v23  ;;  %v16292_v24 = vpack.c.bf16 %v6583_v63, %v6580_v57  ;;  %v16294_v22 = vpack.c.bf16 %v6746_v5, %v6743_v61  ;;  %v6357_v57 = vld [vmem:[%s16941_s12] sm:$0x7] }
 0x701   :  { %12322 = vmatpush3.bf16.msra.mxu1 %v16230_v8  ;;  %17101 = vst [vmem:[#allocation47_spill] sm:$0xff] %v16246_v62  ;;  %v16282_v4 = vpack.c.bf16 %v6577_v37, %v6574_v48  ;;  %v16300_v35 = vsub.s32 0, %v6154_v47  ;;  %v16308_v63 = vsub.s32 1, %v6154_v47 }
 0x702   :  { %12236 = vmatpush1.bf16.msra.mxu0 %v16172_v50  ;;  %12323 = vmatprep.subr.bf16.mxu1 %v16959_v41  ;;  %17110 = vst [vmem:[#allocation56_spill] sm:$0xff] %v16276_v56  ;;  %17115 = vst [vmem:[#allocation61_spill] sm:$0xff] %v16292_v24 }
 0x703   :  { %12238 = vmatprep.subr.bf16.mxu0 %v16176_v43  ;;  %17112 = vst [vmem:[#allocation58_spill] sm:$0xff] %v16282_v4  ;;  %17116 = vst [vmem:[#allocation62_spill] sm:$0xff] %v16294_v22  ;;  %v6156_v61 = vrot.slane %v6151_v49, %v16300_v35  ;;  %v16312_v5 = vrot.slane %v6357_v57, %v16300_v35  ;;  %v6160_v19 = vrot.slane %v6151_v49, %v16308_v63 }
 0x704   :  { %17117 = vst [vmem:[#allocation63_spill] sm:$0xff] %v16300_v35  ;;  %17118 = vst [vmem:[#allocation64_spill] sm:$0xff] %v16308_v63 }
 0x705   :  { %12325 = vmatpush3.bf16.msra.mxu1 %v16240_v2 }
 0x706   :  { %12240 = vmatpush1.bf16.msra.mxu0 %v16179_v25  ;;  %12326 = vmatprep.subr.bf16.mxu1 %v16959_v41 }
 0x707   :  { %12242 = vmatprep.subr.bf16.mxu0 %v16182_v59 }
 0x709   :  { %12328 = vmatpush3.bf16.msra.mxu1 %v16252_v10 }
 0x70a   :  { %12244 = vmatpush1.bf16.msra.mxu0 %v16185_v6  ;;  %12329 = vmatprep.subr.bf16.mxu1 %v16959_v41 }
 0x70b   :  { %12246 = vmatprep.subr.bf16.mxu0 %v16188_v7 }
 0x70d   :  { %12331 = vmatpush3.bf16.msra.mxu1 %v16262_v54 }
 0x70e   :  { %12248 = vmatpush1.bf16.msra.mxu0 %v16191_v40  ;;  %12332 = vmatprep.subr.bf16.mxu1 %v16959_v41 }
 0x70f   :  { %12250 = vmatprep.subr.bf16.mxu0 %v16194_v17 }
 0x711   :  { %12334 = vmatpush3.bf16.msra.mxu1 %v16272_v52 }
 0x712   :  { %12252 = vmatpush1.bf16.msra.mxu0 %v16197_v15  ;;  %12335 = vmatprep.subr.bf16.mxu1 %v16959_v41 }
 0x713   :  { %12254 = vmatprep.subr.bf16.mxu0 %v16200_v12 }
 0x715   :  { %12337 = vmatpush3.bf16.msra.mxu1 %v16282_v4 }
 0x716   :  { %12256 = vmatpush1.bf16.msra.mxu0 %v16203_v34  ;;  %12338 = vmatprep.subr.bf16.mxu1 %v16959_v41 }
 0x717   :  { %12258 = vmatprep.subr.bf16.mxu0 %v16206_v3 }
 0x719   :  { %12340 = vmatpush3.bf16.msra.mxu1 %v16292_v24 }
 0x71a   :  { %12260 = vmatpush1.bf16.msra.mxu0 %v16209_v18  ;;  %12373 = vmatprep.subr.bf16.mxu1 %v16959_v41 }
 0x71b   :  { %12286 = vmatprep.subr.bf16.mxu0 %v16215_v30 }
 0x71d   :  { %6439 = vmatmul.mubr.f32.vlgmr.msra.gmra.mrb[64].mxu0 %v16957_v0 }
 0x71e   :  { %6665 = vmatprep.mubr.f32.mxu0 %v16957_v0  ;;  %12288 = vmatpush1.bf16.msra.mxu0 %v16217_v51 }
 0x71f   :  { %12290 = vmatprep.subr.bf16.mxu0 %v16224_v44 }
 0x722   :  { %12292 = vmatpush1.bf16.msra.mxu0 %v16227_v26 }
 0x723   :  { %12294 = vmatprep.subr.bf16.mxu0 %v16234_v58 }
 0x726   :  { %12296 = vmatpush1.bf16.msra.mxu0 %v16237_v9 }
 0x727   :  { %12298 = vmatprep.subr.bf16.mxu0 %v16246_v62 }
 0x72a   :  { %12300 = vmatpush1.bf16.msra.mxu0 %v16249_v16 }
 0x72b   :  { %12302 = vmatprep.subr.bf16.mxu0 %v16256_v31 }
 0x72e   :  { %12304 = vmatpush1.bf16.msra.mxu0 %v16259_v20 }
 0x72f   :  { %12306 = vmatprep.subr.bf16.mxu0 %v16266_v11 }
 0x732   :  { %12308 = vmatpush1.bf16.msra.mxu0 %v16269_v33 }
 0x733   :  { %12310 = vmatprep.subr.bf16.mxu0 %v16276_v56 }
 0x736   :  { %12312 = vmatpush1.bf16.msra.mxu0 %v16279_v60 }
 0x737   :  { %12314 = vmatprep.subr.bf16.mxu0 %v16286_v39 }
 0x73a   :  { %12316 = vmatpush1.bf16.msra.mxu0 %v16289_v23 }
 0x73b   :  { %12342 = vmatprep.subr.bf16.mxu0 %v16294_v22 }
 0x7b0   :  { %v6234_v53 = vpop.f32.mrb[60].mxu0 }
 0x7b1   :  { %v6236_v27 = vpop.f32.mrb[61].mxu0  ;;  %v16318_v41 = vadd.f32 %v6234_v53, %v6156_v61  ;;  %v16326_v53 = vsub.s32 2, %v6154_v47  ;;  %v6742_v47 = vld [vmem:[#allocation14] sm:$0xff] }
 0x7b2   :  { %v16323_v4 = vadd.f32 %v6236_v27, %v6160_v19  ;;  %v6747_v19 = vld [vmem:[#allocation14 + $0x28] sm:$0xff] }
 0x7b3   :  { %17120 = vst [vmem:[#allocation66_spill] sm:$0xff] %v16318_v41 }
 0x7b4   :  { %17121 = vst [vmem:[#allocation67_spill] sm:$0xff] %v16323_v4 }
 0x7d0   :  { %v6305_v48 = vpop.f32.mrb[62].mxu0 }
 0x7d1   :  { %v11362_v37 = vpop.f32.mrb[63].mxu0 }
 0x7d2   :  { %v16315_v37 = vrot.slane %v6357_v57, %v16308_v63 }
 0x7d4   :  { %17119 = vst [vmem:[#allocation65_spill] sm:$0xff] %v16315_v37 }
 0x7f0   :  { %v6440_v0 = vpop.f32.mrb[64].mxu0 }
 0x7f1   :  { %v6441_v22 = vadd.f32 %v6440_v0, %v16312_v5  ;;  %v6442_v24 = vpop.f32.mrb[65].mxu0  ;;  %v16329_v0 = vrot.slane %v6357_v57, %v16326_v53  ;;  %v6745_v57 = vld [vmem:[#allocation14 + $0x18] sm:$0xff] }
 0x7f2   :  { %v6443_v23 = vadd.f32 %v6442_v24, %v16315_v37  ;;  %v6164_v24 = vrot.slane %v6151_v49, %v16326_v53  ;;  %v6749_v49 = vld [vmem:[#allocation14 + $0x38] sm:$0xff] }
 0x7f3   :  { %v6515_v39 = vadd.f32 %v6441_v22, %v16318_v41  ;;  %17122 = vst [vmem:[#allocation68_spill] sm:$0xff] %v16329_v0 }
 0x7f4   :  { %v6522_v35 = vadd.f32 %v6443_v23, %v16323_v4  ;;  %v16334_v23 = vadd.f32 %v6305_v48, %v6164_v24  ;;  %v6748_v24 = vld [vmem:[#allocation14 + $0x30] sm:$0xff] }
 0x7f5   :  { %v9155_v60 = vmul.f32 -1.442695, %v6515_v39  ;;  %v6512_v39 = vadd.f32 %v16244_v42, %v16329_v0  ;;  %v16337_v42 = vpack.c.bf16 %v6745_v57, %v6742_v47  ;;  %v6758_v0 = vld [vmem:[#allocation14 + $0x80] sm:$0xff]  ;;  %v6756_v57 = vld [vmem:[#allocation14 + $0x70] sm:$0xff] }
 0x7f6   :  { %v9156_v56 = vmul.f32 -1.442695, %v6522_v35  ;;  %17123 = vst [vmem:[#allocation69_spill] sm:$0xff] %v16334_v23 }
 0x7f7   :  { %12981 = vpow2.f32 %v9155_v60  ;;  %17124 = vst [vmem:[#allocation70_spill] sm:$0xff] %v16337_v42 }
 0x7f8   :  { %12983 = vpow2.f32 %v9156_v56 }
 0x801   :  { %v12982_v52 = vpop.eup %12981 }
 0x802   :  { %v6519_v63 = vadd.f32 1.0, %v12982_v52  ;;  %v12984_v61 = vpop.eup %12983 }
 0x803   :  { %v6526_v22 = vadd.f32 1.0, %v12984_v61  ;;  %v6752_v61 = vld [vmem:[#allocation14 + $0x50] sm:$0xff] }
 0x804   :  { %12985 = vrcp.f32 %v6519_v63  ;;  %v6744_v63 = vld [vmem:[#allocation14 + $0x10] sm:$0xff] }
 0x805   :  { %12987 = vrcp.f32 %v6526_v22  ;;  %v16339_v48 = vpack.c.bf16 %v6747_v19, %v6744_v63  ;;  %v6759_v63 = vld [vmem:[#allocation14 + $0x88] sm:$0xff]  ;;  %v6761_v19 = vld [vmem:[#allocation14 + $0x98] sm:$0xff] }
 0x807   :  { %17125 = vst [vmem:[#allocation71_spill] sm:$0xff] %v16339_v48 }
 0x80e   :  { %v12986_v27 = vpop.eup %12985 }
 0x80f   :  { %v6529_v56 = vmul.f32 %v12986_v27, %v6512_v39  ;;  %v12988_v60 = vpop.eup %12987  ;;  %v16343_v39 = vpack.c.bf16 %v6752_v61, %v6749_v49  ;;  %v6751_v27 = vld [vmem:[#allocation14 + $0x48] sm:$0xff]  ;;  %v6764_v49 = vld [vmem:[#allocation14 + $0xb0] sm:$0xff]  ;;  %v17131_v61 = vmov 0.0  }
 0x810   :  { %v6532_v35 = vsub.f32 1.0, %v12988_v60  ;;  %v6534_v41 = vmul.f32 0.0, %v12988_v60 }
 0x811   :  { %v6530_v52 = vadd.f32 %v6529_v56, %v16334_v23  ;;  %17126 = vst [vmem:[#allocation72_spill] sm:$0xff] %v16343_v39  ;;  %v6750_v56 = vld [vmem:[#allocation14 + $0x40] sm:$0xff]  ;;  %v6755_v23 = vld [vmem:[#allocation14 + $0x68] sm:$0xff] }
 0x812   :  { %v16355_v47 = vpack.c.bf16 %v6758_v0, %v6755_v23  ;;  %v6760_v0 = vld [vmem:[#allocation14 + $0x90] sm:$0xff]  ;;  %v16368_v23 = vpack.c.bf16 %v6764_v49, %v6761_v19  ;;  %v6769_v19 = vld [vmem:[#allocation14 + $0xd8] sm:$0xff] }
 0x813   :  { %12989 = vtanh.f32 %v6530_v52  ;;  %v6753_v52 = vld [vmem:[#allocation14 + $0x58] sm:$0xff]  ;;  %v6768_v49 = vld [vmem:[#allocation14 + $0xd0] sm:$0xff] }
 0x814   :  { %v16351_v60 = vpack.c.bf16 %v6753_v52, %v6750_v56  ;;  %17130 = vst [vmem:[#allocation75_spill] sm:$0xff] %v16355_v47  ;;  %17134 = vst [vmem:[#allocation78_spill] sm:$0xff] %v16368_v23  ;;  %v6763_v56 = vld [vmem:[#allocation14 + $0xa8] sm:$0xff]  ;;  %v6762_v52 = vld [vmem:[#allocation14 + $0xa0] sm:$0xff] }
 0x816   :  { %17128 = vst [vmem:[#allocation74_spill] sm:$0xff] %v16351_v60 }
 0x81d   :  { %v12990_v4 = vpop.eup %12989 }
 0x81e   :  { %v6533_v37 = vmul.f32 %v12990_v4, %v6532_v35  ;;  %v16349_v4 = vpack.c.bf16 %v6751_v27, %v6748_v24  ;;  %v6757_v35 = vld [vmem:[#allocation14 + $0x78] sm:$0xff]  ;;  %v16364_v27 = vpack.c.bf16 %v6759_v63, %v6756_v57  ;;  %v6766_v57 = vld [vmem:[#allocation14 + $0xc0] sm:$0xff] }
 0x820   :  { %v16341_v22 = vadd.f32 %v6534_v41, %v6533_v37  ;;  %17127 = vst [vmem:[#allocation73_spill] sm:$0xff] %v16349_v4  ;;  %v6754_v41 = vld [vmem:[#allocation14 + $0x60] sm:$0xff]  ;;  %v17129_v37 = vmov 0.0|0.0   ;;  %17133 = vst [vmem:[#allocation77_spill] sm:$0xff] %v16364_v27 }
 0x821   :  { %v16362_v24 = vpack.c.bf16 %v6757_v35, %v6754_v41  ;;  %v16372_v41 = vpack.c.bf16 %v6763_v56, %v6760_v0  ;;  %v16382_v0 = vpack.c.bf16 %v6769_v19, %v6766_v57  ;;  %v6772_v56 = vld [vmem:[#allocation14 + $0xf0] sm:$0xff]  ;;  %v6778_v19 = vld [vmem:[#allocation14 + $0x120] sm:$0xff] }
 0x822   :  { %6666 = vmatmul.mubr.f32.vlgmr.msra.gmra.mrb[66].mxu0 %v16341_v22  ;;  %11431 = vmatmul.mubr.f32.vlgmr.msra.gmra.mrb[52].mxu1 %v16341_v22 }
 0x823   :  { %12344 = vmatpush1.bf16.msra.mxu0 %v16337_v42  ;;  %12375 = vmatpush3.bf16.msra.mxu1 %v16339_v48  ;;  %17132 = vst [vmem:[#allocation76_spill] sm:$0xff] %v16362_v24  ;;  %v6767_v48 = vld [vmem:[#allocation14 + $0xc8] sm:$0xff]  ;;  %v6770_v42 = vld [vmem:[#allocation14 + $0xe0] sm:$0xff]  ;;  %17135 = vst [vmem:[#allocation79_spill] sm:$0xff] %v16372_v41 }
 0x824   :  { %12346 = vmatprep.subr.bf16.mxu0 %v16343_v39  ;;  %12376 = vmatprep.subr.bf16.mxu1 %v17129_v37  ;;  %v6765_v39 = vld [vmem:[#allocation14 + $0xb8] sm:$0xff]  ;;  %v16378_v63 = vpack.c.bf16 %v6770_v42, %v6767_v48  ;;  %v6775_v48 = vld [vmem:[#allocation14 + $0x108] sm:$0xff] }
 0x825   :  { %6871 = vmatprep.mubr.f32.mxu0 %v17131_v61  ;;  %11465 = vmatprep.mubr.msk.f32.mxu1 %vm13284_vm0, %v17131_v61  ;;  %v16374_v35 = vpack.c.bf16 %v6765_v39, %v6762_v52  ;;  %v6774_v52 = vld [vmem:[#allocation14 + $0x100] sm:$0xff]  ;;  %v16392_v57 = vpack.c.bf16 %v6775_v48, %v6772_v56  ;;  %v6784_v48 = vld [vmem:[#allocation14 + $0x150] sm:$0xff] }
 0x826   :  { %17137 = vst [vmem:[#allocation81_spill] sm:$0xff] %v16378_v63 }
 0x827   :  { %12348 = vmatpush1.bf16.msra.mxu0 %v16349_v4  ;;  %12378 = vmatpush3.bf16.msra.mxu1 %v16351_v60  ;;  %17136 = vst [vmem:[#allocation80_spill] sm:$0xff] %v16374_v35  ;;  %v6773_v60 = vld [vmem:[#allocation14 + $0xf8] sm:$0xff]  ;;  %v6776_v4 = vld [vmem:[#allocation14 + $0x110] sm:$0xff]  ;;  %17139 = vst [vmem:[#allocation83_spill] sm:$0xff] %v16392_v57 }
 0x828   :  { %12350 = vmatprep.subr.bf16.mxu0 %v16355_v47  ;;  %12379 = vmatprep.subr.bf16.mxu1 %v17129_v37  ;;  %v6771_v47 = vld [vmem:[#allocation14 + $0xe8] sm:$0xff]  ;;  %v16388_v42 = vpack.c.bf16 %v6776_v4, %v6773_v60  ;;  %v6781_v60 = vld [vmem:[#allocation14 + $0x138] sm:$0xff] }
 0x829   :  { %v16384_v39 = vpack.c.bf16 %v6771_v47, %v6768_v49  ;;  %v6780_v49 = vld [vmem:[#allocation14 + $0x130] sm:$0xff]  ;;  %v16402_v56 = vpack.c.bf16 %v6781_v60, %v6778_v19 }
 0x82a   :  { %17138 = vst [vmem:[#allocation82_spill] sm:$0xff] %v16388_v42  ;;  %v17144_v60 = vld [vmem:[#allocation59_spill] sm:$0xff] }
 0x82b   :  { %12352 = vmatpush1.bf16.msra.mxu0 %v16362_v24  ;;  %12381 = vmatpush3.bf16.msra.mxu1 %v16364_v27  ;;  %v6779_v27 = vld [vmem:[#allocation14 + $0x128] sm:$0xff]  ;;  %v6782_v24 = vld [vmem:[#allocation14 + $0x140] sm:$0xff] }
 0x82c   :  { %12354 = vmatprep.subr.bf16.mxu0 %v16368_v23  ;;  %12382 = vmatprep.subr.bf16.mxu1 %v17129_v37  ;;  %v6777_v23 = vld [vmem:[#allocation14 + $0x118] sm:$0xff]  ;;  %v16398_v4 = vpack.c.bf16 %v6782_v24, %v6779_v27  ;;  %v6787_v27 = vld [vmem:[#allocation14 + $0x168] sm:$0xff] }
 0x82d   :  { %v16394_v47 = vpack.c.bf16 %v6777_v23, %v6774_v52  ;;  %v6786_v52 = vld [vmem:[#allocation14 + $0x160] sm:$0xff] }
 0x82f   :  { %12356 = vmatpush1.bf16.msra.mxu0 %v16372_v41  ;;  %12384 = vmatpush3.bf16.msra.mxu1 %v16374_v35  ;;  %v6785_v35 = vld [vmem:[#allocation14 + $0x158] sm:$0xff]  ;;  %v6788_v41 = vld [vmem:[#allocation14 + $0x170] sm:$0xff] }
 0x830   :  { %12358 = vmatprep.subr.bf16.mxu0 %v16378_v63  ;;  %12385 = vmatprep.subr.bf16.mxu1 %v17129_v37  ;;  %v6783_v63 = vld [vmem:[#allocation14 + $0x148] sm:$0xff]  ;;  %v16408_v24 = vpack.c.bf16 %v6788_v41, %v6785_v35  ;;  %v17141_v35 = vld [vmem:[#allocation56_spill] sm:$0xff] }
 0x831   :  { %v16404_v23 = vpack.c.bf16 %v6783_v63, %v6780_v49  ;;  %v17140_v41 = vld [vmem:[#allocation55_spill] sm:$0xff]  ;;  %v17142_v63 = vld [vmem:[#allocation57_spill] sm:$0xff]  ;;  %v17145_v49 = vld [vmem:[#allocation60_spill] sm:$0xff] }
 0x833   :  { %12360 = vmatpush1.bf16.msra.mxu0 %v16382_v0  ;;  %12387 = vmatpush3.bf16.msra.mxu1 %v16384_v39 }
 0x834   :  { %12362 = vmatprep.subr.bf16.mxu0 %v16388_v42  ;;  %12388 = vmatprep.subr.bf16.mxu1 %v17129_v37  ;;  %v6789_v42 = vld [vmem:[#allocation14 + $0x178] sm:$0xff] }
 0x835   :  { %v16414_v19 = vpack.c.bf16 %v6789_v42, %v6786_v52  ;;  %v17143_v42 = vld [vmem:[#allocation58_spill] sm:$0xff] }
 0x837   :  { %12364 = vmatpush1.bf16.msra.mxu0 %v16392_v57  ;;  %12390 = vmatpush3.bf16.msra.mxu1 %v16394_v47  ;;  %v16412_v57 = vpack.c.bf16 %v6787_v27, %v6784_v48  ;;  %v17146_v48 = vld [vmem:[#allocation61_spill] sm:$0xff]  ;;  %v17147_v27 = vld [vmem:[#allocation62_spill] sm:$0xff] }
 0x838   :  { %12366 = vmatprep.subr.bf16.mxu0 %v16398_v4  ;;  %12391 = vmatprep.subr.bf16.mxu1 %v17129_v37 }
 0x83b   :  { %12368 = vmatpush1.bf16.msra.mxu0 %v16402_v56  ;;  %12393 = vmatpush3.bf16.msra.mxu1 %v16404_v23 }
 0x83c   :  { %12370 = vmatprep.subr.bf16.mxu0 %v16408_v24  ;;  %12394 = vmatprep.subr.bf16.mxu1 %v17129_v37 }
 0x83f   :  { %12372 = vmatpush1.bf16.msra.mxu0 %v16412_v57  ;;  %12396 = vmatpush3.bf16.msra.mxu1 %v16414_v19 }
 0x840   :  { %12398 = vmatprep.subr.bf16.mxu0 %v16164_v13  ;;  %12429 = vmatprep.subr.bf16.mxu1 %v17129_v37 }
 0x842   :  { %6872 = vmatmul.mubr.f32.vlgmr.msra.gmra.mrb[66].mxu0 %v17131_v61  ;;  %11466 = vmatmul.mubr.f32.vlgmr.msra.gmra.mrb[54].mxu1 %v17131_v61 }
 0x843   :  { %12400 = vmatpush1.bf16.msra.mxu0 %v16166_v32  ;;  %12431 = vmatpush3.bf16.msra.mxu1 %v16112_v21 }
 0x844   :  { %12402 = vmatprep.subr.bf16.mxu0 %v16169_v45  ;;  %12432 = vmatprep.subr.bf16.mxu1 %v17129_v37 }
 0x845   :  { %7033 = vmatprep.mubr.f32.mxu0 %v17131_v61  ;;  %11500 = vmatprep.mubr.msk.f32.mxu1 %vm13284_vm0, %v17131_v61 }
 0x847   :  { %12404 = vmatpush1.bf16.msra.mxu0 %v16172_v50  ;;  %12434 = vmatpush3.bf16.msra.mxu1 %v16116_v14 }
 0x848   :  { %12406 = vmatprep.subr.bf16.mxu0 %v16176_v43  ;;  %12435 = vmatprep.subr.bf16.mxu1 %v17129_v37 }
 0x84b   :  { %12408 = vmatpush1.bf16.msra.mxu0 %v16179_v25  ;;  %12437 = vmatpush3.bf16.msra.mxu1 %v16119_v38 }
 0x84c   :  { %12410 = vmatprep.subr.bf16.mxu0 %v16182_v59  ;;  %12438 = vmatprep.subr.bf16.mxu1 %v17129_v37 }
 0x84f   :  { %12412 = vmatpush1.bf16.msra.mxu0 %v16185_v6  ;;  %12440 = vmatpush3.bf16.msra.mxu1 %v16123_v29 }
 0x850   :  { %12414 = vmatprep.subr.bf16.mxu0 %v16188_v7  ;;  %12441 = vmatprep.subr.bf16.mxu1 %v17129_v37 }
 0x853   :  { %12416 = vmatpush1.bf16.msra.mxu0 %v16191_v40  ;;  %12443 = vmatpush3.bf16.msra.mxu1 %v16127_v1 }
 0x854   :  { %12418 = vmatprep.subr.bf16.mxu0 %v16194_v17  ;;  %12444 = vmatprep.subr.bf16.mxu1 %v17129_v37 }
 0x857   :  { %12420 = vmatpush1.bf16.msra.mxu0 %v16197_v15  ;;  %12446 = vmatpush3.bf16.msra.mxu1 %v16131_v28 }
 0x858   :  { %12422 = vmatprep.subr.bf16.mxu0 %v16200_v12  ;;  %12447 = vmatprep.subr.bf16.mxu1 %v17129_v37 }
 0x85b   :  { %12424 = vmatpush1.bf16.msra.mxu0 %v16203_v34  ;;  %12449 = vmatpush3.bf16.msra.mxu1 %v16135_v46 }
 0x85c   :  { %12426 = vmatprep.subr.bf16.mxu0 %v16206_v3  ;;  %12450 = vmatprep.subr.bf16.mxu1 %v17129_v37 }
 0x85f   :  { %12428 = vmatpush1.bf16.msra.mxu0 %v16209_v18  ;;  %12452 = vmatpush3.bf16.msra.mxu1 %v16139_v36 }
 0x860   :  { %12454 = vmatprep.subr.bf16.mxu0 %v16215_v30  ;;  %12485 = vmatprep.subr.bf16.mxu1 %v17129_v37 }
 0x862   :  { %7034 = vmatmul.mubr.f32.vlgmr.msra.gmra.mrb[68].mxu0 %v16341_v22  ;;  %11501 = vmatmul.mubr.f32.vlgmr.msra.gmra.mrb[56].mxu1 %v16341_v22 }
 0x863   :  { %12456 = vmatpush1.bf16.msra.mxu0 %v16217_v51  ;;  %12487 = vmatpush3.bf16.msra.mxu1 %v16220_v55 }
 0x864   :  { %12458 = vmatprep.subr.bf16.mxu0 %v16224_v44  ;;  %12488 = vmatprep.subr.bf16.mxu1 %v17129_v37 }
 0x865   :  { %7210 = vmatprep.mubr.f32.mxu0 %v17131_v61  ;;  %11535 = vmatprep.mubr.msk.f32.mxu1 %vm13284_vm0, %v17131_v61 }
 0x867   :  { %12460 = vmatpush1.bf16.msra.mxu0 %v16227_v26  ;;  %12490 = vmatpush3.bf16.msra.mxu1 %v16230_v8 }
 0x868   :  { %12462 = vmatprep.subr.bf16.mxu0 %v16234_v58  ;;  %12491 = vmatprep.subr.bf16.mxu1 %v17129_v37 }
 0x86b   :  { %12464 = vmatpush1.bf16.msra.mxu0 %v16237_v9  ;;  %12493 = vmatpush3.bf16.msra.mxu1 %v16240_v2 }
 0x86c   :  { %12466 = vmatprep.subr.bf16.mxu0 %v16246_v62  ;;  %12494 = vmatprep.subr.bf16.mxu1 %v17129_v37 }
 0x86f   :  { %12468 = vmatpush1.bf16.msra.mxu0 %v16249_v16  ;;  %12496 = vmatpush3.bf16.msra.mxu1 %v16252_v10 }
 0x870   :  { %12470 = vmatprep.subr.bf16.mxu0 %v16256_v31  ;;  %12497 = vmatprep.subr.bf16.mxu1 %v17129_v37 }
 0x873   :  { %12472 = vmatpush1.bf16.msra.mxu0 %v16259_v20  ;;  %12499 = vmatpush3.bf16.msra.mxu1 %v16262_v54 }
 0x874   :  { %12474 = vmatprep.subr.bf16.mxu0 %v16266_v11  ;;  %12500 = vmatprep.subr.bf16.mxu1 %v17129_v37 }
 0x877   :  { %12476 = vmatpush1.bf16.msra.mxu0 %v16269_v33  ;;  %12502 = vmatpush3.bf16.msra.mxu1 %v17140_v41  ;;  %v17149_v33 = vld [vmem:[#allocation64_spill] sm:$0xff] }
 0x878   :  { %12478 = vmatprep.subr.bf16.mxu0 %v17141_v35  ;;  %12503 = vmatprep.subr.bf16.mxu1 %v17129_v37 }
 0x87b   :  { %12480 = vmatpush1.bf16.msra.mxu0 %v17142_v63  ;;  %12505 = vmatpush3.bf16.msra.mxu1 %v17143_v42  ;;  %v6790_v63 = vld [vmem:[%s16945_s16] sm:$0x7]  ;;  %v17148_v42 = vld [vmem:[#allocation63_spill] sm:$0xff] }
 0x87c   :  { %12482 = vmatprep.subr.bf16.mxu0 %v17144_v60  ;;  %12506 = vmatprep.subr.bf16.mxu1 %v17129_v37  ;;  %v6584_v60 = vld [vmem:[%s16944_s15] sm:$0x7] }
 0x87d   :  { %v6589_v41 = vrot.slane %v6584_v60, %v17148_v42 }
 0x87f   :  { %12484 = vmatpush1.bf16.msra.mxu0 %v17145_v49  ;;  %12508 = vmatpush3.bf16.msra.mxu1 %v17146_v48  ;;  %v6795_v49 = vrot.slane %v6790_v63, %v17148_v42  ;;  %v6593_v48 = vrot.slane %v6584_v60, %v17149_v33 }
 0x880   :  { %12510 = vmatprep.subr.bf16.mxu0 %v17147_v27  ;;  %12541 = vmatprep.subr.bf16.mxu1 %v17129_v37  ;;  %v6799_v27 = vrot.slane %v6790_v63, %v17149_v33  ;;  %v16513_v33 = vrot.slane %v6790_v63, %v16326_v53 }
 0x881   :  { %v16506_v11 = vadd.f32 %v6795_v49, %v6589_v41  ;;  %v16516_v49 = vrot.slane %v6584_v60, %v16326_v53 }
 0x882   :  { %17152 = vst [vmem:[#allocation84_spill] sm:$0xff] %v16513_v33 }
 0x883   :  { %17150 = vst [vmem:[#allocation63_spill] sm:$0xff] %v16506_v11 }
 0x8f5   :  { %v6738_v52 = vpop.f32.mrb[52].mxu1 }
 0x8f6   :  { %v11432_v35 = vpop.f32.mrb[53].mxu1 }
 0x8f7   :  { %v16508_v35 = vadd.f32 %v6799_v27, %v6593_v48 }
 0x8f9   :  { %17151 = vst [vmem:[#allocation64_spill] sm:$0xff] %v16508_v35 }
 0x915   :  { %v6873_v54 = vpop.f32.mrb[66].mxu0  ;;  %v6944_v20 = vpop.f32.mrb[54].mxu1 }
 0x916   :  { %v12938_v31 = vadd.f32 %v16506_v11, %v6873_v54  ;;  %v6875_v10 = vpop.f32.mrb[67].mxu0  ;;  %v11467_v16 = vpop.f32.mrb[55].mxu1  ;;  %v6945_v54 = vadd.f32 %v6944_v20, %v16513_v33  ;;  %v17155_v20 = vld [vmem:[#allocation67_spill] sm:$0xff] }
 0x917   :  { %v12940_v2 = vadd.f32 %v16508_v35, %v6875_v10 }
 0x918   :  { %v9157_v62 = vmul.f32 -1.442695, %v12938_v31  ;;  %v6739_v31 = vadd.f32 %v6738_v52, %v16516_v49 }
 0x919   :  { %v9158_v9 = vmul.f32 -1.442695, %v12940_v2 }
 0x91a   :  { %12991 = vpow2.f32 %v9157_v62 }
 0x91b   :  { %12993 = vpow2.f32 %v9158_v9 }
 0x924   :  { %v12992_v42 = vpop.eup %12991 }
 0x925   :  { %v6952_v58 = vadd.f32 1.0, %v12992_v42  ;;  %v12994_v41 = vpop.eup %12993  ;;  %v17153_v42 = vld [vmem:[#allocation65_spill] sm:$0xff] }
 0x926   :  { %v6959_v48 = vadd.f32 1.0, %v12994_v41  ;;  %v17154_v41 = vld [vmem:[#allocation66_spill] sm:$0xff] }
 0x927   :  { %12995 = vrcp.f32 %v6952_v58 }
 0x928   :  { %12997 = vrcp.f32 %v6959_v48 }
 0x931   :  { %v12996_v16 = vpop.eup %12995 }
 0x932   :  { %v6962_v62 = vmul.f32 %v12996_v16, %v6945_v54  ;;  %v12998_v8 = vpop.eup %12997 }
 0x933   :  { %v6965_v54 = vsub.f32 1.0, %v12998_v8 }
 0x934   :  { %v6963_v2 = vadd.f32 %v6962_v62, %v6739_v31  ;;  %v6967_v31 = vmul.f32 0.0, %v12998_v8 }
 0x935   :  { %v7035_v9 = vpop.f32.mrb[68].mxu0  ;;  %v7106_v10 = vpop.f32.mrb[56].mxu1 }
 0x936   :  { %12999 = vtanh.f32 %v6963_v2  ;;  %v7036_v58 = vadd.f32 %v7035_v9, %v16312_v5  ;;  %v7037_v63 = vpop.f32.mrb[69].mxu0  ;;  %v11502_v27 = vpop.f32.mrb[57].mxu1 }
 0x937   :  { %v7038_v35 = vadd.f32 %v7037_v63, %v17153_v42 }
 0x938   :  { %v7111_v53 = vrot.slane %v7036_v58, 7 }
 0x939   :  { %v7121_v60 = vrot.slane %v7038_v35, 7  ;;  %v17156_v35 = vld [vmem:[#allocation68_spill] sm:$0xff] }
 0x93a   :  { %v7113_v11 = vadd.f32 %v7111_v53, %v17154_v41  ;;  %v7107_v53 = vadd.f32 %v7106_v10, %v17156_v35  ;;  %v17157_v41 = vld [vmem:[#allocation69_spill] sm:$0xff]  ;;  %v17158_v10 = vld [vmem:[#allocation70_spill] sm:$0xff] }
 0x93b   :  { %v7123_v33 = vadd.f32 %v7121_v60, %v17155_v20 }
 0x93c   :  { %v9159_v52 = vmul.f32 -1.442695, %v7113_v11  ;;  %v7131_v60 = vrot.slane %v7107_v53, 7  ;;  %v7139_v11 = vrot.slane %v16341_v22, 7  ;;  %v17159_v22 = vld [vmem:[#allocation71_spill] sm:$0xff]  ;;  %v17164_v53 = vld [vmem:[#allocation76_spill] sm:$0xff] }
 0x93d   :  { %v9160_v48 = vmul.f32 -1.442695, %v7123_v33 }
 0x93e   :  { %13001 = vpow2.f32 %v9159_v52 }
 0x93f   :  { %13003 = vpow2.f32 %v9160_v48 }
 0x940   :  { %v13000_v16 = vpop.eup %12999 }
 0x941   :  { %v6966_v62 = vmul.f32 %v13000_v16, %v6965_v54 }
 0x943   :  { %v16524_v2 = vadd.f32 %v6967_v31, %v6966_v62 }
 0x948   :  { %v13002_v9 = vpop.eup %13001 }
 0x949   :  { %v13004_v27 = vpop.eup %13003  ;;  %v7117_v63 = vadd.f32 1.0, %v13002_v9 }
 0x94a   :  { %v7127_v58 = vadd.f32 1.0, %v13004_v27  ;;  %v17161_v27 = vld [vmem:[#allocation73_spill] sm:$0xff] }
 0x94b   :  { %13005 = vrcp.f32 %v7117_v63  ;;  %v17162_v63 = vld [vmem:[#allocation74_spill] sm:$0xff] }
 0x94c   :  { %13007 = vrcp.f32 %v7127_v58  ;;  %v17163_v58 = vld [vmem:[#allocation75_spill] sm:$0xff] }
 0x955   :  { %v13006_v20 = vpop.eup %13005 }
 0x956   :  { %v13008_v33 = vpop.eup %13007  ;;  %v7133_v52 = vmul.f32 %v13006_v20, %v7131_v60  ;;  %v17160_v20 = vld [vmem:[#allocation72_spill] sm:$0xff]  ;;  %v17165_v60 = vld [vmem:[#allocation77_spill] sm:$0xff] }
 0x957   :  { %v7141_v48 = vmul.f32 %v13008_v33, %v7139_v11  ;;  %v7136_v54 = vsub.f32 1.0, %v13008_v33  ;;  %v17166_v11 = vld [vmem:[#allocation78_spill] sm:$0xff]  ;;  %v17167_v33 = vld [vmem:[#allocation79_spill] sm:$0xff] }
 0x958   :  { %v7134_v8 = vadd.f32 %v7133_v52, %v17157_v41  ;;  %v17168_v52 = vld [vmem:[#allocation80_spill] sm:$0xff] }
 0x95a   :  { %13009 = vtanh.f32 %v7134_v8  ;;  %v17170_v8 = vld [vmem:[#allocation82_spill] sm:$0xff] }
 0x964   :  { %v13010_v16 = vpop.eup %13009 }
 0x965   :  { %v7137_v31 = vmul.f32 %v13010_v16, %v7136_v54  ;;  %v17171_v54 = vld [vmem:[#allocation83_spill] sm:$0xff] }
 0x966   :  { %v17172_v16 = vld [vmem:[#allocation43_spill] sm:$0xff] }
 0x967   :  { %v16529_v62 = vadd.f32 %v7141_v48, %v7137_v31  ;;  %v17169_v48 = vld [vmem:[#allocation81_spill] sm:$0xff]  ;;  %v17173_v31 = vld [vmem:[#allocation44_spill] sm:$0xff] }
 0x969   :  { %v16532_v9 = vrot.slane %v16529_v62, 1 }
 0x96b   :  { %7211 = vmatmul.mubr.f32.vlgmr.msra.gmra.mrb[70].mxu0 %v16532_v9  ;;  %11536 = vmatmul.mubr.f32.vlgmr.msra.gmra.mrb[58].mxu1 %v16532_v9 }
 0x96c   :  { %12512 = vmatpush1.bf16.msra.mxu0 %v17158_v10  ;;  %12543 = vmatpush3.bf16.msra.mxu1 %v17159_v22 }
 0x96d   :  { %12514 = vmatprep.subr.bf16.mxu0 %v17160_v20  ;;  %12544 = vmatprep.subr.bf16.mxu1 %v17129_v37 }
 0x96e   :  { %7351 = vmatprep.mubr.f32.mxu0 %v17131_v61  ;;  %11570 = vmatprep.mubr.msk.f32.mxu1 %vm13284_vm0, %v17131_v61 }
 0x970   :  { %12516 = vmatpush1.bf16.msra.mxu0 %v17161_v27  ;;  %12546 = vmatpush3.bf16.msra.mxu1 %v17162_v63 }
 0x971   :  { %12518 = vmatprep.subr.bf16.mxu0 %v17163_v58  ;;  %12547 = vmatprep.subr.bf16.mxu1 %v17129_v37 }
 0x974   :  { %12520 = vmatpush1.bf16.msra.mxu0 %v17164_v53  ;;  %12549 = vmatpush3.bf16.msra.mxu1 %v17165_v60 }
 0x975   :  { %12522 = vmatprep.subr.bf16.mxu0 %v17166_v11  ;;  %12550 = vmatprep.subr.bf16.mxu1 %v17129_v37 }
 0x978   :  { %12524 = vmatpush1.bf16.msra.mxu0 %v17167_v33  ;;  %12552 = vmatpush3.bf16.msra.mxu1 %v17168_v52 }
 0x979   :  { %12526 = vmatprep.subr.bf16.mxu0 %v17169_v48  ;;  %12553 = vmatprep.subr.bf16.mxu1 %v17129_v37 }
 0x97c   :  { %12528 = vmatpush1.bf16.msra.mxu0 %v16382_v0  ;;  %12555 = vmatpush3.bf16.msra.mxu1 %v16384_v39 }
 0x97d   :  { %12530 = vmatprep.subr.bf16.mxu0 %v17170_v8  ;;  %12556 = vmatprep.subr.bf16.mxu1 %v17129_v37 }
 0x980   :  { %12532 = vmatpush1.bf16.msra.mxu0 %v17171_v54  ;;  %12558 = vmatpush3.bf16.msra.mxu1 %v16394_v47 }
 0x981   :  { %12534 = vmatprep.subr.bf16.mxu0 %v16398_v4  ;;  %12559 = vmatprep.subr.bf16.mxu1 %v17129_v37 }
 0x984   :  { %12536 = vmatpush1.bf16.msra.mxu0 %v16402_v56  ;;  %12561 = vmatpush3.bf16.msra.mxu1 %v16404_v23 }
 0x985   :  { %12538 = vmatprep.subr.bf16.mxu0 %v16408_v24  ;;  %12562 = vmatprep.subr.bf16.mxu1 %v17129_v37 }
 0x988   :  { %12540 = vmatpush1.bf16.msra.mxu0 %v16412_v57  ;;  %12564 = vmatpush3.bf16.msra.mxu1 %v16414_v19 }
 0x989   :  { %12566 = vmatprep.subr.bf16.mxu0 %v16164_v13  ;;  %12597 = vmatprep.subr.bf16.mxu1 %v17129_v37 }
 0x98b   :  { %7352 = vmatmul.mubr.f32.vlgmr.msra.gmra.mrb[70].mxu0 %v16524_v2  ;;  %11571 = vmatmul.mubr.f32.vlgmr.msra.gmra.mrb[60].mxu1 %v16524_v2 }
 0x98c   :  { %12568 = vmatpush1.bf16.msra.mxu0 %v16166_v32  ;;  %12599 = vmatpush3.bf16.msra.mxu1 %v16112_v21 }
 0x98d   :  { %12570 = vmatprep.subr.bf16.mxu0 %v16169_v45  ;;  %12600 = vmatprep.subr.bf16.mxu1 %v17129_v37 }
 0x98e   :  { %7513 = vmatprep.mubr.f32.mxu0 %v17131_v61  ;;  %11605 = vmatprep.mubr.msk.f32.mxu1 %vm13284_vm0, %v17131_v61 }
 0x990   :  { %12572 = vmatpush1.bf16.msra.mxu0 %v16172_v50  ;;  %12602 = vmatpush3.bf16.msra.mxu1 %v16116_v14 }
 0x991   :  { %12574 = vmatprep.subr.bf16.mxu0 %v16176_v43  ;;  %12603 = vmatprep.subr.bf16.mxu1 %v17129_v37 }
 0x994   :  { %12576 = vmatpush1.bf16.msra.mxu0 %v16179_v25  ;;  %12605 = vmatpush3.bf16.msra.mxu1 %v16119_v38 }
 0x995   :  { %12578 = vmatprep.subr.bf16.mxu0 %v16182_v59  ;;  %12606 = vmatprep.subr.bf16.mxu1 %v17129_v37 }
 0x998   :  { %12580 = vmatpush1.bf16.msra.mxu0 %v16185_v6  ;;  %12608 = vmatpush3.bf16.msra.mxu1 %v16123_v29 }
 0x999   :  { %12582 = vmatprep.subr.bf16.mxu0 %v16188_v7  ;;  %12609 = vmatprep.subr.bf16.mxu1 %v17129_v37 }
 0x99c   :  { %12584 = vmatpush1.bf16.msra.mxu0 %v16191_v40  ;;  %12611 = vmatpush3.bf16.msra.mxu1 %v16127_v1 }
 0x99d   :  { %12586 = vmatprep.subr.bf16.mxu0 %v16194_v17  ;;  %12612 = vmatprep.subr.bf16.mxu1 %v17129_v37  ;;  %v17194_v17 = vld [vmem:[#allocation84_spill] sm:$0xff] }
 0x9a0   :  { %12588 = vmatpush1.bf16.msra.mxu0 %v16197_v15  ;;  %12614 = vmatpush3.bf16.msra.mxu1 %v16131_v28 }
 0x9a1   :  { %12590 = vmatprep.subr.bf16.mxu0 %v16200_v12  ;;  %12615 = vmatprep.subr.bf16.mxu1 %v17129_v37 }
 0x9a4   :  { %12592 = vmatpush1.bf16.msra.mxu0 %v16203_v34  ;;  %12617 = vmatpush3.bf16.msra.mxu1 %v16135_v46 }
 0x9a5   :  { %12594 = vmatprep.subr.bf16.mxu0 %v16206_v3  ;;  %12618 = vmatprep.subr.bf16.mxu1 %v17129_v37  ;;  %v17192_v3 = vld [vmem:[#allocation63_spill] sm:$0xff] }
 0x9a8   :  { %12596 = vmatpush1.bf16.msra.mxu0 %v16209_v18  ;;  %12620 = vmatpush3.bf16.msra.mxu1 %v16139_v36  ;;  %v17179_v36 = vld [vmem:[#allocation50_spill] sm:$0xff] }
 0x9a9   :  { %12622 = vmatprep.subr.bf16.mxu0 %v16215_v30  ;;  %12653 = vmatprep.subr.bf16.mxu1 %v17129_v37  ;;  %v17178_v30 = vld [vmem:[#allocation49_spill] sm:$0xff] }
 0x9ab   :  { %7514 = vmatmul.mubr.f32.vlgmr.msra.gmra.mrb[72].mxu0 %v16532_v9  ;;  %11606 = vmatmul.mubr.f32.vlgmr.msra.gmra.mrb[62].mxu1 %v16532_v9  ;;  %v17174_v9 = vld [vmem:[#allocation45_spill] sm:$0xff] }
 0x9ac   :  { %12624 = vmatpush1.bf16.msra.mxu0 %v16217_v51  ;;  %12655 = vmatpush3.bf16.msra.mxu1 %v16220_v55  ;;  %v17175_v55 = vld [vmem:[#allocation46_spill] sm:$0xff]  ;;  %v17177_v51 = vld [vmem:[#allocation48_spill] sm:$0xff] }
 0x9ad   :  { %12626 = vmatprep.subr.bf16.mxu0 %v16224_v44  ;;  %12656 = vmatprep.subr.bf16.mxu1 %v17129_v37  ;;  %v17176_v44 = vld [vmem:[#allocation47_spill] sm:$0xff] }
 0x9ae   :  { %7689 = vmatprep.mubr.f32.mxu0 %v17131_v61  ;;  %11640 = vmatprep.mubr.msk.f32.mxu1 %vm13284_vm0, %v17131_v61 }
 0x9b0   :  { %12628 = vmatpush1.bf16.msra.mxu0 %v16227_v26  ;;  %12658 = vmatpush3.bf16.msra.mxu1 %v17172_v16  ;;  %v17180_v16 = vld [vmem:[#allocation51_spill] sm:$0xff]  ;;  %v17182_v26 = vld [vmem:[#allocation53_spill] sm:$0xff] }
 0x9b1   :  { %12630 = vmatprep.subr.bf16.mxu0 %v17173_v31  ;;  %12659 = vmatprep.subr.bf16.mxu1 %v17129_v37  ;;  %v17181_v31 = vld [vmem:[#allocation52_spill] sm:$0xff] }
 0x9b4   :  { %12632 = vmatpush1.bf16.msra.mxu0 %v17174_v9  ;;  %12661 = vmatpush3.bf16.msra.mxu1 %v17175_v55  ;;  %v17183_v55 = vld [vmem:[#allocation54_spill] sm:$0xff]  ;;  %v17185_v9 = vld [vmem:[#allocation56_spill] sm:$0xff] }
 0x9b5   :  { %12634 = vmatprep.subr.bf16.mxu0 %v17176_v44  ;;  %12662 = vmatprep.subr.bf16.mxu1 %v17129_v37  ;;  %v17184_v44 = vld [vmem:[#allocation55_spill] sm:$0xff] }
 0x9b8   :  { %12636 = vmatpush1.bf16.msra.mxu0 %v17177_v51  ;;  %12664 = vmatpush3.bf16.msra.mxu1 %v17178_v30  ;;  %v17186_v30 = vld [vmem:[#allocation57_spill] sm:$0xff]  ;;  %v17188_v51 = vld [vmem:[#allocation59_spill] sm:$0xff] }
 0x9b9   :  { %12638 = vmatprep.subr.bf16.mxu0 %v17179_v36  ;;  %12665 = vmatprep.subr.bf16.mxu1 %v17129_v37  ;;  %v17187_v36 = vld [vmem:[#allocation58_spill] sm:$0xff] }
 0x9bc   :  { %12640 = vmatpush1.bf16.msra.mxu0 %v17180_v16  ;;  %12667 = vmatpush3.bf16.msra.mxu1 %v17181_v31  ;;  %v17189_v31 = vld [vmem:[#allocation60_spill] sm:$0xff]  ;;  %v17191_v16 = vld [vmem:[#allocation62_spill] sm:$0xff] }
 0x9bd   :  { %12642 = vmatprep.subr.bf16.mxu0 %v17182_v26  ;;  %12668 = vmatprep.subr.bf16.mxu1 %v17129_v37  ;;  %v17190_v26 = vld [vmem:[#allocation61_spill] sm:$0xff] }
 0x9c0   :  { %12644 = vmatpush1.bf16.msra.mxu0 %v17183_v55  ;;  %12670 = vmatpush3.bf16.msra.mxu1 %v17184_v44 }
 0x9c1   :  { %12646 = vmatprep.subr.bf16.mxu0 %v17185_v9  ;;  %12671 = vmatprep.subr.bf16.mxu1 %v17129_v37 }
 0x9c4   :  { %12648 = vmatpush1.bf16.msra.mxu0 %v17186_v30  ;;  %12673 = vmatpush3.bf16.msra.mxu1 %v17187_v36 }
 0x9c5   :  { %12650 = vmatprep.subr.bf16.mxu0 %v17188_v51  ;;  %12674 = vmatprep.subr.bf16.mxu1 %v17129_v37  ;;  %v17193_v51 = vld [vmem:[#allocation64_spill] sm:$0xff] }
 0x9c8   :  { %12652 = vmatpush1.bf16.msra.mxu0 %v17189_v31  ;;  %12676 = vmatpush3.bf16.msra.mxu1 %v17190_v26 }
 0x9c9   :  { %12678 = vmatprep.subr.bf16.mxu0 %v17191_v16  ;;  %12709 = vmatprep.subr.bf16.mxu1 %v17129_v37 }
 0xa3e   :  { %v7283_v44 = vpop.f32.mrb[58].mxu1 }
 0xa3f   :  { %v11537_v9 = vpop.f32.mrb[59].mxu1  ;;  %v7284_v40 = vadd.f32 %v7283_v44, %v16516_v49 }
 0xa5e   :  { %v7353_v55 = vpop.f32.mrb[70].mxu0  ;;  %v7424_v18 = vpop.f32.mrb[60].mxu1 }
 0xa5f   :  { %v12942_v30 = vadd.f32 %v17192_v3, %v7353_v55  ;;  %v7355_v46 = vpop.f32.mrb[71].mxu0  ;;  %v11572_v36 = vpop.f32.mrb[61].mxu1  ;;  %v7425_v1 = vadd.f32 %v7424_v18, %v17194_v17  ;;  %v17196_v18 = vld [vmem:[#allocation67_spill] sm:$0xff] }
 0xa60   :  { %v12944_v12 = vadd.f32 %v17193_v51, %v7355_v46 }
 0xa61   :  { %v9161_v34 = vmul.f32 -1.442695, %v12942_v30 }
 0xa62   :  { %v9162_v28 = vmul.f32 -1.442695, %v12944_v12 }
 0xa63   :  { %13011 = vpow2.f32 %v9161_v34 }
 0xa64   :  { %13013 = vpow2.f32 %v9162_v28 }
 0xa6d   :  { %v13012_v31 = vpop.eup %13011 }
 0xa6e   :  { %v7432_v26 = vadd.f32 1.0, %v13012_v31  ;;  %v13014_v16 = vpop.eup %13013 }
 0xa6f   :  { %v7439_v15 = vadd.f32 1.0, %v13014_v16  ;;  %v17195_v16 = vld [vmem:[#allocation66_spill] sm:$0xff] }
 0xa70   :  { %13015 = vrcp.f32 %v7432_v26 }
 0xa71   :  { %13017 = vrcp.f32 %v7439_v15 }
 0xa7a   :  { %v13016_v9 = vpop.eup %13015 }
 0xa7b   :  { %v7442_v7 = vmul.f32 %v13016_v9, %v7425_v1  ;;  %v13018_v3 = vpop.eup %13017 }
 0xa7c   :  { %v7447_v9 = vmul.f32 %v13018_v3, %v16524_v2 }
 0xa7d   :  { %v7443_v55 = vadd.f32 %v7442_v7, %v7284_v40  ;;  %v7445_v7 = vsub.f32 1.0, %v13018_v3 }
 0xa7e   :  { %v7515_v36 = vpop.f32.mrb[72].mxu0  ;;  %v7586_v30 = vpop.f32.mrb[62].mxu1 }
 0xa7f   :  { %13019 = vtanh.f32 %v7443_v55  ;;  %v7516_v46 = vadd.f32 %v7515_v36, %v16312_v5  ;;  %v7517_v12 = vpop.f32.mrb[73].mxu0  ;;  %v11607_v28 = vpop.f32.mrb[63].mxu1 }
 0xa80   :  { %v7518_v34 = vadd.f32 %v7517_v12, %v17153_v42 }
 0xa81   :  { %v7591_v26 = vrot.slane %v7516_v46, 6 }
 0xa82   :  { %v7601_v31 = vrot.slane %v7518_v34, 6  ;;  %v7587_v34 = vadd.f32 %v7586_v30, %v17156_v35  ;;  %v17210_v30 = vld [vmem:[#allocation39_spill] sm:$0xff] }
 0xa83   :  { %v7593_v51 = vadd.f32 %v7591_v26, %v17195_v16 }
 0xa84   :  { %v7603_v17 = vadd.f32 %v7601_v31, %v17196_v18  ;;  %v7611_v26 = vrot.slane %v7587_v34, 6  ;;  %v17215_v34 = vld [vmem:[#allocation44_spill] sm:$0xff] }
 0xa85   :  { %v9163_v44 = vmul.f32 -1.442695, %v7593_v51 }
 0xa86   :  { %v9164_v1 = vmul.f32 -1.442695, %v7603_v17  ;;  %v7618_v17 = vrot.slane %v16529_v62, 7  ;;  %v17209_v62 = vld [vmem:[#allocation38_spill] sm:$0xff] }
 0xa87   :  { %13021 = vpow2.f32 %v9163_v44 }
 0xa88   :  { %13023 = vpow2.f32 %v9164_v1 }
 0xa89   :  { %v13020_v40 = vpop.eup %13019 }
 0xa8a   :  { %v7446_v15 = vmul.f32 %v13020_v40, %v7445_v7 }
 0xa8c   :  { %v16654_v55 = vadd.f32 %v7447_v9, %v7446_v15 }
 0xa91   :  { %v13022_v36 = vpop.eup %13021 }
 0xa92   :  { %v13024_v12 = vpop.eup %13023  ;;  %v7597_v46 = vadd.f32 1.0, %v13022_v36  ;;  %v17211_v36 = vld [vmem:[#allocation40_spill] sm:$0xff] }
 0xa93   :  { %v7607_v28 = vadd.f32 1.0, %v13024_v12  ;;  %v17212_v12 = vld [vmem:[#allocation41_spill] sm:$0xff] }
 0xa94   :  { %13025 = vrcp.f32 %v7597_v46  ;;  %v17213_v46 = vld [vmem:[#allocation42_spill] sm:$0xff] }
 0xa95   :  { %13027 = vrcp.f32 %v7607_v28  ;;  %v17214_v28 = vld [vmem:[#allocation43_spill] sm:$0xff] }
 0xa9e   :  { %v13026_v51 = vpop.eup %13025 }
 0xa9f   :  { %v13028_v31 = vpop.eup %13027  ;;  %v7613_v44 = vmul.f32 %v13026_v51, %v7611_v26  ;;  %v17216_v26 = vld [vmem:[#allocation45_spill] sm:$0xff]  ;;  %v17217_v51 = vld [vmem:[#allocation46_spill] sm:$0xff] }
 0xaa0   :  { %v7620_v1 = vmul.f32 %v13028_v31, %v7618_v17  ;;  %v7616_v3 = vsub.f32 1.0, %v13028_v31  ;;  %v17218_v17 = vld [vmem:[#allocation47_spill] sm:$0xff]  ;;  %v17219_v31 = vld [vmem:[#allocation48_spill] sm:$0xff] }
 0xaa1   :  { %v7614_v7 = vadd.f32 %v7613_v44, %v17157_v41  ;;  %v17220_v44 = vld [vmem:[#allocation49_spill] sm:$0xff] }
 0xaa3   :  { %13029 = vtanh.f32 %v7614_v7  ;;  %v17222_v7 = vld [vmem:[#allocation51_spill] sm:$0xff] }
 0xaad   :  { %v13030_v2 = vpop.eup %13029 }
 0xaae   :  { %v7617_v40 = vmul.f32 %v13030_v2, %v7616_v3  ;;  %v17223_v3 = vld [vmem:[#allocation52_spill] sm:$0xff]  ;;  %v17224_v2 = vld [vmem:[#allocation53_spill] sm:$0xff] }
 0xab0   :  { %v16659_v15 = vadd.f32 %v7620_v1, %v7617_v40  ;;  %v17221_v1 = vld [vmem:[#allocation50_spill] sm:$0xff] }
 0xab1   :  { %v17225_v40 = vld [vmem:[#allocation54_spill] sm:$0xff] }
 0xab2   :  { %v16662_v9 = vrot.slane %v16659_v15, 2 }
 0xab4   :  { %7690 = vmatmul.mubr.f32.vlgmr.msra.gmra.mrb[74].mxu0 %v16662_v9  ;;  %11641 = vmatmul.mubr.f32.vlgmr.msra.gmra.mrb[64].mxu1 %v16662_v9 }
 0xab5   :  { %12680 = vmatpush1.bf16.msra.mxu0 %v17158_v10  ;;  %12711 = vmatpush3.bf16.msra.mxu1 %v17159_v22 }
 0xab6   :  { %12682 = vmatprep.subr.bf16.mxu0 %v17160_v20  ;;  %12712 = vmatprep.subr.bf16.mxu1 %v17129_v37 }
 0xab7   :  { %7830 = vmatprep.mubr.f32.mxu0 %v17131_v61  ;;  %11675 = vmatprep.mubr.msk.f32.mxu1 %vm13284_vm0, %v17131_v61 }
 0xab9   :  { %12684 = vmatpush1.bf16.msra.mxu0 %v17161_v27  ;;  %12714 = vmatpush3.bf16.msra.mxu1 %v17162_v63 }
 0xaba   :  { %12686 = vmatprep.subr.bf16.mxu0 %v17163_v58  ;;  %12715 = vmatprep.subr.bf16.mxu1 %v17129_v37 }
 0xabd   :  { %12688 = vmatpush1.bf16.msra.mxu0 %v17164_v53  ;;  %12717 = vmatpush3.bf16.msra.mxu1 %v17165_v60 }
 0xabe   :  { %12690 = vmatprep.subr.bf16.mxu0 %v17166_v11  ;;  %12718 = vmatprep.subr.bf16.mxu1 %v17129_v37 }
 0xac1   :  { %12692 = vmatpush1.bf16.msra.mxu0 %v17167_v33  ;;  %12720 = vmatpush3.bf16.msra.mxu1 %v17168_v52 }
 0xac2   :  { %12694 = vmatprep.subr.bf16.mxu0 %v17169_v48  ;;  %12721 = vmatprep.subr.bf16.mxu1 %v17129_v37 }
 0xac5   :  { %12696 = vmatpush1.bf16.msra.mxu0 %v16382_v0  ;;  %12723 = vmatpush3.bf16.msra.mxu1 %v16384_v39 }
 0xac6   :  { %12698 = vmatprep.subr.bf16.mxu0 %v17170_v8  ;;  %12724 = vmatprep.subr.bf16.mxu1 %v17129_v37 }
 0xac9   :  { %12700 = vmatpush1.bf16.msra.mxu0 %v17171_v54  ;;  %12726 = vmatpush3.bf16.msra.mxu1 %v16394_v47 }
 0xaca   :  { %12702 = vmatprep.subr.bf16.mxu0 %v16398_v4  ;;  %12727 = vmatprep.subr.bf16.mxu1 %v17129_v37 }
 0xacd   :  { %12704 = vmatpush1.bf16.msra.mxu0 %v16402_v56  ;;  %12729 = vmatpush3.bf16.msra.mxu1 %v16404_v23 }
 0xace   :  { %12706 = vmatprep.subr.bf16.mxu0 %v16408_v24  ;;  %12730 = vmatprep.subr.bf16.mxu1 %v17129_v37 }
 0xad1   :  { %12708 = vmatpush1.bf16.msra.mxu0 %v16412_v57  ;;  %12732 = vmatpush3.bf16.msra.mxu1 %v16414_v19 }
 0xad2   :  { %12734 = vmatprep.subr.bf16.mxu0 %v16164_v13  ;;  %12765 = vmatprep.subr.bf16.mxu1 %v17129_v37  ;;  %v17199_v13 = vld [vmem:[#allocation26_spill] sm:$0xff] }
 0xad4   :  { %7831 = vmatmul.mubr.f32.vlgmr.msra.gmra.mrb[74].mxu0 %v16654_v55  ;;  %11676 = vmatmul.mubr.f32.vlgmr.msra.gmra.mrb[66].mxu1 %v16654_v55 }
 0xad5   :  { %12736 = vmatpush1.bf16.msra.mxu0 %v16166_v32  ;;  %12767 = vmatpush3.bf16.msra.mxu1 %v16112_v21  ;;  %v17197_v21 = vld [vmem:[#allocation30_spill] sm:$0xff]  ;;  %v17200_v32 = vld [vmem:[#allocation32_spill] sm:$0xff] }
 0xad6   :  { %12738 = vmatprep.subr.bf16.mxu0 %v16169_v45  ;;  %12768 = vmatprep.subr.bf16.mxu1 %v17129_v37  ;;  %v17202_v45 = vld [vmem:[#allocation27_spill] sm:$0xff] }
 0xad7   :  { %7992 = vmatprep.mubr.f32.mxu0 %v17131_v61  ;;  %11710 = vmatprep.mubr.msk.f32.mxu1 %vm13284_vm0, %v17131_v61 }
 0xad9   :  { %12740 = vmatpush1.bf16.msra.mxu0 %v16172_v50  ;;  %12770 = vmatpush3.bf16.msra.mxu1 %v16116_v14  ;;  %v17198_v14 = vld [vmem:[#allocation31_spill] sm:$0xff]  ;;  %v17203_v50 = vld [vmem:[#allocation34_spill] sm:$0xff] }
 0xada   :  { %12742 = vmatprep.subr.bf16.mxu0 %v16176_v43  ;;  %12771 = vmatprep.subr.bf16.mxu1 %v17129_v37  ;;  %v17205_v43 = vld [vmem:[#allocation28_spill] sm:$0xff] }
 0xadd   :  { %12744 = vmatpush1.bf16.msra.mxu0 %v16179_v25  ;;  %12773 = vmatpush3.bf16.msra.mxu1 %v16119_v38  ;;  %v17201_v38 = vld [vmem:[#allocation33_spill] sm:$0xff]  ;;  %v17206_v25 = vld [vmem:[#allocation36_spill] sm:$0xff] }
 0xade   :  { %12746 = vmatprep.subr.bf16.mxu0 %v16182_v59  ;;  %12774 = vmatprep.subr.bf16.mxu1 %v17129_v37  ;;  %v17207_v59 = vld [vmem:[#allocation37_spill] sm:$0xff] }
 0xae1   :  { %12748 = vmatpush1.bf16.msra.mxu0 %v16185_v6  ;;  %12776 = vmatpush3.bf16.msra.mxu1 %v16123_v29  ;;  %v17204_v29 = vld [vmem:[#allocation35_spill] sm:$0xff]  ;;  %v17208_v6 = vld [vmem:[#allocation29_spill] sm:$0xff] }
 0xae2   :  { %12750 = vmatprep.subr.bf16.mxu0 %v17197_v21  ;;  %12777 = vmatprep.subr.bf16.mxu1 %v17129_v37  ;;  %v17227_v21 = vld [vmem:[#allocation56_spill] sm:$0xff] }
 0xae5   :  { %12752 = vmatpush1.bf16.msra.mxu0 %v17198_v14  ;;  %12779 = vmatpush3.bf16.msra.mxu1 %v17199_v13  ;;  %v17228_v14 = vld [vmem:[#allocation57_spill] sm:$0xff]  ;;  %v17229_v13 = vld [vmem:[#allocation58_spill] sm:$0xff] }
 0xae6   :  { %12754 = vmatprep.subr.bf16.mxu0 %v17200_v32  ;;  %12780 = vmatprep.subr.bf16.mxu1 %v17129_v37  ;;  %v17230_v32 = vld [vmem:[#allocation59_spill] sm:$0xff] }
 0xae9   :  { %12756 = vmatpush1.bf16.msra.mxu0 %v17201_v38  ;;  %12782 = vmatpush3.bf16.msra.mxu1 %v17202_v45  ;;  %v17231_v38 = vld [vmem:[#allocation60_spill] sm:$0xff]  ;;  %v17232_v45 = vld [vmem:[#allocation61_spill] sm:$0xff] }
 0xaea   :  { %12758 = vmatprep.subr.bf16.mxu0 %v17203_v50  ;;  %12783 = vmatprep.subr.bf16.mxu1 %v17129_v37  ;;  %v17233_v50 = vld [vmem:[#allocation62_spill] sm:$0xff] }
 0xaed   :  { %12760 = vmatpush1.bf16.msra.mxu0 %v17204_v29  ;;  %12785 = vmatpush3.bf16.msra.mxu1 %v17205_v43 }
 0xaee   :  { %12762 = vmatprep.subr.bf16.mxu0 %v17206_v25  ;;  %12786 = vmatprep.subr.bf16.mxu1 %v17129_v37 }
 0xaf1   :  { %12764 = vmatpush1.bf16.msra.mxu0 %v17207_v59  ;;  %12788 = vmatpush3.bf16.msra.mxu1 %v17208_v6  ;;  %v17234_v6 = vld [vmem:[#allocation63_spill] sm:$0xff] }
 0xaf2   :  { %12790 = vmatprep.subr.bf16.mxu0 %v17209_v62  ;;  %12821 = vmatprep.subr.bf16.mxu1 %v17129_v37 }
 0xaf4   :  { %7993 = vmatmul.mubr.f32.vlgmr.msra.gmra.mrb[76].mxu0 %v16662_v9  ;;  %11711 = vmatmul.mubr.f32.vlgmr.msra.gmra.mrb[68].mxu1 %v16662_v9  ;;  %v17226_v9 = vld [vmem:[#allocation55_spill] sm:$0xff] }
 0xaf5   :  { %12792 = vmatpush1.bf16.msra.mxu0 %v17210_v30  ;;  %12823 = vmatpush3.bf16.msra.mxu1 %v17211_v36 }
 0xaf6   :  { %12794 = vmatprep.subr.bf16.mxu0 %v17212_v12  ;;  %12824 = vmatprep.subr.bf16.mxu1 %v17129_v37 }
 0xaf7   :  { %8168 = vmatprep.mubr.f32.mxu0 %v17131_v61  ;;  %11745 = vmatprep.mubr.msk.f32.mxu1 %vm13284_vm0, %v17131_v61 }
 0xaf9   :  { %12796 = vmatpush1.bf16.msra.mxu0 %v17213_v46  ;;  %12826 = vmatpush3.bf16.msra.mxu1 %v17214_v28  ;;  %v17235_v46 = vld [vmem:[#allocation64_spill] sm:$0xff] }
 0xafa   :  { %12798 = vmatprep.subr.bf16.mxu0 %v17215_v34  ;;  %12827 = vmatprep.subr.bf16.mxu1 %v17129_v37 }
 0xafd   :  { %12800 = vmatpush1.bf16.msra.mxu0 %v17216_v26  ;;  %12829 = vmatpush3.bf16.msra.mxu1 %v17217_v51 }
 0xafe   :  { %12802 = vmatprep.subr.bf16.mxu0 %v17218_v17  ;;  %12830 = vmatprep.subr.bf16.mxu1 %v17129_v37 }
 0xb01   :  { %12804 = vmatpush1.bf16.msra.mxu0 %v17219_v31  ;;  %12832 = vmatpush3.bf16.msra.mxu1 %v17220_v44  ;;  %v17236_v44 = vld [vmem:[#allocation84_spill] sm:$0xff] }
 0xb02   :  { %12806 = vmatprep.subr.bf16.mxu0 %v17221_v1  ;;  %12833 = vmatprep.subr.bf16.mxu1 %v17129_v37 }
 0xb05   :  { %12808 = vmatpush1.bf16.msra.mxu0 %v17222_v7  ;;  %12835 = vmatpush3.bf16.msra.mxu1 %v17223_v3 }
 0xb06   :  { %12810 = vmatprep.subr.bf16.mxu0 %v17224_v2  ;;  %12836 = vmatprep.subr.bf16.mxu1 %v17129_v37 }
 0xb09   :  { %12812 = vmatpush1.bf16.msra.mxu0 %v17225_v40  ;;  %12838 = vmatpush3.bf16.msra.mxu1 %v17226_v9 }
 0xb0a   :  { %12814 = vmatprep.subr.bf16.mxu0 %v17227_v21  ;;  %12839 = vmatprep.subr.bf16.mxu1 %v17129_v37 }
 0xb0d   :  { %12816 = vmatpush1.bf16.msra.mxu0 %v17228_v14  ;;  %12841 = vmatpush3.bf16.msra.mxu1 %v17229_v13 }
 0xb0e   :  { %12818 = vmatprep.subr.bf16.mxu0 %v17230_v32  ;;  %12842 = vmatprep.subr.bf16.mxu1 %v17129_v37 }
 0xb11   :  { %12820 = vmatpush1.bf16.msra.mxu0 %v17231_v38  ;;  %12844 = vmatpush3.bf16.msra.mxu1 %v17232_v45 }
 0xb12   :  { %12846 = vmatprep.subr.bf16.mxu0 %v17233_v50  ;;  %12877 = vmatprep.subr.bf16.mxu1 %v17129_v37 }
 0xb87   :  { %v7762_v29 = vpop.f32.mrb[64].mxu1 }
 0xb88   :  { %v11642_v43 = vpop.f32.mrb[65].mxu1  ;;  %v7763_v3 = vadd.f32 %v7762_v29, %v16516_v49 }
 0xba7   :  { %v7832_v25 = vpop.f32.mrb[74].mxu0  ;;  %v7903_v59 = vpop.f32.mrb[66].mxu1 }
 0xba8   :  { %v12946_v62 = vadd.f32 %v17234_v6, %v7832_v25  ;;  %v7834_v30 = vpop.f32.mrb[75].mxu0  ;;  %v11677_v36 = vpop.f32.mrb[67].mxu1  ;;  %v7904_v1 = vadd.f32 %v7903_v59, %v17236_v44 }
 0xba9   :  { %v12948_v28 = vadd.f32 %v17235_v46, %v7834_v30 }
 0xbaa   :  { %v9165_v12 = vmul.f32 -1.442695, %v12946_v62 }
 0xbab   :  { %v9166_v34 = vmul.f32 -1.442695, %v12948_v28 }
 0xbac   :  { %13031 = vpow2.f32 %v9165_v12 }
 0xbad   :  { %13033 = vpow2.f32 %v9166_v34 }
 0xbb6   :  { %v13032_v26 = vpop.eup %13031 }
 0xbb7   :  { %v7911_v51 = vadd.f32 1.0, %v13032_v26  ;;  %v13034_v17 = vpop.eup %13033 }
 0xbb8   :  { %v7918_v31 = vadd.f32 1.0, %v13034_v17 }
 0xbb9   :  { %13035 = vrcp.f32 %v7911_v51 }
 0xbba   :  { %13037 = vrcp.f32 %v7918_v31  ;;  %v8097_v31 = vrot.slane %v16659_v15, 7  ;;  %v8497_v15 = vld [vmem:[%s16948_s19 + $0x10] sm:$0xff] }
 0xbc3   :  { %v13036_v7 = vpop.eup %13035 }
 0xbc4   :  { %v7921_v2 = vmul.f32 %v13036_v7, %v7904_v1  ;;  %v13038_v59 = vpop.eup %13037 }
 0xbc5   :  { %v7924_v30 = vsub.f32 1.0, %v13038_v59 }
 0xbc6   :  { %v7922_v40 = vadd.f32 %v7921_v2, %v7763_v3 }
 0xbc7   :  { %v7994_v9 = vpop.f32.mrb[76].mxu0  ;;  %v8065_v21 = vpop.f32.mrb[68].mxu1 }
 0xbc8   :  { %13039 = vtanh.f32 %v7922_v40  ;;  %v7995_v14 = vadd.f32 %v7994_v9, %v16312_v5  ;;  %v7996_v13 = vpop.f32.mrb[77].mxu0  ;;  %v11712_v32 = vpop.f32.mrb[69].mxu1  ;;  %v7926_v5 = vmul.f32 %v13038_v59, %v16654_v55 }
 0xbc9   :  { %v7997_v38 = vadd.f32 %v7996_v13, %v17153_v42  ;;  %v8498_v32 = vld [vmem:[%s16948_s19 + $0x18] sm:$0xff] }
 0xbca   :  { %v8070_v45 = vrot.slane %v7995_v14, 5 }
 0xbcb   :  { %v8080_v50 = vrot.slane %v7997_v38, 5  ;;  %v12929_v38 = vpack.c.bf16 %v8498_v32, %v8497_v15 }
 0xbcc   :  { %v8072_v43 = vadd.f32 %v8070_v45, %v17195_v16  ;;  %v8066_v16 = vadd.f32 %v8065_v21, %v17156_v35  ;;  %v8499_v45 = vld [vmem:[%s16948_s19 + $0x20] sm:$0xff] }
 0xbcd   :  { %v8082_v25 = vadd.f32 %v8080_v50, %v17196_v18  ;;  %v8500_v50 = vld [vmem:[%s16948_s19 + $0x28] sm:$0xff] }
 0xbce   :  { %v9167_v29 = vmul.f32 -1.442695, %v8072_v43  ;;  %v8090_v18 = vrot.slane %v8066_v16, 5  ;;  %v12932_v43 = vpack.c.bf16 %v8500_v50, %v8499_v45 }
 0xbcf   :  { %v9168_v62 = vmul.f32 -1.442695, %v8082_v25 }
 0xbd0   :  { %13041 = vpow2.f32 %v9167_v29 }
 0xbd1   :  { %13043 = vpow2.f32 %v9168_v62 }
 0xbd2   :  { %v13040_v36 = vpop.eup %13039 }
 0xbd3   :  { %v7925_v12 = vmul.f32 %v13040_v36, %v7924_v30 }
 0xbd5   :  { %v16784_v28 = vadd.f32 %v7926_v5, %v7925_v12 }
 0xbda   :  { %v13042_v34 = vpop.eup %13041 }
 0xbdb   :  { %v13044_v42 = vpop.eup %13043  ;;  %v8076_v26 = vadd.f32 1.0, %v13042_v34 }
 0xbdc   :  { %v8086_v51 = vadd.f32 1.0, %v13044_v42 }
 0xbdd   :  { %13045 = vrcp.f32 %v8076_v26 }
 0xbde   :  { %13047 = vrcp.f32 %v8086_v51 }
 0xbe7   :  { %v13046_v17 = vpop.eup %13045 }
 0xbe8   :  { %v13048_v1 = vpop.eup %13047  ;;  %v8092_v7 = vmul.f32 %v13046_v17, %v8090_v18 }
 0xbe9   :  { %v8099_v3 = vmul.f32 %v13048_v1, %v8097_v31  ;;  %v8095_v55 = vsub.f32 1.0, %v13048_v1 }
 0xbea   :  { %v8093_v2 = vadd.f32 %v8092_v7, %v17157_v41  ;;  %v8414_v41 = vld [vmem:[%s16946_s17 + $0x38] sm:$0xff] }
 0xbec   :  { %13049 = vtanh.f32 %v8093_v2 }
 0xbf6   :  { %v13050_v40 = vpop.eup %13049 }
 0xbf7   :  { %v8096_v9 = vmul.f32 %v13050_v40, %v8095_v55 }
 0xbf9   :  { %v8100_v14 = vadd.f32 %v8099_v3, %v8096_v9  ;;  %v8501_v9 = vld [vmem:[%s16948_s19 + $0x30] sm:$0xff] }
 0xbfb   :  { %v8102_v13 = vrot.slane %v8100_v14, 3  ;;  %v8423_v14 = vld [vmem:[#allocation16] sm:$0x1] }
 0xbfd   :  { %8169 = vmatmul.mubr.f32.vlgmr.msra.gmra.mrb[78].mxu0 %v8102_v13  ;;  %11746 = vmatmul.mubr.f32.vlgmr.msra.gmra.mrb[70].mxu1 %v8102_v13 }
 0xbfe   :  { %12848 = vmatpush1.bf16.msra.mxu0 %v17158_v10  ;;  %12879 = vmatpush3.bf16.msra.mxu1 %v17159_v22  ;;  %v8415_v10 = vld [vmem:[%s16946_s17 + $0x40] sm:$0xff]  ;;  %v8416_v22 = vld [vmem:[%s16946_s17 + $0x48] sm:$0xff] }
 0xbff   :  { %12850 = vmatprep.subr.bf16.mxu0 %v17160_v20  ;;  %12880 = vmatprep.subr.bf16.mxu1 %v17129_v37  ;;  %v12914_v20 = vpack.c.bf16 %v8416_v22, %v8415_v10 }
 0xc00   :  { %8309 = vmatprep.mubr.f32.mxu0 %v17131_v61  ;;  %11780 = vmatprep.mubr.msk.f32.mxu1 %vm13284_vm0, %v17131_v61 }
 0xc02   :  { %12852 = vmatpush1.bf16.msra.mxu0 %v17161_v27  ;;  %12882 = vmatpush3.bf16.msra.mxu1 %v17162_v63  ;;  %v8417_v27 = vld [vmem:[%s16946_s17 + $0x50] sm:$0xff]  ;;  %v8418_v63 = vld [vmem:[%s16946_s17 + $0x58] sm:$0xff] }
 0xc03   :  { %12854 = vmatprep.subr.bf16.mxu0 %v17163_v58  ;;  %12883 = vmatprep.subr.bf16.mxu1 %v17129_v37  ;;  %v12917_v58 = vpack.c.bf16 %v8418_v63, %v8417_v27 }
 0xc06   :  { %12856 = vmatpush1.bf16.msra.mxu0 %v17164_v53  ;;  %12885 = vmatpush3.bf16.msra.mxu1 %v17165_v60  ;;  %v8419_v53 = vld [vmem:[%s16946_s17 + $0x60] sm:$0xff]  ;;  %v8420_v60 = vld [vmem:[%s16946_s17 + $0x68] sm:$0xff] }
 0xc07   :  { %12858 = vmatprep.subr.bf16.mxu0 %v17166_v11  ;;  %12886 = vmatprep.subr.bf16.mxu1 %v17129_v37  ;;  %v12920_v11 = vpack.c.bf16 %v8420_v60, %v8419_v53 }
 0xc0a   :  { %12860 = vmatpush1.bf16.msra.mxu0 %v17167_v33  ;;  %12888 = vmatpush3.bf16.msra.mxu1 %v17168_v52  ;;  %v8421_v33 = vld [vmem:[%s16946_s17 + $0x70] sm:$0xff]  ;;  %v8422_v52 = vld [vmem:[%s16946_s17 + $0x78] sm:$0xff] }
 0xc0b   :  { %12862 = vmatprep.subr.bf16.mxu0 %v17169_v48  ;;  %12889 = vmatprep.subr.bf16.mxu1 %v17129_v37  ;;  %v12923_v48 = vpack.c.bf16 %v8422_v52, %v8421_v33 }
 0xc0e   :  { %12864 = vmatpush1.bf16.msra.mxu0 %v16382_v0  ;;  %12891 = vmatpush3.bf16.msra.mxu1 %v16384_v39  ;;  %v8407_v0 = vld [vmem:[%s16946_s17] sm:$0xff]  ;;  %v8408_v39 = vld [vmem:[%s16946_s17 + $0x8] sm:$0xff] }
 0xc0f   :  { %12866 = vmatprep.subr.bf16.mxu0 %v17170_v8  ;;  %12892 = vmatprep.subr.bf16.mxu1 %v17129_v37  ;;  %v8495_v8 = vld [vmem:[%s16948_s19] sm:$0xff] }
 0xc12   :  { %12868 = vmatpush1.bf16.msra.mxu0 %v17171_v54  ;;  %12894 = vmatpush3.bf16.msra.mxu1 %v16394_v47  ;;  %v8409_v47 = vld [vmem:[%s16946_s17 + $0x10] sm:$0xff]  ;;  %v8496_v54 = vld [vmem:[%s16948_s19 + $0x8] sm:$0xff] }
 0xc13   :  { %12870 = vmatprep.subr.bf16.mxu0 %v16398_v4  ;;  %12895 = vmatprep.subr.bf16.mxu1 %v17129_v37  ;;  %v12926_v21 = vpack.c.bf16 %v8496_v54, %v8495_v8 }
 0xc16   :  { %12872 = vmatpush1.bf16.msra.mxu0 %v16402_v56  ;;  %12897 = vmatpush3.bf16.msra.mxu1 %v16404_v23  ;;  %v8411_v56 = vld [vmem:[%s16946_s17 + $0x20] sm:$0xff]  ;;  %v8412_v23 = vld [vmem:[%s16946_s17 + $0x28] sm:$0xff] }
 0xc17   :  { %12874 = vmatprep.subr.bf16.mxu0 %v16408_v24  ;;  %12898 = vmatprep.subr.bf16.mxu1 %v17129_v37  ;;  %v12908_v24 = vpack.c.bf16 %v8412_v23, %v8411_v56 }
 0xc1a   :  { %12876 = vmatpush1.bf16.msra.mxu0 %v16412_v57  ;;  %12900 = vmatpush3.bf16.msra.mxu1 %v16414_v19  ;;  %v12902_v57 = vpack.c.bf16 %v8408_v39, %v8407_v0  ;;  %v8413_v19 = vld [vmem:[%s16946_s17 + $0x30] sm:$0xff] }
 0xc1b   :  { %12901 = vmatprep.subr.bf16.mxu0 %v17129_v37  ;;  %12925 = vmatprep.subr.bf16.mxu1 %v17129_v37  ;;  %v12911_v35 = vpack.c.bf16 %v8414_v41, %v8413_v19 }
 0xc1d   :  { %8310 = vmatmul.mubr.f32.vlgmr.msra.gmra.mrb[78].mxu0 %v16784_v28  ;;  %11781 = vmatmul.mubr.f32.vlgmr.msra.gmra.mrb[72].mxu1 %v16784_v28 }
 0xc1e   :  { %11815 = vmatprep.mubr.msk.f32.mxu0 %vm13284_vm0, %v17131_v61  ;;  %11834 = vmatprep.mubr.msk.f32.mxu1 %vm13284_vm0, %v17131_v61  ;;  %v8410_v61 = vld [vmem:[%s16946_s17 + $0x18] sm:$0xff] }
 0xc1f   :  { %12903 = vmatpush3.bf16.msra.mxu0 %v12902_v57  ;;  %v12905_v4 = vpack.c.bf16 %v8410_v61, %v8409_v47  ;;  %12927 = vmatpush3.bf16.msra.mxu1 %v12926_v21 }
 0xc20   :  { %12904 = vmatprep.subr.bf16.mxu0 %v17129_v37  ;;  %12928 = vmatprep.subr.bf16.mxu1 %v17129_v37 }
 0xc23   :  { %12906 = vmatpush3.bf16.msra.mxu0 %v12905_v4  ;;  %12930 = vmatpush3.bf16.msra.mxu1 %v12929_v38 }
 0xc24   :  { %12907 = vmatprep.subr.bf16.mxu0 %v17129_v37  ;;  %12931 = vmatprep.subr.bf16.mxu1 %v17129_v37 }
 0xc27   :  { %12909 = vmatpush3.bf16.msra.mxu0 %v12908_v24  ;;  %12933 = vmatpush3.bf16.msra.mxu1 %v12932_v43 }
 0xc28   :  { %12910 = vmatprep.subr.bf16.mxu0 %v17129_v37  ;;  %12934 = vmatprep.subr.bf16.mxu1 %v17129_v37 }
 0xc2b   :  { %12912 = vmatpush3.bf16.msra.mxu0 %v12911_v35 }
 0xc2c   :  { %12913 = vmatprep.subr.bf16.mxu0 %v17129_v37 }
 0xc2f   :  { %12915 = vmatpush3.bf16.msra.mxu0 %v12914_v20 }
 0xc30   :  { %12916 = vmatprep.subr.bf16.mxu0 %v17129_v37 }
 0xc33   :  { %12918 = vmatpush3.bf16.msra.mxu0 %v12917_v58 }
 0xc34   :  { %12919 = vmatprep.subr.bf16.mxu0 %v17129_v37 }
 0xc37   :  { %12921 = vmatpush3.bf16.msra.mxu0 %v12920_v11 }
 0xc38   :  { %12922 = vmatprep.subr.bf16.mxu0 %v17129_v37 }
 0xc3b   :  { %12924 = vmatpush3.bf16.msra.mxu0 %v12923_v48 }
 0xcd0   :  { %v8241_v25 = vpop.f32.mrb[70].mxu1 }
 0xcd1   :  { %v11747_v59 = vpop.f32.mrb[71].mxu1  ;;  %v8242_v31 = vadd.f32 %v8241_v25, %v16516_v49  ;;  %v8502_v49 = vld [vmem:[%s16948_s19 + $0x38] sm:$0xff]  ;;  %s13241_s19 = scalar_lea.vmem %s8587_s6, 32 }
 0xcd2   :  { %p13243_p10 = scmp.lt.s32.totalorder %s13241_s19, %s13237_s22 }
 0xcd4   :  { %p13244_p11 = por %p13243_p10, %p13242_p9 }
 0xcd6   :  { %p13245_p12 = pnand %p13244_p11, %p13238_p8 }
 0xcf0   :  { %v8311_v29 = vpop.f32.mrb[78].mxu0  ;;  %v8382_v62 = vpop.f32.mrb[72].mxu1 }
 0xcf1   :  { %v12950_v30 = vadd.f32 %v17234_v6, %v8311_v29  ;;  %v8313_v36 = vpop.f32.mrb[79].mxu0  ;;  %v11782_v12 = vpop.f32.mrb[73].mxu1  ;;  %v8383_v37 = vadd.f32 %v8382_v62, %v17236_v44  ;;  %v12935_v44 = vpack.c.bf16 %v8502_v49, %v8501_v9 }
 0xcf2   :  { %v12952_v34 = vadd.f32 %v17235_v46, %v8313_v36 }
 0xcf3   :  { %v9169_v5 = vmul.f32 -1.442695, %v12950_v30  ;;  %12936 = vmatpush3.bf16.msra.mxu1 %v12935_v44 }
 0xcf4   :  { %v9170_v42 = vmul.f32 -1.442695, %v12952_v34 }
 0xcf5   :  { %13051 = vpow2.f32 %v9169_v5 }
 0xcf6   :  { %13053 = vpow2.f32 %v9170_v42 }
 0xcff   :  { %v13052_v26 = vpop.eup %13051 }
 0xd00   :  { %v8390_v51 = vadd.f32 1.0, %v13052_v26  ;;  %v13054_v16 = vpop.eup %13053 }
 0xd01   :  { %v8397_v18 = vadd.f32 1.0, %v13054_v16 }
 0xd02   :  { %13055 = vrcp.f32 %v8390_v51 }
 0xd03   :  { %13057 = vrcp.f32 %v8397_v18 }
 0xd0c   :  { %v13056_v17 = vpop.eup %13055 }
 0xd0d   :  { %v8400_v1 = vmul.f32 %v13056_v17, %v8383_v37  ;;  %v13058_v7 = vpop.eup %13057 }
 0xd0e   :  { %v8403_v3 = vsub.f32 1.0, %v13058_v7  ;;  %v8405_v55 = vmul.f32 %v13058_v7, %v16784_v28  ;;  %v8503_v28 = vld [vmem:[#allocation17] sm:$0x1] }
 0xd0f   :  { %v8401_v6 = vadd.f32 %v8400_v1, %v8242_v31 }
 0xd11   :  { %13059 = vtanh.f32 %v8401_v6 }
 0xd1b   :  { %v13060_v46 = vpop.eup %13059 }
 0xd1c   :  { %v8404_v2 = vmul.f32 %v13060_v46, %v8403_v3 }
 0xd1e   :  { %v8406_v40 = vadd.f32 %v8405_v55, %v8404_v2 }
 0xd20   :  { %11816 = vmatmul.mubr.f32.vlgmr.msra.gmra.mrb[80].mxu0 %v8406_v40 }
 0xdf3   :  { %v8490_v13 = vpop.f32.mrb[80].mxu0 }
 0xdf4   :  { %v8491_v0 = vadd.f32 %v8490_v13, %v8423_v14  ;;  %v11817_v39 = vpop.f32.mrb[81].mxu0 }
 0xdf6   :  { %v8494_v57 = vmax.f32 %v8491_v0, 0.0 }
 0xdf8   :  { %11835 = vmatmul.mubr.msk.f32.vlgmr.msra.gmra.mrb[74].mxu1 %vm8504_vm10, %v8494_v57 }
 0xecb   :  { %v8574_v47 = vpop.f32.mrb[74].mxu1 }
 0xecc   :  { %v8575_v61 = vadd.f32 %v8574_v47, %v8503_v28  ;;  %v11836_v4 = vpop.f32.mrb[75].mxu1 }
 0xece   :  { %8579 = vst.msk [vmem:[#allocation19] sm:$0x1] %vm8578_vm11, %v8575_v61 }
 0xecf   :  { %13248 = shalt.err (!%p13245_p12)
}
 0xed0   :  { %s17237_s14 = sld [smem:[#allocation91_spill]] }
 0xed6   :  { %s13249_s2 = scalar_lea.hbm %s17237_s14, 16 }
 0xed7   :  { %p13250_p13 = scmp.ne.s32.totalorder %s17237_s14, %s13249_s2  ;;  %p13253_p0 = scmp.lt.u32.totalorder %s13249_s2, %s17237_s14 }
 0xed9   :  { %p13255_p1 = pnand %p13253_p0, %p13250_p13 }
 0xedb   :  { %13258 = shalt.err (!%p13255_p1)
}
 0xedc   :  { %8589 = dma.vmem_to_hbm [thread:$0]  %s8587_s6, 16, %s17237_s14, [#allocation7]  }
 0xedd   :  { %13269 = dma.done.wait [#allocation7], 16  }
 0xede   :  { %13270 = vsyncadd [#allocation7], 4294967280 }
 0xedf   :  { %8593 = vsyncpa [#allocation6], 1 }
 0xee0   :  { %8594 = vsyncpa [#allocation9], 1 }
 0xee1   :  { %8595 = vsyncpa [#allocation12], 1 }
 0xee2   :  { %8596 = vsyncpa [#allocation15], 1 }
 0xee3   :  { %8597 = vsyncpa [#allocation18], 1 }
 0xee4   :  { %8598 = vsyncpa [#allocation7], 1 }

</bundles_post_ra>
